<compile_context>
chip_gen: v7x
topology: tpu7x:2x2x1
jax: 0.10.0
libtpu: 0.0.40
codegen_flags: <defaults>
</compile_context>

<pallas_src>
import jax
import jax.numpy as jnp
from jax import lax
from jax.experimental import pallas as pl
from jax.experimental.pallas import tpu as pltpu

H, W = 28, 28                  # spatial size (matches the module's inputs)
HW = H * W                     # 784 = lane dimension everywhere
CIN, COUT = 192, 48            # conv channels (fixed by the module)
C51 = 192                      # channels of x51
KH, KW = 3, 3
C_TOTAL = C51 + 5 * 48 + COUT  # 480 output channels after concat
PAD = 32                       # flat-accumulator halo (needs >= W + 1 = 29)
ACC_W = HW + 2 * PAD           # 848


def conv_cat_kernel(x_ref, w_ref, x51_ref, x58_ref, x65_ref, x72_ref,
                    x79_ref, x93_ref, out_ref, acc_ref):
    # ---- channel concat: lane-dense, sublane-aligned row-block stores ----
    out_ref[0:192, :]   = x51_ref[...]
    out_ref[192:240, :] = x58_ref[...]
    out_ref[240:288, :] = x65_ref[...]
    out_ref[288:336, :] = x72_ref[...]
    out_ref[336:384, :] = x79_ref[...]
    out_ref[432:480, :] = x93_ref[...]

    # ---- 3x3 conv, stride 1, padding 1 (computed into rows 384:432) ----
    acc_ref[...] = jnp.zeros_like(acc_ref)
    x = x_ref[...]                                       # (192, 784) lane-dense

    qidx = lax.broadcasted_iota(jnp.int32, (1, HW), 1)   # flat source index
    col = qidx % W                                       # source column
    not_col_first = col != 0                             # mask for dw == +1
    not_col_last = col != (W - 1)                        # mask for dw == -1

    for kh in range(KH):
        for kw in range(KW):
            t = kh * KW + kw
            # z[:, q] = W_tap @ x[:, q]  — lane-dense MXU matmul, f32 accum.
            z = jnp.dot(w_ref[t], x, preferred_element_type=jnp.float32)
            dw = kw - 1
            if dw == 1:        # contribution invalid where source col wraps
                z = jnp.where(not_col_first, z, 0.0)
            elif dw == -1:
                z = jnp.where(not_col_last, z, 0.0)
            # y[p] += z[p + s]   <=>   acc[PAD - s + q] += z[q]
            s = (kh - 1) * W + dw
            off = PAD - s                                # in [PAD-29, PAD+29]
            acc_ref[:, off:off + HW] += z

    out_ref[384:432, :] = acc_ref[:, PAD:PAD + HW].astype(out_ref.dtype)


@jax.jit
def forward(x85, x51, x58, x65, x72, x79, x93, weight_oihw):
    """Inputs follow PyTorch NCHW (batch=1); weight is OIHW (48,192,3,3)."""
    def flat(t):  # (1, C, H, W) -> (C, H*W): a free (contiguous) reshape
        return t.reshape(t.shape[1], HW)

    # (O,I,KH,KW) -> (KH,KW,O,I) -> (9, 48, 192); small one-time transpose.
    w_taps = jnp.transpose(weight_oihw, (2, 3, 0, 1)).reshape(KH * KW, COUT, CIN)

    out_flat = pl.pallas_call(
        conv_cat_kernel,
        out_shape=jax.ShapeDtypeStruct((C_TOTAL, HW), jnp.float32),
        in_specs=[pl.BlockSpec(memory_space=pltpu.MemorySpace.VMEM)] * 8,
        out_specs=pl.BlockSpec(memory_space=pltpu.MemorySpace.VMEM),
        scratch_shapes=[pltpu.VMEM((COUT, ACC_W), jnp.float32)],
    )(flat(x85), w_taps, flat(x51), flat(x58), flat(x65), flat(x72),
      flat(x79), flat(x93))

    # (480, 784) -> (1, 480, 28, 28): free reshape, no transpose.
    return out_flat.reshape(1, C_TOTAL, H, W)


if __name__ == "__main__":
    key = jax.random.PRNGKey(0)
    ks = jax.random.split(key, 8)

    x85 = jax.random.normal(ks[0], (1, CIN, H, W), jnp.float32)
    x51 = jax.random.normal(ks[1], (1, C51, H, W), jnp.float32)
    x58 = jax.random.normal(ks[2], (1, 48, H, W), jnp.float32)
    x65 = jax.random.normal(ks[3], (1, 48, H, W), jnp.float32)
    x72 = jax.random.normal(ks[4], (1, 48, H, W), jnp.float32)
    x79 = jax.random.normal(ks[5], (1, 48, H, W), jnp.float32)
    x93 = jax.random.normal(ks[6], (1, 48, H, W), jnp.float32)
    # Conv2d(192, 48, 3, bias=False) weight, OIHW.
    weight = jax.random.normal(ks[7], (COUT, CIN, KH, KW), jnp.float32) * 0.02

    out = forward(x85, x51, x58, x65, x72, x79, x93, weight)
    jax.block_until_ready(out)
    assert out.shape == (1, C_TOTAL, H, W), out.shape

    # Reference check against plain-JAX conv + concat.
    ref_conv = lax.conv_general_dilated(
        x85, weight, window_strides=(1, 1), padding=((1, 1), (1, 1)),
        dimension_numbers=("NCHW", "OIHW", "NCHW"))
    ref = jnp.concatenate([x51, x58, x65, x72, x79, ref_conv, x93], axis=1)
    assert jnp.allclose(out, ref, atol=1e-4, rtol=1e-4), \
        float(jnp.max(jnp.abs(out - ref)))

    print("KERNEL_OK")
</pallas_src>

<mosaic_0001>
module attributes {stable_mosaic.version = 11 : i64} {
  func.func @conv_cat_kernel(%arg0: memref<192x784xf32, #tpu.memory_space<vmem>>, %arg1: memref<9x48x192xf32, #tpu.memory_space<vmem>>, %arg2: memref<192x784xf32, #tpu.memory_space<vmem>>, %arg3: memref<48x784xf32, #tpu.memory_space<vmem>>, %arg4: memref<48x784xf32, #tpu.memory_space<vmem>>, %arg5: memref<48x784xf32, #tpu.memory_space<vmem>>, %arg6: memref<48x784xf32, #tpu.memory_space<vmem>>, %arg7: memref<48x784xf32, #tpu.memory_space<vmem>>, %arg8: memref<480x784xf32, #tpu.memory_space<vmem>>, %arg9: memref<48x848xf32, #tpu.memory_space<vmem>>) attributes {dimension_semantics = [], scalar_prefetch = 0 : i64, scratch_operands = 1 : i64, tpu.core_type = #tpu.core_type<tc>} {
    %c0 = arith.constant 0 : index
    %c0_0 = arith.constant 0 : index
    %0 = vector.load %arg2[%c0, %c0_0] : memref<192x784xf32, #tpu.memory_space<vmem>>, vector<192x784xf32>
    %c0_1 = arith.constant 0 : index
    %c0_2 = arith.constant 0 : index
    %1 = vector.load %arg8[%c0_1, %c0_2] : memref<480x784xf32, #tpu.memory_space<vmem>>, vector<192x784xf32>
    tpu.vector_store %arg8[%c0_1, %c0_2], %0 {strides = array<i32>} : memref<480x784xf32, #tpu.memory_space<vmem>>, vector<192x784xf32>,
    %c0_3 = arith.constant 0 : index
    %c0_4 = arith.constant 0 : index
    %2 = vector.load %arg3[%c0_3, %c0_4] : memref<48x784xf32, #tpu.memory_space<vmem>>, vector<48x784xf32>
    %c192 = arith.constant 192 : index
    %c0_5 = arith.constant 0 : index
    %3 = vector.load %arg8[%c192, %c0_5] : memref<480x784xf32, #tpu.memory_space<vmem>>, vector<48x784xf32>
    tpu.vector_store %arg8[%c192, %c0_5], %2 {strides = array<i32>} : memref<480x784xf32, #tpu.memory_space<vmem>>, vector<48x784xf32>,
    %c0_6 = arith.constant 0 : index
    %c0_7 = arith.constant 0 : index
    %4 = vector.load %arg4[%c0_6, %c0_7] : memref<48x784xf32, #tpu.memory_space<vmem>>, vector<48x784xf32>
    %c240 = arith.constant 240 : index
    %c0_8 = arith.constant 0 : index
    %5 = vector.load %arg8[%c240, %c0_8] : memref<480x784xf32, #tpu.memory_space<vmem>>, vector<48x784xf32>
    tpu.vector_store %arg8[%c240, %c0_8], %4 {strides = array<i32>} : memref<480x784xf32, #tpu.memory_space<vmem>>, vector<48x784xf32>,
    %c0_9 = arith.constant 0 : index
    %c0_10 = arith.constant 0 : index
    %6 = vector.load %arg5[%c0_9, %c0_10] : memref<48x784xf32, #tpu.memory_space<vmem>>, vector<48x784xf32>
    %c288 = arith.constant 288 : index
    %c0_11 = arith.constant 0 : index
    %7 = vector.load %arg8[%c288, %c0_11] : memref<480x784xf32, #tpu.memory_space<vmem>>, vector<48x784xf32>
    tpu.vector_store %arg8[%c288, %c0_11], %6 {strides = array<i32>} : memref<480x784xf32, #tpu.memory_space<vmem>>, vector<48x784xf32>,
    %c0_12 = arith.constant 0 : index
    %c0_13 = arith.constant 0 : index
    %8 = vector.load %arg6[%c0_12, %c0_13] : memref<48x784xf32, #tpu.memory_space<vmem>>, vector<48x784xf32>
    %c336 = arith.constant 336 : index
    %c0_14 = arith.constant 0 : index
    %9 = vector.load %arg8[%c336, %c0_14] : memref<480x784xf32, #tpu.memory_space<vmem>>, vector<48x784xf32>
    tpu.vector_store %arg8[%c336, %c0_14], %8 {strides = array<i32>} : memref<480x784xf32, #tpu.memory_space<vmem>>, vector<48x784xf32>,
    %c0_15 = arith.constant 0 : index
    %c0_16 = arith.constant 0 : index
    %10 = vector.load %arg7[%c0_15, %c0_16] : memref<48x784xf32, #tpu.memory_space<vmem>>, vector<48x784xf32>
    %c432 = arith.constant 432 : index
    %c0_17 = arith.constant 0 : index
    %11 = vector.load %arg8[%c432, %c0_17] : memref<480x784xf32, #tpu.memory_space<vmem>>, vector<48x784xf32>
    tpu.vector_store %arg8[%c432, %c0_17], %10 {strides = array<i32>} : memref<480x784xf32, #tpu.memory_space<vmem>>, vector<48x784xf32>,
    %cst = arith.constant 0.000000e+00 : f32
    %12 = vector.broadcast %cst : f32 to vector<48x848xf32>
    %c0_18 = arith.constant 0 : index
    %c0_19 = arith.constant 0 : index
    %13 = vector.load %arg9[%c0_18, %c0_19] : memref<48x848xf32, #tpu.memory_space<vmem>>, vector<48x848xf32>
    tpu.vector_store %arg9[%c0_18, %c0_19], %12 {strides = array<i32>} : memref<48x848xf32, #tpu.memory_space<vmem>>, vector<48x848xf32>,
    %c0_20 = arith.constant 0 : index
    %c0_21 = arith.constant 0 : index
    %14 = vector.load %arg0[%c0_20, %c0_21] : memref<192x784xf32, #tpu.memory_space<vmem>>, vector<192x784xf32>
    %15 = tpu.iota {dimensions = array<i32: 1>} : vector<1x784xi32>
    %c28_i32 = arith.constant 28 : i32
    %c0_i32 = arith.constant 0 : i32
    %16 = arith.cmpi eq, %c28_i32, %c0_i32 : i32
    %c1_i32 = arith.constant 1 : i32
    %17 = arith.select %16, %c1_i32, %c28_i32 : i32
    %18 = vector.broadcast %17 : i32 to vector<1x784xi32>
    %19 = arith.remsi %15, %18 : vector<1x784xi32>
    %c0_i32_22 = arith.constant 0 : i32
    %20 = vector.broadcast %c0_i32_22 : i32 to vector<1x784xi32>
    %21 = arith.cmpi ne, %19, %20 : vector<1x784xi32>
    %c0_i32_23 = arith.constant 0 : i32
    %22 = vector.broadcast %c0_i32_23 : i32 to vector<1x784xi32>
    %23 = arith.cmpi slt, %19, %22 : vector<1x784xi32>
    %c0_i32_24 = arith.constant 0 : i32
    %24 = arith.cmpi slt, %17, %c0_i32_24 : i32
    %25 = vector.broadcast %24 : i1 to vector<1x784xi1>
    %26 = vector.broadcast %25 : vector<1x784xi1> to vector<1x784xi1>
    %27 = arith.xori %23, %26 : vector<1x784xi1>
    %28 = arith.andi %27, %21 : vector<1x784xi1>
    %29 = vector.broadcast %17 : i32 to vector<1x784xi32>
    %30 = arith.addi %19, %29 : vector<1x784xi32>
    %31 = arith.select %28, %30, %19 : vector<1x784xi1>, vector<1x784xi32>
    %c0_i32_25 = arith.constant 0 : i32
    %32 = vector.broadcast %c0_i32_25 : i32 to vector<1x784xi32>
    %33 = arith.cmpi ne, %31, %32 : vector<1x784xi32>
    %c27_i32 = arith.constant 27 : i32
    %34 = vector.broadcast %c27_i32 : i32 to vector<1x784xi32>
    %35 = arith.cmpi ne, %31, %34 : vector<1x784xi32>
    %c0_26 = arith.constant 0 : index
    %c0_27 = arith.constant 0 : index
    %c0_28 = arith.constant 0 : index
    %36 = vector.load %arg1[%c0_26, %c0_27, %c0_28] : memref<9x48x192xf32, #tpu.memory_space<vmem>>, vector<1x48x192xf32>
    %37 = vector.shape_cast %36 : vector<1x48x192xf32> to vector<48x192xf32>
    %cst_29 = arith.constant dense<0.000000e+00> : vector<48x784xf32>
    %38 = tpu.matmul %37, %14, %cst_29 {dimension_numbers = #tpu.dot_dimension_numbers<[1], [0], [0], [1], [0, 0, 1, 1], [], []>} : vector<48x192xf32>, vector<192x784xf32>, vector<48x784xf32> -> vector<48x784xf32>
    %cst_30 = arith.constant 0.000000e+00 : f32
    %39 = vector.shape_cast %35 : vector<1x784xi1> to vector<1x784xi1>
    %40 = vector.broadcast %39 : vector<1x784xi1> to vector<48x784xi1>
    %41 = vector.broadcast %cst_30 : f32 to vector<48x784xf32>
    %42 = arith.select %40, %38, %41 : vector<48x784xi1>, vector<48x784xf32>
    %c0_31 = arith.constant 0 : index
    %c61 = arith.constant 61 : index
    %43 = vector.load %arg9[%c0_31, %c61] : memref<48x848xf32, #tpu.memory_space<vmem>>, vector<48x784xf32>
    %44 = arith.addf %43, %42 : vector<48x784xf32>
    %c0_32 = arith.constant 0 : index
    %c61_33 = arith.constant 61 : index
    %45 = vector.load %arg9[%c0_32, %c61_33] : memref<48x848xf32, #tpu.memory_space<vmem>>, vector<48x784xf32>
    tpu.vector_store %arg9[%c0_32, %c61_33], %44 {strides = array<i32>} : memref<48x848xf32, #tpu.memory_space<vmem>>, vector<48x784xf32>,
    %c1 = arith.constant 1 : index
    %c0_34 = arith.constant 0 : index
    %c0_35 = arith.constant 0 : index
    %46 = vector.load %arg1[%c1, %c0_34, %c0_35] : memref<9x48x192xf32, #tpu.memory_space<vmem>>, vector<1x48x192xf32>
    %47 = vector.shape_cast %46 : vector<1x48x192xf32> to vector<48x192xf32>
    %cst_36 = arith.constant dense<0.000000e+00> : vector<48x784xf32>
    %48 = tpu.matmul %47, %14, %cst_36 {dimension_numbers = #tpu.dot_dimension_numbers<[1], [0], [0], [1], [0, 0, 1, 1], [], []>} : vector<48x192xf32>, vector<192x784xf32>, vector<48x784xf32> -> vector<48x784xf32>
    %c0_37 = arith.constant 0 : index
    %c60 = arith.constant 60 : index
    %49 = vector.load %arg9[%c0_37, %c60] : memref<48x848xf32, #tpu.memory_space<vmem>>, vector<48x784xf32>
    %50 = arith.addf %49, %48 : vector<48x784xf32>
    %c0_38 = arith.constant 0 : index
    %c60_39 = arith.constant 60 : index
    %51 = vector.load %arg9[%c0_38, %c60_39] : memref<48x848xf32, #tpu.memory_space<vmem>>, vector<48x784xf32>
    tpu.vector_store %arg9[%c0_38, %c60_39], %50 {strides = array<i32>} : memref<48x848xf32, #tpu.memory_space<vmem>>, vector<48x784xf32>,
    %c2 = arith.constant 2 : index
    %c0_40 = arith.constant 0 : index
    %c0_41 = arith.constant 0 : index
    %52 = vector.load %arg1[%c2, %c0_40, %c0_41] : memref<9x48x192xf32, #tpu.memory_space<vmem>>, vector<1x48x192xf32>
    %53 = vector.shape_cast %52 : vector<1x48x192xf32> to vector<48x192xf32>
    %cst_42 = arith.constant dense<0.000000e+00> : vector<48x784xf32>
    %54 = tpu.matmul %53, %14, %cst_42 {dimension_numbers = #tpu.dot_dimension_numbers<[1], [0], [0], [1], [0, 0, 1, 1], [], []>} : vector<48x192xf32>, vector<192x784xf32>, vector<48x784xf32> -> vector<48x784xf32>
    %cst_43 = arith.constant 0.000000e+00 : f32
    %55 = vector.shape_cast %33 : vector<1x784xi1> to vector<1x784xi1>
    %56 = vector.broadcast %55 : vector<1x784xi1> to vector<48x784xi1>
    %57 = vector.broadcast %cst_43 : f32 to vector<48x784xf32>
    %58 = arith.select %56, %54, %57 : vector<48x784xi1>, vector<48x784xf32>
    %c0_44 = arith.constant 0 : index
    %c59 = arith.constant 59 : index
    %59 = vector.load %arg9[%c0_44, %c59] : memref<48x848xf32, #tpu.memory_space<vmem>>, vector<48x784xf32>
    %60 = arith.addf %59, %58 : vector<48x784xf32>
    %c0_45 = arith.constant 0 : index
    %c59_46 = arith.constant 59 : index
    %61 = vector.load %arg9[%c0_45, %c59_46] : memref<48x848xf32, #tpu.memory_space<vmem>>, vector<48x784xf32>
    tpu.vector_store %arg9[%c0_45, %c59_46], %60 {strides = array<i32>} : memref<48x848xf32, #tpu.memory_space<vmem>>, vector<48x784xf32>,
    %c3 = arith.constant 3 : index
    %c0_47 = arith.constant 0 : index
    %c0_48 = arith.constant 0 : index
    %62 = vector.load %arg1[%c3, %c0_47, %c0_48] : memref<9x48x192xf32, #tpu.memory_space<vmem>>, vector<1x48x192xf32>
    %63 = vector.shape_cast %62 : vector<1x48x192xf32> to vector<48x192xf32>
    %cst_49 = arith.constant dense<0.000000e+00> : vector<48x784xf32>
    %64 = tpu.matmul %63, %14, %cst_49 {dimension_numbers = #tpu.dot_dimension_numbers<[1], [0], [0], [1], [0, 0, 1, 1], [], []>} : vector<48x192xf32>, vector<192x784xf32>, vector<48x784xf32> -> vector<48x784xf32>
    %cst_50 = arith.constant 0.000000e+00 : f32
    %65 = vector.shape_cast %35 : vector<1x784xi1> to vector<1x784xi1>
    %66 = vector.broadcast %65 : vector<1x784xi1> to vector<48x784xi1>
    %67 = vector.broadcast %cst_50 : f32 to vector<48x784xf32>
    %68 = arith.select %66, %64, %67 : vector<48x784xi1>, vector<48x784xf32>
    %c0_51 = arith.constant 0 : index
    %c33 = arith.constant 33 : index
    %69 = vector.load %arg9[%c0_51, %c33] : memref<48x848xf32, #tpu.memory_space<vmem>>, vector<48x784xf32>
    %70 = arith.addf %69, %68 : vector<48x784xf32>
    %c0_52 = arith.constant 0 : index
    %c33_53 = arith.constant 33 : index
    %71 = vector.load %arg9[%c0_52, %c33_53] : memref<48x848xf32, #tpu.memory_space<vmem>>, vector<48x784xf32>
    tpu.vector_store %arg9[%c0_52, %c33_53], %70 {strides = array<i32>} : memref<48x848xf32, #tpu.memory_space<vmem>>, vector<48x784xf32>,
    %c4 = arith.constant 4 : index
    %c0_54 = arith.constant 0 : index
    %c0_55 = arith.constant 0 : index
    %72 = vector.load %arg1[%c4, %c0_54, %c0_55] : memref<9x48x192xf32, #tpu.memory_space<vmem>>, vector<1x48x192xf32>
    %73 = vector.shape_cast %72 : vector<1x48x192xf32> to vector<48x192xf32>
    %cst_56 = arith.constant dense<0.000000e+00> : vector<48x784xf32>
    %74 = tpu.matmul %73, %14, %cst_56 {dimension_numbers = #tpu.dot_dimension_numbers<[1], [0], [0], [1], [0, 0, 1, 1], [], []>} : vector<48x192xf32>, vector<192x784xf32>, vector<48x784xf32> -> vector<48x784xf32>
    %c0_57 = arith.constant 0 : index
    %c32 = arith.constant 32 : index
    %75 = vector.load %arg9[%c0_57, %c32] : memref<48x848xf32, #tpu.memory_space<vmem>>, vector<48x784xf32>
    %76 = arith.addf %75, %74 : vector<48x784xf32>
    %c0_58 = arith.constant 0 : index
    %c32_59 = arith.constant 32 : index
    %77 = vector.load %arg9[%c0_58, %c32_59] : memref<48x848xf32, #tpu.memory_space<vmem>>, vector<48x784xf32>
    tpu.vector_store %arg9[%c0_58, %c32_59], %76 {strides = array<i32>} : memref<48x848xf32, #tpu.memory_space<vmem>>, vector<48x784xf32>,
    %c5 = arith.constant 5 : index
    %c0_60 = arith.constant 0 : index
    %c0_61 = arith.constant 0 : index
    %78 = vector.load %arg1[%c5, %c0_60, %c0_61] : memref<9x48x192xf32, #tpu.memory_space<vmem>>, vector<1x48x192xf32>
    %79 = vector.shape_cast %78 : vector<1x48x192xf32> to vector<48x192xf32>
    %cst_62 = arith.constant dense<0.000000e+00> : vector<48x784xf32>
    %80 = tpu.matmul %79, %14, %cst_62 {dimension_numbers = #tpu.dot_dimension_numbers<[1], [0], [0], [1], [0, 0, 1, 1], [], []>} : vector<48x192xf32>, vector<192x784xf32>, vector<48x784xf32> -> vector<48x784xf32>
    %cst_63 = arith.constant 0.000000e+00 : f32
    %81 = vector.shape_cast %33 : vector<1x784xi1> to vector<1x784xi1>
    %82 = vector.broadcast %81 : vector<1x784xi1> to vector<48x784xi1>
    %83 = vector.broadcast %cst_63 : f32 to vector<48x784xf32>
    %84 = arith.select %82, %80, %83 : vector<48x784xi1>, vector<48x784xf32>
    %c0_64 = arith.constant 0 : index
    %c31 = arith.constant 31 : index
    %85 = vector.load %arg9[%c0_64, %c31] : memref<48x848xf32, #tpu.memory_space<vmem>>, vector<48x784xf32>
    %86 = arith.addf %85, %84 : vector<48x784xf32>
    %c0_65 = arith.constant 0 : index
    %c31_66 = arith.constant 31 : index
    %87 = vector.load %arg9[%c0_65, %c31_66] : memref<48x848xf32, #tpu.memory_space<vmem>>, vector<48x784xf32>
    tpu.vector_store %arg9[%c0_65, %c31_66], %86 {strides = array<i32>} : memref<48x848xf32, #tpu.memory_space<vmem>>, vector<48x784xf32>,
    %c6 = arith.constant 6 : index
    %c0_67 = arith.constant 0 : index
    %c0_68 = arith.constant 0 : index
    %88 = vector.load %arg1[%c6, %c0_67, %c0_68] : memref<9x48x192xf32, #tpu.memory_space<vmem>>, vector<1x48x192xf32>
    %89 = vector.shape_cast %88 : vector<1x48x192xf32> to vector<48x192xf32>
    %cst_69 = arith.constant dense<0.000000e+00> : vector<48x784xf32>
    %90 = tpu.matmul %89, %14, %cst_69 {dimension_numbers = #tpu.dot_dimension_numbers<[1], [0], [0], [1], [0, 0, 1, 1], [], []>} : vector<48x192xf32>, vector<192x784xf32>, vector<48x784xf32> -> vector<48x784xf32>
    %cst_70 = arith.constant 0.000000e+00 : f32
    %91 = vector.shape_cast %35 : vector<1x784xi1> to vector<1x784xi1>
    %92 = vector.broadcast %91 : vector<1x784xi1> to vector<48x784xi1>
    %93 = vector.broadcast %cst_70 : f32 to vector<48x784xf32>
    %94 = arith.select %92, %90, %93 : vector<48x784xi1>, vector<48x784xf32>
    %c0_71 = arith.constant 0 : index
    %c5_72 = arith.constant 5 : index
    %95 = vector.load %arg9[%c0_71, %c5_72] : memref<48x848xf32, #tpu.memory_space<vmem>>, vector<48x784xf32>
    %96 = arith.addf %95, %94 : vector<48x784xf32>
    %c0_73 = arith.constant 0 : index
    %c5_74 = arith.constant 5 : index
    %97 = vector.load %arg9[%c0_73, %c5_74] : memref<48x848xf32, #tpu.memory_space<vmem>>, vector<48x784xf32>
    tpu.vector_store %arg9[%c0_73, %c5_74], %96 {strides = array<i32>} : memref<48x848xf32, #tpu.memory_space<vmem>>, vector<48x784xf32>,
    %c7 = arith.constant 7 : index
    %c0_75 = arith.constant 0 : index
    %c0_76 = arith.constant 0 : index
    %98 = vector.load %arg1[%c7, %c0_75, %c0_76] : memref<9x48x192xf32, #tpu.memory_space<vmem>>, vector<1x48x192xf32>
    %99 = vector.shape_cast %98 : vector<1x48x192xf32> to vector<48x192xf32>
    %cst_77 = arith.constant dense<0.000000e+00> : vector<48x784xf32>
    %100 = tpu.matmul %99, %14, %cst_77 {dimension_numbers = #tpu.dot_dimension_numbers<[1], [0], [0], [1], [0, 0, 1, 1], [], []>} : vector<48x192xf32>, vector<192x784xf32>, vector<48x784xf32> -> vector<48x784xf32>
    %c0_78 = arith.constant 0 : index
    %c4_79 = arith.constant 4 : index
    %101 = vector.load %arg9[%c0_78, %c4_79] : memref<48x848xf32, #tpu.memory_space<vmem>>, vector<48x784xf32>
    %102 = arith.addf %101, %100 : vector<48x784xf32>
    %c0_80 = arith.constant 0 : index
    %c4_81 = arith.constant 4 : index
    %103 = vector.load %arg9[%c0_80, %c4_81] : memref<48x848xf32, #tpu.memory_space<vmem>>, vector<48x784xf32>
    tpu.vector_store %arg9[%c0_80, %c4_81], %102 {strides = array<i32>} : memref<48x848xf32, #tpu.memory_space<vmem>>, vector<48x784xf32>,
    %c8 = arith.constant 8 : index
    %c0_82 = arith.constant 0 : index
    %c0_83 = arith.constant 0 : index
    %104 = vector.load %arg1[%c8, %c0_82, %c0_83] : memref<9x48x192xf32, #tpu.memory_space<vmem>>, vector<1x48x192xf32>
    %105 = vector.shape_cast %104 : vector<1x48x192xf32> to vector<48x192xf32>
    %cst_84 = arith.constant dense<0.000000e+00> : vector<48x784xf32>
    %106 = tpu.matmul %105, %14, %cst_84 {dimension_numbers = #tpu.dot_dimension_numbers<[1], [0], [0], [1], [0, 0, 1, 1], [], []>} : vector<48x192xf32>, vector<192x784xf32>, vector<48x784xf32> -> vector<48x784xf32>
    %cst_85 = arith.constant 0.000000e+00 : f32
    %107 = vector.shape_cast %33 : vector<1x784xi1> to vector<1x784xi1>
    %108 = vector.broadcast %107 : vector<1x784xi1> to vector<48x784xi1>
    %109 = vector.broadcast %cst_85 : f32 to vector<48x784xf32>
    %110 = arith.select %108, %106, %109 : vector<48x784xi1>, vector<48x784xf32>
    %c0_86 = arith.constant 0 : index
    %c3_87 = arith.constant 3 : index
    %111 = vector.load %arg9[%c0_86, %c3_87] : memref<48x848xf32, #tpu.memory_space<vmem>>, vector<48x784xf32>
    %112 = arith.addf %111, %110 : vector<48x784xf32>
    %c0_88 = arith.constant 0 : index
    %c3_89 = arith.constant 3 : index
    %113 = vector.load %arg9[%c0_88, %c3_89] : memref<48x848xf32, #tpu.memory_space<vmem>>, vector<48x784xf32>
    tpu.vector_store %arg9[%c0_88, %c3_89], %112 {strides = array<i32>} : memref<48x848xf32, #tpu.memory_space<vmem>>, vector<48x784xf32>,
    %c0_90 = arith.constant 0 : index
    %c32_91 = arith.constant 32 : index
    %114 = vector.load %arg9[%c0_90, %c32_91] : memref<48x848xf32, #tpu.memory_space<vmem>>, vector<48x784xf32>
    %c384 = arith.constant 384 : index
    %c0_92 = arith.constant 0 : index
    %115 = vector.load %arg8[%c384, %c0_92] : memref<480x784xf32, #tpu.memory_space<vmem>>, vector<48x784xf32>
    tpu.vector_store %arg8[%c384, %c0_92], %114 {strides = array<i32>} : memref<480x784xf32, #tpu.memory_space<vmem>>, vector<48x784xf32>,
    return
  }
}

</mosaic_0001>

<bundles_post_ra>
// kernel: forward.1
= control target key start
LH: loop header
LB: loop body
LE: loop exit
PB: predicated region body
PF: predicated region fallthrough
CT: control target
= control target key end

     0   :  { %vm1164_vm0 = vcmask 523264   ;;  %s10546_s14 = smov 61   ;;  %s10547_s11 = smov 60   ;;  %s18956_s0 = inlined_call_operand.vmem [shape: f32[192,784], index: 0, kind: input, shape index: {}]   ;;  %s18957_s1 = inlined_call_operand.vmem [shape: f32[9,48,192], index: 1, kind: input, shape index: {}]   ;;  %s18958_s2 = inlined_call_operand.vmem [shape: f32[192,784], index: 2, kind: input, shape index: {}]   ;;  %s18959_s8 = inlined_call_operand.vmem [shape: f32[480,784], index: 8, kind: output, shape index: {}]   ;;  %s18960_s3 = inlined_call_operand.vmem [shape: f32[48,784], index: 3, kind: input, shape index: {}]   ;;  %s18961_s4 = inlined_call_operand.vmem [shape: f32[48,784], index: 4, kind: input, shape index: {}]   ;;  %s18962_s5 = inlined_call_operand.vmem [shape: f32[48,784], index: 5, kind: input, shape index: {}]   ;;  %s18963_s6 = inlined_call_operand.vmem [shape: f32[48,784], index: 6, kind: input, shape index: {}]   ;;  %s18964_s7 = inlined_call_operand.vmem [shape: f32[48,784], index: 7, kind: input, shape index: {}]  }
   0x1   :  { %v830_v0 = vld [vmem:[%s18956_s0 + $0x8] sm:$0xff]  ;;  %v837_v1 = vld [vmem:[%s18956_s0 + $0x40] sm:$0xff]  ;;  %v836_v4 = vld [vmem:[%s18956_s0 + $0x38] sm:$0xff]  ;;  %s10550_s16 = smov 32   ;;  %s10551_s18 = smov 31  }
   0x2   :  { %v829_v2 = vld [vmem:[%s18956_s0] sm:$0xff]  ;;  %v10610_v3 = vpack.c.bf16 %v837_v1, %v830_v0  ;;  %v832_v5 = vld [vmem:[%s18956_s0 + $0x18] sm:$0xff]  ;;  %v839_v6 = vld [vmem:[%s18956_s0 + $0x50] sm:$0xff]  ;;  %s10552_s20 = smov 5   ;;  %s10554_s27 = smov 3  }
   0x3   :  { %v10621_v7 = vpack.c.bf16 %v836_v4, %v829_v2  ;;  %v10623_v8 = vpack.c.bf16 %v839_v6, %v832_v5  ;;  %v831_v9 = vld [vmem:[%s18956_s0 + $0x10] sm:$0xff]  ;;  %v838_v10 = vld [vmem:[%s18956_s0 + $0x48] sm:$0xff]  ;;  %v844_v11 = vld [vmem:[%s18956_s0 + $0x78] sm:$0xff]  ;;  %s10555_s28 = smov 96  }
   0x4   :  { %8896 = vmatprep.subr.bf16.mxu0 %v10610_v3  ;;  %v10635_v12 = vpack.c.bf16 %v838_v10, %v831_v9  ;;  %v851_v13 = vld [vmem:[%s18956_s0 + $0xb0] sm:$0xff]  ;;  %v850_v15 = vld [vmem:[%s18956_s0 + $0xa8] sm:$0xff]  ;;  %v853_v19 = vld [vmem:[%s18956_s0 + $0xc0] sm:$0xff] }
   0x5   :  { %v843_v14 = vld [vmem:[%s18956_s0 + $0x70] sm:$0xff]  ;;  %8898 = vmatpush1.bf16.msra.mxu0 %v10621_v7  ;;  %8944 = vmatprep.subr.bf16.mxu1 %v10623_v8  ;;  %v10648_v16 = vpack.c.bf16 %v851_v13, %v844_v11  ;;  %v846_v18 = vld [vmem:[%s18956_s0 + $0x88] sm:$0xff]  ;;  %v845_v20 = vld [vmem:[%s18956_s0 + $0x80] sm:$0xff] }
   0x6   :  { %v10650_v17 = vpack.c.bf16 %v850_v15, %v843_v14  ;;  %8946 = vmatpush1.bf16.msra.mxu1 %v10635_v12  ;;  %v10662_v21 = vpack.c.bf16 %v853_v19, %v846_v18  ;;  %v852_v22 = vld [vmem:[%s18956_s0 + $0xb8] sm:$0xff]  ;;  %v858_v23 = vld [vmem:[%s18956_s0 + $0xe8] sm:$0xff]  ;;  %v865_v24 = vld [vmem:[%s18956_s0 + $0x120] sm:$0xff] }
   0x7   :  { %8900 = vmatprep.subr.bf16.mxu0 %v10648_v16  ;;  %v10674_v25 = vpack.c.bf16 %v852_v22, %v845_v20  ;;  %v10676_v26 = vpack.c.bf16 %v865_v24, %v858_v23  ;;  %v857_v27 = vld [vmem:[%s18956_s0 + $0xe0] sm:$0xff]  ;;  %v864_v28 = vld [vmem:[%s18956_s0 + $0x118] sm:$0xff]  ;;  %v867_v30 = vld [vmem:[%s18956_s0 + $0x130] sm:$0xff] }
   0x8   :  { %v860_v29 = vld [vmem:[%s18956_s0 + $0xf8] sm:$0xff]  ;;  %8948 = vmatprep.subr.bf16.mxu1 %v10662_v21  ;;  %v859_v31 = vld [vmem:[%s18956_s0 + $0xf0] sm:$0xff]  ;;  %v866_v32 = vld [vmem:[%s18956_s0 + $0x128] sm:$0xff]  ;;  %v10698_v33 = vpack.c.bf16 %v864_v28, %v857_v27 }
   0x9   :  { %8902 = vmatpush1.bf16.msra.mxu0 %v10650_v17  ;;  %v10700_v34 = vpack.c.bf16 %v867_v30, %v860_v29  ;;  %v872_v35 = vld [vmem:[%s18956_s0 + $0x158] sm:$0xff]  ;;  %v879_v36 = vld [vmem:[%s18956_s0 + $0x190] sm:$0xff]  ;;  %v10713_v38 = vpack.c.bf16 %v866_v32, %v859_v31  ;;  %v878_v40 = vld [vmem:[%s18956_s0 + $0x188] sm:$0xff] }
   0xa   :  { %v871_v37 = vld [vmem:[%s18956_s0 + $0x150] sm:$0xff]  ;;  %8950 = vmatpush1.bf16.msra.mxu1 %v10674_v25  ;;  %8904 = vmatprep.subr.bf16.mxu0 %v10676_v26  ;;  %v10715_v39 = vpack.c.bf16 %v879_v36, %v872_v35  ;;  %v874_v41 = vld [vmem:[%s18956_s0 + $0x168] sm:$0xff]  ;;  %v881_v42 = vld [vmem:[%s18956_s0 + $0x1a0] sm:$0xff] }
   0xb   :  { %8952 = vmatprep.subr.bf16.mxu1 %v10700_v34  ;;  %v10727_v43 = vpack.c.bf16 %v881_v42, %v874_v41  ;;  %v873_v44 = vld [vmem:[%s18956_s0 + $0x160] sm:$0xff]  ;;  %v880_v45 = vld [vmem:[%s18956_s0 + $0x198] sm:$0xff]  ;;  %v886_v46 = vld [vmem:[%s18956_s0 + $0x1c8] sm:$0xff]  ;;  %v10742_v48 = vpack.c.bf16 %v878_v40, %v871_v37 }
   0xc   :  { %v893_v47 = vld [vmem:[%s18956_s0 + $0x200] sm:$0xff]  ;;  %v888_v49 = vld [vmem:[%s18956_s0 + $0x1d8] sm:$0xff]  ;;  %v895_v50 = vld [vmem:[%s18956_s0 + $0x210] sm:$0xff]  ;;  %v10752_v51 = vpack.c.bf16 %v880_v45, %v873_v44 }
   0xd   :  { %8906 = vmatpush1.bf16.msra.mxu0 %v10698_v33  ;;  %v10754_v52 = vpack.c.bf16 %v893_v47, %v886_v46  ;;  %v885_v53 = vld [vmem:[%s18956_s0 + $0x1c0] sm:$0xff]  ;;  %v892_v54 = vld [vmem:[%s18956_s0 + $0x1f8] sm:$0xff]  ;;  %v887_v55 = vld [vmem:[%s18956_s0 + $0x1d0] sm:$0xff]  ;;  %v10766_v56 = vpack.c.bf16 %v895_v50, %v888_v49 }
   0xe   :  { %8954 = vmatpush1.bf16.msra.mxu1 %v10713_v38  ;;  %8908 = vmatprep.subr.bf16.mxu0 %v10715_v39  ;;  %v894_v57 = vld [vmem:[%s18956_s0 + $0x208] sm:$0xff]  ;;  %v900_v58 = vld [vmem:[%s18956_s0 + $0x238] sm:$0xff]  ;;  %v907_v59 = vld [vmem:[%s18956_s0 + $0x270] sm:$0xff]  ;;  %v10784_v62 = vpack.c.bf16 %v892_v54, %v885_v53 }
   0xf   :  { %8956 = vmatprep.subr.bf16.mxu1 %v10727_v43  ;;  %v902_v60 = vld [vmem:[%s18956_s0 + $0x248] sm:$0xff]  ;;  %v909_v61 = vld [vmem:[%s18956_s0 + $0x280] sm:$0xff]  ;;  %v10788_v63 = vpack.c.bf16 %v894_v57, %v887_v55  ;;  %v10790_v0 = vpack.c.bf16 %v907_v59, %v900_v58  ;;  %v899_v1 = vld [vmem:[%s18956_s0 + $0x230] sm:$0xff] }
  0x10   :  { %v906_v2 = vld [vmem:[%s18956_s0 + $0x268] sm:$0xff]  ;;  %v901_v4 = vld [vmem:[%s18956_s0 + $0x240] sm:$0xff]  ;;  %v10802_v5 = vpack.c.bf16 %v909_v61, %v902_v60  ;;  %v908_v6 = vld [vmem:[%s18956_s0 + $0x278] sm:$0xff] }
  0x11   :  { %8910 = vmatpush1.bf16.msra.mxu0 %v10742_v48  ;;  %19439 = vst [vmem:[#allocation3_spill] sm:$0xff] %v10788_v63  ;;  %v914_v9 = vld [vmem:[%s18956_s0 + $0x2a8] sm:$0xff]  ;;  %v921_v10 = vld [vmem:[%s18956_s0 + $0x2e0] sm:$0xff]  ;;  %v916_v11 = vld [vmem:[%s18956_s0 + $0x2b8] sm:$0xff]  ;;  %v10820_v14 = vpack.c.bf16 %v906_v2, %v899_v1  ;;  %v10824_v15 = vpack.c.bf16 %v908_v6, %v901_v4 }
  0x12   :  { %8958 = vmatpush1.bf16.msra.mxu1 %v10752_v51  ;;  %8912 = vmatprep.subr.bf16.mxu0 %v10754_v52  ;;  %19440 = vst [vmem:[#allocation4_spill] sm:$0xff] %v10802_v5  ;;  %v923_v13 = vld [vmem:[%s18956_s0 + $0x2f0] sm:$0xff]  ;;  %v10826_v18 = vpack.c.bf16 %v921_v10, %v914_v9  ;;  %v913_v19 = vld [vmem:[%s18956_s0 + $0x2a0] sm:$0xff]  ;;  %v920_v20 = vld [vmem:[%s18956_s0 + $0x2d8] sm:$0xff] }
  0x13   :  { %8960 = vmatprep.subr.bf16.mxu1 %v10766_v56  ;;  %19441 = vst [vmem:[#allocation5_spill] sm:$0xff] %v10820_v14  ;;  %19442 = vst [vmem:[#allocation6_spill] sm:$0xff] %v10824_v15  ;;  %v915_v22 = vld [vmem:[%s18956_s0 + $0x2b0] sm:$0xff]  ;;  %v10838_v23 = vpack.c.bf16 %v923_v13, %v916_v11  ;;  %v922_v24 = vld [vmem:[%s18956_s0 + $0x2e8] sm:$0xff]  ;;  %v10856_v31 = vpack.c.bf16 %v920_v20, %v913_v19 }
  0x14   :  { %19443 = vst [vmem:[#allocation7_spill] sm:$0xff] %v10826_v18  ;;  %v928_v27 = vld [vmem:[%s18956_s0 + $0x318] sm:$0xff]  ;;  %v935_v28 = vld [vmem:[%s18956_s0 + $0x350] sm:$0xff]  ;;  %v930_v29 = vld [vmem:[%s18956_s0 + $0x328] sm:$0xff]  ;;  %v10860_v32 = vpack.c.bf16 %v922_v24, %v915_v22 }
  0x15   :  { %8914 = vmatpush1.bf16.msra.mxu0 %v10784_v62  ;;  %19444 = vst [vmem:[#allocation8_spill] sm:$0xff] %v10838_v23  ;;  %v937_v30 = vld [vmem:[%s18956_s0 + $0x360] sm:$0xff]  ;;  %19445 = vst [vmem:[#allocation9_spill] sm:$0xff] %v10856_v31  ;;  %v10862_v35 = vpack.c.bf16 %v935_v28, %v928_v27  ;;  %v927_v36 = vld [vmem:[%s18956_s0 + $0x310] sm:$0xff] }
  0x16   :  { %8962 = vmatpush1.bf16.msra.mxu1 %v10788_v63  ;;  %8916 = vmatprep.subr.bf16.mxu0 %v10790_v0  ;;  %19446 = vst [vmem:[#allocation10_spill] sm:$0xff] %v10860_v32  ;;  %v934_v37 = vld [vmem:[%s18956_s0 + $0x348] sm:$0xff]  ;;  %v929_v40 = vld [vmem:[%s18956_s0 + $0x320] sm:$0xff]  ;;  %v10874_v41 = vpack.c.bf16 %v937_v30, %v930_v29  ;;  %v936_v42 = vld [vmem:[%s18956_s0 + $0x358] sm:$0xff] }
  0x17   :  { %8964 = vmatprep.subr.bf16.mxu1 %v10802_v5  ;;  %19447 = vst [vmem:[#allocation11_spill] sm:$0xff] %v10862_v35  ;;  %v942_v44 = vld [vmem:[%s18956_s0 + $0x388] sm:$0xff]  ;;  %v949_v45 = vld [vmem:[%s18956_s0 + $0x3c0] sm:$0xff]  ;;  %v944_v46 = vld [vmem:[%s18956_s0 + $0x398] sm:$0xff]  ;;  %v10892_v49 = vpack.c.bf16 %v934_v37, %v927_v36  ;;  %v10896_v50 = vpack.c.bf16 %v936_v42, %v929_v40 }
  0x18   :  { %19448 = vst [vmem:[#allocation12_spill] sm:$0xff] %v10874_v41  ;;  %v951_v47 = vld [vmem:[%s18956_s0 + $0x3d0] sm:$0xff]  ;;  %v10898_v53 = vpack.c.bf16 %v949_v45, %v942_v44  ;;  %v941_v54 = vld [vmem:[%s18956_s0 + $0x380] sm:$0xff]  ;;  %v948_v55 = vld [vmem:[%s18956_s0 + $0x3b8] sm:$0xff] }
  0x19   :  { %8918 = vmatpush1.bf16.msra.mxu0 %v10820_v14  ;;  %19449 = vst [vmem:[#allocation13_spill] sm:$0xff] %v10892_v49  ;;  %19450 = vst [vmem:[#allocation14_spill] sm:$0xff] %v10896_v50  ;;  %v943_v57 = vld [vmem:[%s18956_s0 + $0x390] sm:$0xff]  ;;  %v10910_v58 = vpack.c.bf16 %v951_v47, %v944_v46  ;;  %v950_v59 = vld [vmem:[%s18956_s0 + $0x3c8] sm:$0xff]  ;;  %v10928_v4 = vpack.c.bf16 %v948_v55, %v941_v54 }
  0x1a   :  { %8966 = vmatpush1.bf16.msra.mxu1 %v10824_v15  ;;  %8920 = vmatprep.subr.bf16.mxu0 %v10826_v18  ;;  %19451 = vst [vmem:[#allocation15_spill] sm:$0xff] %v10898_v53  ;;  %v956_v60 = vld [vmem:[%s18956_s0 + $0x3f8] sm:$0xff]  ;;  %v963_v61 = vld [vmem:[%s18956_s0 + $0x430] sm:$0xff]  ;;  %v958_v1 = vld [vmem:[%s18956_s0 + $0x408] sm:$0xff]  ;;  %v10937_v9 = vpack.c.bf16 %v950_v59, %v943_v57 }
  0x1b   :  { %8968 = vmatprep.subr.bf16.mxu1 %v10838_v23  ;;  %19452 = vst [vmem:[#allocation16_spill] sm:$0xff] %v10910_v58  ;;  %v965_v2 = vld [vmem:[%s18956_s0 + $0x440] sm:$0xff]  ;;  %19453 = vst [vmem:[#allocation17_spill] sm:$0xff] %v10928_v4  ;;  %v10933_v6 = vld [vmem:[%s18957_s1 + $0x8] sm:$0xff]  ;;  %v10939_v10 = vpack.c.bf16 %v963_v61, %v956_v60 }
  0x1c   :  { %19454 = vst [vmem:[#allocation18_spill] sm:$0xff] %v10937_v9  ;;  %v955_v11 = vld [vmem:[%s18956_s0 + $0x3f0] sm:$0xff]  ;;  %v962_v13 = vld [vmem:[%s18956_s0 + $0x428] sm:$0xff]  ;;  %v957_v19 = vld [vmem:[%s18956_s0 + $0x400] sm:$0xff]  ;;  %v10951_v20 = vpack.c.bf16 %v965_v2, %v958_v1  ;;  %8583 = vmatprep.mubr.msk.f32.mxu0 %vm1164_vm0, %v10933_v6  ;;  %8589 = vmatprep.mubr.msk.f32.mxu1 %vm1164_vm0, %v10933_v6 }
  0x1d   :  { %8922 = vmatpush1.bf16.msra.mxu0 %v10856_v31  ;;  %19455 = vst [vmem:[#allocation19_spill] sm:$0xff] %v10939_v10  ;;  %v964_v22 = vld [vmem:[%s18956_s0 + $0x438] sm:$0xff]  ;;  %v970_v24 = vld [vmem:[%s18956_s0 + $0x468] sm:$0xff]  ;;  %v977_v27 = vld [vmem:[%s18956_s0 + $0x4a0] sm:$0xff]  ;;  %v10973_v30 = vpack.c.bf16 %v962_v13, %v955_v11 }
  0x1e   :  { %8970 = vmatpush1.bf16.msra.mxu1 %v10860_v32  ;;  %8924 = vmatprep.subr.bf16.mxu0 %v10862_v35  ;;  %19456 = vst [vmem:[#allocation20_spill] sm:$0xff] %v10951_v20  ;;  %v972_v28 = vld [vmem:[%s18956_s0 + $0x478] sm:$0xff]  ;;  %v979_v29 = vld [vmem:[%s18956_s0 + $0x4b0] sm:$0xff]  ;;  %v10977_v36 = vpack.c.bf16 %v964_v22, %v957_v19  ;;  %v10979_v37 = vpack.c.bf16 %v977_v27, %v970_v24  ;;  %v969_v40 = vld [vmem:[%s18956_s0 + $0x460] sm:$0xff] }
  0x1f   :  { %8972 = vmatprep.subr.bf16.mxu1 %v10874_v41  ;;  %19457 = vst [vmem:[#allocation21_spill] sm:$0xff] %v10973_v30  ;;  %v976_v42 = vld [vmem:[%s18956_s0 + $0x498] sm:$0xff]  ;;  %v971_v44 = vld [vmem:[%s18956_s0 + $0x470] sm:$0xff]  ;;  %v10991_v45 = vpack.c.bf16 %v979_v29, %v972_v28  ;;  %v978_v46 = vld [vmem:[%s18956_s0 + $0x4a8] sm:$0xff] }
  0x20   :  { %19458 = vst [vmem:[#allocation22_spill] sm:$0xff] %v10977_v36  ;;  %19459 = vst [vmem:[#allocation23_spill] sm:$0xff] %v10979_v37  ;;  %v984_v47 = vld [vmem:[%s18956_s0 + $0x4d8] sm:$0xff]  ;;  %v991_v54 = vld [vmem:[%s18956_s0 + $0x510] sm:$0xff]  ;;  %v11009_v59 = vpack.c.bf16 %v976_v42, %v969_v40  ;;  %v11013_v60 = vpack.c.bf16 %v978_v46, %v971_v44 }
  0x21   :  { %8926 = vmatpush1.bf16.msra.mxu0 %v10892_v49  ;;  %19460 = vst [vmem:[#allocation24_spill] sm:$0xff] %v10991_v45  ;;  %v986_v55 = vld [vmem:[%s18956_s0 + $0x4e8] sm:$0xff]  ;;  %v993_v57 = vld [vmem:[%s18956_s0 + $0x520] sm:$0xff]  ;;  %v11015_v61 = vpack.c.bf16 %v991_v54, %v984_v47  ;;  %v983_v1 = vld [vmem:[%s18956_s0 + $0x4d0] sm:$0xff] }
  0x22   :  { %8974 = vmatpush1.bf16.msra.mxu1 %v10896_v50  ;;  %8928 = vmatprep.subr.bf16.mxu0 %v10898_v53  ;;  %19461 = vst [vmem:[#allocation25_spill] sm:$0xff] %v11009_v59  ;;  %19462 = vst [vmem:[#allocation26_spill] sm:$0xff] %v11013_v60  ;;  %v990_v2 = vld [vmem:[%s18956_s0 + $0x508] sm:$0xff]  ;;  %v985_v11 = vld [vmem:[%s18956_s0 + $0x4e0] sm:$0xff]  ;;  %v11027_v13 = vpack.c.bf16 %v993_v57, %v986_v55 }
  0x23   :  { %8976 = vmatprep.subr.bf16.mxu1 %v10910_v58  ;;  %19463 = vst [vmem:[#allocation27_spill] sm:$0xff] %v11015_v61  ;;  %v992_v19 = vld [vmem:[%s18956_s0 + $0x518] sm:$0xff]  ;;  %v834_v22 = vld [vmem:[%s18956_s0 + $0x28] sm:$0xff]  ;;  %v841_v24 = vld [vmem:[%s18956_s0 + $0x60] sm:$0xff]  ;;  %v11039_v27 = vpack.c.bf16 %v990_v2, %v983_v1 }
  0x24   :  { %19464 = vst [vmem:[#allocation28_spill] sm:$0xff] %v11027_v13  ;;  %v11043_v28 = vpack.c.bf16 %v992_v19, %v985_v11  ;;  %v11045_v29 = vpack.c.bf16 %v841_v24, %v834_v22  ;;  %v833_v40 = vld [vmem:[%s18956_s0 + $0x20] sm:$0xff]  ;;  %v840_v42 = vld [vmem:[%s18956_s0 + $0x58] sm:$0xff]  ;;  %v855_v46 = vld [vmem:[%s18956_s0 + $0xd0] sm:$0xff]  ;;  %v18965_v24 = vmov 0.0|0.0  }
  0x25   :  { %8930 = vmatpush1.bf16.msra.mxu0 %v10928_v4  ;;  %19465 = vst [vmem:[#allocation29_spill] sm:$0xff] %v11039_v27  ;;  %v848_v44 = vld [vmem:[%s18956_s0 + $0x98] sm:$0xff]  ;;  %v835_v47 = vld [vmem:[%s18956_s0 + $0x30] sm:$0xff]  ;;  %v842_v54 = vld [vmem:[%s18956_s0 + $0x68] sm:$0xff]  ;;  %v11072_v57 = vpack.c.bf16 %v840_v42, %v833_v40 }
  0x26   :  { %8978 = vmatpush1.bf16.msra.mxu1 %v10937_v9  ;;  %8932 = vmatprep.subr.bf16.mxu0 %v10939_v10  ;;  %19466 = vst [vmem:[#allocation30_spill] sm:$0xff] %v11043_v28  ;;  %19467 = vst [vmem:[#allocation31_spill] sm:$0xff] %v11045_v29  ;;  %v11070_v55 = vld [vmem:[%s18957_s1] sm:$0xff]  ;;  %v11076_v1 = vpack.c.bf16 %v855_v46, %v848_v44  ;;  %v11078_v2 = vpack.c.bf16 %v842_v54, %v835_v47  ;;  %v847_v11 = vld [vmem:[%s18956_s0 + $0x90] sm:$0xff] }
  0x27   :  { %8980 = vmatprep.subr.bf16.mxu1 %v10951_v20  ;;  %19468 = vst [vmem:[#allocation32_spill] sm:$0xff] %v11072_v57  ;;  %v854_v19 = vld [vmem:[%s18956_s0 + $0xc8] sm:$0xff]  ;;  %v869_v40 = vld [vmem:[%s18956_s0 + $0x140] sm:$0xff]  ;;  %v856_v44 = vld [vmem:[%s18956_s0 + $0xd8] sm:$0xff] }
  0x28   :  { %19469 = vst [vmem:[#allocation33_spill] sm:$0xff] %v11076_v1  ;;  %19470 = vst [vmem:[#allocation34_spill] sm:$0xff] %v11078_v2  ;;  %v862_v22 = vld [vmem:[%s18956_s0 + $0x108] sm:$0xff]  ;;  %v849_v42 = vld [vmem:[%s18956_s0 + $0xa0] sm:$0xff]  ;;  %v11107_v47 = vpack.c.bf16 %v854_v19, %v847_v11 }
  0x29   :  { %8934 = vmatpush1.bf16.msra.mxu0 %v10973_v30  ;;  %v11103_v46 = vld [vmem:[%s18957_s1 + $0x18] sm:$0xff]  ;;  %v11112_v54 = vld [vmem:[%s18957_s1 + $0x10] sm:$0xff] }
  0x2a   :  { %8982 = vmatpush1.bf16.msra.mxu1 %v10977_v36  ;;  %8936 = vmatprep.subr.bf16.mxu0 %v10979_v37  ;;  %19471 = vst [vmem:[#allocation35_spill] sm:$0xff] %v11107_v47  ;;  %v868_v11 = vld [vmem:[%s18956_s0 + $0x138] sm:$0xff]  ;;  %v931_v30 = vld [vmem:[%s18956_s0 + $0x330] sm:$0xff] }
  0x2b   :  { %8984 = vmatprep.subr.bf16.mxu1 %v10991_v45  ;;  %v876_v19 = vld [vmem:[%s18956_s0 + $0x178] sm:$0xff] }
  0x2d   :  { %8938 = vmatpush1.bf16.msra.mxu0 %v11009_v59 }
  0x2e   :  { %8986 = vmatpush1.bf16.msra.mxu1 %v11013_v60  ;;  %8940 = vmatprep.subr.bf16.mxu0 %v11015_v61 }
  0x2f   :  { %8988 = vmatprep.subr.bf16.mxu1 %v11027_v13 }
  0x31   :  { %8942 = vmatpush1.bf16.msra.mxu0 %v11039_v27 }
  0x32   :  { %8990 = vmatpush1.bf16.msra.mxu1 %v11043_v28  ;;  %8992 = vmatprep.subr.bf16.mxu0 %v11045_v29  ;;  %v11118_v28 = vpack.c.bf16 %v856_v44, %v849_v42  ;;  %v861_v29 = vld [vmem:[%s18956_s0 + $0x100] sm:$0xff]  ;;  %v870_v42 = vld [vmem:[%s18956_s0 + $0x148] sm:$0xff] }
  0x33   :  { %9039 = vmatprep.subr.bf16.mxu1 %v18965_v24  ;;  %v11116_v24 = vpack.c.bf16 %v869_v40, %v862_v22  ;;  %v883_v22 = vld [vmem:[%s18956_s0 + $0x1b0] sm:$0xff]  ;;  %v11147_v44 = vld [vmem:[%s18957_s1 + $0x28] sm:$0xff] }
  0x34   :  { %1248 = vmatmul.mubr.f32.vlgmr.msra.gmra.mrb[0].mxu0 %v11070_v55  ;;  %19473 = vst [vmem:[#allocation37_spill] sm:$0xff] %v11118_v28  ;;  %v863_v40 = vld [vmem:[%s18956_s0 + $0x110] sm:$0xff]  ;;  %v11160_v27 = vpack.c.bf16 %v883_v22, %v876_v19  ;;  %v897_v19 = vld [vmem:[%s18956_s0 + $0x220] sm:$0xff] }
  0x35   :  { %1349 = vmatmul.mubr.f32.vlgmr.msra.gmra.mrb[0].mxu1 %v11070_v55  ;;  %8994 = vmatpush1.bf16.msra.mxu0 %v11072_v57  ;;  %19472 = vst [vmem:[#allocation36_spill] sm:$0xff] %v11116_v24  ;;  %v11156_v57 = vld [vmem:[%s18957_s1 + $0x20] sm:$0xff]  ;;  %v11162_v13 = vpack.c.bf16 %v870_v42, %v863_v40  ;;  %v884_v40 = vld [vmem:[%s18956_s0 + $0x1b8] sm:$0xff] }
  0x36   :  { %8996 = vmatprep.subr.bf16.mxu0 %v11076_v1  ;;  %9041 = vmatpush1.bf16.msra.mxu1 %v11078_v2  ;;  %v19474_v2 = vmov 0.0|0.0   ;;  %v11150_v1 = vpack.c.bf16 %v868_v11, %v861_v29  ;;  %19476 = vst [vmem:[#allocation39_spill] sm:$0xff] %v11160_v27  ;;  %v875_v29 = vld [vmem:[%s18956_s0 + $0x170] sm:$0xff]  ;;  %v882_v11 = vld [vmem:[%s18956_s0 + $0x1a8] sm:$0xff]  ;;  %v877_v22 = vld [vmem:[%s18956_s0 + $0x180] sm:$0xff] }
  0x37   :  { %8584 = vmatprep.mubr.msk.f32.mxu0 %vm1164_vm0, %v11103_v46  ;;  %9042 = vmatprep.subr.bf16.mxu1 %v19474_v2  ;;  %19477 = vst [vmem:[#allocation40_spill] sm:$0xff] %v11162_v13  ;;  %v11191_v42 = vld [vmem:[%s18957_s1 + $0x38] sm:$0xff]  ;;  %v11206_v61 = vpack.c.bf16 %v884_v40, %v877_v22  ;;  %v898_v22 = vld [vmem:[%s18956_s0 + $0x228] sm:$0xff] }
  0x38   :  { %1254 = vmatmul.mubr.f32.gmra.mrb[2].mxu0 %v11112_v54  ;;  %8590 = vmatprep.mubr.msk.f32.mxu1 %vm1164_vm0, %v11103_v46  ;;  %19475 = vst [vmem:[#allocation38_spill] sm:$0xff] %v11150_v1  ;;  %v11235_v40 = vld [vmem:[%s18957_s1 + $0x48] sm:$0xff] }
  0x39   :  { %8998 = vmatpush1.bf16.msra.mxu0 %v11107_v47  ;;  %1355 = vmatmul.mubr.f32.gmra.mrb[2].mxu1 %v11112_v54  ;;  %v890_v47 = vld [vmem:[%s18956_s0 + $0x1e8] sm:$0xff]  ;;  %19480 = vst [vmem:[#allocation43_spill] sm:$0xff] %v11206_v61 }
  0x3a   :  { %9000 = vmatprep.subr.bf16.mxu0 %v11116_v24  ;;  %9044 = vmatpush1.bf16.msra.mxu1 %v11118_v28  ;;  %v11194_v28 = vpack.c.bf16 %v882_v11, %v875_v29  ;;  %v11200_v24 = vld [vmem:[%s18957_s1 + $0x30] sm:$0xff]  ;;  %v11204_v60 = vpack.c.bf16 %v897_v19, %v890_v47  ;;  %v889_v29 = vld [vmem:[%s18956_s0 + $0x1e0] sm:$0xff]  ;;  %v896_v11 = vld [vmem:[%s18956_s0 + $0x218] sm:$0xff] }
  0x3b   :  { %9045 = vmatprep.subr.bf16.mxu1 %v19474_v2  ;;  %8585 = vmatprep.mubr.msk.f32.mxu0 %vm1164_vm0, %v11147_v44  ;;  %v911_v47 = vld [vmem:[%s18956_s0 + $0x290] sm:$0xff] }
  0x3c   :  { %1260 = vmatmul.mubr.f32.gmra.mrb[4].mxu0 %v11156_v57  ;;  %8591 = vmatprep.mubr.msk.f32.mxu1 %vm1164_vm0, %v11147_v44  ;;  %19478 = vst [vmem:[#allocation41_spill] sm:$0xff] %v11194_v28  ;;  %19479 = vst [vmem:[#allocation42_spill] sm:$0xff] %v11204_v60  ;;  %v891_v19 = vld [vmem:[%s18956_s0 + $0x1f0] sm:$0xff] }
  0x3d   :  { %9002 = vmatpush1.bf16.msra.mxu0 %v11150_v1  ;;  %1361 = vmatmul.mubr.f32.gmra.mrb[4].mxu1 %v11156_v57  ;;  %v904_v1 = vld [vmem:[%s18956_s0 + $0x258] sm:$0xff]  ;;  %v11250_v45 = vpack.c.bf16 %v898_v22, %v891_v19 }
  0x3e   :  { %9004 = vmatprep.subr.bf16.mxu0 %v11160_v27  ;;  %9047 = vmatpush1.bf16.msra.mxu1 %v11162_v13  ;;  %v11238_v13 = vpack.c.bf16 %v896_v11, %v889_v29  ;;  %v11244_v27 = vld [vmem:[%s18957_s1 + $0x40] sm:$0xff]  ;;  %v11248_v59 = vpack.c.bf16 %v911_v47, %v904_v1  ;;  %v903_v29 = vld [vmem:[%s18956_s0 + $0x250] sm:$0xff]  ;;  %v910_v11 = vld [vmem:[%s18956_s0 + $0x288] sm:$0xff] }
  0x3f   :  { %9048 = vmatprep.subr.bf16.mxu1 %v19474_v2  ;;  %8586 = vmatprep.mubr.msk.f32.mxu0 %vm1164_vm0, %v11191_v42  ;;  %19483 = vst [vmem:[#allocation46_spill] sm:$0xff] %v11250_v45  ;;  %v925_v1 = vld [vmem:[%s18956_s0 + $0x300] sm:$0xff]  ;;  %v912_v19 = vld [vmem:[%s18956_s0 + $0x298] sm:$0xff] }
  0x40   :  { %1266 = vmatmul.mubr.f32.gmra.mrb[6].mxu0 %v11200_v24  ;;  %8592 = vmatprep.mubr.msk.f32.mxu1 %vm1164_vm0, %v11191_v42  ;;  %19481 = vst [vmem:[#allocation44_spill] sm:$0xff] %v11238_v13  ;;  %19482 = vst [vmem:[#allocation45_spill] sm:$0xff] %v11248_v59  ;;  %v905_v47 = vld [vmem:[%s18956_s0 + $0x260] sm:$0xff]  ;;  %v11279_v22 = vld [vmem:[%s18957_s1 + $0x58] sm:$0xff] }
  0x41   :  { %9006 = vmatpush1.bf16.msra.mxu0 %v11194_v28  ;;  %1367 = vmatmul.mubr.f32.gmra.mrb[6].mxu1 %v11200_v24  ;;  %v918_v28 = vld [vmem:[%s18956_s0 + $0x2c8] sm:$0xff]  ;;  %v11294_v37 = vpack.c.bf16 %v912_v19, %v905_v47 }
  0x42   :  { %9008 = vmatprep.subr.bf16.mxu0 %v11204_v60  ;;  %9050 = vmatpush1.bf16.msra.mxu1 %v11206_v61  ;;  %v11282_v61 = vpack.c.bf16 %v910_v11, %v903_v29  ;;  %v11288_v60 = vld [vmem:[%s18957_s1 + $0x50] sm:$0xff]  ;;  %v11292_v36 = vpack.c.bf16 %v925_v1, %v918_v28  ;;  %v917_v29 = vld [vmem:[%s18956_s0 + $0x2c0] sm:$0xff]  ;;  %v924_v11 = vld [vmem:[%s18956_s0 + $0x2f8] sm:$0xff] }
  0x43   :  { %9051 = vmatprep.subr.bf16.mxu1 %v19474_v2  ;;  %8587 = vmatprep.mubr.msk.f32.mxu0 %vm1164_vm0, %v11235_v40  ;;  %19486 = vst [vmem:[#allocation49_spill] sm:$0xff] %v11294_v37  ;;  %v939_v28 = vld [vmem:[%s18956_s0 + $0x370] sm:$0xff]  ;;  %v926_v47 = vld [vmem:[%s18956_s0 + $0x308] sm:$0xff]  ;;  %v11321_v19 = vpack.c.bf16 %v924_v11, %v917_v29  ;;  %v933_v11 = vld [vmem:[%s18956_s0 + $0x340] sm:$0xff] }
  0x44   :  { %1272 = vmatmul.mubr.f32.gmra.mrb[8].mxu0 %v11244_v27  ;;  %8593 = vmatprep.mubr.msk.f32.mxu1 %vm1164_vm0, %v11235_v40  ;;  %19484 = vst [vmem:[#allocation47_spill] sm:$0xff] %v11282_v61  ;;  %19485 = vst [vmem:[#allocation48_spill] sm:$0xff] %v11292_v36  ;;  %v919_v1 = vld [vmem:[%s18956_s0 + $0x2d0] sm:$0xff]  ;;  %v946_v29 = vld [vmem:[%s18956_s0 + $0x3a8] sm:$0xff] }
  0x45   :  { %9010 = vmatpush1.bf16.msra.mxu0 %v11238_v13  ;;  %1373 = vmatmul.mubr.f32.gmra.mrb[8].mxu1 %v11244_v27  ;;  %v932_v13 = vld [vmem:[%s18956_s0 + $0x338] sm:$0xff]  ;;  %19487 = vst [vmem:[#allocation50_spill] sm:$0xff] %v11321_v19 }
  0x46   :  { %9012 = vmatprep.subr.bf16.mxu0 %v11248_v59  ;;  %9053 = vmatpush1.bf16.msra.mxu1 %v11250_v45  ;;  %v11326_v45 = vpack.c.bf16 %v939_v28, %v932_v13  ;;  %v11328_v59 = vpack.c.bf16 %v926_v47, %v919_v1  ;;  %v953_v13 = vld [vmem:[%s18956_s0 + $0x3e0] sm:$0xff]  ;;  %v940_v28 = vld [vmem:[%s18956_s0 + $0x378] sm:$0xff] }
  0x47   :  { %9054 = vmatprep.subr.bf16.mxu1 %v19474_v2  ;;  %8588 = vmatprep.mubr.msk.f32.mxu0 %vm1164_vm0, %v11279_v22  ;;  %v11358_v47 = vpack.c.bf16 %v953_v13, %v946_v29  ;;  %v947_v29 = vld [vmem:[%s18956_s0 + $0x3b0] sm:$0xff]  ;;  %v954_v13 = vld [vmem:[%s18956_s0 + $0x3e8] sm:$0xff] }
  0x48   :  { %1278 = vmatmul.mubr.f32.gmra.mrb[10].mxu0 %v11288_v60  ;;  %8594 = vmatprep.mubr.msk.f32.mxu1 %vm1164_vm0, %v11279_v22  ;;  %19488 = vst [vmem:[#allocation51_spill] sm:$0xff] %v11326_v45  ;;  %19489 = vst [vmem:[#allocation52_spill] sm:$0xff] %v11328_v59 }
  0x49   :  { %9014 = vmatpush1.bf16.msra.mxu0 %v11282_v61  ;;  %1379 = vmatmul.mubr.f32.gmra.mrb[10].mxu1 %v11288_v60  ;;  %v938_v61 = vld [vmem:[%s18956_s0 + $0x368] sm:$0xff]  ;;  %19491 = vst [vmem:[#allocation54_spill] sm:$0xff] %v11358_v47 }
  0x4a   :  { %9016 = vmatprep.subr.bf16.mxu0 %v11292_v36  ;;  %9056 = vmatpush1.bf16.msra.mxu1 %v11294_v37  ;;  %v11354_v1 = vpack.c.bf16 %v938_v61, %v931_v30  ;;  %v11360_v37 = vpack.c.bf16 %v940_v28, %v933_v11  ;;  %v945_v36 = vld [vmem:[%s18956_s0 + $0x3a0] sm:$0xff]  ;;  %v960_v30 = vld [vmem:[%s18956_s0 + $0x418] sm:$0xff]  ;;  %v967_v61 = vld [vmem:[%s18956_s0 + $0x450] sm:$0xff] }
  0x4b   :  { %9057 = vmatprep.subr.bf16.mxu1 %v19474_v2  ;;  %8595 = vmatprep.mubr.msk.f32.mxu0 %vm1164_vm0, %v10933_v6  ;;  %v11386_v28 = vpack.c.bf16 %v967_v61, %v960_v30  ;;  %v961_v30 = vld [vmem:[%s18956_s0 + $0x420] sm:$0xff]  ;;  %v968_v61 = vld [vmem:[%s18956_s0 + $0x458] sm:$0xff] }
  0x4c   :  { %8601 = vmatprep.mubr.msk.f32.mxu1 %vm1164_vm0, %v10933_v6  ;;  %19490 = vst [vmem:[#allocation53_spill] sm:$0xff] %v11354_v1  ;;  %19492 = vst [vmem:[#allocation55_spill] sm:$0xff] %v11360_v37  ;;  %v952_v6 = vld [vmem:[%s18956_s0 + $0x3d8] sm:$0xff] }
  0x4d   :  { %9018 = vmatpush1.bf16.msra.mxu0 %v11321_v19  ;;  %v11382_v11 = vpack.c.bf16 %v952_v6, %v945_v36  ;;  %19494 = vst [vmem:[#allocation57_spill] sm:$0xff] %v11386_v28  ;;  %v966_v19 = vld [vmem:[%s18956_s0 + $0x448] sm:$0xff]  ;;  %v981_v6 = vld [vmem:[%s18956_s0 + $0x4c0] sm:$0xff] }
  0x4e   :  { %9020 = vmatprep.subr.bf16.mxu0 %v11326_v45  ;;  %9059 = vmatpush1.bf16.msra.mxu1 %v11328_v59  ;;  %v11388_v59 = vpack.c.bf16 %v954_v13, %v947_v29  ;;  %v959_v45 = vld [vmem:[%s18956_s0 + $0x410] sm:$0xff]  ;;  %v974_v36 = vld [vmem:[%s18956_s0 + $0x488] sm:$0xff] }
  0x4f   :  { %9060 = vmatprep.subr.bf16.mxu1 %v19474_v2  ;;  %19493 = vst [vmem:[#allocation56_spill] sm:$0xff] %v11382_v11  ;;  %v11410_v29 = vpack.c.bf16 %v966_v19, %v959_v45  ;;  %v11414_v13 = vpack.c.bf16 %v981_v6, %v974_v36  ;;  %v988_v45 = vld [vmem:[%s18956_s0 + $0x4f8] sm:$0xff]  ;;  %v995_v19 = vld [vmem:[%s18956_s0 + $0x530] sm:$0xff]  ;;  %v982_v6 = vld [vmem:[%s18956_s0 + $0x4c8] sm:$0xff] }
  0x50   :  { %19495 = vst [vmem:[#allocation58_spill] sm:$0xff] %v11388_v59  ;;  %v975_v36 = vld [vmem:[%s18956_s0 + $0x490] sm:$0xff] }
  0x51   :  { %9022 = vmatpush1.bf16.msra.mxu0 %v11354_v1  ;;  %19496 = vst [vmem:[#allocation59_spill] sm:$0xff] %v11410_v29  ;;  %19497 = vst [vmem:[#allocation60_spill] sm:$0xff] %v11414_v13  ;;  %v980_v1 = vld [vmem:[%s18956_s0 + $0x4b8] sm:$0xff] }
  0x52   :  { %9024 = vmatprep.subr.bf16.mxu0 %v11358_v47  ;;  %9062 = vmatpush1.bf16.msra.mxu1 %v11360_v37  ;;  %v11416_v37 = vpack.c.bf16 %v968_v61, %v961_v30  ;;  %v973_v47 = vld [vmem:[%s18956_s0 + $0x480] sm:$0xff]  ;;  %v11442_v61 = vpack.c.bf16 %v995_v19, %v988_v45 }
  0x53   :  { %9063 = vmatprep.subr.bf16.mxu1 %v19474_v2  ;;  %v11438_v30 = vpack.c.bf16 %v980_v1, %v973_v47  ;;  %v989_v1 = vld [vmem:[%s18956_s0 + $0x500] sm:$0xff]  ;;  %v996_v47 = vld [vmem:[%s18956_s0 + $0x538] sm:$0xff] }
  0x54   :  { %19498 = vst [vmem:[#allocation61_spill] sm:$0xff] %v11416_v37  ;;  %v11464_v19 = vpack.c.bf16 %v996_v47, %v989_v1  ;;  %v11577_v1 = vld [vmem:[%s18957_s1 + $0x70] sm:$0xff]  ;;  %v19512_v47 = vld [vmem:[#allocation33_spill] sm:$0xff] }
  0x55   :  { %9026 = vmatpush1.bf16.msra.mxu0 %v11382_v11  ;;  %v994_v11 = vld [vmem:[%s18956_s0 + $0x528] sm:$0xff] }
  0x56   :  { %9028 = vmatprep.subr.bf16.mxu0 %v11386_v28  ;;  %9065 = vmatpush1.bf16.msra.mxu1 %v11388_v59  ;;  %v11444_v59 = vpack.c.bf16 %v982_v6, %v975_v36  ;;  %v987_v28 = vld [vmem:[%s18956_s0 + $0x4f0] sm:$0xff]  ;;  %v19510_v36 = vld [vmem:[#allocation30_spill] sm:$0xff]  ;;  %v19511_v6 = vld [vmem:[#allocation32_spill] sm:$0xff]  ;;  %s10548_s0 = smov 59  }
  0x57   :  { %9066 = vmatprep.subr.bf16.mxu1 %v19474_v2  ;;  %v11460_v45 = vpack.c.bf16 %v994_v11, %v987_v28  ;;  %v19509_v11 = vld [vmem:[#allocation31_spill] sm:$0xff]  ;;  %v11566_v28 = vld [vmem:[%s18957_s1 + $0x78] sm:$0xff] }
  0x58   :  { %19499 = vst [vmem:[#allocation62_spill] sm:$0xff] %v11444_v59 }
  0x59   :  { %9030 = vmatpush1.bf16.msra.mxu0 %v11410_v29 }
  0x5a   :  { %9032 = vmatprep.subr.bf16.mxu0 %v11414_v13  ;;  %9068 = vmatpush1.bf16.msra.mxu1 %v11416_v37 }
  0x5b   :  { %9069 = vmatprep.subr.bf16.mxu1 %v19474_v2 }
  0x5d   :  { %9034 = vmatpush1.bf16.msra.mxu0 %v11438_v30 }
  0x5e   :  { %9036 = vmatprep.subr.bf16.mxu0 %v11442_v61  ;;  %9071 = vmatpush1.bf16.msra.mxu1 %v11444_v59 }
  0x5f   :  { %9072 = vmatprep.subr.bf16.mxu1 %v19474_v2 }
  0x61   :  { %9038 = vmatpush1.bf16.msra.mxu0 %v11460_v45 }
  0x62   :  { %9074 = vmatpush1.bf16.msra.mxu1 %v11464_v19  ;;  %9076 = vmatprep.subr.bf16.mxu0 %v10610_v3 }
  0x63   :  { %9124 = vmatprep.subr.bf16.mxu1 %v10623_v8 }
  0x64   :  { %1450 = vmatmul.mubr.f32.vlgmr.msra.gmra.mrb[12].mxu0 %v11070_v55 }
  0x65   :  { %9078 = vmatpush1.bf16.msra.mxu0 %v10621_v7  ;;  %8596 = vmatprep.mubr.msk.f32.mxu0 %vm1164_vm0, %v11103_v46 }
  0x66   :  { %1551 = vmatmul.mubr.f32.vlgmr.msra.gmra.mrb[12].mxu1 %v11070_v55  ;;  %9080 = vmatprep.subr.bf16.mxu0 %v10648_v16  ;;  %v11520_v55 = vld [vmem:[%s18957_s1 + $0x68] sm:$0xff] }
  0x67   :  { %9126 = vmatpush1.bf16.msra.mxu1 %v10635_v12  ;;  %8602 = vmatprep.mubr.msk.f32.mxu1 %vm1164_vm0, %v11103_v46  ;;  %v19504_v46 = vld [vmem:[#allocation25_spill] sm:$0xff] }
  0x68   :  { %1456 = vmatmul.mubr.f32.gmra.mrb[14].mxu0 %v11112_v54  ;;  %9128 = vmatprep.subr.bf16.mxu1 %v10662_v21 }
  0x69   :  { %9082 = vmatpush1.bf16.msra.mxu0 %v10650_v17  ;;  %8597 = vmatprep.mubr.msk.f32.mxu0 %vm1164_vm0, %v11147_v44 }
  0x6a   :  { %9084 = vmatprep.subr.bf16.mxu0 %v10676_v26  ;;  %1556 = vmatmul.mubr.f32.gmra.mrb[14].mxu1 %v11112_v54  ;;  %v19505_v54 = vld [vmem:[#allocation27_spill] sm:$0xff] }
  0x6b   :  { %9130 = vmatpush1.bf16.msra.mxu1 %v10674_v25  ;;  %8603 = vmatprep.mubr.msk.f32.mxu1 %vm1164_vm0, %v11147_v44  ;;  %v19506_v44 = vld [vmem:[#allocation26_spill] sm:$0xff] }
  0x6c   :  { %9132 = vmatprep.subr.bf16.mxu1 %v10700_v34  ;;  %1462 = vmatmul.mubr.f32.gmra.mrb[16].mxu0 %v11156_v57 }
  0x6d   :  { %9086 = vmatpush1.bf16.msra.mxu0 %v10698_v33  ;;  %8598 = vmatprep.mubr.msk.f32.mxu0 %vm1164_vm0, %v11191_v42 }
  0x6e   :  { %9088 = vmatprep.subr.bf16.mxu0 %v10715_v39  ;;  %1561 = vmatmul.mubr.f32.gmra.mrb[16].mxu1 %v11156_v57  ;;  %v19502_v57 = vld [vmem:[#allocation22_spill] sm:$0xff] }
  0x6f   :  { %9134 = vmatpush1.bf16.msra.mxu1 %v10713_v38  ;;  %8604 = vmatprep.mubr.msk.f32.mxu1 %vm1164_vm0, %v11191_v42  ;;  %v19507_v42 = vld [vmem:[#allocation28_spill] sm:$0xff] }
  0x70   :  { %9136 = vmatprep.subr.bf16.mxu1 %v10727_v43  ;;  %1468 = vmatmul.mubr.f32.gmra.mrb[18].mxu0 %v11200_v24 }
  0x71   :  { %9090 = vmatpush1.bf16.msra.mxu0 %v10742_v48  ;;  %8599 = vmatprep.mubr.msk.f32.mxu0 %vm1164_vm0, %v11235_v40 }
  0x72   :  { %9092 = vmatprep.subr.bf16.mxu0 %v10754_v52  ;;  %1566 = vmatmul.mubr.f32.gmra.mrb[18].mxu1 %v11200_v24  ;;  %v19503_v24 = vld [vmem:[#allocation24_spill] sm:$0xff] }
  0x73   :  { %9138 = vmatpush1.bf16.msra.mxu1 %v10752_v51  ;;  %8605 = vmatprep.mubr.msk.f32.mxu1 %vm1164_vm0, %v11235_v40  ;;  %v19508_v40 = vld [vmem:[#allocation29_spill] sm:$0xff] }
  0x74   :  { %9140 = vmatprep.subr.bf16.mxu1 %v10766_v56  ;;  %1474 = vmatmul.mubr.f32.gmra.mrb[20].mxu0 %v11244_v27 }
  0x75   :  { %9094 = vmatpush1.bf16.msra.mxu0 %v10784_v62  ;;  %8600 = vmatprep.mubr.msk.f32.mxu0 %vm1164_vm0, %v11279_v22 }
  0x76   :  { %9096 = vmatprep.subr.bf16.mxu0 %v10790_v0  ;;  %1571 = vmatmul.mubr.f32.gmra.mrb[20].mxu1 %v11244_v27  ;;  %v19501_v27 = vld [vmem:[#allocation23_spill] sm:$0xff] }
  0x77   :  { %9142 = vmatpush1.bf16.msra.mxu1 %v10788_v63  ;;  %8606 = vmatprep.mubr.msk.f32.mxu1 %vm1164_vm0, %v11279_v22  ;;  %v11560_v22 = vld [vmem:[%s18957_s1 + $0x60] sm:$0xff] }
  0x78   :  { %9144 = vmatprep.subr.bf16.mxu1 %v10802_v5  ;;  %1480 = vmatmul.mubr.f32.gmra.mrb[22].mxu0 %v11288_v60 }
  0x79   :  { %9098 = vmatpush1.bf16.msra.mxu0 %v10820_v14  ;;  %8619 = vmatprep.mubr.msk.f32.mxu0 %vm1164_vm0, %v11520_v55 }
  0x7a   :  { %9100 = vmatprep.subr.bf16.mxu0 %v10826_v18  ;;  %1576 = vmatmul.mubr.f32.gmra.mrb[22].mxu1 %v11288_v60  ;;  %v19500_v60 = vld [vmem:[#allocation21_spill] sm:$0xff] }
  0x7b   :  { %9146 = vmatpush1.bf16.msra.mxu1 %v10824_v15  ;;  %8625 = vmatprep.mubr.msk.f32.mxu1 %vm1164_vm0, %v11520_v55 }
  0x7c   :  { %9148 = vmatprep.subr.bf16.mxu1 %v10838_v23 }
  0x7d   :  { %9102 = vmatpush1.bf16.msra.mxu0 %v10856_v31 }
  0x7e   :  { %9104 = vmatprep.subr.bf16.mxu0 %v10862_v35 }
  0x7f   :  { %9150 = vmatpush1.bf16.msra.mxu1 %v10860_v32 }
  0x80   :  { %9152 = vmatprep.subr.bf16.mxu1 %v10874_v41 }
  0x81   :  { %9106 = vmatpush1.bf16.msra.mxu0 %v10892_v49 }
  0x82   :  { %9108 = vmatprep.subr.bf16.mxu0 %v10898_v53 }
  0x83   :  { %9154 = vmatpush1.bf16.msra.mxu1 %v10896_v50 }
  0x84   :  { %9156 = vmatprep.subr.bf16.mxu1 %v10910_v58 }
  0x85   :  { %9110 = vmatpush1.bf16.msra.mxu0 %v10928_v4 }
  0x86   :  { %9112 = vmatprep.subr.bf16.mxu0 %v10939_v10  ;;  %v19537_v10 = vld [vmem:[#allocation58_spill] sm:$0xff] }
  0x87   :  { %9158 = vmatpush1.bf16.msra.mxu1 %v10937_v9  ;;  %v19534_v9 = vld [vmem:[#allocation55_spill] sm:$0xff] }
  0x88   :  { %9160 = vmatprep.subr.bf16.mxu1 %v10951_v20  ;;  %v19531_v20 = vld [vmem:[#allocation52_spill] sm:$0xff] }
  0x89   :  { %9114 = vmatpush1.bf16.msra.mxu0 %v19500_v60  ;;  %v19530_v60 = vld [vmem:[#allocation51_spill] sm:$0xff] }
  0x8a   :  { %9116 = vmatprep.subr.bf16.mxu0 %v19501_v27  ;;  %v19527_v27 = vld [vmem:[#allocation48_spill] sm:$0xff] }
  0x8b   :  { %9162 = vmatpush1.bf16.msra.mxu1 %v19502_v57  ;;  %v19524_v57 = vld [vmem:[#allocation45_spill] sm:$0xff] }
  0x8c   :  { %9164 = vmatprep.subr.bf16.mxu1 %v19503_v24  ;;  %v19522_v24 = vld [vmem:[#allocation43_spill] sm:$0xff] }
  0x8d   :  { %9118 = vmatpush1.bf16.msra.mxu0 %v19504_v46  ;;  %v19521_v46 = vld [vmem:[#allocation42_spill] sm:$0xff] }
  0x8e   :  { %9120 = vmatprep.subr.bf16.mxu0 %v19505_v54  ;;  %v19519_v54 = vld [vmem:[#allocation40_spill] sm:$0xff] }
  0x8f   :  { %9166 = vmatpush1.bf16.msra.mxu1 %v19506_v44  ;;  %v19518_v44 = vld [vmem:[#allocation39_spill] sm:$0xff] }
  0x90   :  { %9168 = vmatprep.subr.bf16.mxu1 %v19507_v42  ;;  %v19516_v42 = vld [vmem:[#allocation37_spill] sm:$0xff] }
  0x91   :  { %9122 = vmatpush1.bf16.msra.mxu0 %v19508_v40  ;;  %v19515_v40 = vld [vmem:[#allocation36_spill] sm:$0xff] }
  0x92   :  { %9172 = vmatprep.subr.bf16.mxu0 %v19509_v11  ;;  %v19513_v11 = vld [vmem:[#allocation34_spill] sm:$0xff] }
  0x93   :  { %9170 = vmatpush1.bf16.msra.mxu1 %v19510_v36  ;;  %v11584_v36 = vld [vmem:[%s18957_s1 + $0x88] sm:$0xff] }
  0x94   :  { %2066 = vmatmul.mubr.f32.vlgmr.msra.gmra.mrb[24].mxu0 %v11560_v22  ;;  %9219 = vmatprep.subr.bf16.mxu1 %v19474_v2 }
  0x95   :  { %9174 = vmatpush1.bf16.msra.mxu0 %v19511_v6  ;;  %8620 = vmatprep.mubr.msk.f32.mxu0 %vm1164_vm0, %v11566_v28  ;;  %v19514_v6 = vld [vmem:[#allocation35_spill] sm:$0xff] }
  0x96   :  { %2167 = vmatmul.mubr.f32.vlgmr.msra.gmra.mrb[24].mxu1 %v11560_v22  ;;  %9176 = vmatprep.subr.bf16.mxu0 %v19512_v47  ;;  %v11597_v47 = vld [vmem:[%s18957_s1 + $0x80] sm:$0xff] }
  0x97   :  { %9221 = vmatpush1.bf16.msra.mxu1 %v19513_v11  ;;  %8626 = vmatprep.mubr.msk.f32.mxu1 %vm1164_vm0, %v11566_v28  ;;  %v11604_v11 = vld [vmem:[%s18957_s1 + $0x98] sm:$0xff] }
  0x98   :  { %2072 = vmatmul.mubr.f32.gmra.mrb[26].mxu0 %v11577_v1  ;;  %9222 = vmatprep.subr.bf16.mxu1 %v19474_v2 }
  0x99   :  { %9178 = vmatpush1.bf16.msra.mxu0 %v19514_v6  ;;  %8621 = vmatprep.mubr.msk.f32.mxu0 %vm1164_vm0, %v11584_v36  ;;  %v19517_v6 = vld [vmem:[#allocation38_spill] sm:$0xff] }
  0x9a   :  { %9180 = vmatprep.subr.bf16.mxu0 %v19515_v40  ;;  %2173 = vmatmul.mubr.f32.gmra.mrb[26].mxu1 %v11577_v1  ;;  %v11617_v40 = vld [vmem:[%s18957_s1 + $0x90] sm:$0xff] }
  0x9b   :  { %9224 = vmatpush1.bf16.msra.mxu1 %v19516_v42  ;;  %8627 = vmatprep.mubr.msk.f32.mxu1 %vm1164_vm0, %v11584_v36  ;;  %v11624_v42 = vld [vmem:[%s18957_s1 + $0xa8] sm:$0xff] }
  0x9c   :  { %9225 = vmatprep.subr.bf16.mxu1 %v19474_v2  ;;  %2078 = vmatmul.mubr.f32.gmra.mrb[28].mxu0 %v11597_v47 }
  0x9d   :  { %9182 = vmatpush1.bf16.msra.mxu0 %v19517_v6  ;;  %8622 = vmatprep.mubr.msk.f32.mxu0 %vm1164_vm0, %v11604_v11  ;;  %v19520_v6 = vld [vmem:[#allocation41_spill] sm:$0xff] }
  0x9e   :  { %9184 = vmatprep.subr.bf16.mxu0 %v19518_v44  ;;  %2179 = vmatmul.mubr.f32.gmra.mrb[28].mxu1 %v11597_v47  ;;  %v11637_v44 = vld [vmem:[%s18957_s1 + $0xa0] sm:$0xff] }
  0x9f   :  { %9227 = vmatpush1.bf16.msra.mxu1 %v19519_v54  ;;  %8628 = vmatprep.mubr.msk.f32.mxu1 %vm1164_vm0, %v11604_v11  ;;  %v11644_v54 = vld [vmem:[%s18957_s1 + $0xb8] sm:$0xff] }
  0xa0   :  { %9228 = vmatprep.subr.bf16.mxu1 %v19474_v2  ;;  %2084 = vmatmul.mubr.f32.gmra.mrb[30].mxu0 %v11617_v40 }
  0xa1   :  { %9186 = vmatpush1.bf16.msra.mxu0 %v19520_v6  ;;  %8623 = vmatprep.mubr.msk.f32.mxu0 %vm1164_vm0, %v11624_v42  ;;  %v19523_v6 = vld [vmem:[#allocation44_spill] sm:$0xff] }
  0xa2   :  { %9188 = vmatprep.subr.bf16.mxu0 %v19521_v46  ;;  %2185 = vmatmul.mubr.f32.gmra.mrb[30].mxu1 %v11617_v40  ;;  %v11657_v46 = vld [vmem:[%s18957_s1 + $0xb0] sm:$0xff] }
  0xa3   :  { %9230 = vmatpush1.bf16.msra.mxu1 %v19522_v24  ;;  %8629 = vmatprep.mubr.msk.f32.mxu1 %vm1164_vm0, %v11624_v42  ;;  %v19525_v24 = vld [vmem:[#allocation46_spill] sm:$0xff] }
  0xa4   :  { %9231 = vmatprep.subr.bf16.mxu1 %v19474_v2  ;;  %2090 = vmatmul.mubr.f32.gmra.mrb[32].mxu0 %v11637_v44 }
  0xa5   :  { %9190 = vmatpush1.bf16.msra.mxu0 %v19523_v6  ;;  %8624 = vmatprep.mubr.msk.f32.mxu0 %vm1164_vm0, %v11644_v54  ;;  %v19526_v6 = vld [vmem:[#allocation47_spill] sm:$0xff] }
  0xa6   :  { %9192 = vmatprep.subr.bf16.mxu0 %v19524_v57  ;;  %2191 = vmatmul.mubr.f32.gmra.mrb[32].mxu1 %v11637_v44  ;;  %v19528_v57 = vld [vmem:[#allocation49_spill] sm:$0xff] }
  0xa7   :  { %9233 = vmatpush1.bf16.msra.mxu1 %v19525_v24  ;;  %8630 = vmatprep.mubr.msk.f32.mxu1 %vm1164_vm0, %v11644_v54  ;;  %v19529_v24 = vld [vmem:[#allocation50_spill] sm:$0xff] }
  0xa8   :  { %9234 = vmatprep.subr.bf16.mxu1 %v19474_v2  ;;  %2096 = vmatmul.mubr.f32.gmra.mrb[34].mxu0 %v11657_v46 }
  0xa9   :  { %9194 = vmatpush1.bf16.msra.mxu0 %v19526_v6  ;;  %8631 = vmatprep.mubr.msk.f32.mxu0 %vm1164_vm0, %v11520_v55  ;;  %v19532_v6 = vld [vmem:[#allocation53_spill] sm:$0xff] }
  0xaa   :  { %9196 = vmatprep.subr.bf16.mxu0 %v19527_v27  ;;  %2197 = vmatmul.mubr.f32.gmra.mrb[34].mxu1 %v11657_v46  ;;  %v19533_v27 = vld [vmem:[#allocation54_spill] sm:$0xff] }
  0xab   :  { %9236 = vmatpush1.bf16.msra.mxu1 %v19528_v57  ;;  %8637 = vmatprep.mubr.msk.f32.mxu1 %vm1164_vm0, %v11520_v55  ;;  %v19535_v57 = vld [vmem:[#allocation56_spill] sm:$0xff]  ;;  %v19536_v55 = vld [vmem:[#allocation57_spill] sm:$0xff] }
  0xac   :  { %9237 = vmatprep.subr.bf16.mxu1 %v19474_v2 }
  0xad   :  { %9198 = vmatpush1.bf16.msra.mxu0 %v19529_v24 }
  0xae   :  { %9200 = vmatprep.subr.bf16.mxu0 %v19530_v60 }
  0xaf   :  { %9239 = vmatpush1.bf16.msra.mxu1 %v19531_v20 }
  0xb0   :  { %9240 = vmatprep.subr.bf16.mxu1 %v19474_v2 }
  0xb1   :  { %9202 = vmatpush1.bf16.msra.mxu0 %v19532_v6 }
  0xb2   :  { %9204 = vmatprep.subr.bf16.mxu0 %v19533_v27 }
  0xb3   :  { %9242 = vmatpush1.bf16.msra.mxu1 %v19534_v9 }
  0xb4   :  { %9243 = vmatprep.subr.bf16.mxu1 %v19474_v2 }
  0xb5   :  { %9206 = vmatpush1.bf16.msra.mxu0 %v19535_v57 }
  0xb6   :  { %9208 = vmatprep.subr.bf16.mxu0 %v19536_v55 }
  0xb7   :  { %9245 = vmatpush1.bf16.msra.mxu1 %v19537_v10 }
  0xb8   :  { %9246 = vmatprep.subr.bf16.mxu1 %v19474_v2 }
  0xb9   :  { %9210 = vmatpush1.bf16.msra.mxu0 %v11410_v29 }
  0xba   :  { %9212 = vmatprep.subr.bf16.mxu0 %v11414_v13 }
  0xbb   :  { %9248 = vmatpush1.bf16.msra.mxu1 %v11416_v37 }
  0xbc   :  { %9249 = vmatprep.subr.bf16.mxu1 %v19474_v2 }
  0xbd   :  { %9214 = vmatpush1.bf16.msra.mxu0 %v11438_v30 }
  0xbe   :  { %9216 = vmatprep.subr.bf16.mxu0 %v11442_v61 }
  0xbf   :  { %9251 = vmatpush1.bf16.msra.mxu1 %v11444_v59 }
  0xc0   :  { %9252 = vmatprep.subr.bf16.mxu1 %v19474_v2 }
  0xc1   :  { %9218 = vmatpush1.bf16.msra.mxu0 %v11460_v45 }
  0xc2   :  { %9256 = vmatprep.subr.bf16.mxu0 %v10610_v3 }
  0xc3   :  { %9254 = vmatpush1.bf16.msra.mxu1 %v11464_v19 }
  0xc4   :  { %2268 = vmatmul.mubr.f32.vlgmr.msra.gmra.mrb[36].mxu0 %v11560_v22  ;;  %9304 = vmatprep.subr.bf16.mxu1 %v10623_v8 }
  0xc5   :  { %9258 = vmatpush1.bf16.msra.mxu0 %v10621_v7  ;;  %8632 = vmatprep.mubr.msk.f32.mxu0 %vm1164_vm0, %v11566_v28 }
  0xc6   :  { %2369 = vmatmul.mubr.f32.vlgmr.msra.gmra.mrb[36].mxu1 %v11560_v22  ;;  %9260 = vmatprep.subr.bf16.mxu0 %v10648_v16 }
  0xc7   :  { %9306 = vmatpush1.bf16.msra.mxu1 %v10635_v12  ;;  %8638 = vmatprep.mubr.msk.f32.mxu1 %vm1164_vm0, %v11566_v28 }
  0xc8   :  { %2274 = vmatmul.mubr.f32.gmra.mrb[38].mxu0 %v11577_v1  ;;  %9308 = vmatprep.subr.bf16.mxu1 %v10662_v21 }
  0xc9   :  { %9262 = vmatpush1.bf16.msra.mxu0 %v10650_v17  ;;  %8633 = vmatprep.mubr.msk.f32.mxu0 %vm1164_vm0, %v11584_v36 }
  0xca   :  { %9264 = vmatprep.subr.bf16.mxu0 %v10676_v26  ;;  %2374 = vmatmul.mubr.f32.gmra.mrb[38].mxu1 %v11577_v1 }
  0xcb   :  { %9310 = vmatpush1.bf16.msra.mxu1 %v10674_v25  ;;  %8639 = vmatprep.mubr.msk.f32.mxu1 %vm1164_vm0, %v11584_v36 }
  0xcc   :  { %9312 = vmatprep.subr.bf16.mxu1 %v10700_v34  ;;  %2280 = vmatmul.mubr.f32.gmra.mrb[40].mxu0 %v11597_v47 }
  0xcd   :  { %9266 = vmatpush1.bf16.msra.mxu0 %v10698_v33  ;;  %8634 = vmatprep.mubr.msk.f32.mxu0 %vm1164_vm0, %v11604_v11 }
  0xce   :  { %9268 = vmatprep.subr.bf16.mxu0 %v10715_v39  ;;  %2379 = vmatmul.mubr.f32.gmra.mrb[40].mxu1 %v11597_v47 }
  0xcf   :  { %9314 = vmatpush1.bf16.msra.mxu1 %v10713_v38  ;;  %8640 = vmatprep.mubr.msk.f32.mxu1 %vm1164_vm0, %v11604_v11 }
  0xd0   :  { %9316 = vmatprep.subr.bf16.mxu1 %v10727_v43  ;;  %2286 = vmatmul.mubr.f32.gmra.mrb[42].mxu0 %v11617_v40 }
  0xd1   :  { %9270 = vmatpush1.bf16.msra.mxu0 %v10742_v48  ;;  %8635 = vmatprep.mubr.msk.f32.mxu0 %vm1164_vm0, %v11624_v42 }
  0xd2   :  { %9272 = vmatprep.subr.bf16.mxu0 %v10754_v52  ;;  %2384 = vmatmul.mubr.f32.gmra.mrb[42].mxu1 %v11617_v40  ;;  %v11748_v40 = vld [vmem:[%s18957_s1 + $0xc8] sm:$0xff] }
  0xd3   :  { %9318 = vmatpush1.bf16.msra.mxu1 %v10752_v51  ;;  %8641 = vmatprep.mubr.msk.f32.mxu1 %vm1164_vm0, %v11624_v42  ;;  %v997_v42 = vlaneseq }
  0xd4   :  { %9320 = vmatprep.subr.bf16.mxu1 %v10766_v56  ;;  %2292 = vmatmul.mubr.f32.gmra.mrb[44].mxu0 %v11637_v44 }
  0xd5   :  { %9274 = vmatpush1.bf16.msra.mxu0 %v10784_v62  ;;  %8636 = vmatprep.mubr.msk.f32.mxu0 %vm1164_vm0, %v11644_v54 }
  0xd6   :  { %9276 = vmatprep.subr.bf16.mxu0 %v10790_v0  ;;  %2389 = vmatmul.mubr.f32.gmra.mrb[44].mxu1 %v11637_v44 }
  0xd7   :  { %9322 = vmatpush1.bf16.msra.mxu1 %v10788_v63  ;;  %8642 = vmatprep.mubr.msk.f32.mxu1 %vm1164_vm0, %v11644_v54  ;;  %v11763_v54 = vand.u32 127, %v997_v42 }
  0xd8   :  { %9324 = vmatprep.subr.bf16.mxu1 %v10802_v5  ;;  %2298 = vmatmul.mubr.f32.gmra.mrb[46].mxu0 %v11657_v46  ;;  %v19569_v5 = vld [vmem:[#allocation43_spill] sm:$0xff] }
  0xd9   :  { %9278 = vmatpush1.bf16.msra.mxu0 %v10820_v14  ;;  %8655 = vmatprep.mubr.msk.f32.mxu0 %vm1164_vm0, %v11748_v40  ;;  %v11770_v44 = vadd.s32 256, %v11763_v54  ;;  %v11779_v22 = vadd.s32 128, %v11763_v54  ;;  %v11782_v11 = vmul.u32.u64.low 2454267026, %v11763_v54  ;;  %v11783_v28 = vmul.u32.u64.high 2454267026, %v11763_v54, %v11782_v11 }
  0xda   :  { %9280 = vmatprep.subr.bf16.mxu0 %v10826_v18  ;;  %2394 = vmatmul.mubr.f32.gmra.mrb[46].mxu1 %v11657_v46  ;;  %v11775_v46 = vadd.s32 384, %v11763_v54  ;;  %v19548_v18 = vld [vmem:[#allocation28_spill] sm:$0xff] }
  0xdb   :  { %9326 = vmatpush1.bf16.msra.mxu1 %v10824_v15  ;;  %8661 = vmatprep.mubr.msk.f32.mxu1 %vm1164_vm0, %v11748_v40  ;;  %v11787_v36 = vmul.u32.u64.low 2454267026, %v11770_v44  ;;  %v11788_v1 = vmul.u32.u64.high 2454267026, %v11770_v44, %v11787_v36  ;;  %vm1011_vm1 = vc.u32 %v11782_v11, 2454267026  ;;  %v19544_v15 = vld [vmem:[#allocation24_spill] sm:$0xff] }
  0xdc   :  { %9328 = vmatprep.subr.bf16.mxu1 %v10838_v23  ;;  %v11793_v47 = vmul.u32.u64.low 2454267026, %v11775_v46  ;;  %v11794_v42 = vmul.u32.u64.high 2454267026, %v11775_v46, %v11793_v47  ;;  %v19542_v23 = vld [vmem:[#allocation23_spill] sm:$0xff] }
  0xdd   :  { %9282 = vmatpush1.bf16.msra.mxu0 %v10856_v31  ;;  %vm1039_vm2 = vc.u32 %v11787_v36, 2454267026  ;;  %v19543_v31 = vld [vmem:[#allocation22_spill] sm:$0xff] }
  0xde   :  { %9284 = vmatprep.subr.bf16.mxu0 %v10862_v35  ;;  %v19541_v35 = vld [vmem:[#allocation21_spill] sm:$0xff]  ;;  %vm1053_vm3 = vc.u32 %v11793_v47, 2454267026  ;;  %v19546_v47 = vld [vmem:[#allocation27_spill] sm:$0xff] }
  0xdf   :  { %9330 = vmatpush1.bf16.msra.mxu1 %v10860_v32  ;;  %v19540_v32 = vld [vmem:[#allocation20_spill] sm:$0xff] }
  0xe0   :  { %9332 = vmatprep.subr.bf16.mxu1 %v10874_v41 }
  0xe1   :  { %9286 = vmatpush1.bf16.msra.mxu0 %v10892_v49  ;;  %v11798_v41 = vmul.u32.u64.low 2454267026, %v11779_v22  ;;  %v11799_v49 = vmul.u32.u64.high 2454267026, %v11779_v22, %v11798_v41 }
  0xe2   :  { %9288 = vmatprep.subr.bf16.mxu0 %v10898_v53  ;;  %v19538_v53 = vld [vmem:[#allocation19_spill] sm:$0xff] }
  0xe3   :  { %9334 = vmatpush1.bf16.msra.mxu1 %v10896_v50  ;;  %v19539_v50 = vld [vmem:[#allocation18_spill] sm:$0xff]  ;;  %vm1025_vm4 = vc.u32 %v11798_v41, 2454267026 }
  0xe4   :  { %9336 = vmatprep.subr.bf16.mxu1 %v10910_v58  ;;  %v19073_v58 = vmov 0  }
  0xe5   :  { %9290 = vmatpush1.bf16.msra.mxu0 %v10928_v4  ;;  %v1012_v4 = vsel %vm1011_vm1, 1, %v19073_v58  ;;  %v1054_v36 = vsel %vm1053_vm3, 1, %v19073_v58 }
  0xe6   :  { %9292 = vmatprep.subr.bf16.mxu0 %v19538_v53  ;;  %v1040_v53 = vsel %vm1039_vm2, 1, %v19073_v58  ;;  %v1013_v11 = vadd.s32 %v11783_v28, %v1012_v4  ;;  %v1055_v41 = vadd.s32 %v11794_v42, %v1054_v36  ;;  %v19549_v4 = vld [vmem:[#allocation29_spill] sm:$0xff]  ;;  %v19551_v42 = vld [vmem:[#allocation30_spill] sm:$0xff] }
  0xe7   :  { %9338 = vmatpush1.bf16.msra.mxu1 %v19539_v50  ;;  %v1041_v50 = vadd.s32 %v11788_v1, %v1040_v53  ;;  %v11823_v28 = vld [vmem:[%s18957_s1 + $0xc0] sm:$0xff]  ;;  %v19550_v53 = vld [vmem:[#allocation31_spill] sm:$0xff]  ;;  %v11829_v1 = vld [vmem:[%s18957_s1 + $0xd8] sm:$0xff] }
  0xe8   :  { %9340 = vmatprep.subr.bf16.mxu1 %v19540_v32  ;;  %v19545_v32 = vld [vmem:[#allocation25_spill] sm:$0xff]  ;;  %v1056_v36 = vshrl.u32 %v1055_v41, 4 }
  0xe9   :  { %9294 = vmatpush1.bf16.msra.mxu0 %v19541_v35  ;;  %v1026_v35 = vsel %vm1025_vm4, 1, %v19073_v58  ;;  %v1042_v58 = vshrl.u32 %v1041_v50, 4  ;;  %v11840_v50 = vld [vmem:[%s18957_s1 + $0xd0] sm:$0xff]  ;;  %v19553_v41 = vld [vmem:[#allocation33_spill] sm:$0xff] }
  0xea   :  { %9296 = vmatprep.subr.bf16.mxu0 %v19542_v23  ;;  %v19547_v23 = vld [vmem:[#allocation26_spill] sm:$0xff] }
  0xeb   :  { %9342 = vmatpush1.bf16.msra.mxu1 %v19543_v31  ;;  %v1014_v31 = vshrl.u32 %v1013_v11, 4  ;;  %v19552_v11 = vld [vmem:[#allocation32_spill] sm:$0xff] }
  0xec   :  { %9344 = vmatprep.subr.bf16.mxu1 %v19544_v15  ;;  %v1027_v15 = vadd.s32 %v11799_v49, %v1026_v35 }
  0xed   :  { %9298 = vmatpush1.bf16.msra.mxu0 %v19545_v32  ;;  %v1015_v49 = vmul.u32 28, %v1014_v31  ;;  %v19554_v31 = vld [vmem:[#allocation34_spill] sm:$0xff] }
  0xee   :  { %9300 = vmatprep.subr.bf16.mxu0 %v19546_v47  ;;  %v1028_v35 = vshrl.u32 %v1027_v15, 4  ;;  %v11847_v15 = vld [vmem:[%s18957_s1 + $0xe8] sm:$0xff] }
  0xef   :  { %9346 = vmatpush1.bf16.msra.mxu1 %v19547_v23  ;;  %v19566_v23 = vld [vmem:[#allocation42_spill] sm:$0xff] }
  0xf0   :  { %9348 = vmatprep.subr.bf16.mxu1 %v19548_v18  ;;  %v19555_v18 = vld [vmem:[#allocation35_spill] sm:$0xff] }
  0xf1   :  { %9302 = vmatpush1.bf16.msra.mxu0 %v19549_v4  ;;  %v11918_v4 = vld [vmem:[%s18957_s1 + $0x100] sm:$0xff] }
  0xf2   :  { %9352 = vmatprep.subr.bf16.mxu0 %v19550_v53  ;;  %v1043_v53 = vmul.u32 28, %v1042_v58  ;;  %v1029_v58 = vmul.u32 28, %v1028_v35  ;;  %v11869_v35 = vld [vmem:[%s18957_s1 + $0xf8] sm:$0xff]  ;;  %19565 = vst [vmem:[#allocation64_spill] sm:$0xff] %v11918_v4 }
  0xf3   :  { %9350 = vmatpush1.bf16.msra.mxu1 %v19551_v42  ;;  %v1016_v42 = vsub.s32 %v11763_v54, %v1015_v49  ;;  %v19557_v49 = vld [vmem:[#allocation37_spill] sm:$0xff] }
  0xf4   :  { %2828 = vmatmul.mubr.f32.vlgmr.msra.gmra.mrb[48].mxu0 %v11823_v28  ;;  %9399 = vmatprep.subr.bf16.mxu1 %v19474_v2 }
  0xf5   :  { %9354 = vmatpush1.bf16.msra.mxu0 %v19552_v11  ;;  %8656 = vmatprep.mubr.msk.f32.mxu0 %vm1164_vm0, %v11829_v1  ;;  %v1057_v11 = vmul.u32 28, %v1056_v36  ;;  %v19556_v36 = vld [vmem:[#allocation36_spill] sm:$0xff]  ;;  %vm1103_vm5 = vcmp.ne.s32.totalorder %v1016_v42, 0  ;;  %vm1110_vm6 = vcmp.lt.s32.totalorder %v1016_v42, 0 }
  0xf6   :  { %2929 = vmatmul.mubr.f32.vlgmr.msra.gmra.mrb[48].mxu1 %v11823_v28  ;;  %9356 = vmatprep.subr.bf16.mxu0 %v19553_v41  ;;  %v1044_v41 = vsub.s32 %v11770_v44, %v1043_v53  ;;  %v1030_v44 = vsub.s32 %v11779_v22, %v1029_v58  ;;  %v19075_v53 = vmov 0.0   ;;  %v11890_v22 = vld [vmem:[%s18957_s1 + $0xf0] sm:$0xff]  ;;  %v1124_v58 = vadd.s32 28, %v1016_v42  ;;  %vm11902_vm9 = vmand %vm1110_vm6, %vm1103_vm5 }
  0xf7   :  { %9401 = vmatpush1.bf16.msra.mxu1 %v19554_v31  ;;  %8662 = vmatprep.mubr.msk.f32.mxu1 %vm1164_vm0, %v11829_v1  ;;  %v11861_v31 = vld [vmem:[%s18957_s1 + $0xe0] sm:$0xff]  ;;  %786 = vst [vmem:[#allocation2] sm:$0xff] %v19075_v53  ;;  %794 = vst [vmem:[#allocation2 + $0x38] sm:$0xff] %v19075_v53 }
  0xf8   :  { %2834 = vmatmul.mubr.f32.gmra.mrb[50].mxu0 %v11840_v50  ;;  %9402 = vmatprep.subr.bf16.mxu1 %v19474_v2  ;;  %801 = vst [vmem:[#allocation2 + $0x70] sm:$0xff] %v19075_v53  ;;  %808 = vst [vmem:[#allocation2 + $0xa8] sm:$0xff] %v19075_v53  ;;  %vm1105_vm7 = vcmp.ne.s32.totalorder %v1044_v41, 0  ;;  %vm1112_vm8 = vcmp.lt.s32.totalorder %v1044_v41, 0  ;;  %vm1104_vm12 = vcmp.ne.s32.totalorder %v1030_v44, 0  ;;  %vm1111_vm13 = vcmp.lt.s32.totalorder %v1030_v44, 0 }
  0xf9   :  { %9358 = vmatpush1.bf16.msra.mxu0 %v19555_v18  ;;  %8657 = vmatprep.mubr.msk.f32.mxu0 %vm1164_vm0, %v11847_v15  ;;  %v1058_v18 = vsub.s32 %v11775_v46, %v1057_v11  ;;  %815 = vst [vmem:[#allocation2 + $0xe0] sm:$0xff] %v19075_v53  ;;  %822 = vst [vmem:[#allocation2 + $0x118] sm:$0xff] %v19075_v53  ;;  %v19558_v46 = vld [vmem:[#allocation38_spill] sm:$0xff]  ;;  %v19559_v11 = vld [vmem:[#allocation39_spill] sm:$0xff]  ;;  %v1125_v47 = vadd.s32 28, %v1030_v44  ;;  %v11923_v32 = vsel %vm11902_vm9, %v1124_v58, %v1016_v42 }
  0xfa   :  { %9360 = vmatprep.subr.bf16.mxu0 %v19556_v36  ;;  %2935 = vmatmul.mubr.f32.gmra.mrb[50].mxu1 %v11840_v50  ;;  %v11897_v53 = vld [vmem:[%s18957_s1 + $0x108] sm:$0xff]  ;;  %v1126_v36 = vadd.s32 28, %v1044_v41  ;;  %vm1119_vm14 = vmand %vm1112_vm8, %vm1105_vm7  ;;  %19567 = vst [vmem:[#allocation65_spill] sm:$0xff] %v11923_v32  ;;  %v19571_v42 = vld [vmem:[#allocation44_spill] sm:$0xff]  ;;  %vm1145_vm2 = vcmp.ne.s32.totalorder %v11923_v32, 27 }
  0xfb   :  { %9404 = vmatpush1.bf16.msra.mxu1 %v19557_v49  ;;  %8663 = vmatprep.mubr.msk.f32.mxu1 %vm1164_vm0, %v11847_v15  ;;  %19560 = vst [vmem:[#allocation63_spill] sm:$0xff] %v11897_v53  ;;  %vm1106_vm10 = vcmp.ne.s32.totalorder %v1058_v18, 0  ;;  %vm1113_vm11 = vcmp.lt.s32.totalorder %v1058_v18, 0  ;;  %vm1118_vm1 = vmand %vm1111_vm13, %vm1104_vm12  ;;  %v19575_v58 = vld [vmem:[#allocation45_spill] sm:$0xff] }
  0xfc   :  { %9405 = vmatprep.subr.bf16.mxu1 %v19474_v2  ;;  %2840 = vmatmul.mubr.f32.gmra.mrb[52].mxu0 %v11861_v31  ;;  %vm1120_vm15 = vmand %vm1113_vm11, %vm1106_vm10  ;;  %v11934_v14 = vsel %vm1119_vm14, %v1126_v36, %v1044_v41  ;;  %v11949_v41 = vld [vmem:[%s18957_s1 + $0x110] sm:$0xff]  ;;  %v11951_v36 = vsel %vm1118_vm1, %v1125_v47, %v1030_v44  ;;  %vm792_vm11 = vcmask 654336  }
  0xfd   :  { %9362 = vmatpush1.bf16.msra.mxu0 %v19558_v46  ;;  %8658 = vmatprep.mubr.msk.f32.mxu0 %vm1164_vm0, %v11869_v35  ;;  %v19561_v46 = vld [vmem:[#allocation40_spill] sm:$0xff]  ;;  %19570 = vst [vmem:[#allocation67_spill] sm:$0xff] %v11934_v14  ;;  %19573 = vst [vmem:[#allocation69_spill] sm:$0xff] %v11949_v41  ;;  %vm1147_vm3 = vcmp.ne.s32.totalorder %v11934_v14, 27  ;;  %vm1146_vm5 = vcmp.ne.s32.totalorder %v11951_v36, 27  ;;  %v19577_v47 = vld [vmem:[#allocation47_spill] sm:$0xff] }
  0xfe   :  { %9364 = vmatprep.subr.bf16.mxu0 %v19559_v11  ;;  %2941 = vmatmul.mubr.f32.gmra.mrb[52].mxu1 %v11861_v31  ;;  %v1127_v11 = vadd.s32 28, %v1058_v18  ;;  %19574 = vst [vmem:[#allocation70_spill] sm:$0xff] %v11951_v36  ;;  %v19608_v14 = vld [vmem:[#allocation23_spill] sm:$0xff] }
  0xff   :  { %9407 = vmatpush1.bf16.msra.mxu1 %v19561_v46  ;;  %8664 = vmatprep.mubr.msk.f32.mxu1 %vm1164_vm0, %v11869_v35  ;;  %v19564_v46 = vld [vmem:[#allocation41_spill] sm:$0xff] }
 0x100   :  { %9408 = vmatprep.subr.bf16.mxu1 %v19474_v2  ;;  %2846 = vmatmul.mubr.f32.gmra.mrb[54].mxu0 %v11890_v22  ;;  %v11942_v49 = vsel %vm1120_vm15, %v1127_v11, %v1058_v18 }
 0x101   :  { %9366 = vmatpush1.bf16.msra.mxu0 %v19564_v46  ;;  %8659 = vmatprep.mubr.msk.f32.mxu0 %vm1164_vm0, %v11897_v53  ;;  %v11930_v46 = vld [vmem:[%s18957_s1 + $0x118] sm:$0xff]  ;;  %19572 = vst [vmem:[#allocation68_spill] sm:$0xff] %v11942_v49  ;;  %vm1148_vm4 = vcmp.ne.s32.totalorder %v11942_v49, 27 }
 0x102   :  { %9368 = vmatprep.subr.bf16.mxu0 %v19566_v23  ;;  %2947 = vmatmul.mubr.f32.gmra.mrb[54].mxu1 %v11890_v22  ;;  %19568 = vst [vmem:[#allocation66_spill] sm:$0xff] %v11930_v46 }
 0x103   :  { %9410 = vmatpush1.bf16.msra.mxu1 %v19569_v5  ;;  %8665 = vmatprep.mubr.msk.f32.mxu1 %vm1164_vm0, %v11897_v53  ;;  %v19576_v5 = vld [vmem:[#allocation46_spill] sm:$0xff] }
 0x104   :  { %9411 = vmatprep.subr.bf16.mxu1 %v19474_v2  ;;  %2852 = vmatmul.mubr.f32.gmra.mrb[56].mxu0 %v11918_v4 }
 0x105   :  { %9370 = vmatpush1.bf16.msra.mxu0 %v19571_v42  ;;  %8660 = vmatprep.mubr.msk.f32.mxu0 %vm1164_vm0, %v11930_v46 }
 0x106   :  { %9372 = vmatprep.subr.bf16.mxu0 %v19575_v58  ;;  %2953 = vmatmul.mubr.f32.gmra.mrb[56].mxu1 %v11918_v4 }
 0x107   :  { %v1249_v42 = vpop.f32.mrb[0].mxu0  ;;  %9413 = vmatpush1.bf16.msra.mxu1 %v19576_v5  ;;  %8666 = vmatprep.mubr.msk.f32.mxu1 %vm1164_vm0, %v11930_v46  ;;  %v19579_v46 = vld [vmem:[#allocation49_spill] sm:$0xff] }
 0x108   :  { %v1251_v18 = vpop.f32.mrb[1].mxu0  ;;  %v1350_v11 = vpop.f32.mrb[0].mxu1  ;;  %v1595_v23 = vsel %vm1145_vm2, %v1249_v42, 0.0  ;;  %9414 = vmatprep.subr.bf16.mxu1 %v19474_v2  ;;  %2858 = vmatmul.mubr.f32.gmra.mrb[58].mxu0 %v11949_v41  ;;  %v19578_v42 = vld [vmem:[#allocation48_spill] sm:$0xff] }
 0x109   :  { %9374 = vmatpush1.bf16.msra.mxu0 %v19577_v47  ;;  %1721 = vrot.lane.b32.xlu0 %v1595_v23, %s10546_s14  ;;  %v1597_v44 = vsel %vm1147_vm3, %v1350_v11, 0.0  ;;  %v1352_v5 = vpop.f32.mrb[1].mxu1  ;;  %v1596_v23 = vsel %vm1146_vm5, %v1251_v18, 0.0  ;;  %v11987_v18 = vadd.s32 512, %v11763_v54 }
 0x10a   :  { %1725 = vrot.lane.b32.xlu1 %v1597_v44, %s10546_s14  ;;  %9376 = vmatprep.subr.bf16.mxu0 %v19578_v42  ;;  %v1598_v58 = vsel %vm1148_vm4, %v1352_v5, 0.0 }
 0x10b   :  { %9416 = vmatpush1.bf16.msra.mxu1 %v19579_v46  ;;  %v1255_v4 = vpop.f32.mrb[2].mxu0  ;;  %8667 = vmatprep.mubr.msk.f32.mxu0 %vm1164_vm0, %v11748_v40 }
 0x10c   :  { %v1257_v47 = vpop.f32.mrb[3].mxu0  ;;  %9417 = vmatprep.subr.bf16.mxu1 %v19474_v2  ;;  %v1356_v11 = vpop.f32.mrb[2].mxu1  ;;  %2959 = vmatmul.mubr.f32.gmra.mrb[58].mxu1 %v11949_v41  ;;  %v1602_v46 = vsel %vm1145_vm2, %v1255_v4, 0.0 }
 0x10d   :  { %9378 = vmatpush1.bf16.msra.mxu0 %v19529_v24  ;;  %1723 = vrot.lane.b32.xlu0 %v1596_v23, %s10546_s14  ;;  %v1358_v5 = vpop.f32.mrb[3].mxu1  ;;  %v1603_v44 = vsel %vm1146_vm5, %v1257_v47, 0.0  ;;  %v11995_v23 = vadd.s32 640, %v11763_v54  ;;  %v12009_v24 = vadd.s32 768, %v11763_v54 }
 0x10e   :  { %1727 = vrot.lane.b32.xlu1 %v1598_v58, %s10546_s14  ;;  %9380 = vmatprep.subr.bf16.mxu0 %v19530_v60  ;;  %v1605_v4 = vsel %vm1148_vm4, %v1358_v5, 0.0 }
 0x10f   :  { %9419 = vmatpush1.bf16.msra.mxu1 %v19531_v20  ;;  %v1261_v42 = vpop.f32.mrb[4].mxu0  ;;  %8673 = vmatprep.mubr.msk.f32.mxu1 %vm1164_vm0, %v11748_v40  ;;  %v12005_v40 = vmul.u32.u64.low 2454267026, %v11987_v18  ;;  %v12006_v20 = vmul.u32.u64.high 2454267026, %v11987_v18, %v12005_v40 }
 0x110   :  { %9420 = vmatprep.subr.bf16.mxu1 %v19474_v2  ;;  %v1263_v58 = vpop.f32.mrb[5].mxu0  ;;  %v1362_v47 = vpop.f32.mrb[4].mxu1 }
 0x111   :  { %9382 = vmatpush1.bf16.msra.mxu0 %v19532_v6  ;;  %1737 = vrot.lane.b32.xlu0 %v1603_v44, %s10546_s14  ;;  %v1364_v60 = vpop.f32.mrb[5].mxu1  ;;  %v1604_v6 = vsel %vm1147_vm3, %v1356_v11, 0.0  ;;  %v1609_v11 = vsel %vm1145_vm2, %v1261_v42, 0.0  ;;  %vm1067_vm6 = vc.u32 %v12005_v40, 2454267026  ;;  %v1610_v63 = vsel %vm1146_vm5, %v1263_v58, 0.0 }
 0x112   :  { %1735 = vrot.lane.b32.xlu1 %v1602_v46, %s10546_s14  ;;  %9384 = vmatprep.subr.bf16.mxu0 %v19533_v27  ;;  %v12015_v46 = vmul.u32.u64.low 2454267026, %v11995_v23  ;;  %v12016_v41 = vmul.u32.u64.high 2454267026, %v11995_v23, %v12015_v46  ;;  %v19580_v40 = vmov 0   ;;  %v1611_v58 = vsel %vm1147_vm3, %v1362_v47, 0.0 }
 0x113   :  { %9422 = vmatpush1.bf16.msra.mxu1 %v19534_v9  ;;  %v1267_v44 = vpop.f32.mrb[6].mxu0  ;;  %v12026_v9 = vmul.u32.u64.low 2454267026, %v12009_v24  ;;  %v12027_v53 = vmul.u32.u64.high 2454267026, %v12009_v24, %v12026_v9 }
 0x114   :  { %9423 = vmatprep.subr.bf16.mxu1 %v19474_v2  ;;  %v1269_v5 = vpop.f32.mrb[7].mxu0  ;;  %v1368_v27 = vpop.f32.mrb[6].mxu1  ;;  %vm1081_vm7 = vc.u32 %v12015_v46, 2454267026 }
 0x115   :  { %9386 = vmatpush1.bf16.msra.mxu0 %v19535_v57  ;;  %1741 = vrot.lane.b32.xlu0 %v1605_v4, %s10546_s14  ;;  %v1370_v54 = vpop.f32.mrb[7].mxu1  ;;  %v1082_v46 = vsel %vm1081_vm7, 1, %v19580_v40  ;;  %vm1095_vm8 = vc.u32 %v12026_v9, 2454267026 }
 0x116   :  { %1739 = vrot.lane.b32.xlu1 %v1604_v6, %s10546_s14  ;;  %9388 = vmatprep.subr.bf16.mxu0 %v19536_v55  ;;  %v1068_v55 = vsel %vm1067_vm6, 1, %v19580_v40 }
 0x117   :  { %9425 = vmatpush1.bf16.msra.mxu1 %v19537_v10  ;;  %v1273_v57 = vpop.f32.mrb[8].mxu0  ;;  %v1612_v10 = vsel %vm1148_vm4, %v1364_v60, 0.0  ;;  %v1069_v47 = vadd.s32 %v12006_v20, %v1068_v55  ;;  %v1083_v60 = vadd.s32 %v12016_v41, %v1082_v46  ;;  %v1616_v20 = vsel %vm1145_vm2, %v1267_v44, 0.0 }
 0x118   :  { %9426 = vmatprep.subr.bf16.mxu1 %v19474_v2  ;;  %v1275_v6 = vpop.f32.mrb[9].mxu0  ;;  %v12033_v4 = vpop.f32.mrb[8].mxu1  ;;  %v1619_v41 = vsel %vm1148_vm4, %v1370_v54, 0.0  ;;  %v1618_v44 = vsel %vm1147_vm3, %v1368_v27, 0.0 }
 0x119   :  { %9390 = vmatpush1.bf16.msra.mxu0 %v11410_v29  ;;  %1749 = vrot.lane.b32.xlu0 %v1609_v11, %s10546_s14  ;;  %v1376_v42 = vpop.f32.mrb[9].mxu1  ;;  %v1070_v55 = vshrl.u32 %v1069_v47, 4  ;;  %v1624_v27 = vsel %vm1146_vm5, %v1275_v6, 0.0 }
 0x11a   :  { %1751 = vrot.lane.b32.xlu1 %v1610_v63, %s10546_s14  ;;  %9392 = vmatprep.subr.bf16.mxu0 %v11414_v13  ;;  %v1617_v13 = vsel %vm1146_vm5, %v1269_v5, 0.0  ;;  %v1623_v5 = vsel %vm1145_vm2, %v1273_v57, 0.0  ;;  %v1626_v6 = vsel %vm1148_vm4, %v1376_v42, 0.0 }
 0x11b   :  { %9428 = vmatpush1.bf16.msra.mxu1 %v11416_v37  ;;  %v12046_v29 = vpop.f32.mrb[10].mxu0  ;;  %v1096_v37 = vsel %vm1095_vm8, 1, %v19580_v40 }
 0x11c   :  { %9429 = vmatprep.subr.bf16.mxu1 %v19474_v2  ;;  %v12049_v11 = vpop.f32.mrb[11].mxu0  ;;  %v12051_v63 = vpop.f32.mrb[10].mxu1 }
 0x11d   :  { %9394 = vmatpush1.bf16.msra.mxu0 %v11438_v30  ;;  %1753 = vrot.lane.b32.xlu0 %v1611_v58, %s10546_s14  ;;  %v12056_v9 = vpop.f32.mrb[11].mxu1  ;;  %v1097_v58 = vadd.s32 %v12027_v53, %v1096_v37  ;;  %v1071_v37 = vmul.u32 28, %v1070_v55 }
 0x11e   :  { %1755 = vrot.lane.b32.xlu1 %v1612_v10, %s10546_s14  ;;  %9396 = vmatprep.subr.bf16.mxu0 %v11442_v61  ;;  %v1084_v10 = vshrl.u32 %v1083_v60, 4  ;;  %v1633_v46 = vsel %vm1148_vm4, %v12056_v9, 0.0 }
 0x11f   :  { %9431 = vmatpush1.bf16.msra.mxu1 %v11444_v59  ;;  %v1098_v53 = vshrl.u32 %v1097_v58, 4  ;;  %v1072_v54 = vsub.s32 %v11987_v18, %v1071_v37  ;;  %v19586_v58 = vld [vmem:[#allocation63_spill] sm:$0xff]  ;;  %v19588_v37 = vld [vmem:[#allocation4_spill] sm:$0xff] }
 0x120   :  { %9432 = vmatprep.subr.bf16.mxu1 %v19474_v2 }
 0x121   :  { %9398 = vmatpush1.bf16.msra.mxu0 %v11460_v45  ;;  %1765 = vrot.lane.b32.xlu0 %v1617_v13, %s10546_s14  ;;  %v1085_v13 = vmul.u32 28, %v1084_v10  ;;  %v1099_v40 = vmul.u32 28, %v1098_v53  ;;  %vm1107_vm9 = vcmp.ne.s32.totalorder %v1072_v54, 0  ;;  %vm1114_vm10 = vcmp.lt.s32.totalorder %v1072_v54, 0  ;;  %v19587_v10 = vld [vmem:[#allocation5_spill] sm:$0xff] }
 0x122   :  { %1763 = vrot.lane.b32.xlu1 %v1616_v20, %s10546_s14  ;;  %9436 = vmatprep.subr.bf16.mxu0 %v10610_v3  ;;  %vm1121_vm14 = vmand %vm1114_vm10, %vm1107_vm9  ;;  %v19585_v20 = vld [vmem:[#allocation3_spill] sm:$0xff] }
 0x123   :  { %9434 = vmatpush1.bf16.msra.mxu1 %v11464_v19  ;;  %v1086_v57 = vsub.s32 %v11995_v23, %v1085_v13  ;;  %v1100_v18 = vsub.s32 %v12009_v24, %v1099_v40  ;;  %v19581_v23 = vmov 0.0   ;;  %v1128_v24 = vadd.s32 28, %v1072_v54  ;;  %v19589_v13 = vld [vmem:[#allocation64_spill] sm:$0xff]  ;;  %v19592_v40 = vld [vmem:[#allocation9_spill] sm:$0xff] }
 0x124   :  { %3030 = vmatmul.mubr.f32.vlgmr.msra.gmra.mrb[60].mxu0 %v11823_v28  ;;  %9484 = vmatprep.subr.bf16.mxu1 %v10623_v8  ;;  %793 = vst.msk [vmem:[#allocation2 + $0x30] sm:$0xff] %vm792_vm11, %v19581_v23  ;;  %800 = vst.msk [vmem:[#allocation2 + $0x68] sm:$0xff] %vm792_vm11, %v19581_v23 }
 0x125   :  { %9438 = vmatpush1.bf16.msra.mxu0 %v10621_v7  ;;  %1769 = vrot.lane.b32.xlu0 %v1619_v41, %s10546_s14  ;;  %vm1108_vm12 = vcmp.ne.s32.totalorder %v1086_v57, 0  ;;  %vm1115_vm13 = vcmp.lt.s32.totalorder %v1086_v57, 0  ;;  %807 = vst.msk [vmem:[#allocation2 + $0xa0] sm:$0xff] %vm792_vm11, %v19581_v23  ;;  %814 = vst.msk [vmem:[#allocation2 + $0xd8] sm:$0xff] %vm792_vm11, %v19581_v23  ;;  %vm1109_vm1 = vcmp.ne.s32.totalorder %v1100_v18, 0  ;;  %vm1116_vm6 = vcmp.lt.s32.totalorder %v1100_v18, 0 }
 0x126   :  { %1767 = vrot.lane.b32.xlu1 %v1618_v44, %s10546_s14  ;;  %8668 = vmatprep.mubr.msk.f32.mxu0 %vm1164_vm0, %v11829_v1  ;;  %821 = vst.msk [vmem:[#allocation2 + $0x110] sm:$0xff] %vm792_vm11, %v19581_v23  ;;  %828 = vst.msk [vmem:[#allocation2 + $0x148] sm:$0xff] %vm792_vm11, %v19581_v23  ;;  %v1130_v42 = vadd.s32 28, %v1100_v18  ;;  %v19594_v23 = vld [vmem:[#allocation66_spill] sm:$0xff]  ;;  %vm1926_vm11 = vcmask 1048040  }
 0x127   :  { %3131 = vmatmul.mubr.f32.vlgmr.msra.gmra.mrb[60].mxu1 %v11823_v28  ;;  %9440 = vmatprep.subr.bf16.mxu0 %v10648_v16  ;;  %v1625_v28 = vsel %vm1147_vm3, %v12033_v4, 0.0  ;;  %v1129_v4 = vadd.s32 28, %v1086_v57  ;;  %vm1122_vm15 = vmand %vm1115_vm13, %vm1108_vm12  ;;  %vm19175_vm12 = vcmask 498688   ;;  %vm1933_vm13 = vcmask 629760  }
 0x128   :  { %9486 = vmatpush1.bf16.msra.mxu1 %v10635_v12  ;;  %3036 = vmatmul.mubr.f32.gmra.mrb[62].mxu0 %v11840_v50  ;;  %vm1123_vm7 = vmand %vm1116_vm6, %vm1109_vm1 }
 0x129   :  { %9442 = vmatpush1.bf16.msra.mxu0 %v10650_v17  ;;  %1777 = vrot.lane.b32.xlu0 %v1623_v5, %s10546_s14  ;;  %v12161_v47 = vsel %vm1123_vm7, %v1130_v42, %v1100_v18  ;;  %v19593_v18 = vld [vmem:[#allocation8_spill] sm:$0xff]  ;;  %v19596_v42 = vld [vmem:[#allocation10_spill] sm:$0xff]  ;;  %vm2688_vm7 = vcmask 1048032  }
 0x12a   :  { %1779 = vrot.lane.b32.xlu1 %v1624_v27, %s10546_s14  ;;  %9488 = vmatprep.subr.bf16.mxu1 %v10662_v21  ;;  %19584 = vst [vmem:[#allocation73_spill] sm:$0xff] %v12161_v47  ;;  %vm19292_vm10 = vcmp.ne.s32.totalorder %v12161_v47, 27  ;;  %v19591_v27 = vld [vmem:[#allocation6_spill] sm:$0xff]  ;;  %v19629_v47 = vld [vmem:[#allocation43_spill] sm:$0xff] }
 0x12b   :  { %8674 = vmatprep.mubr.msk.f32.mxu1 %vm1164_vm0, %v11829_v1  ;;  %9444 = vmatprep.subr.bf16.mxu0 %v10676_v26  ;;  %v1630_v1 = vsel %vm1145_vm2, %v12046_v29, 0.0  ;;  %v12140_v29 = vsel %vm1121_vm14, %v1128_v24, %v1072_v54 }
 0x12c   :  { %9490 = vmatpush1.bf16.msra.mxu1 %v10674_v25  ;;  %8669 = vmatprep.mubr.msk.f32.mxu0 %vm1164_vm0, %v11847_v15  ;;  %19582 = vst [vmem:[#allocation71_spill] sm:$0xff] %v12140_v29  ;;  %vm1149_vm8 = vcmp.ne.s32.totalorder %v12140_v29, 27 }
 0x12d   :  { %3136 = vmatmul.mubr.f32.gmra.mrb[62].mxu1 %v11840_v50  ;;  %9446 = vmatpush1.bf16.msra.mxu0 %v10698_v33  ;;  %v1631_v50 = vsel %vm1146_vm5, %v12049_v11, 0.0  ;;  %v12148_v11 = vsel %vm1122_vm15, %v1129_v4, %v1086_v57 }
 0x12e   :  { %1781 = vrot.lane.b32.xlu0 %v1625_v28, %s10546_s14  ;;  %1783 = vrot.lane.b32.xlu1 %v1626_v6, %s10546_s14  ;;  %19583 = vst [vmem:[#allocation72_spill] sm:$0xff] %v12148_v11  ;;  %vm1150_vm9 = vcmp.ne.s32.totalorder %v12148_v11, 27  ;;  %v19626_v11 = vld [vmem:[#allocation40_spill] sm:$0xff] }
 0x12f   :  { %9492 = vmatprep.subr.bf16.mxu1 %v10700_v34  ;;  %3042 = vmatmul.mubr.f32.gmra.mrb[64].mxu0 %v11861_v31 }
 0x130   :  { %9448 = vmatprep.subr.bf16.mxu0 %v10715_v39  ;;  %9494 = vmatpush1.bf16.msra.mxu1 %v10713_v38 }
 0x131   :  { %9450 = vmatpush1.bf16.msra.mxu0 %v10742_v48  ;;  %8675 = vmatprep.mubr.msk.f32.mxu1 %vm1164_vm0, %v11847_v15  ;;  %v1632_v15 = vsel %vm1147_vm3, %v12051_v63, 0.0 }
 0x132   :  { %1793 = vrot.lane.b32.xlu0 %v1631_v50, %s10546_s14  ;;  %1791 = vrot.lane.b32.xlu1 %v1630_v1, %s10546_s14  ;;  %v19595_v50 = vld [vmem:[#allocation11_spill] sm:$0xff] }
 0x133   :  { %9496 = vmatprep.subr.bf16.mxu1 %v10727_v43  ;;  %8670 = vmatprep.mubr.msk.f32.mxu0 %vm1164_vm0, %v11869_v35 }
 0x134   :  { %3141 = vmatmul.mubr.f32.gmra.mrb[64].mxu1 %v11861_v31  ;;  %9452 = vmatprep.subr.bf16.mxu0 %v10754_v52 }
 0x135   :  { %9498 = vmatpush1.bf16.msra.mxu1 %v10752_v51  ;;  %3048 = vmatmul.mubr.f32.gmra.mrb[66].mxu0 %v11890_v22 }
 0x136   :  { %9454 = vmatpush1.bf16.msra.mxu0 %v10784_v62  ;;  %1797 = vrot.lane.b32.xlu0 %v1633_v46, %s10546_s14  ;;  %v19597_v46 = vld [vmem:[#allocation69_spill] sm:$0xff] }
 0x137   :  { %1795 = vrot.lane.b32.xlu1 %v1632_v15, %s10546_s14  ;;  %v1451_v63 = vpop.f32.mrb[12].mxu0  ;;  %9500 = vmatprep.subr.bf16.mxu1 %v10766_v56 }
 0x138   :  { %v1599_v31 = vsel %vm1149_vm8, %v1451_v63, 0.0  ;;  %v1453_v9 = vpop.f32.mrb[13].mxu0  ;;  %8676 = vmatprep.mubr.msk.f32.mxu1 %vm1164_vm0, %v11869_v35  ;;  %9456 = vmatprep.subr.bf16.mxu0 %v10790_v0  ;;  %v19598_v63 = vld [vmem:[#allocation13_spill] sm:$0xff] }
 0x139   :  { %v1600_v60 = vsel %vm1150_vm9, %v1453_v9, 0.0  ;;  %9502 = vmatpush1.bf16.msra.mxu1 %v19585_v20  ;;  %v1552_v55 = vpop.f32.mrb[12].mxu1  ;;  %8671 = vmatprep.mubr.msk.f32.mxu0 %vm1164_vm0, %v19586_v58  ;;  %v12209_v9 = vld [vmem:[%s18957_s1 + $0x128] sm:$0xff] }
 0x13a   :  { %3146 = vmatmul.mubr.f32.gmra.mrb[66].mxu1 %v11890_v22  ;;  %9458 = vmatpush1.bf16.msra.mxu0 %v19587_v10  ;;  %v1554_v41 = vpop.f32.mrb[13].mxu1  ;;  %v1601_v44 = vsel %vm19292_vm10, %v1552_v55, 0.0  ;;  %v19590_v22 = vld [vmem:[#allocation7_spill] sm:$0xff] }
 0x13b   :  { %1729 = vrot.lane.b32.xlu0 %v1599_v31, %s10546_s14  ;;  %1731 = vrot.lane.b32.xlu1 %v1600_v60, %s10546_s14  ;;  %v1457_v35 = vpop.f32.mrb[14].mxu0  ;;  %v19599_v60 = vld [vmem:[#allocation12_spill] sm:$0xff] }
 0x13c   :  { %9504 = vmatprep.subr.bf16.mxu1 %v19588_v37  ;;  %v1606_v53 = vsel %vm1149_vm8, %v1457_v35, 0.0  ;;  %3054 = vmatmul.mubr.f32.gmra.mrb[68].mxu0 %v19589_v13  ;;  %v1459_v5 = vpop.f32.mrb[15].mxu0  ;;  %v19600_v35 = vld [vmem:[#allocation15_spill] sm:$0xff] }
 0x13d   :  { %9460 = vmatprep.subr.bf16.mxu0 %v19590_v22  ;;  %9506 = vmatpush1.bf16.msra.mxu1 %v19591_v27  ;;  %v1557_v54 = vpop.f32.mrb[14].mxu1  ;;  %v1607_v6 = vsel %vm1150_vm9, %v1459_v5, 0.0  ;;  %v19602_v5 = vld [vmem:[#allocation17_spill] sm:$0xff] }
 0x13e   :  { %9462 = vmatpush1.bf16.msra.mxu0 %v19592_v40  ;;  %8677 = vmatprep.mubr.msk.f32.mxu1 %vm1164_vm0, %v19586_v58  ;;  %v1559_v57 = vpop.f32.mrb[15].mxu1  ;;  %v1608_v1 = vsel %vm19292_vm10, %v1557_v54, 0.0 }
 0x13f   :  { %1733 = vrot.lane.b32.xlu0 %v1601_v44, %s10546_s14  ;;  %1743 = vrot.lane.b32.xlu1 %v1606_v53, %s10546_s14  ;;  %v1463_v28 = vpop.f32.mrb[16].mxu0  ;;  %v19601_v53 = vld [vmem:[#allocation14_spill] sm:$0xff] }
 0x140   :  { %9508 = vmatprep.subr.bf16.mxu1 %v19593_v18  ;;  %8672 = vmatprep.mubr.msk.f32.mxu0 %vm1164_vm0, %v19594_v23  ;;  %v1465_v24 = vpop.f32.mrb[17].mxu0  ;;  %v1613_v58 = vsel %vm1149_vm8, %v1463_v28, 0.0 }
 0x141   :  { %3151 = vmatmul.mubr.f32.gmra.mrb[68].mxu1 %v19589_v13  ;;  %9464 = vmatprep.subr.bf16.mxu0 %v19595_v50  ;;  %v1562_v4 = vpop.f32.mrb[16].mxu1  ;;  %v1614_v41 = vsel %vm1150_vm9, %v1465_v24, 0.0  ;;  %v19604_v24 = vld [vmem:[#allocation19_spill] sm:$0xff] }
 0x142   :  { %9510 = vmatpush1.bf16.msra.mxu1 %v19596_v42  ;;  %3060 = vmatmul.mubr.f32.gmra.mrb[70].mxu0 %v19597_v46  ;;  %v1564_v15 = vpop.f32.mrb[17].mxu1  ;;  %v1615_v28 = vsel %vm19292_vm10, %v1562_v4, 0.0 }
 0x143   :  { %9466 = vmatpush1.bf16.msra.mxu0 %v19598_v63  ;;  %1745 = vrot.lane.b32.xlu0 %v1607_v6, %s10546_s14  ;;  %v1469_v31 = vpop.f32.mrb[18].mxu0  ;;  %v19603_v6 = vld [vmem:[#allocation16_spill] sm:$0xff] }
 0x144   :  { %1747 = vrot.lane.b32.xlu1 %v1608_v1, %s10546_s14  ;;  %9512 = vmatprep.subr.bf16.mxu1 %v19599_v60  ;;  %v1471_v55 = vpop.f32.mrb[19].mxu0 }
 0x145   :  { %8678 = vmatprep.mubr.msk.f32.mxu1 %vm1164_vm0, %v19594_v23  ;;  %9468 = vmatprep.subr.bf16.mxu0 %v19600_v35  ;;  %v1567_v44 = vpop.f32.mrb[18].mxu1  ;;  %v1620_v23 = vsel %vm1149_vm8, %v1469_v31, 0.0  ;;  %v1621_v31 = vsel %vm1150_vm9, %v1471_v55, 0.0 }
 0x146   :  { %9514 = vmatpush1.bf16.msra.mxu1 %v19601_v53  ;;  %8691 = vmatprep.mubr.msk.f32.mxu0 %vm1164_vm0, %v12209_v9  ;;  %v1569_v13 = vpop.f32.mrb[19].mxu1  ;;  %v1622_v49 = vsel %vm19292_vm10, %v1567_v44, 0.0 }
 0x147   :  { %3156 = vmatmul.mubr.f32.gmra.mrb[70].mxu1 %v19597_v46  ;;  %9470 = vmatpush1.bf16.msra.mxu0 %v19602_v5  ;;  %v1475_v54 = vpop.f32.mrb[20].mxu0  ;;  %v19605_v46 = vld [vmem:[#allocation18_spill] sm:$0xff] }
 0x148   :  { %1757 = vrot.lane.b32.xlu0 %v1613_v58, %s10546_s14  ;;  %1759 = vrot.lane.b32.xlu1 %v1614_v41, %s10546_s14  ;;  %v1477_v57 = vpop.f32.mrb[21].mxu0  ;;  %v19606_v58 = vld [vmem:[#allocation21_spill] sm:$0xff]  ;;  %v19607_v41 = vld [vmem:[#allocation20_spill] sm:$0xff]  ;;  %v1627_v55 = vsel %vm1149_vm8, %v1475_v54, 0.0  ;;  %v19616_v54 = vld [vmem:[#allocation31_spill] sm:$0xff] }
 0x149   :  { %9516 = vmatprep.subr.bf16.mxu1 %v19603_v6  ;;  %9472 = vmatprep.subr.bf16.mxu0 %v19604_v24  ;;  %v1572_v1 = vpop.f32.mrb[20].mxu1  ;;  %v1628_v44 = vsel %vm1150_vm9, %v1477_v57, 0.0  ;;  %v19617_v57 = vld [vmem:[#allocation30_spill] sm:$0xff]  ;;  %v19642_v6 = vld [vmem:[#allocation55_spill] sm:$0xff] }
 0x14a   :  { %9518 = vmatpush1.bf16.msra.mxu1 %v19605_v46  ;;  %8697 = vmatprep.mubr.msk.f32.mxu1 %vm1164_vm0, %v12209_v9  ;;  %v1574_v15 = vpop.f32.mrb[21].mxu1  ;;  %v1629_v29 = vsel %vm19292_vm10, %v1572_v1, 0.0  ;;  %v12306_v1 = vld [vmem:[%s18957_s1 + $0x140] sm:$0xff] }
 0x14b   :  { %9474 = vmatpush1.bf16.msra.mxu0 %v19606_v58  ;;  %9520 = vmatprep.subr.bf16.mxu1 %v19607_v41  ;;  %v1481_v13 = vpop.f32.mrb[22].mxu0  ;;  %v19609_v15 = vld [vmem:[#allocation22_spill] sm:$0xff]  ;;  %v19610_v58 = vld [vmem:[#allocation25_spill] sm:$0xff]  ;;  %v19611_v41 = vld [vmem:[#allocation24_spill] sm:$0xff] }
 0x14c   :  { %1761 = vrot.lane.b32.xlu0 %v1615_v28, %s10546_s14  ;;  %1771 = vrot.lane.b32.xlu1 %v1620_v23, %s10546_s14  ;;  %v1483_v4 = vpop.f32.mrb[23].mxu0  ;;  %v19612_v28 = vld [vmem:[#allocation27_spill] sm:$0xff]  ;;  %v19613_v23 = vld [vmem:[#allocation26_spill] sm:$0xff] }
 0x14d   :  { %9476 = vmatprep.subr.bf16.mxu0 %v19608_v14  ;;  %v1577_v36 = vpop.f32.mrb[22].mxu1  ;;  %v19638_v14 = vld [vmem:[#allocation52_spill] sm:$0xff] }
 0x14e   :  { %9522 = vmatpush1.bf16.msra.mxu1 %v19609_v15  ;;  %v1579_v32 = vpop.f32.mrb[23].mxu1  ;;  %v19614_v15 = vld [vmem:[#allocation29_spill] sm:$0xff] }
 0x14f   :  { %9478 = vmatpush1.bf16.msra.mxu0 %v19610_v58  ;;  %9524 = vmatprep.subr.bf16.mxu1 %v19611_v41  ;;  %v19615_v32 = vld [vmem:[#allocation28_spill] sm:$0xff] }
 0x150   :  { %1773 = vrot.lane.b32.xlu0 %v1621_v31, %s10546_s14  ;;  %1775 = vrot.lane.b32.xlu1 %v1622_v49, %s10546_s14  ;;  %v12261_v31 = vld [vmem:[%s18957_s1 + $0x120] sm:$0xff]  ;;  %v1634_v49 = vsel %vm1149_vm8, %v1481_v13, 0.0 }
 0x151   :  { %9480 = vmatprep.subr.bf16.mxu0 %v19612_v28  ;;  %v19619_v13 = vld [vmem:[#allocation33_spill] sm:$0xff] }
 0x152   :  { %9526 = vmatpush1.bf16.msra.mxu1 %v19613_v23  ;;  %v19635_v28 = vld [vmem:[#allocation49_spill] sm:$0xff] }
 0x153   :  { %9482 = vmatpush1.bf16.msra.mxu0 %v19614_v15  ;;  %9528 = vmatprep.subr.bf16.mxu1 %v19615_v32  ;;  %v12273_v15 = vld [vmem:[%s18957_s1 + $0x138] sm:$0xff] }
 0x154   :  { %1785 = vrot.lane.b32.xlu0 %v1627_v55, %s10546_s14  ;;  %1787 = vrot.lane.b32.xlu1 %v1628_v44, %s10546_s14  ;;  %v19618_v32 = vld [vmem:[#allocation32_spill] sm:$0xff]  ;;  %v12280_v55 = vld [vmem:[%s18957_s1 + $0x130] sm:$0xff]  ;;  %v19620_v44 = vld [vmem:[#allocation34_spill] sm:$0xff] }
 0x155   :  { %9532 = vmatprep.subr.bf16.mxu0 %v19616_v54  ;;  %v12361_v54 = vld [vmem:[%s18957_s1 + $0x160] sm:$0xff] }
 0x156   :  { %3646 = vmatmul.mubr.f32.vlgmr.msra.gmra.mrb[72].mxu0 %v12261_v31  ;;  %9530 = vmatpush1.bf16.msra.mxu1 %v19617_v57  ;;  %v19624_v57 = vld [vmem:[#allocation38_spill] sm:$0xff] }
 0x157   :  { %9534 = vmatpush1.bf16.msra.mxu0 %v19618_v32  ;;  %9579 = vmatprep.subr.bf16.mxu1 %v19474_v2  ;;  %v19621_v32 = vld [vmem:[#allocation35_spill] sm:$0xff] }
 0x158   :  { %1799 = vrot.lane.b32.xlu1 %v1634_v49, %s10546_s14  ;;  %9536 = vmatprep.subr.bf16.mxu0 %v19619_v13  ;;  %v12296_v49 = vld [vmem:[%s18957_s1 + $0x148] sm:$0xff]  ;;  %v19622_v13 = vld [vmem:[#allocation36_spill] sm:$0xff] }
 0x159   :  { %3747 = vmatmul.mubr.f32.vlgmr.msra.gmra.mrb[72].mxu1 %v12261_v31  ;;  %8692 = vmatprep.mubr.msk.f32.mxu0 %vm1164_vm0, %v12273_v15 }
 0x15a   :  { %9581 = vmatpush1.bf16.msra.mxu1 %v19620_v44  ;;  %3652 = vmatmul.mubr.f32.gmra.mrb[74].mxu0 %v12280_v55  ;;  %v1635_v44 = vsel %vm1150_vm9, %v1483_v4, 0.0  ;;  %v19627_v4 = vld [vmem:[#allocation41_spill] sm:$0xff] }
 0x15b   :  { %9538 = vmatpush1.bf16.msra.mxu0 %v19621_v32  ;;  %9582 = vmatprep.subr.bf16.mxu1 %v19474_v2  ;;  %v19623_v32 = vld [vmem:[#allocation37_spill] sm:$0xff] }
 0x15c   :  { %9540 = vmatprep.subr.bf16.mxu0 %v19622_v13  ;;  %8698 = vmatprep.mubr.msk.f32.mxu1 %vm1164_vm0, %v12273_v15  ;;  %v1636_v13 = vsel %vm19292_vm10, %v1577_v36, 0.0  ;;  %v12327_v36 = vld [vmem:[%s18957_s1 + $0x158] sm:$0xff] }
 0x15d   :  { %3753 = vmatmul.mubr.f32.gmra.mrb[74].mxu1 %v12280_v55  ;;  %1789 = vrot.lane.b32.xlu0 %v1629_v29, %s10546_s14  ;;  %v19625_v29 = vld [vmem:[#allocation39_spill] sm:$0xff] }
 0x15e   :  { %9584 = vmatpush1.bf16.msra.mxu1 %v19623_v32  ;;  %8693 = vmatprep.mubr.msk.f32.mxu0 %vm1164_vm0, %v12296_v49 }
 0x15f   :  { %9542 = vmatpush1.bf16.msra.mxu0 %v19624_v57  ;;  %9585 = vmatprep.subr.bf16.mxu1 %v19474_v2  ;;  %v19631_v57 = vld [vmem:[#allocation45_spill] sm:$0xff] }
 0x160   :  { %9544 = vmatprep.subr.bf16.mxu0 %v19625_v29  ;;  %3658 = vmatmul.mubr.f32.gmra.mrb[76].mxu0 %v12306_v1 }
 0x161   :  { %1801 = vrot.lane.b32.xlu0 %v1635_v44, %s10546_s14  ;;  %1803 = vrot.lane.b32.xlu1 %v1636_v13, %s10546_s14  ;;  %v12334_v44 = vld [vmem:[%s18957_s1 + $0x150] sm:$0xff]  ;;  %v19628_v13 = vld [vmem:[#allocation42_spill] sm:$0xff]  ;;  %s10549_s14 = smov 33  }
 0x162   :  { %9587 = vmatpush1.bf16.msra.mxu1 %v19626_v11  ;;  %8699 = vmatprep.mubr.msk.f32.mxu1 %vm1164_vm0, %v12296_v49 }
 0x163   :  { %9546 = vmatpush1.bf16.msra.mxu0 %v19627_v4  ;;  %9588 = vmatprep.subr.bf16.mxu1 %v19474_v2  ;;  %v19630_v4 = vld [vmem:[#allocation44_spill] sm:$0xff] }
 0x164   :  { %9548 = vmatprep.subr.bf16.mxu0 %v19628_v13  ;;  %3759 = vmatmul.mubr.f32.gmra.mrb[76].mxu1 %v12306_v1  ;;  %v12349_v13 = vld [vmem:[%s18957_s1 + $0x168] sm:$0xff] }
 0x165   :  { %8694 = vmatprep.mubr.msk.f32.mxu0 %vm1164_vm0, %v12327_v36  ;;  %8700 = vmatprep.mubr.msk.f32.mxu1 %vm1164_vm0, %v12327_v36 }
 0x166   :  { %9590 = vmatpush1.bf16.msra.mxu1 %v19629_v47  ;;  %3664 = vmatmul.mubr.f32.gmra.mrb[78].mxu0 %v12334_v44 }
 0x167   :  { %9550 = vmatpush1.bf16.msra.mxu0 %v19630_v4  ;;  %v2067_v11 = vpop.f32.mrb[24].mxu0  ;;  %9591 = vmatprep.subr.bf16.mxu1 %v19474_v2  ;;  %v19632_v4 = vld [vmem:[#allocation46_spill] sm:$0xff] }
 0x168   :  { %v2069_v29 = vpop.f32.mrb[25].mxu0  ;;  %9552 = vmatprep.subr.bf16.mxu0 %v19631_v57  ;;  %2483 = vrot.lane.b32.xlu0 %v2067_v11, %s10547_s11  ;;  %v19633_v57 = vld [vmem:[#allocation47_spill] sm:$0xff] }
 0x169   :  { %2485 = vrot.lane.b32.xlu1 %v2069_v29, %s10547_s11  ;;  %v2168_v47 = vpop.f32.mrb[24].mxu1  ;;  %3765 = vmatmul.mubr.f32.gmra.mrb[78].mxu1 %v12334_v44  ;;  %v19634_v29 = vld [vmem:[#allocation48_spill] sm:$0xff] }
 0x16a   :  { %9593 = vmatpush1.bf16.msra.mxu1 %v19632_v4  ;;  %v2170_v32 = vpop.f32.mrb[25].mxu1  ;;  %8695 = vmatprep.mubr.msk.f32.mxu0 %vm1164_vm0, %v12349_v13 }
 0x16b   :  { %9554 = vmatpush1.bf16.msra.mxu0 %v19633_v57  ;;  %9594 = vmatprep.subr.bf16.mxu1 %v19474_v2  ;;  %v2073_v11 = vpop.f32.mrb[26].mxu0  ;;  %v19636_v57 = vld [vmem:[#allocation50_spill] sm:$0xff] }
 0x16c   :  { %9556 = vmatprep.subr.bf16.mxu0 %v19634_v29  ;;  %2487 = vrot.lane.b32.xlu0 %v2168_v47, %s10547_s11  ;;  %v2075_v23 = vpop.f32.mrb[27].mxu0  ;;  %v12377_v47 = vld [vmem:[%s18957_s1 + $0x178] sm:$0xff] }
 0x16d   :  { %2489 = vrot.lane.b32.xlu1 %v2170_v32, %s10547_s11  ;;  %v2174_v4 = vpop.f32.mrb[26].mxu1  ;;  %3670 = vmatmul.mubr.f32.gmra.mrb[80].mxu0 %v12361_v54  ;;  %v19637_v32 = vld [vmem:[#allocation51_spill] sm:$0xff] }
 0x16e   :  { %9596 = vmatpush1.bf16.msra.mxu1 %v19635_v28  ;;  %v2176_v58 = vpop.f32.mrb[27].mxu1  ;;  %8701 = vmatprep.mubr.msk.f32.mxu1 %vm1164_vm0, %v12349_v13 }
 0x16f   :  { %9558 = vmatpush1.bf16.msra.mxu0 %v19636_v57  ;;  %9597 = vmatprep.subr.bf16.mxu1 %v19474_v2  ;;  %v2079_v41 = vpop.f32.mrb[28].mxu0  ;;  %v12389_v57 = vld [vmem:[%s18957_s1 + $0x170] sm:$0xff] }
 0x170   :  { %9560 = vmatprep.subr.bf16.mxu0 %v19637_v32  ;;  %2499 = vrot.lane.b32.xlu0 %v2075_v23, %s10547_s11  ;;  %v2081_v29 = vpop.f32.mrb[29].mxu0  ;;  %19639 = vst [vmem:[#allocation3_spill] sm:$0xff] %v12389_v57  ;;  %v19640_v32 = vld [vmem:[#allocation53_spill] sm:$0xff] }
 0x171   :  { %2497 = vrot.lane.b32.xlu1 %v2073_v11, %s10547_s11  ;;  %3771 = vmatmul.mubr.f32.gmra.mrb[80].mxu1 %v12361_v54  ;;  %v2180_v28 = vpop.f32.mrb[28].mxu1  ;;  %v19641_v11 = vld [vmem:[#allocation54_spill] sm:$0xff] }
 0x172   :  { %9599 = vmatpush1.bf16.msra.mxu1 %v19638_v14  ;;  %8696 = vmatprep.mubr.msk.f32.mxu0 %vm1164_vm0, %v12377_v47  ;;  %v2182_v46 = vpop.f32.mrb[29].mxu1 }
 0x173   :  { %9562 = vmatpush1.bf16.msra.mxu0 %v19640_v32  ;;  %9600 = vmatprep.subr.bf16.mxu1 %v19474_v2  ;;  %v2085_v23 = vpop.f32.mrb[30].mxu0  ;;  %v19643_v32 = vld [vmem:[#allocation56_spill] sm:$0xff] }
 0x174   :  { %9564 = vmatprep.subr.bf16.mxu0 %v19641_v11  ;;  %2503 = vrot.lane.b32.xlu0 %v2176_v58, %s10547_s11  ;;  %v2087_v24 = vpop.f32.mrb[31].mxu0  ;;  %v19644_v11 = vld [vmem:[#allocation57_spill] sm:$0xff] }
 0x175   :  { %2501 = vrot.lane.b32.xlu1 %v2174_v4, %s10547_s11  ;;  %3676 = vmatmul.mubr.f32.gmra.mrb[82].mxu0 %v12389_v57  ;;  %v2186_v14 = vpop.f32.mrb[30].mxu1 }
 0x176   :  { %9602 = vmatpush1.bf16.msra.mxu1 %v19642_v6  ;;  %8702 = vmatprep.mubr.msk.f32.mxu1 %vm1164_vm0, %v12377_v47  ;;  %v2188_v5 = vpop.f32.mrb[31].mxu1  ;;  %v19645_v6 = vld [vmem:[#allocation58_spill] sm:$0xff] }
 0x177   :  { %9566 = vmatpush1.bf16.msra.mxu0 %v19643_v32  ;;  %9603 = vmatprep.subr.bf16.mxu1 %v19474_v2  ;;  %v2091_v53 = vpop.f32.mrb[32].mxu0  ;;  %v19646_v32 = vld [vmem:[#allocation59_spill] sm:$0xff] }
 0x178   :  { %9568 = vmatprep.subr.bf16.mxu0 %v19644_v11  ;;  %2511 = vrot.lane.b32.xlu0 %v2079_v41, %s10547_s11  ;;  %v2093_v58 = vpop.f32.mrb[33].mxu0 }
 0x179   :  { %2513 = vrot.lane.b32.xlu1 %v2081_v29, %s10547_s11  ;;  %3777 = vmatmul.mubr.f32.gmra.mrb[82].mxu1 %v12389_v57  ;;  %v2192_v4 = vpop.f32.mrb[32].mxu1  ;;  %v19649_v29 = vld [vmem:[#allocation60_spill] sm:$0xff] }
 0x17a   :  { %9605 = vmatpush1.bf16.msra.mxu1 %v19645_v6  ;;  %8703 = vmatprep.mubr.msk.f32.mxu0 %vm1164_vm0, %v12209_v9  ;;  %v2194_v35 = vpop.f32.mrb[33].mxu1 }
 0x17b   :  { %9570 = vmatpush1.bf16.msra.mxu0 %v19646_v32  ;;  %9606 = vmatprep.subr.bf16.mxu1 %v19474_v2  ;;  %v12411_v11 = vpop.permute.xlu0 %1721  ;;  %v2097_v41 = vpop.f32.mrb[34].mxu0  ;;  %v19650_v32 = vld [vmem:[#allocation61_spill] sm:$0xff] }
 0x17c   :  { %19647 = vst [vmem:[#allocation63_spill] sm:$0xff] %v12411_v11  ;;  %v12413_v60 = vpop.permute.xlu1 %1725  ;;  %9572 = vmatprep.subr.bf16.mxu0 %v19649_v29  ;;  %2515 = vrot.lane.b32.xlu0 %v2180_v28, %s10547_s11  ;;  %v2099_v63 = vpop.f32.mrb[35].mxu0  ;;  %1927 = vst.msk [vmem:[#allocation2] sm:$0xff] %vm1926_vm11, %v12411_v11  ;;  %v19689_v11 = vld [vmem:[#allocation24_spill] sm:$0xff] }
 0x17d   :  { %19648 = vst [vmem:[#allocation5_spill] sm:$0xff] %v12413_v60  ;;  %2517 = vrot.lane.b32.xlu1 %v2182_v46, %s10547_s11  ;;  %8709 = vmatprep.mubr.msk.f32.mxu1 %vm1164_vm0, %v12209_v9  ;;  %v12420_v6 = vpop.f32.mrb[34].mxu1 }
 0x17e   :  { %9608 = vmatpush1.bf16.msra.mxu1 %v19650_v32  ;;  %v12425_v57 = vpop.f32.mrb[35].mxu1 }
 0x17f   :  { %9574 = vmatpush1.bf16.msra.mxu0 %v11438_v30  ;;  %9609 = vmatprep.subr.bf16.mxu1 %v19474_v2  ;;  %v12429_v28 = vpop.permute.xlu0 %1723 }
 0x180   :  { %19651 = vst [vmem:[#allocation4_spill] sm:$0xff] %v12429_v28  ;;  %v12431_v60 = vpop.permute.xlu1 %1727  ;;  %9576 = vmatprep.subr.bf16.mxu0 %v11442_v61  ;;  %2527 = vrot.lane.b32.xlu0 %v2087_v24, %s10547_s11  ;;  %v1643_v28 = vld [vmem:[#allocation2 + $0x30] sm:$0xff] }
 0x181   :  { %19652 = vst [vmem:[#allocation64_spill] sm:$0xff] %v12431_v60  ;;  %2525 = vrot.lane.b32.xlu1 %v2085_v23, %s10547_s11  ;;  %v19688_v60 = vld [vmem:[#allocation22_spill] sm:$0xff] }
 0x182   :  { %9611 = vmatpush1.bf16.msra.mxu1 %v11444_v59 }
 0x183   :  { %9578 = vmatpush1.bf16.msra.mxu0 %v11460_v45  ;;  %9612 = vmatprep.subr.bf16.mxu1 %v19474_v2  ;;  %v12439_v9 = vpop.permute.xlu0 %1737 }
 0x184   :  { %19653 = vst [vmem:[#allocation66_spill] sm:$0xff] %v12439_v9  ;;  %9616 = vmatprep.subr.bf16.mxu0 %v10610_v3  ;;  %v12442_v46 = vpop.permute.xlu1 %1735  ;;  %2531 = vrot.lane.b32.xlu0 %v2188_v5, %s10547_s11 }
 0x185   :  { %19654 = vst [vmem:[#allocation69_spill] sm:$0xff] %v12442_v46  ;;  %2529 = vrot.lane.b32.xlu1 %v2186_v14, %s10547_s11  ;;  %1935 = vst.msk [vmem:[#allocation2 + $0x38] sm:$0xff] %vm1926_vm11, %v12442_v46 }
 0x186   :  { %3848 = vmatmul.mubr.f32.vlgmr.msra.gmra.mrb[84].mxu0 %v12261_v31  ;;  %9614 = vmatpush1.bf16.msra.mxu1 %v11464_v19 }
 0x187   :  { %9618 = vmatpush1.bf16.msra.mxu0 %v10621_v7  ;;  %9664 = vmatprep.subr.bf16.mxu1 %v10623_v8  ;;  %v12452_v24 = vpop.permute.xlu0 %1741 }
 0x188   :  { %19655 = vst [vmem:[#allocation60_spill] sm:$0xff] %v12452_v24  ;;  %8704 = vmatprep.mubr.msk.f32.mxu0 %vm1164_vm0, %v12273_v15  ;;  %9620 = vmatprep.subr.bf16.mxu0 %v10648_v16  ;;  %v12457_v5 = vpop.permute.xlu1 %1739  ;;  %v19683_v24 = vld [vmem:[#allocation20_spill] sm:$0xff] }
 0x189   :  { %19656 = vst [vmem:[#allocation61_spill] sm:$0xff] %v12457_v5  ;;  %3949 = vmatmul.mubr.f32.vlgmr.msra.gmra.mrb[84].mxu1 %v12261_v31  ;;  %2539 = vrot.lane.b32.xlu0 %v2091_v53, %s10547_s11 }
 0x18a   :  { %9666 = vmatpush1.bf16.msra.mxu1 %v10635_v12  ;;  %3854 = vmatmul.mubr.f32.gmra.mrb[86].mxu0 %v12280_v55 }
 0x18b   :  { %9622 = vmatpush1.bf16.msra.mxu0 %v10650_v17  ;;  %2541 = vrot.lane.b32.xlu1 %v2093_v58, %s10547_s11  ;;  %v12465_v14 = vpop.permute.xlu0 %1749 }
 0x18c   :  { %19657 = vst [vmem:[#allocation74_spill] sm:$0xff] %v12465_v14  ;;  %9668 = vmatprep.subr.bf16.mxu1 %v10662_v21  ;;  %8710 = vmatprep.mubr.msk.f32.mxu1 %vm1164_vm0, %v12273_v15  ;;  %v12470_v23 = vpop.permute.xlu1 %1751  ;;  %1942 = vst.msk [vmem:[#allocation2 + $0x70] sm:$0xff] %vm1926_vm11, %v12465_v14  ;;  %v19680_v14 = vld [vmem:[#allocation16_spill] sm:$0xff] }
 0x18d   :  { %19658 = vst [vmem:[#allocation75_spill] sm:$0xff] %v12470_v23  ;;  %9624 = vmatprep.subr.bf16.mxu0 %v10676_v26  ;;  %2543 = vrot.lane.b32.xlu0 %v2192_v4, %s10547_s11  ;;  %v19682_v23 = vld [vmem:[#allocation18_spill] sm:$0xff] }
 0x18e   :  { %9670 = vmatpush1.bf16.msra.mxu1 %v10674_v25  ;;  %8705 = vmatprep.mubr.msk.f32.mxu0 %vm1164_vm0, %v12296_v49 }
 0x18f   :  { %3954 = vmatmul.mubr.f32.gmra.mrb[86].mxu1 %v12280_v55  ;;  %9626 = vmatpush1.bf16.msra.mxu0 %v10698_v33  ;;  %v12481_v53 = vpop.permute.xlu0 %1753  ;;  %v12503_v55 = vld [vmem:[#allocation2 + $0xa8] sm:$0xff] }
 0x190   :  { %19659 = vst [vmem:[#allocation76_spill] sm:$0xff] %v12481_v53  ;;  %2545 = vrot.lane.b32.xlu1 %v2194_v35, %s10547_s11  ;;  %9672 = vmatprep.subr.bf16.mxu1 %v10700_v34  ;;  %v12485_v15 = vpop.permute.xlu1 %1755  ;;  %19663 = vst [vmem:[#allocation80_spill] sm:$0xff] %v12503_v55 }
 0x191   :  { %19660 = vst [vmem:[#allocation77_spill] sm:$0xff] %v12485_v15  ;;  %3860 = vmatmul.mubr.f32.gmra.mrb[88].mxu0 %v12306_v1  ;;  %9628 = vmatprep.subr.bf16.mxu0 %v10715_v39  ;;  %v19675_v15 = vld [vmem:[#allocation15_spill] sm:$0xff] }
 0x192   :  { %9674 = vmatpush1.bf16.msra.mxu1 %v10713_v38  ;;  %2555 = vrot.lane.b32.xlu0 %v2099_v63, %s10547_s11 }
 0x193   :  { %9630 = vmatpush1.bf16.msra.mxu0 %v10742_v48  ;;  %8711 = vmatprep.mubr.msk.f32.mxu1 %vm1164_vm0, %v12296_v49  ;;  %v12494_v31 = vpop.permute.xlu0 %1765 }
 0x194   :  { %19661 = vst [vmem:[#allocation78_spill] sm:$0xff] %v12494_v31  ;;  %2553 = vrot.lane.b32.xlu1 %v2097_v41, %s10547_s11  ;;  %9676 = vmatprep.subr.bf16.mxu1 %v10727_v43  ;;  %v12498_v35 = vpop.permute.xlu1 %1763  ;;  %v19674_v31 = vld [vmem:[#allocation12_spill] sm:$0xff] }
 0x195   :  { %19662 = vst [vmem:[#allocation79_spill] sm:$0xff] %v12498_v35  ;;  %8706 = vmatprep.mubr.msk.f32.mxu0 %vm1164_vm0, %v12327_v36  ;;  %3959 = vmatmul.mubr.f32.gmra.mrb[88].mxu1 %v12306_v1  ;;  %v1905_v63 = vadd.f32 %v12503_v55, %v12498_v35 }
 0x196   :  { %9632 = vmatprep.subr.bf16.mxu0 %v10754_v52  ;;  %9678 = vmatpush1.bf16.msra.mxu1 %v10752_v51 }
 0x197   :  { %1949 = vst.msk [vmem:[#allocation2 + $0xa8] sm:$0xff] %vm1926_vm11, %v1905_v63  ;;  %2559 = vrot.lane.b32.xlu0 %v12425_v57, %s10547_s11  ;;  %3866 = vmatmul.mubr.f32.gmra.mrb[90].mxu0 %v12334_v44  ;;  %v12513_v49 = vpop.permute.xlu0 %1769  ;;  %v2269_v58 = vpop.f32.mrb[36].mxu0 }
 0x198   :  { %19664 = vst [vmem:[#allocation81_spill] sm:$0xff] %v12513_v49  ;;  %9634 = vmatpush1.bf16.msra.mxu0 %v10784_v62  ;;  %2557 = vrot.lane.b32.xlu1 %v12420_v6, %s10547_s11  ;;  %v12518_v1 = vpop.permute.xlu1 %1767  ;;  %v2271_v4 = vpop.f32.mrb[37].mxu0 }
 0x199   :  { %19665 = vst [vmem:[#allocation82_spill] sm:$0xff] %v12518_v1  ;;  %9680 = vmatprep.subr.bf16.mxu1 %v10766_v56  ;;  %8712 = vmatprep.mubr.msk.f32.mxu1 %vm1164_vm0, %v12327_v36  ;;  %v2370_v41 = vpop.f32.mrb[36].mxu1 }
 0x19a   :  { %9636 = vmatprep.subr.bf16.mxu0 %v10790_v0  ;;  %9682 = vmatpush1.bf16.msra.mxu1 %v19585_v20  ;;  %v2372_v57 = vpop.f32.mrb[37].mxu1 }
 0x19b   :  { %2491 = vrot.lane.b32.xlu0 %v2269_v58, %s10547_s11  ;;  %3964 = vmatmul.mubr.f32.gmra.mrb[90].mxu1 %v12334_v44  ;;  %v12527_v63 = vpop.permute.xlu0 %1777  ;;  %v2275_v6 = vpop.f32.mrb[38].mxu0 }
 0x19c   :  { %19666 = vst [vmem:[#allocation83_spill] sm:$0xff] %v12527_v63  ;;  %9638 = vmatpush1.bf16.msra.mxu0 %v19587_v10  ;;  %2493 = vrot.lane.b32.xlu1 %v2271_v4, %s10547_s11  ;;  %v1912_v36 = vadd.f32 %v12503_v55, %v12527_v63  ;;  %v12533_v49 = vpop.permute.xlu1 %1779  ;;  %v2277_v1 = vpop.f32.mrb[39].mxu0 }
 0x19d   :  { %19667 = vst [vmem:[#allocation84_spill] sm:$0xff] %v12533_v49  ;;  %8707 = vmatprep.mubr.msk.f32.mxu0 %vm1164_vm0, %v12349_v13  ;;  %9684 = vmatprep.subr.bf16.mxu1 %v19588_v37  ;;  %v2375_v58 = vpop.f32.mrb[38].mxu1  ;;  %v19673_v49 = vld [vmem:[#allocation13_spill] sm:$0xff] }
 0x19e   :  { %1956 = vst.msk [vmem:[#allocation2 + $0xe0] sm:$0xff] %vm1926_vm11, %v1912_v36  ;;  %3872 = vmatmul.mubr.f32.gmra.mrb[92].mxu0 %v12361_v54  ;;  %9640 = vmatprep.subr.bf16.mxu0 %v19590_v22  ;;  %v2377_v44 = vpop.f32.mrb[39].mxu1  ;;  %v19736_v22 = vld [vmem:[#allocation55_spill] sm:$0xff] }
 0x19f   :  { %9686 = vmatpush1.bf16.msra.mxu1 %v19591_v27  ;;  %2495 = vrot.lane.b32.xlu0 %v2370_v41, %s10547_s11  ;;  %v2281_v4 = vpop.f32.mrb[40].mxu0 }
 0x1a0   :  { %9642 = vmatpush1.bf16.msra.mxu0 %v19592_v40  ;;  %2505 = vrot.lane.b32.xlu1 %v2275_v6, %s10547_s11  ;;  %v12545_v57 = vpop.permute.xlu0 %1781  ;;  %v12547_v63 = vpop.permute.xlu1 %1783  ;;  %v19732_v40 = vld [vmem:[#allocation52_spill] sm:$0xff] }
 0x1a1   :  { %19668 = vst [vmem:[#allocation85_spill] sm:$0xff] %v12545_v57  ;;  %19669 = vst [vmem:[#allocation86_spill] sm:$0xff] %v12547_v63  ;;  %8713 = vmatprep.mubr.msk.f32.mxu1 %vm1164_vm0, %v12349_v13  ;;  %9688 = vmatprep.subr.bf16.mxu1 %v19593_v18  ;;  %v2283_v36 = vpop.f32.mrb[41].mxu0  ;;  %v2380_v44 = vpop.f32.mrb[40].mxu1  ;;  %v19670_v63 = vld [vmem:[#allocation3_spill] sm:$0xff] }
 0x1a2   :  { %8708 = vmatprep.mubr.msk.f32.mxu0 %vm1164_vm0, %v12377_v47  ;;  %3969 = vmatmul.mubr.f32.gmra.mrb[92].mxu1 %v12361_v54  ;;  %v2382_v41 = vpop.f32.mrb[41].mxu1 }
 0x1a3   :  { %9644 = vmatprep.subr.bf16.mxu0 %v19595_v50  ;;  %9690 = vmatpush1.bf16.msra.mxu1 %v19596_v42  ;;  %v2287_v6 = vpop.f32.mrb[42].mxu0  ;;  %v19731_v50 = vld [vmem:[#allocation51_spill] sm:$0xff] }
 0x1a4   :  { %2507 = vrot.lane.b32.xlu0 %v2277_v1, %s10547_s11  ;;  %3878 = vmatmul.mubr.f32.gmra.mrb[94].mxu0 %v19670_v63  ;;  %v12559_v13 = vpop.permute.xlu0 %1793  ;;  %v12561_v57 = vpop.permute.xlu1 %1791 }
 0x1a5   :  { %19671 = vst [vmem:[#allocation3_spill] sm:$0xff] %v12559_v13  ;;  %19672 = vst [vmem:[#allocation87_spill] sm:$0xff] %v12561_v57  ;;  %9646 = vmatpush1.bf16.msra.mxu0 %v19673_v49  ;;  %2509 = vrot.lane.b32.xlu1 %v2375_v58, %s10547_s11  ;;  %v1919_v54 = vadd.f32 %v12503_v55, %v12561_v57  ;;  %v2289_v41 = vpop.f32.mrb[43].mxu0  ;;  %v2385_v35 = vpop.f32.mrb[42].mxu1  ;;  %v19676_v13 = vld [vmem:[#allocation14_spill] sm:$0xff]  ;;  %v19728_v49 = vld [vmem:[#allocation49_spill] sm:$0xff] }
 0x1a6   :  { %9692 = vmatprep.subr.bf16.mxu1 %v19674_v31  ;;  %8714 = vmatprep.mubr.msk.f32.mxu1 %vm1164_vm0, %v12377_v47  ;;  %v2387_v1 = vpop.f32.mrb[43].mxu1  ;;  %v12580_v55 = vld [vmem:[%s18957_s1 + $0x188] sm:$0xff]  ;;  %v19678_v47 = vld [vmem:[#allocation17_spill] sm:$0xff] }
 0x1a7   :  { %9648 = vmatprep.subr.bf16.mxu0 %v19675_v15  ;;  %9694 = vmatpush1.bf16.msra.mxu1 %v19676_v13  ;;  %1963 = vst.msk [vmem:[#allocation2 + $0x118] sm:$0xff] %vm1926_vm11, %v1919_v54  ;;  %v2293_v53 = vpop.f32.mrb[44].mxu0  ;;  %v19723_v13 = vld [vmem:[#allocation46_spill] sm:$0xff]  ;;  %v1671_v15 = vld [vmem:[#allocation2 + $0x110] sm:$0xff] }
 0x1a8   :  { %2519 = vrot.lane.b32.xlu0 %v2281_v4, %s10547_s11  ;;  %3974 = vmatmul.mubr.f32.gmra.mrb[94].mxu1 %v19670_v63  ;;  %v12575_v58 = vpop.permute.xlu0 %1797  ;;  %v2295_v57 = vpop.f32.mrb[45].mxu0  ;;  %v19681_v4 = vld [vmem:[#allocation19_spill] sm:$0xff] }
 0x1a9   :  { %19677 = vst [vmem:[#allocation88_spill] sm:$0xff] %v12575_v58  ;;  %9650 = vmatpush1.bf16.msra.mxu0 %v19678_v47  ;;  %2521 = vrot.lane.b32.xlu1 %v2283_v36, %s10547_s11  ;;  %v12584_v1 = vpop.permute.xlu1 %1795  ;;  %v2390_v54 = vpop.f32.mrb[44].mxu1  ;;  %v19684_v36 = vld [vmem:[#allocation21_spill] sm:$0xff] }
 0x1aa   :  { %19679 = vst [vmem:[#allocation89_spill] sm:$0xff] %v12584_v1  ;;  %9696 = vmatprep.subr.bf16.mxu1 %v19680_v14  ;;  %9652 = vmatprep.subr.bf16.mxu0 %v19681_v4  ;;  %v2392_v63 = vpop.f32.mrb[45].mxu1 }
 0x1ab   :  { %9698 = vmatpush1.bf16.msra.mxu1 %v19682_v23  ;;  %8727 = vmatprep.mubr.msk.f32.mxu0 %vm1164_vm0, %v12580_v55  ;;  %v2299_v58 = vpop.f32.mrb[46].mxu0  ;;  %v19687_v63 = vld [vmem:[#allocation23_spill] sm:$0xff]  ;;  %v19721_v23 = vld [vmem:[#allocation45_spill] sm:$0xff] }
 0x1ac   :  { %2523 = vrot.lane.b32.xlu0 %v2380_v44, %s10547_s11  ;;  %9700 = vmatprep.subr.bf16.mxu1 %v19683_v24  ;;  %v2301_v5 = vpop.f32.mrb[47].mxu0 }
 0x1ad   :  { %9654 = vmatpush1.bf16.msra.mxu0 %v19684_v36  ;;  %2533 = vrot.lane.b32.xlu1 %v2287_v6, %s10547_s11  ;;  %v12595_v1 = vpop.permute.xlu0 %1729  ;;  %v12597_v46 = vpop.permute.xlu1 %1731  ;;  %v19690_v6 = vld [vmem:[#allocation25_spill] sm:$0xff]  ;;  %v19692_v36 = vld [vmem:[#allocation27_spill] sm:$0xff] }
 0x1ae   :  { %19685 = vst [vmem:[#allocation90_spill] sm:$0xff] %v12595_v1  ;;  %19686 = vst [vmem:[#allocation91_spill] sm:$0xff] %v12597_v46  ;;  %9656 = vmatprep.subr.bf16.mxu0 %v19687_v63  ;;  %8733 = vmatprep.mubr.msk.f32.mxu1 %vm1164_vm0, %v12580_v55  ;;  %v2395_v9 = vpop.f32.mrb[46].mxu1 }
 0x1af   :  { %9702 = vmatpush1.bf16.msra.mxu1 %v19688_v60  ;;  %v2397_v44 = vpop.f32.mrb[47].mxu1  ;;  %v19693_v60 = vld [vmem:[#allocation26_spill] sm:$0xff] }
 0x1b0   :  { %2535 = vrot.lane.b32.xlu0 %v2289_v41, %s10547_s11  ;;  %9704 = vmatprep.subr.bf16.mxu1 %v19689_v11  ;;  %v19694_v41 = vld [vmem:[#allocation28_spill] sm:$0xff]  ;;  %v19695_v11 = vld [vmem:[#allocation29_spill] sm:$0xff] }
 0x1b1   :  { %9658 = vmatpush1.bf16.msra.mxu0 %v19690_v6  ;;  %2537 = vrot.lane.b32.xlu1 %v2385_v35, %s10547_s11  ;;  %v1734_v1 = vpop.permute.xlu0 %1733  ;;  %v12607_v24 = vpop.permute.xlu1 %1743 }
 0x1b2   :  { %19691 = vst [vmem:[#allocation92_spill] sm:$0xff] %v12607_v24  ;;  %v1811_v63 = vsel %vm19175_vm12, %v12597_v46, %v1734_v1  ;;  %9660 = vmatprep.subr.bf16.mxu0 %v19692_v36  ;;  %v12623_v1 = vld [vmem:[%s18957_s1 + $0x180] sm:$0xff]  ;;  %v19720_v36 = vld [vmem:[#allocation44_spill] sm:$0xff] }
 0x1b3   :  { %v1890_v44 = vadd.f32 %v1811_v63, %v1643_v28  ;;  %9706 = vmatpush1.bf16.msra.mxu1 %v19693_v60  ;;  %v1650_v28 = vld [vmem:[#allocation2 + $0x68] sm:$0xff]  ;;  %v19697_v63 = vld [vmem:[#allocation31_spill] sm:$0xff] }
 0x1b4   :  { %2547 = vrot.lane.b32.xlu0 %v2293_v53, %s10547_s11  ;;  %9708 = vmatprep.subr.bf16.mxu1 %v19694_v41  ;;  %v19698_v53 = vld [vmem:[#allocation30_spill] sm:$0xff]  ;;  %v12636_v41 = vld [vmem:[%s18957_s1 + $0x198] sm:$0xff] }
 0x1b5   :  { %1934 = vst.msk [vmem:[#allocation2 + $0x30] sm:$0xff] %vm1933_vm13, %v1890_v44  ;;  %9662 = vmatpush1.bf16.msra.mxu0 %v19695_v11  ;;  %2549 = vrot.lane.b32.xlu1 %v2295_v57, %s10547_s11  ;;  %v12618_v35 = vpop.permute.xlu0 %1745  ;;  %v19699_v57 = vld [vmem:[#allocation32_spill] sm:$0xff]  ;;  %v19717_v11 = vld [vmem:[#allocation67_spill] sm:$0xff] }
 0x1b6   :  { %19696 = vst [vmem:[#allocation93_spill] sm:$0xff] %v12618_v35  ;;  %9712 = vmatprep.subr.bf16.mxu0 %v19697_v63  ;;  %v1748_v24 = vpop.permute.xlu1 %1747  ;;  %vm1140_vm1 = vcmp.ne.s32.totalorder %v19717_v11, 0 }
 0x1b7   :  { %9710 = vmatpush1.bf16.msra.mxu1 %v19698_v53  ;;  %v1817_v44 = vsel %vm19175_vm12, %v12618_v35, %v1748_v24 }
 0x1b8   :  { %4450 = vmatmul.mubr.f32.vlgmr.msra.gmra.mrb[96].mxu0 %v12623_v1  ;;  %v1897_v46 = vadd.f32 %v1817_v44, %v1650_v28  ;;  %2551 = vrot.lane.b32.xlu0 %v2390_v54, %s10547_s11  ;;  %v19702_v54 = vld [vmem:[#allocation33_spill] sm:$0xff]  ;;  %v19703_v28 = vld [vmem:[#allocation34_spill] sm:$0xff] }
 0x1b9   :  { %9714 = vmatpush1.bf16.msra.mxu0 %v19699_v57  ;;  %2561 = vrot.lane.b32.xlu1 %v2299_v58, %s10547_s11  ;;  %v12650_v58 = vld [vmem:[%s18957_s1 + $0x190] sm:$0xff]  ;;  %v1657_v44 = vld [vmem:[#allocation2 + $0xa0] sm:$0xff] }
 0x1ba   :  { %1941 = vst.msk [vmem:[#allocation2 + $0x68] sm:$0xff] %vm1933_vm13, %v1897_v46  ;;  %9759 = vmatprep.subr.bf16.mxu1 %v19474_v2  ;;  %v12640_v53 = vpop.permute.xlu0 %1757  ;;  %4551 = vmatmul.mubr.f32.vlgmr.msra.gmra.mrb[96].mxu1 %v12623_v1  ;;  %v12643_v24 = vpop.permute.xlu1 %1759  ;;  %v19704_v46 = vld [vmem:[#allocation35_spill] sm:$0xff] }
 0x1bb   :  { %19700 = vst [vmem:[#allocation94_spill] sm:$0xff] %v12640_v53  ;;  %19701 = vst [vmem:[#allocation95_spill] sm:$0xff] %v12643_v24  ;;  %9716 = vmatprep.subr.bf16.mxu0 %v19702_v54  ;;  %9761 = vmatpush1.bf16.msra.mxu1 %v19703_v28  ;;  %v19706_v54 = vld [vmem:[#allocation36_spill] sm:$0xff] }
 0x1bc   :  { %2563 = vrot.lane.b32.xlu0 %v2301_v5, %s10547_s11  ;;  %8728 = vmatprep.mubr.msk.f32.mxu0 %vm1164_vm0, %v12636_v41  ;;  %v19707_v5 = vld [vmem:[#allocation37_spill] sm:$0xff] }
 0x1bd   :  { %9718 = vmatpush1.bf16.msra.mxu0 %v19704_v46  ;;  %2565 = vrot.lane.b32.xlu1 %v2395_v9, %s10547_s11  ;;  %v12668_v46 = vld [vmem:[%s18957_s1 + $0x1a8] sm:$0xff] }
 0x1be   :  { %4456 = vmatmul.mubr.f32.gmra.mrb[98].mxu0 %v12650_v58  ;;  %9762 = vmatprep.subr.bf16.mxu1 %v19474_v2  ;;  %v1762_v53 = vpop.permute.xlu0 %1761  ;;  %v12659_v35 = vpop.permute.xlu1 %1771 }
 0x1bf   :  { %19705 = vst [vmem:[#allocation96_spill] sm:$0xff] %v12659_v35  ;;  %v1823_v28 = vsel %vm19175_vm12, %v12643_v24, %v1762_v53  ;;  %9720 = vmatprep.subr.bf16.mxu0 %v19706_v54  ;;  %9764 = vmatpush1.bf16.msra.mxu1 %v19707_v5  ;;  %v12676_v35 = vld [vmem:[%s18957_s1 + $0x1a0] sm:$0xff]  ;;  %v19708_v53 = vld [vmem:[#allocation38_spill] sm:$0xff]  ;;  %v1664_v24 = vld [vmem:[#allocation2 + $0xd8] sm:$0xff] }
 0x1c0   :  { %v1904_v9 = vadd.f32 %v1823_v28, %v1657_v44  ;;  %8734 = vmatprep.mubr.msk.f32.mxu1 %vm1164_vm0, %v12636_v41  ;;  %9765 = vmatprep.subr.bf16.mxu1 %v19474_v2  ;;  %v19710_v28 = vld [vmem:[#allocation39_spill] sm:$0xff]  ;;  %v19711_v54 = vld [vmem:[#allocation40_spill] sm:$0xff] }
 0x1c1   :  { %9722 = vmatpush1.bf16.msra.mxu0 %v19708_v53  ;;  %4557 = vmatmul.mubr.f32.gmra.mrb[98].mxu1 %v12650_v58  ;;  %v12693_v53 = vld [vmem:[%s18957_s1 + $0x1b8] sm:$0xff] }
 0x1c2   :  { %1948 = vst.msk [vmem:[#allocation2 + $0xa0] sm:$0xff] %vm1933_vm13, %v1904_v9  ;;  %v12681_v5 = vpop.permute.xlu0 %1773  ;;  %9724 = vmatprep.subr.bf16.mxu0 %v19710_v28  ;;  %v1776_v44 = vpop.permute.xlu1 %1775  ;;  %8729 = vmatprep.mubr.msk.f32.mxu0 %vm1164_vm0, %v12668_v46  ;;  %v19712_v28 = vld [vmem:[#allocation41_spill] sm:$0xff] }
 0x1c3   :  { %19709 = vst [vmem:[#allocation97_spill] sm:$0xff] %v12681_v5  ;;  %9767 = vmatpush1.bf16.msra.mxu1 %v19711_v54  ;;  %v1829_v57 = vsel %vm19175_vm12, %v12681_v5, %v1776_v44  ;;  %4462 = vmatmul.mubr.f32.gmra.mrb[100].mxu0 %v12676_v35  ;;  %v12701_v54 = vld [vmem:[%s18957_s1 + $0x1b0] sm:$0xff]  ;;  %v19713_v44 = vld [vmem:[#allocation65_spill] sm:$0xff]  ;;  %v19714_v5 = vld [vmem:[#allocation42_spill] sm:$0xff] }
 0x1c4   :  { %v1911_v9 = vadd.f32 %v1829_v57, %v1664_v24  ;;  %9768 = vmatprep.subr.bf16.mxu1 %v19474_v2  ;;  %8735 = vmatprep.mubr.msk.f32.mxu1 %vm1164_vm0, %v12668_v46  ;;  %vm1138_vm14 = vcmp.ne.s32.totalorder %v19713_v44, 0  ;;  %v19715_v57 = vld [vmem:[#allocation70_spill] sm:$0xff]  ;;  %v19716_v24 = vld [vmem:[#allocation43_spill] sm:$0xff] }
 0x1c5   :  { %9726 = vmatpush1.bf16.msra.mxu0 %v19712_v28  ;;  %4563 = vmatmul.mubr.f32.gmra.mrb[100].mxu1 %v12676_v35  ;;  %vm1139_vm15 = vcmp.ne.s32.totalorder %v19715_v57, 0  ;;  %v19878_v57 = vld [vmem:[#allocation23_spill] sm:$0xff] }
 0x1c6   :  { %1955 = vst.msk [vmem:[#allocation2 + $0xd8] sm:$0xff] %vm1933_vm13, %v1911_v9  ;;  %9728 = vmatprep.subr.bf16.mxu0 %v19714_v5  ;;  %8730 = vmatprep.mubr.msk.f32.mxu0 %vm1164_vm0, %v12693_v53  ;;  %v12714_v28 = vpop.permute.xlu1 %1787  ;;  %v19719_v5 = vld [vmem:[#allocation68_spill] sm:$0xff]  ;;  %v12735_v47 = vpop.permute.xlu0 %1785 }
 0x1c7   :  { %9770 = vmatpush1.bf16.msra.mxu1 %v19716_v24  ;;  %v2829_v63 = vpop.f32.mrb[48].mxu0  ;;  %4468 = vmatmul.mubr.f32.gmra.mrb[102].mxu0 %v12701_v54  ;;  %19718 = vst [vmem:[#allocation98_spill] sm:$0xff] %v12714_v28  ;;  %vm19196_vm6 = vcmp.ne.s32.totalorder %v19719_v5, 0  ;;  %v12725_v24 = vld [vmem:[%s18957_s1 + $0x1c8] sm:$0xff]  ;;  %19722 = vst [vmem:[#allocation99_spill] sm:$0xff] %v12735_v47 }
 0x1c8   :  { %v3175_v60 = vsel %vm1138_vm14, %v2829_v63, 0.0  ;;  %9771 = vmatprep.subr.bf16.mxu1 %v19474_v2  ;;  %v2831_v9 = vpop.f32.mrb[49].mxu0  ;;  %8736 = vmatprep.mubr.msk.f32.mxu1 %vm1164_vm0, %v12693_v53 }
 0x1c9   :  { %9730 = vmatpush1.bf16.msra.mxu0 %v19720_v36  ;;  %v3176_v6 = vsel %vm1139_vm15, %v2831_v9, 0.0  ;;  %3301 = vrot.lane.b32.xlu0 %v3175_v60, %s10548_s0  ;;  %v2930_v63 = vpop.f32.mrb[48].mxu1 }
 0x1ca   :  { %9732 = vmatprep.subr.bf16.mxu0 %v19721_v23  ;;  %3303 = vrot.lane.b32.xlu1 %v3176_v6, %s10548_s0  ;;  %v3177_v4 = vsel %vm1140_vm1, %v2930_v63, 0.0  ;;  %v2932_v14 = vpop.f32.mrb[49].mxu1  ;;  %v12747_v6 = vld [vmem:[%s18957_s1 + $0x1c0] sm:$0xff]  ;;  %v19725_v63 = vld [vmem:[#allocation47_spill] sm:$0xff] }
 0x1cb   :  { %9773 = vmatpush1.bf16.msra.mxu1 %v19723_v13  ;;  %v3178_v36 = vsel %vm19196_vm6, %v2932_v14, 0.0  ;;  %v2835_v9 = vpop.f32.mrb[50].mxu0  ;;  %8731 = vmatprep.mubr.msk.f32.mxu0 %vm1164_vm0, %v12725_v24  ;;  %19724 = vst [vmem:[#allocation100_spill] sm:$0xff] %v12747_v6  ;;  %v12751_v14 = vpop.permute.xlu1 %1799  ;;  %v19727_v13 = vld [vmem:[#allocation48_spill] sm:$0xff] }
 0x1cc   :  { %9774 = vmatprep.subr.bf16.mxu1 %v19474_v2  ;;  %v2837_v60 = vpop.f32.mrb[51].mxu0  ;;  %4569 = vmatmul.mubr.f32.gmra.mrb[102].mxu1 %v12701_v54  ;;  %19726 = vst [vmem:[#allocation101_spill] sm:$0xff] %v12751_v14  ;;  %v3182_v42 = vsel %vm1138_vm14, %v2835_v9, 0.0 }
 0x1cd   :  { %9734 = vmatpush1.bf16.msra.mxu0 %v19725_v63  ;;  %3305 = vrot.lane.b32.xlu0 %v3177_v4, %s10548_s0  ;;  %v2936_v47 = vpop.f32.mrb[50].mxu1  ;;  %v3183_v23 = vsel %vm1139_vm15, %v2837_v60, 0.0  ;;  %v12769_v60 = vld [vmem:[%s18957_s1 + $0x1d8] sm:$0xff] }
 0x1ce   :  { %9736 = vmatprep.subr.bf16.mxu0 %v19727_v13  ;;  %3307 = vrot.lane.b32.xlu1 %v3178_v36, %s10548_s0  ;;  %v2938_v31 = vpop.f32.mrb[51].mxu1  ;;  %19729 = vst [vmem:[#allocation102_spill] sm:$0xff] %v12769_v60  ;;  %v3184_v27 = vsel %vm1140_vm1, %v2936_v47, 0.0  ;;  %v19734_v47 = vld [vmem:[#allocation53_spill] sm:$0xff] }
 0x1cf   :  { %9776 = vmatpush1.bf16.msra.mxu1 %v19728_v49  ;;  %v1790_v63 = vpop.permute.xlu0 %1789  ;;  %4474 = vmatmul.mubr.f32.gmra.mrb[104].mxu0 %v12747_v6  ;;  %v2841_v4 = vpop.f32.mrb[52].mxu0  ;;  %v19730_v49 = vld [vmem:[#allocation50_spill] sm:$0xff] }
 0x1d0   :  { %9777 = vmatprep.subr.bf16.mxu1 %v19474_v2  ;;  %v1835_v14 = vsel %vm19175_vm12, %v12714_v28, %v1790_v63  ;;  %8737 = vmatprep.mubr.msk.f32.mxu1 %vm1164_vm0, %v12725_v24  ;;  %v2843_v36 = vpop.f32.mrb[53].mxu0  ;;  %v3185_v63 = vsel %vm19196_vm6, %v2938_v31, 0.0  ;;  %v1678_v28 = vld [vmem:[#allocation2 + $0x148] sm:$0xff] }
 0x1d1   :  { %9738 = vmatpush1.bf16.msra.mxu0 %v19730_v49  ;;  %3317 = vrot.lane.b32.xlu0 %v3183_v23, %s10548_s0  ;;  %v1918_v9 = vadd.f32 %v1835_v14, %v1671_v15  ;;  %v2942_v13 = vpop.f32.mrb[52].mxu1  ;;  %v12792_v15 = vld [vmem:[%s18957_s1 + $0x1d0] sm:$0xff] }
 0x1d2   :  { %9740 = vmatprep.subr.bf16.mxu0 %v19731_v50  ;;  %3315 = vrot.lane.b32.xlu1 %v3182_v42, %s10548_s0  ;;  %v2944_v18 = vpop.f32.mrb[53].mxu1  ;;  %v19735_v50 = vld [vmem:[#allocation54_spill] sm:$0xff] }
 0x1d3   :  { %9779 = vmatpush1.bf16.msra.mxu1 %v19732_v40  ;;  %1962 = vst.msk [vmem:[#allocation2 + $0x110] sm:$0xff] %vm1933_vm13, %v1918_v9  ;;  %v12781_v49 = vpop.permute.xlu0 %1801  ;;  %v1804_v23 = vpop.permute.xlu1 %1803  ;;  %8732 = vmatprep.mubr.msk.f32.mxu0 %vm1164_vm0, %v12769_v60 }
 0x1d4   :  { %19733 = vst [vmem:[#allocation103_spill] sm:$0xff] %v12781_v49  ;;  %9780 = vmatprep.subr.bf16.mxu1 %v19474_v2  ;;  %v1841_v42 = vsel %vm19175_vm12, %v12781_v49, %v1804_v23  ;;  %4575 = vmatmul.mubr.f32.gmra.mrb[104].mxu1 %v12747_v6  ;;  %v2847_v31 = vpop.f32.mrb[54].mxu0  ;;  %v3189_v23 = vsel %vm1138_vm14, %v2841_v4, 0.0  ;;  %v19742_v6 = vld [vmem:[#allocation59_spill] sm:$0xff] }
 0x1d5   :  { %9742 = vmatpush1.bf16.msra.mxu0 %v19734_v47  ;;  %3321 = vrot.lane.b32.xlu0 %v3185_v63, %s10548_s0  ;;  %v1925_v14 = vadd.f32 %v1841_v42, %v1678_v28  ;;  %v2849_v9 = vpop.f32.mrb[55].mxu0  ;;  %v2948_v40 = vpop.f32.mrb[54].mxu1  ;;  %v3190_v47 = vsel %vm1139_vm15, %v2843_v36, 0.0  ;;  %v19737_v63 = vld [vmem:[#allocation56_spill] sm:$0xff]  ;;  %v19738_v42 = vld [vmem:[#allocation57_spill] sm:$0xff] }
 0x1d6   :  { %9744 = vmatprep.subr.bf16.mxu0 %v19735_v50  ;;  %3319 = vrot.lane.b32.xlu1 %v3184_v27, %s10548_s0  ;;  %v2950_v49 = vpop.f32.mrb[55].mxu1  ;;  %v2399_v36 = vld [vmem:[#allocation2] sm:$0xff] }
 0x1d7   :  { %9782 = vmatpush1.bf16.msra.mxu1 %v19736_v22  ;;  %1969 = vst.msk [vmem:[#allocation2 + $0x148] sm:$0xff] %vm1933_vm13, %v1925_v14  ;;  %4480 = vmatmul.mubr.f32.gmra.mrb[106].mxu0 %v12792_v15  ;;  %v2853_v28 = vpop.f32.mrb[56].mxu0  ;;  %v3191_v22 = vsel %vm1140_vm1, %v2942_v13, 0.0 }
 0x1d8   :  { %9783 = vmatprep.subr.bf16.mxu1 %v19474_v2  ;;  %8738 = vmatprep.mubr.msk.f32.mxu1 %vm1164_vm0, %v12769_v60  ;;  %v2855_v27 = vpop.f32.mrb[57].mxu0  ;;  %v19740_v60 = vld [vmem:[#allocation58_spill] sm:$0xff] }
 0x1d9   :  { %9746 = vmatpush1.bf16.msra.mxu0 %v19737_v63  ;;  %3329 = vrot.lane.b32.xlu0 %v3189_v23, %s10548_s0  ;;  %v12810_v4 = vpop.f32.mrb[56].mxu1 }
 0x1da   :  { %9748 = vmatprep.subr.bf16.mxu0 %v19738_v42  ;;  %3331 = vrot.lane.b32.xlu1 %v3190_v47, %s10548_s0  ;;  %v12814_v14 = vpop.permute.xlu0 %2483  ;;  %v12818_v50 = vpop.f32.mrb[57].mxu1  ;;  %v3192_v42 = vsel %vm19196_vm6, %v2944_v18, 0.0 }
 0x1db   :  { %19739 = vst [vmem:[#allocation104_spill] sm:$0xff] %v12814_v14  ;;  %9785 = vmatpush1.bf16.msra.mxu1 %v19740_v60  ;;  %v2646_v63 = vadd.f32 %v12814_v14, %v2399_v36  ;;  %v12822_v23 = vpop.permute.xlu1 %2485  ;;  %8739 = vmatprep.mubr.msk.f32.mxu0 %vm1164_vm0, %v12580_v55  ;;  %v12828_v47 = vpop.f32.mrb[58].mxu0  ;;  %v3197_v36 = vsel %vm1139_vm15, %v2849_v9, 0.0  ;;  %v3196_v14 = vsel %vm1138_vm14, %v2847_v31, 0.0  ;;  %v3199_v9 = vsel %vm19196_vm6, %v2950_v49, 0.0 }
 0x1dc   :  { %19741 = vst [vmem:[#allocation58_spill] sm:$0xff] %v12822_v23  ;;  %9786 = vmatprep.subr.bf16.mxu1 %v19474_v2  ;;  %4581 = vmatmul.mubr.f32.gmra.mrb[106].mxu1 %v12792_v15  ;;  %v12832_v13 = vpop.f32.mrb[59].mxu0 }
 0x1dd   :  { %9750 = vmatpush1.bf16.msra.mxu0 %v19742_v6  ;;  %2689 = vst.msk [vmem:[#allocation2] sm:$0xff] %vm2688_vm7, %v2646_v63  ;;  %3333 = vrot.lane.b32.xlu0 %v3191_v22, %s10548_s0 }
 0x1de   :  { %9752 = vmatprep.subr.bf16.mxu0 %v19649_v29  ;;  %3335 = vrot.lane.b32.xlu1 %v3192_v42, %s10548_s0  ;;  %v12839_v18 = vpop.permute.xlu0 %2487  ;;  %v2406_v42 = vld [vmem:[#allocation2 + $0x38] sm:$0xff] }
 0x1df   :  { %19743 = vst [vmem:[#allocation59_spill] sm:$0xff] %v12839_v18  ;;  %9788 = vmatpush1.bf16.msra.mxu1 %v19650_v32  ;;  %v12846_v23 = vpop.permute.xlu1 %2489  ;;  %8745 = vmatprep.mubr.msk.f32.mxu1 %vm1164_vm0, %v12580_v55  ;;  %v12850_v22 = vpop.f32.mrb[58].mxu1  ;;  %v3198_v55 = vsel %vm1140_vm1, %v2948_v40, 0.0 }
 0x1e0   :  { %19744 = vst [vmem:[#allocation105_spill] sm:$0xff] %v12846_v23  ;;  %9789 = vmatprep.subr.bf16.mxu1 %v19474_v2  ;;  %v12853_v63 = vpop.f32.mrb[59].mxu1 }
 0x1e1   :  { %9754 = vmatpush1.bf16.msra.mxu0 %v11438_v30  ;;  %3345 = vrot.lane.b32.xlu0 %v3197_v36, %s10548_s0 }
 0x1e2   :  { %9756 = vmatprep.subr.bf16.mxu0 %v11442_v61  ;;  %3343 = vrot.lane.b32.xlu1 %v3196_v14, %s10548_s0  ;;  %v12859_v31 = vpop.permute.xlu0 %2499  ;;  %v3203_v14 = vsel %vm1138_vm14, %v2853_v28, 0.0 }
 0x1e3   :  { %19745 = vst [vmem:[#allocation106_spill] sm:$0xff] %v12859_v31  ;;  %9791 = vmatpush1.bf16.msra.mxu1 %v11444_v59  ;;  %v12866_v23 = vpop.permute.xlu1 %2497 }
 0x1e4   :  { %19746 = vst [vmem:[#allocation107_spill] sm:$0xff] %v12866_v23  ;;  %9792 = vmatprep.subr.bf16.mxu1 %v19474_v2  ;;  %v2653_v36 = vadd.f32 %v12866_v23, %v2406_v42 }
 0x1e5   :  { %9758 = vmatpush1.bf16.msra.mxu0 %v11460_v45  ;;  %3349 = vrot.lane.b32.xlu0 %v3199_v9, %s10548_s0  ;;  %v3204_v9 = vsel %vm1139_vm15, %v2855_v27, 0.0  ;;  %v3206_v27 = vsel %vm19196_vm6, %v12818_v50, 0.0  ;;  %v3210_v50 = vsel %vm1138_vm14, %v12828_v47, 0.0 }
 0x1e6   :  { %2697 = vst.msk [vmem:[#allocation2 + $0x38] sm:$0xff] %vm2688_vm7, %v2653_v36  ;;  %9796 = vmatprep.subr.bf16.mxu0 %v10610_v3  ;;  %3347 = vrot.lane.b32.xlu1 %v3198_v55, %s10548_s0  ;;  %v12875_v49 = vpop.permute.xlu0 %2503  ;;  %v2413_v55 = vld [vmem:[#allocation2 + $0x70] sm:$0xff] }
 0x1e7   :  { %19747 = vst [vmem:[#allocation108_spill] sm:$0xff] %v12875_v49  ;;  %9794 = vmatpush1.bf16.msra.mxu1 %v11464_v19  ;;  %v12878_v40 = vpop.permute.xlu1 %2501 }
 0x1e8   :  { %19748 = vst [vmem:[#allocation109_spill] sm:$0xff] %v12878_v40  ;;  %4652 = vmatmul.mubr.f32.vlgmr.msra.gmra.mrb[108].mxu0 %v12623_v1  ;;  %9844 = vmatprep.subr.bf16.mxu1 %v10623_v8  ;;  %v19776_v40 = vld [vmem:[#allocation15_spill] sm:$0xff] }
 0x1e9   :  { %9798 = vmatpush1.bf16.msra.mxu0 %v10621_v7  ;;  %8740 = vmatprep.mubr.msk.f32.mxu0 %vm1164_vm0, %v12636_v41 }
 0x1ea   :  { %4753 = vmatmul.mubr.f32.vlgmr.msra.gmra.mrb[108].mxu1 %v12623_v1  ;;  %9800 = vmatprep.subr.bf16.mxu0 %v10648_v16  ;;  %v12891_v42 = vpop.permute.xlu0 %2511  ;;  %v3205_v1 = vsel %vm1140_vm1, %v12810_v4, 0.0 }
 0x1eb   :  { %19749 = vst [vmem:[#allocation110_spill] sm:$0xff] %v12891_v42  ;;  %9846 = vmatpush1.bf16.msra.mxu1 %v10635_v12  ;;  %3357 = vrot.lane.b32.xlu0 %v3203_v14, %s10548_s0  ;;  %v2660_v28 = vadd.f32 %v12891_v42, %v2413_v55  ;;  %v12896_v36 = vpop.permute.xlu1 %2513 }
 0x1ec   :  { %19750 = vst [vmem:[#allocation111_spill] sm:$0xff] %v12896_v36  ;;  %4658 = vmatmul.mubr.f32.gmra.mrb[110].mxu0 %v12650_v58  ;;  %3359 = vrot.lane.b32.xlu1 %v3204_v9, %s10548_s0  ;;  %v2420_v9 = vld [vmem:[#allocation2 + $0xa8] sm:$0xff] }
 0x1ed   :  { %9802 = vmatpush1.bf16.msra.mxu0 %v10650_v17  ;;  %2704 = vst.msk [vmem:[#allocation2 + $0x70] sm:$0xff] %vm2688_vm7, %v2660_v28  ;;  %9848 = vmatprep.subr.bf16.mxu1 %v10662_v21 }
 0x1ee   :  { %8746 = vmatprep.mubr.msk.f32.mxu1 %vm1164_vm0, %v12636_v41  ;;  %9804 = vmatprep.subr.bf16.mxu0 %v10676_v26  ;;  %v12912_v14 = vpop.permute.xlu0 %2515  ;;  %v3211_v41 = vsel %vm1139_vm15, %v12832_v13, 0.0  ;;  %v3213_v13 = vsel %vm19196_vm6, %v12853_v63, 0.0  ;;  %vm2695_vm6 = vcmask 621568  }
 0x1ef   :  { %19751 = vst [vmem:[#allocation112_spill] sm:$0xff] %v12912_v14  ;;  %9850 = vmatpush1.bf16.msra.mxu1 %v10674_v25  ;;  %3361 = vrot.lane.b32.xlu0 %v3205_v1, %s10548_s0  ;;  %v12916_v4 = vpop.permute.xlu1 %2517  ;;  %v3212_v1 = vsel %vm1140_vm1, %v12850_v22, 0.0 }
 0x1f0   :  { %19752 = vst [vmem:[#allocation113_spill] sm:$0xff] %v12916_v4  ;;  %4758 = vmatmul.mubr.f32.gmra.mrb[110].mxu1 %v12650_v58  ;;  %3363 = vrot.lane.b32.xlu1 %v3206_v27, %s10548_s0  ;;  %v19757_v27 = vld [vmem:[#allocation71_spill] sm:$0xff]  ;;  %v19769_v4 = vld [vmem:[#allocation102_spill] sm:$0xff] }
 0x1f1   :  { %9806 = vmatpush1.bf16.msra.mxu0 %v10698_v33  ;;  %8741 = vmatprep.mubr.msk.f32.mxu0 %vm1164_vm0, %v12668_v46  ;;  %vm1142_vm11 = vcmp.ne.s32.totalorder %v19757_v27, 0 }
 0x1f2   :  { %9852 = vmatprep.subr.bf16.mxu1 %v10700_v34  ;;  %4664 = vmatmul.mubr.f32.gmra.mrb[112].mxu0 %v12676_v35  ;;  %v12931_v58 = vpop.permute.xlu0 %2527 }
 0x1f3   :  { %19753 = vst [vmem:[#allocation114_spill] sm:$0xff] %v12931_v58  ;;  %9808 = vmatprep.subr.bf16.mxu0 %v10715_v39  ;;  %9854 = vmatpush1.bf16.msra.mxu1 %v10713_v38  ;;  %v12935_v55 = vpop.permute.xlu1 %2525  ;;  %v19768_v58 = vld [vmem:[#allocation8_spill] sm:$0xff] }
 0x1f4   :  { %19754 = vst [vmem:[#allocation115_spill] sm:$0xff] %v12935_v55  ;;  %3373 = vrot.lane.b32.xlu0 %v3211_v41, %s10548_s0  ;;  %3371 = vrot.lane.b32.xlu1 %v3210_v50, %s10548_s0  ;;  %v2667_v47 = vadd.f32 %v12935_v55, %v2420_v9  ;;  %v19758_v50 = vld [vmem:[#allocation72_spill] sm:$0xff]  ;;  %v19764_v55 = vld [vmem:[#allocation7_spill] sm:$0xff] }
 0x1f5   :  { %9810 = vmatpush1.bf16.msra.mxu0 %v10742_v48  ;;  %8747 = vmatprep.mubr.msk.f32.mxu1 %vm1164_vm0, %v12668_v46  ;;  %vm1143_vm13 = vcmp.ne.s32.totalorder %v19758_v50, 0  ;;  %v13605_v50 = vld [vmem:[%s18957_s1 + $0x268] sm:$0xff] }
 0x1f6   :  { %9856 = vmatprep.subr.bf16.mxu1 %v10727_v43  ;;  %2711 = vst.msk [vmem:[#allocation2 + $0xa8] sm:$0xff] %vm2688_vm7, %v2667_v47  ;;  %8742 = vmatprep.mubr.msk.f32.mxu0 %vm1164_vm0, %v12693_v53  ;;  %v12950_v28 = vpop.permute.xlu0 %2531  ;;  %v2427_v47 = vld [vmem:[#allocation2 + $0xe0] sm:$0xff] }
 0x1f7   :  { %19755 = vst [vmem:[#allocation116_spill] sm:$0xff] %v12950_v28  ;;  %4763 = vmatmul.mubr.f32.gmra.mrb[112].mxu1 %v12676_v35  ;;  %9812 = vmatprep.subr.bf16.mxu0 %v10754_v52  ;;  %v12957_v46 = vpop.permute.xlu1 %2529  ;;  %v3031_v63 = vpop.f32.mrb[60].mxu0 }
 0x1f8   :  { %19756 = vst [vmem:[#allocation117_spill] sm:$0xff] %v12957_v46  ;;  %9858 = vmatpush1.bf16.msra.mxu1 %v10752_v51  ;;  %4670 = vmatmul.mubr.f32.gmra.mrb[114].mxu0 %v12701_v54  ;;  %v3033_v41 = vpop.f32.mrb[61].mxu0  ;;  %v3179_v22 = vsel %vm1142_vm11, %v3031_v63, 0.0  ;;  %v19760_v46 = vld [vmem:[#allocation73_spill] sm:$0xff] }
 0x1f9   :  { %9814 = vmatpush1.bf16.msra.mxu0 %v10784_v62  ;;  %3377 = vrot.lane.b32.xlu0 %v3213_v13, %s10548_s0  ;;  %v3180_v9 = vsel %vm1143_vm13, %v3033_v41, 0.0  ;;  %vm1144_vm12 = vcmp.ne.s32.totalorder %v19760_v46, 0  ;;  %v19897_v46 = vld [vmem:[#allocation36_spill] sm:$0xff] }
 0x1fa   :  { %3375 = vrot.lane.b32.xlu1 %v3212_v1, %s10548_s0  ;;  %9860 = vmatprep.subr.bf16.mxu1 %v10766_v56  ;;  %v3132_v35 = vpop.f32.mrb[60].mxu1 }
 0x1fb   :  { %8748 = vmatprep.mubr.msk.f32.mxu1 %vm1164_vm0, %v12693_v53  ;;  %9816 = vmatprep.subr.bf16.mxu0 %v10790_v0  ;;  %v12974_v28 = vpop.permute.xlu0 %2539  ;;  %v3037_v13 = vpop.f32.mrb[62].mxu0 }
 0x1fc   :  { %19759 = vst [vmem:[#allocation118_spill] sm:$0xff] %v12974_v28  ;;  %9862 = vmatpush1.bf16.msra.mxu1 %v19585_v20  ;;  %v2674_v1 = vadd.f32 %v12974_v28, %v2427_v47  ;;  %8743 = vmatprep.mubr.msk.f32.mxu0 %vm1164_vm0, %v12725_v24  ;;  %v3134_v63 = vpop.f32.mrb[61].mxu1  ;;  %v3039_v41 = vpop.f32.mrb[63].mxu0  ;;  %v3181_v47 = vsel %vm1144_vm12, %v3132_v35, 0.0  ;;  %v19762_v28 = vld [vmem:[#allocation100_spill] sm:$0xff] }
 0x1fd   :  { %4768 = vmatmul.mubr.f32.gmra.mrb[114].mxu1 %v12701_v54  ;;  %9818 = vmatpush1.bf16.msra.mxu0 %v19587_v10  ;;  %v12983_v53 = vpop.permute.xlu1 %2541  ;;  %v3186_v63 = vsel %vm1142_vm11, %v3037_v13, 0.0 }
 0x1fe   :  { %19761 = vst [vmem:[#allocation119_spill] sm:$0xff] %v12983_v53  ;;  %3309 = vrot.lane.b32.xlu0 %v3179_v22, %s10548_s0  ;;  %3311 = vrot.lane.b32.xlu1 %v3180_v9, %s10548_s0  ;;  %2718 = vst.msk [vmem:[#allocation2 + $0xe0] sm:$0xff] %vm2688_vm7, %v2674_v1  ;;  %v19765_v53 = vld [vmem:[#allocation6_spill] sm:$0xff]  ;;  %v19766_v9 = vld [vmem:[#allocation9_spill] sm:$0xff] }
 0x1ff   :  { %9864 = vmatprep.subr.bf16.mxu1 %v19588_v37  ;;  %4676 = vmatmul.mubr.f32.gmra.mrb[116].mxu0 %v19762_v28  ;;  %v12994_v54 = vpop.permute.xlu0 %2543 }
 0x200   :  { %19763 = vst [vmem:[#allocation100_spill] sm:$0xff] %v12994_v54  ;;  %9820 = vmatprep.subr.bf16.mxu0 %v19764_v55  ;;  %9866 = vmatpush1.bf16.msra.mxu1 %v19765_v53  ;;  %v3137_v22 = vpop.f32.mrb[62].mxu1  ;;  %v3187_v54 = vsel %vm1143_vm13, %v3039_v41, 0.0  ;;  %v2434_v41 = vld [vmem:[#allocation2 + $0x118] sm:$0xff] }
 0x201   :  { %9822 = vmatpush1.bf16.msra.mxu0 %v19766_v9  ;;  %8749 = vmatprep.mubr.msk.f32.mxu1 %vm1164_vm0, %v12725_v24  ;;  %v3139_v35 = vpop.f32.mrb[63].mxu1  ;;  %v3188_v24 = vsel %vm1144_vm12, %v3137_v22, 0.0  ;;  %v13025_v22 = vld [vmem:[%s18957_s1 + $0x1e8] sm:$0xff] }
 0x202   :  { %3313 = vrot.lane.b32.xlu0 %v3181_v47, %s10548_s0  ;;  %3323 = vrot.lane.b32.xlu1 %v3186_v63, %s10548_s0  ;;  %v13003_v13 = vpop.permute.xlu1 %2545  ;;  %v3043_v1 = vpop.f32.mrb[64].mxu0  ;;  %v19770_v47 = vld [vmem:[#allocation11_spill] sm:$0xff]  ;;  %v19772_v35 = vld [vmem:[#allocation10_spill] sm:$0xff] }
 0x203   :  { %19767 = vst [vmem:[#allocation120_spill] sm:$0xff] %v13003_v13  ;;  %9868 = vmatprep.subr.bf16.mxu1 %v19768_v58  ;;  %8744 = vmatprep.mubr.msk.f32.mxu0 %vm1164_vm0, %v19769_v4  ;;  %v3045_v14 = vpop.f32.mrb[65].mxu0  ;;  %v19773_v13 = vld [vmem:[#allocation13_spill] sm:$0xff]  ;;  %v3193_v49 = vsel %vm1142_vm11, %v3043_v1, 0.0  ;;  %v19821_v58 = vld [vmem:[#allocation46_spill] sm:$0xff] }
 0x204   :  { %4773 = vmatmul.mubr.f32.gmra.mrb[116].mxu1 %v19762_v28  ;;  %9824 = vmatprep.subr.bf16.mxu0 %v19770_v47  ;;  %v13014_v63 = vpop.permute.xlu0 %2555  ;;  %v19775_v28 = vld [vmem:[#allocation12_spill] sm:$0xff] }
 0x205   :  { %19771 = vst [vmem:[#allocation102_spill] sm:$0xff] %v13014_v63  ;;  %9870 = vmatpush1.bf16.msra.mxu1 %v19772_v35  ;;  %4682 = vmatmul.mubr.f32.gmra.mrb[118].mxu0 %v12792_v15  ;;  %v19820_v35 = vld [vmem:[#allocation45_spill] sm:$0xff] }
 0x206   :  { %9826 = vmatpush1.bf16.msra.mxu0 %v19773_v13  ;;  %3325 = vrot.lane.b32.xlu0 %v3187_v54, %s10548_s0  ;;  %v13020_v42 = vpop.permute.xlu1 %2553  ;;  %v3194_v54 = vsel %vm1143_vm13, %v3045_v14, 0.0  ;;  %v19779_v14 = vld [vmem:[#allocation17_spill] sm:$0xff] }
 0x207   :  { %19774 = vst [vmem:[#allocation121_spill] sm:$0xff] %v13020_v42  ;;  %3327 = vrot.lane.b32.xlu1 %v3188_v24, %s10548_s0  ;;  %9872 = vmatprep.subr.bf16.mxu1 %v19775_v28  ;;  %v2681_v63 = vadd.f32 %v13020_v42, %v2434_v41  ;;  %v3142_v36 = vpop.f32.mrb[64].mxu1  ;;  %v19777_v24 = vld [vmem:[#allocation14_spill] sm:$0xff]  ;;  %v2433_v28 = vld [vmem:[#allocation2 + $0x110] sm:$0xff] }
 0x208   :  { %8750 = vmatprep.mubr.msk.f32.mxu1 %vm1164_vm0, %v19769_v4  ;;  %9828 = vmatprep.subr.bf16.mxu0 %v19776_v40  ;;  %v3049_v23 = vpop.f32.mrb[66].mxu0  ;;  %v3144_v31 = vpop.f32.mrb[65].mxu1  ;;  %v19781_v4 = vld [vmem:[#allocation16_spill] sm:$0xff]  ;;  %v19783_v42 = vld [vmem:[#allocation18_spill] sm:$0xff] }
 0x209   :  { %2725 = vst.msk [vmem:[#allocation2 + $0x118] sm:$0xff] %vm2688_vm7, %v2681_v63  ;;  %9874 = vmatpush1.bf16.msra.mxu1 %v19777_v24  ;;  %v13039_v18 = vpop.permute.xlu0 %2559  ;;  %v3051_v41 = vpop.f32.mrb[67].mxu0  ;;  %8763 = vmatprep.mubr.msk.f32.mxu0 %vm1164_vm0, %v13025_v22  ;;  %v3195_v31 = vsel %vm1144_vm12, %v3142_v36, 0.0  ;;  %v3200_v63 = vsel %vm1142_vm11, %v3049_v23, 0.0  ;;  %vm19239_vm7 = vcmask 490496   ;;  %v19790_v24 = vld [vmem:[#allocation25_spill] sm:$0xff] }
 0x20a   :  { %19778 = vst [vmem:[#allocation122_spill] sm:$0xff] %v13039_v18  ;;  %4778 = vmatmul.mubr.f32.gmra.mrb[118].mxu1 %v12792_v15  ;;  %9830 = vmatpush1.bf16.msra.mxu0 %v19779_v14  ;;  %v13045_v1 = vpop.permute.xlu1 %2557  ;;  %v19782_v18 = vld [vmem:[#allocation19_spill] sm:$0xff] }
 0x20b   :  { %19780 = vst [vmem:[#allocation123_spill] sm:$0xff] %v13045_v1  ;;  %3337 = vrot.lane.b32.xlu0 %v3193_v49, %s10548_s0  ;;  %3339 = vrot.lane.b32.xlu1 %v3194_v54, %s10548_s0  ;;  %v19785_v49 = vld [vmem:[#allocation21_spill] sm:$0xff]  ;;  %v19786_v54 = vld [vmem:[#allocation20_spill] sm:$0xff] }
 0x20c   :  { %9876 = vmatprep.subr.bf16.mxu1 %v19781_v4  ;;  %9832 = vmatprep.subr.bf16.mxu0 %v19782_v18  ;;  %v19788_v18 = vld [vmem:[#allocation23_spill] sm:$0xff] }
 0x20d   :  { %9878 = vmatpush1.bf16.msra.mxu1 %v19783_v42  ;;  %v13056_v15 = vpop.permute.xlu0 %2491  ;;  %v3147_v14 = vpop.f32.mrb[66].mxu1  ;;  %8769 = vmatprep.mubr.msk.f32.mxu1 %vm1164_vm0, %v13025_v22  ;;  %v3201_v42 = vsel %vm1143_vm13, %v3051_v41, 0.0 }
 0x20e   :  { %19784 = vst [vmem:[#allocation124_spill] sm:$0xff] %v13056_v15  ;;  %9834 = vmatpush1.bf16.msra.mxu0 %v19785_v49  ;;  %9880 = vmatprep.subr.bf16.mxu1 %v19786_v54  ;;  %v13062_v36 = vpop.permute.xlu1 %2493  ;;  %v3149_v1 = vpop.f32.mrb[67].mxu1  ;;  %v3202_v15 = vsel %vm1144_vm12, %v3147_v14, 0.0  ;;  %v19789_v49 = vld [vmem:[#allocation22_spill] sm:$0xff] }
 0x20f   :  { %19787 = vst [vmem:[#allocation125_spill] sm:$0xff] %v13062_v36  ;;  %3341 = vrot.lane.b32.xlu0 %v3195_v31, %s10548_s0  ;;  %3351 = vrot.lane.b32.xlu1 %v3200_v63, %s10548_s0  ;;  %v3055_v23 = vpop.f32.mrb[68].mxu0  ;;  %v2405_v1 = vld [vmem:[#allocation2 + $0x30] sm:$0xff]  ;;  %v19791_v63 = vld [vmem:[#allocation24_spill] sm:$0xff] }
 0x210   :  { %9836 = vmatprep.subr.bf16.mxu0 %v19788_v18  ;;  %v3057_v4 = vpop.f32.mrb[69].mxu0  ;;  %v19793_v18 = vld [vmem:[#allocation27_spill] sm:$0xff] }
 0x211   :  { %9882 = vmatpush1.bf16.msra.mxu1 %v19789_v49  ;;  %v2496_v54 = vpop.permute.xlu0 %2495  ;;  %v3207_v49 = vsel %vm1142_vm11, %v3055_v23, 0.0  ;;  %v13094_v23 = vld [vmem:[%s18957_s1 + $0x1e0] sm:$0xff] }
 0x212   :  { %9838 = vmatpush1.bf16.msra.mxu0 %v19790_v24  ;;  %v2573_v31 = vsel %vm19239_vm7, %v13062_v36, %v2496_v54  ;;  %9884 = vmatprep.subr.bf16.mxu1 %v19791_v63  ;;  %v13076_v41 = vpop.permute.xlu1 %2505  ;;  %v3208_v24 = vsel %vm1143_vm13, %v3057_v4, 0.0  ;;  %v19794_v54 = vld [vmem:[#allocation26_spill] sm:$0xff]  ;;  %v19795_v63 = vld [vmem:[#allocation29_spill] sm:$0xff] }
 0x213   :  { %19792 = vst [vmem:[#allocation126_spill] sm:$0xff] %v13076_v41  ;;  %3353 = vrot.lane.b32.xlu0 %v3201_v42, %s10548_s0  ;;  %3355 = vrot.lane.b32.xlu1 %v3202_v15, %s10548_s0  ;;  %v2652_v14 = vadd.f32 %v2573_v31, %v2405_v1  ;;  %v19797_v15 = vld [vmem:[#allocation28_spill] sm:$0xff] }
 0x214   :  { %9840 = vmatprep.subr.bf16.mxu0 %v19793_v18  ;;  %v3152_v40 = vpop.f32.mrb[68].mxu1  ;;  %v19799_v18 = vld [vmem:[#allocation30_spill] sm:$0xff] }
 0x215   :  { %2696 = vst.msk [vmem:[#allocation2 + $0x30] sm:$0xff] %vm2695_vm6, %v2652_v14  ;;  %9886 = vmatpush1.bf16.msra.mxu1 %v19794_v54  ;;  %v3061_v36 = vpop.f32.mrb[70].mxu0  ;;  %v3154_v41 = vpop.f32.mrb[69].mxu1  ;;  %v3209_v31 = vsel %vm1144_vm12, %v3152_v40, 0.0 }
 0x216   :  { %9842 = vmatpush1.bf16.msra.mxu0 %v19795_v63  ;;  %v13088_v42 = vpop.permute.xlu0 %2507  ;;  %9888 = vmatprep.subr.bf16.mxu1 %v19797_v15  ;;  %v3063_v4 = vpop.f32.mrb[71].mxu0  ;;  %v2412_v41 = vld [vmem:[#allocation2 + $0x68] sm:$0xff]  ;;  %v3214_v63 = vsel %vm1142_vm11, %v3061_v36, 0.0  ;;  %v19798_v15 = vld [vmem:[#allocation31_spill] sm:$0xff] }
 0x217   :  { %19796 = vst [vmem:[#allocation127_spill] sm:$0xff] %v13088_v42  ;;  %3365 = vrot.lane.b32.xlu0 %v3207_v49, %s10548_s0  ;;  %3367 = vrot.lane.b32.xlu1 %v3208_v24, %s10548_s0  ;;  %v2510_v1 = vpop.permute.xlu1 %2509  ;;  %v19800_v49 = vld [vmem:[#allocation32_spill] sm:$0xff] }
 0x218   :  { %v2579_v14 = vsel %vm19239_vm7, %v13088_v42, %v2510_v1  ;;  %9892 = vmatprep.subr.bf16.mxu0 %v19798_v15  ;;  %v13114_v1 = vld [vmem:[%s18957_s1 + $0x1f8] sm:$0xff]  ;;  %v19803_v42 = vld [vmem:[#allocation33_spill] sm:$0xff]  ;;  %v13205_v15 = vld [vmem:[%s18957_s1 + $0x228] sm:$0xff] }
 0x219   :  { %v2659_v54 = vadd.f32 %v2579_v14, %v2412_v41  ;;  %5212 = vmatmul.mubr.f32.vlgmr.msra.gmra.mrb[120].mxu0 %v13094_v23  ;;  %9890 = vmatpush1.bf16.msra.mxu1 %v19799_v18  ;;  %v3215_v14 = vsel %vm1143_vm13, %v3063_v4, 0.0  ;;  %v19808_v18 = vld [vmem:[#allocation37_spill] sm:$0xff] }
 0x21a   :  { %9894 = vmatpush1.bf16.msra.mxu0 %v19800_v49  ;;  %v13108_v24 = vpop.permute.xlu0 %2519  ;;  %9939 = vmatprep.subr.bf16.mxu1 %v19474_v2  ;;  %v3157_v40 = vpop.f32.mrb[70].mxu1  ;;  %v19804_v49 = vld [vmem:[#allocation34_spill] sm:$0xff] }
 0x21b   :  { %19801 = vst [vmem:[#allocation128_spill] sm:$0xff] %v13108_v24  ;;  %2703 = vst.msk [vmem:[#allocation2 + $0x68] sm:$0xff] %vm2695_vm6, %v2659_v54  ;;  %3369 = vrot.lane.b32.xlu0 %v3209_v31, %s10548_s0  ;;  %3379 = vrot.lane.b32.xlu1 %v3214_v63, %s10548_s0  ;;  %v13119_v36 = vpop.permute.xlu1 %2521  ;;  %v3159_v41 = vpop.f32.mrb[71].mxu1  ;;  %v3216_v24 = vsel %vm1144_vm12, %v3157_v40, 0.0  ;;  %v13133_v63 = vld [vmem:[%s18957_s1 + $0x1f0] sm:$0xff]  ;;  %v2419_v31 = vld [vmem:[#allocation2 + $0xa0] sm:$0xff] }
 0x21c   :  { %19802 = vst [vmem:[#allocation129_spill] sm:$0xff] %v13119_v36  ;;  %5313 = vmatmul.mubr.f32.vlgmr.msra.gmra.mrb[120].mxu1 %v13094_v23  ;;  %9896 = vmatprep.subr.bf16.mxu0 %v19803_v42  ;;  %v19805_v54 = vld [vmem:[#allocation35_spill] sm:$0xff]  ;;  %v19807_v42 = vld [vmem:[#allocation36_spill] sm:$0xff] }
 0x21d   :  { %9941 = vmatpush1.bf16.msra.mxu1 %v19804_v49  ;;  %8764 = vmatprep.mubr.msk.f32.mxu0 %vm1164_vm0, %v13114_v1 }
 0x21e   :  { %9898 = vmatpush1.bf16.msra.mxu0 %v19805_v54  ;;  %v2524_v4 = vpop.permute.xlu0 %2523  ;;  %9942 = vmatprep.subr.bf16.mxu1 %v19474_v2 }
 0x21f   :  { %3381 = vrot.lane.b32.xlu0 %v3215_v14, %s10548_s0  ;;  %3383 = vrot.lane.b32.xlu1 %v3216_v24, %s10548_s0  ;;  %v2585_v40 = vsel %vm19239_vm7, %v13119_v36, %v2524_v4  ;;  %v13141_v41 = vpop.permute.xlu1 %2533  ;;  %v13151_v24 = vld [vmem:[%s18957_s1 + $0x208] sm:$0xff]  ;;  %v2426_v36 = vld [vmem:[#allocation2 + $0xd8] sm:$0xff] }
 0x220   :  { %19806 = vst [vmem:[#allocation130_spill] sm:$0xff] %v13141_v41  ;;  %v2666_v49 = vadd.f32 %v2585_v40, %v2419_v31  ;;  %5218 = vmatmul.mubr.f32.gmra.mrb[122].mxu0 %v13133_v63  ;;  %9900 = vmatprep.subr.bf16.mxu0 %v19807_v42  ;;  %v19809_v14 = vld [vmem:[#allocation38_spill] sm:$0xff]  ;;  %v13161_v31 = vld [vmem:[%s18957_s1 + $0x200] sm:$0xff]  ;;  %v19811_v41 = vld [vmem:[#allocation39_spill] sm:$0xff] }
 0x221   :  { %9944 = vmatpush1.bf16.msra.mxu1 %v19808_v18  ;;  %8770 = vmatprep.mubr.msk.f32.mxu1 %vm1164_vm0, %v13114_v1  ;;  %v19812_v18 = vld [vmem:[#allocation40_spill] sm:$0xff] }
 0x222   :  { %2710 = vst.msk [vmem:[#allocation2 + $0xa0] sm:$0xff] %vm2695_vm6, %v2666_v49  ;;  %9902 = vmatpush1.bf16.msra.mxu0 %v19809_v14  ;;  %v13155_v4 = vpop.permute.xlu0 %2535  ;;  %5319 = vmatmul.mubr.f32.gmra.mrb[122].mxu1 %v13133_v63  ;;  %v13176_v42 = vld [vmem:[%s18957_s1 + $0x218] sm:$0xff] }
 0x223   :  { %19810 = vst [vmem:[#allocation131_spill] sm:$0xff] %v13155_v4  ;;  %9945 = vmatprep.subr.bf16.mxu1 %v19474_v2  ;;  %v2538_v40 = vpop.permute.xlu1 %2537  ;;  %9904 = vmatprep.subr.bf16.mxu0 %v19811_v41  ;;  %v19813_v41 = vld [vmem:[#allocation41_spill] sm:$0xff] }
 0x224   :  { %v2591_v49 = vsel %vm19239_vm7, %v13155_v4, %v2538_v40  ;;  %8765 = vmatprep.mubr.msk.f32.mxu0 %vm1164_vm0, %v13151_v24  ;;  %8771 = vmatprep.mubr.msk.f32.mxu1 %vm1164_vm0, %v13151_v24  ;;  %v13185_v40 = vld [vmem:[%s18957_s1 + $0x210] sm:$0xff] }
 0x225   :  { %v2673_v14 = vadd.f32 %v2591_v49, %v2426_v36  ;;  %9947 = vmatpush1.bf16.msra.mxu1 %v19812_v18  ;;  %5224 = vmatmul.mubr.f32.gmra.mrb[124].mxu0 %v13161_v31  ;;  %v19816_v49 = vld [vmem:[#allocation42_spill] sm:$0xff] }
 0x226   :  { %9906 = vmatpush1.bf16.msra.mxu0 %v19813_v41  ;;  %v13179_v54 = vpop.permute.xlu0 %2547  ;;  %9948 = vmatprep.subr.bf16.mxu1 %v19474_v2  ;;  %v19818_v41 = vld [vmem:[#allocation44_spill] sm:$0xff] }
 0x227   :  { %19814 = vst [vmem:[#allocation132_spill] sm:$0xff] %v13179_v54  ;;  %2717 = vst.msk [vmem:[#allocation2 + $0xd8] sm:$0xff] %vm2695_vm6, %v2673_v14  ;;  %v13188_v36 = vpop.permute.xlu1 %2549  ;;  %9908 = vmatprep.subr.bf16.mxu0 %v19816_v49  ;;  %5325 = vmatmul.mubr.f32.gmra.mrb[124].mxu1 %v13161_v31  ;;  %v19817_v54 = vld [vmem:[#allocation43_spill] sm:$0xff] }
 0x228   :  { %19815 = vst [vmem:[#allocation133_spill] sm:$0xff] %v13188_v36  ;;  %8766 = vmatprep.mubr.msk.f32.mxu0 %vm1164_vm0, %v13176_v42  ;;  %8772 = vmatprep.mubr.msk.f32.mxu1 %vm1164_vm0, %v13176_v42 }
 0x229   :  { %9950 = vmatpush1.bf16.msra.mxu1 %v19817_v54  ;;  %v3647_v4 = vpop.f32.mrb[72].mxu0  ;;  %5230 = vmatmul.mubr.f32.gmra.mrb[126].mxu0 %v13185_v40 }
 0x22a   :  { %9910 = vmatpush1.bf16.msra.mxu0 %v19818_v41  ;;  %v2552_v14 = vpop.permute.xlu0 %2551  ;;  %9951 = vmatprep.subr.bf16.mxu1 %v19474_v2  ;;  %v3979_v49 = vsel %vm1145_vm2, %v3647_v4, 0.0  ;;  %v3649_v18 = vpop.f32.mrb[73].mxu0 }
 0x22b   :  { %v2597_v54 = vsel %vm19239_vm7, %v13188_v36, %v2552_v14  ;;  %v13209_v13 = vpop.permute.xlu1 %2561  ;;  %v3980_v41 = vsel %vm1146_vm5, %v3649_v18, 0.0  ;;  %9912 = vmatprep.subr.bf16.mxu0 %v19820_v35  ;;  %4105 = vrot.lane.b32.xlu0 %v3979_v49, %s10549_s14  ;;  %v13225_v18 = vld [vmem:[%s18957_s1 + $0x220] sm:$0xff]  ;;  %v2440_v35 = vld [vmem:[#allocation2 + $0x148] sm:$0xff] }
 0x22c   :  { %19819 = vst [vmem:[#allocation134_spill] sm:$0xff] %v13209_v13  ;;  %v2680_v4 = vadd.f32 %v2597_v54, %v2433_v28  ;;  %4107 = vrot.lane.b32.xlu1 %v3980_v41, %s10549_s14  ;;  %v3748_v47 = vpop.f32.mrb[72].mxu1  ;;  %5331 = vmatmul.mubr.f32.gmra.mrb[126].mxu1 %v13185_v40  ;;  %v19822_v28 = vld [vmem:[#allocation47_spill] sm:$0xff] }
 0x22d   :  { %9953 = vmatpush1.bf16.msra.mxu1 %v19821_v58  ;;  %v3981_v14 = vsel %vm1147_vm3, %v3748_v47, 0.0  ;;  %v3750_v13 = vpop.f32.mrb[73].mxu1  ;;  %v3653_v36 = vpop.f32.mrb[74].mxu0  ;;  %8767 = vmatprep.mubr.msk.f32.mxu0 %vm1164_vm0, %v13205_v15  ;;  %v19824_v58 = vld [vmem:[#allocation48_spill] sm:$0xff] }
 0x22e   :  { %2724 = vst.msk [vmem:[#allocation2 + $0x110] sm:$0xff] %vm2695_vm6, %v2680_v4  ;;  %9914 = vmatpush1.bf16.msra.mxu0 %v19822_v28  ;;  %v13229_v54 = vpop.permute.xlu0 %2563  ;;  %9954 = vmatprep.subr.bf16.mxu1 %v19474_v2  ;;  %v3982_v47 = vsel %vm1148_vm4, %v3750_v13, 0.0  ;;  %v3655_v41 = vpop.f32.mrb[75].mxu0  ;;  %v19825_v13 = vld [vmem:[#allocation49_spill] sm:$0xff] }
 0x22f   :  { %19823 = vst [vmem:[#allocation135_spill] sm:$0xff] %v13229_v54  ;;  %v2566_v49 = vpop.permute.xlu1 %2565  ;;  %9916 = vmatprep.subr.bf16.mxu0 %v19824_v58  ;;  %4109 = vrot.lane.b32.xlu0 %v3981_v14, %s10549_s14  ;;  %v3987_v4 = vsel %vm1146_vm5, %v3655_v41, 0.0  ;;  %v3986_v58 = vsel %vm1145_vm2, %v3653_v36, 0.0  ;;  %v19826_v14 = vld [vmem:[#allocation50_spill] sm:$0xff] }
 0x230   :  { %v2603_v9 = vsel %vm19239_vm7, %v13229_v54, %v2566_v49  ;;  %4111 = vrot.lane.b32.xlu1 %v3982_v47, %s10549_s14  ;;  %v3754_v28 = vpop.f32.mrb[74].mxu1  ;;  %5236 = vmatmul.mubr.f32.gmra.mrb[128].mxu0 %v13225_v18  ;;  %v13252_v47 = vld [vmem:[%s18957_s1 + $0x238] sm:$0xff]  ;;  %vm3513_vm7 = vcmask 613376  }
 0x231   :  { %v2687_v53 = vadd.f32 %v2603_v9, %v2440_v35  ;;  %9956 = vmatpush1.bf16.msra.mxu1 %v19825_v13  ;;  %v3756_v55 = vpop.f32.mrb[75].mxu1  ;;  %8773 = vmatprep.mubr.msk.f32.mxu1 %vm1164_vm0, %v13205_v15  ;;  %19827 = vst [vmem:[#allocation136_spill] sm:$0xff] %v13252_v47  ;;  %v19828_v9 = vld [vmem:[#allocation51_spill] sm:$0xff]  ;;  %v19829_v49 = vld [vmem:[#allocation52_spill] sm:$0xff]  ;;  %v3988_v54 = vsel %vm1147_vm3, %v3754_v28, 0.0 }
 0x232   :  { %9918 = vmatpush1.bf16.msra.mxu0 %v19826_v14  ;;  %9957 = vmatprep.subr.bf16.mxu1 %v19474_v2  ;;  %v3989_v36 = vsel %vm1148_vm4, %v3756_v55, 0.0  ;;  %v19831_v55 = vld [vmem:[#allocation54_spill] sm:$0xff]  ;;  %v19833_v14 = vld [vmem:[#allocation56_spill] sm:$0xff] }
 0x233   :  { %2731 = vst.msk [vmem:[#allocation2 + $0x148] sm:$0xff] %vm2695_vm6, %v2687_v53  ;;  %9920 = vmatprep.subr.bf16.mxu0 %v19828_v9  ;;  %4121 = vrot.lane.b32.xlu0 %v3987_v4, %s10549_s14  ;;  %v3659_v35 = vpop.f32.mrb[76].mxu0  ;;  %v13269_v53 = vld [vmem:[%s18957_s1 + $0x230] sm:$0xff]  ;;  %vm3506_vm6 = vcmask 1048024  }
 0x234   :  { %4119 = vrot.lane.b32.xlu1 %v3986_v58, %s10549_s14  ;;  %v3661_v41 = vpop.f32.mrb[77].mxu0  ;;  %5337 = vmatmul.mubr.f32.gmra.mrb[128].mxu1 %v13225_v18  ;;  %v19830_v58 = vld [vmem:[#allocation53_spill] sm:$0xff]  ;;  %v3993_v28 = vsel %vm1145_vm2, %v3659_v35, 0.0  ;;  %v19832_v9 = vld [vmem:[#allocation55_spill] sm:$0xff] }
 0x235   :  { %9959 = vmatpush1.bf16.msra.mxu1 %v19829_v49  ;;  %8768 = vmatprep.mubr.msk.f32.mxu0 %vm1164_vm0, %v13252_v47  ;;  %v3217_v35 = vld [vmem:[#allocation2] sm:$0xff] }
 0x236   :  { %9922 = vmatpush1.bf16.msra.mxu0 %v19830_v58  ;;  %9960 = vmatprep.subr.bf16.mxu1 %v19474_v2  ;;  %v3994_v58 = vsel %vm1146_vm5, %v3661_v41, 0.0 }
 0x237   :  { %9924 = vmatprep.subr.bf16.mxu0 %v19831_v55  ;;  %4125 = vrot.lane.b32.xlu0 %v3989_v36, %s10549_s14  ;;  %v3760_v4 = vpop.f32.mrb[76].mxu1  ;;  %v19834_v36 = vld [vmem:[#allocation57_spill] sm:$0xff] }
 0x238   :  { %4123 = vrot.lane.b32.xlu1 %v3988_v54, %s10549_s14  ;;  %5242 = vmatmul.mubr.f32.gmra.mrb[130].mxu0 %v13269_v53  ;;  %v3762_v49 = vpop.f32.mrb[77].mxu1  ;;  %v3995_v41 = vsel %vm1147_vm3, %v3760_v4, 0.0 }
 0x239   :  { %9962 = vmatpush1.bf16.msra.mxu1 %v19832_v9  ;;  %8774 = vmatprep.mubr.msk.f32.mxu1 %vm1164_vm0, %v13252_v47  ;;  %v3665_v55 = vpop.f32.mrb[78].mxu0 }
 0x23a   :  { %9926 = vmatpush1.bf16.msra.mxu0 %v19833_v14  ;;  %9963 = vmatprep.subr.bf16.mxu1 %v19474_v2  ;;  %v3667_v54 = vpop.f32.mrb[79].mxu0 }
 0x23b   :  { %9928 = vmatprep.subr.bf16.mxu0 %v19834_v36  ;;  %4133 = vrot.lane.b32.xlu0 %v3993_v28, %s10549_s14  ;;  %v13288_v13 = vpop.permute.xlu0 %3301  ;;  %v3996_v28 = vsel %vm1148_vm4, %v3762_v49, 0.0  ;;  %v4001_v49 = vsel %vm1146_vm5, %v3667_v54, 0.0 }
 0x23c   :  { %19835 = vst [vmem:[#allocation137_spill] sm:$0xff] %v13288_v13  ;;  %4135 = vrot.lane.b32.xlu1 %v3994_v58, %s10549_s14  ;;  %v3464_v9 = vadd.f32 %v13288_v13, %v3217_v35  ;;  %v13294_v47 = vpop.permute.xlu1 %3303  ;;  %5343 = vmatmul.mubr.f32.gmra.mrb[130].mxu1 %v13269_v53  ;;  %v3766_v14 = vpop.f32.mrb[78].mxu1 }
 0x23d   :  { %19836 = vst [vmem:[#allocation138_spill] sm:$0xff] %v13294_v47  ;;  %9965 = vmatpush1.bf16.msra.mxu1 %v19740_v60  ;;  %v3768_v36 = vpop.f32.mrb[79].mxu1  ;;  %8775 = vmatprep.mubr.msk.f32.mxu0 %vm1164_vm0, %v13025_v22 }
 0x23e   :  { %9930 = vmatpush1.bf16.msra.mxu0 %v19742_v6  ;;  %9966 = vmatprep.subr.bf16.mxu1 %v19474_v2  ;;  %3507 = vst.msk [vmem:[#allocation2] sm:$0xff] %vm3506_vm6, %v3464_v9  ;;  %v4000_v9 = vsel %vm1145_vm2, %v3665_v55, 0.0 }
 0x23f   :  { %9932 = vmatprep.subr.bf16.mxu0 %v19649_v29  ;;  %4137 = vrot.lane.b32.xlu0 %v3995_v41, %s10549_s14  ;;  %v13307_v58 = vpop.permute.xlu0 %3305  ;;  %v3224_v41 = vld [vmem:[#allocation2 + $0x38] sm:$0xff] }
 0x240   :  { %19837 = vst [vmem:[#allocation139_spill] sm:$0xff] %v13307_v58  ;;  %4139 = vrot.lane.b32.xlu1 %v3996_v28, %s10549_s14  ;;  %v13312_v4 = vpop.permute.xlu1 %3307  ;;  %v3671_v35 = vpop.f32.mrb[80].mxu0  ;;  %8781 = vmatprep.mubr.msk.f32.mxu1 %vm1164_vm0, %v13025_v22  ;;  %v4003_v22 = vsel %vm1148_vm4, %v3768_v36, 0.0 }
 0x241   :  { %19838 = vst [vmem:[#allocation140_spill] sm:$0xff] %v13312_v4  ;;  %9968 = vmatpush1.bf16.msra.mxu1 %v19650_v32  ;;  %v3673_v13 = vpop.f32.mrb[81].mxu0  ;;  %v4002_v4 = vsel %vm1147_vm3, %v3766_v14, 0.0 }
 0x242   :  { %9934 = vmatpush1.bf16.msra.mxu0 %v11438_v30  ;;  %9969 = vmatprep.subr.bf16.mxu1 %v19474_v2 }
 0x243   :  { %9936 = vmatprep.subr.bf16.mxu0 %v11442_v61  ;;  %4149 = vrot.lane.b32.xlu0 %v4001_v49, %s10549_s14  ;;  %v13323_v54 = vpop.permute.xlu0 %3317 }
 0x244   :  { %19839 = vst [vmem:[#allocation141_spill] sm:$0xff] %v13323_v54  ;;  %4147 = vrot.lane.b32.xlu1 %v4000_v9, %s10549_s14  ;;  %v13328_v28 = vpop.permute.xlu1 %3315  ;;  %v3772_v55 = vpop.f32.mrb[80].mxu1  ;;  %v4007_v9 = vsel %vm1145_vm2, %v3671_v35, 0.0  ;;  %v19875_v54 = vld [vmem:[#allocation21_spill] sm:$0xff] }
 0x245   :  { %19840 = vst [vmem:[#allocation142_spill] sm:$0xff] %v13328_v28  ;;  %9971 = vmatpush1.bf16.msra.mxu1 %v11444_v59  ;;  %v3471_v58 = vadd.f32 %v13328_v28, %v3224_v41  ;;  %v3774_v47 = vpop.f32.mrb[81].mxu1 }
 0x246   :  { %9938 = vmatpush1.bf16.msra.mxu0 %v11460_v45  ;;  %9972 = vmatprep.subr.bf16.mxu1 %v19474_v2 }
 0x247   :  { %9976 = vmatprep.subr.bf16.mxu0 %v10610_v3  ;;  %3515 = vst.msk [vmem:[#allocation2 + $0x38] sm:$0xff] %vm3506_vm6, %v3471_v58  ;;  %4153 = vrot.lane.b32.xlu0 %v4003_v22, %s10549_s14  ;;  %v13339_v36 = vpop.permute.xlu0 %3321  ;;  %v4008_v58 = vsel %vm1146_vm5, %v3673_v13, 0.0  ;;  %v4009_v13 = vsel %vm1147_vm3, %v3772_v55, 0.0  ;;  %v3238_v55 = vld [vmem:[#allocation2 + $0xa8] sm:$0xff] }
 0x248   :  { %19841 = vst [vmem:[#allocation143_spill] sm:$0xff] %v13339_v36  ;;  %4151 = vrot.lane.b32.xlu1 %v4002_v4, %s10549_s14  ;;  %v13342_v49 = vpop.permute.xlu1 %3319  ;;  %v3677_v14 = vpop.f32.mrb[82].mxu0  ;;  %v3231_v4 = vld [vmem:[#allocation2 + $0x70] sm:$0xff] }
 0x249   :  { %19842 = vst [vmem:[#allocation144_spill] sm:$0xff] %v13342_v49  ;;  %5414 = vmatmul.mubr.f32.vlgmr.msra.gmra.mrb[132].mxu0 %v13094_v23  ;;  %9974 = vmatpush1.bf16.msra.mxu1 %v11464_v19  ;;  %v3679_v41 = vpop.f32.mrb[83].mxu0 }
 0x24a   :  { %9978 = vmatpush1.bf16.msra.mxu0 %v10621_v7  ;;  %10024 = vmatprep.subr.bf16.mxu1 %v10623_v8 }
 0x24b   :  { %8776 = vmatprep.mubr.msk.f32.mxu0 %vm1164_vm0, %v13114_v1  ;;  %9980 = vmatprep.subr.bf16.mxu0 %v10648_v16  ;;  %v13355_v22 = vpop.permute.xlu0 %3329 }
 0x24c   :  { %19843 = vst [vmem:[#allocation145_spill] sm:$0xff] %v13355_v22  ;;  %5515 = vmatmul.mubr.f32.vlgmr.msra.gmra.mrb[132].mxu1 %v13094_v23  ;;  %4161 = vrot.lane.b32.xlu0 %v4007_v9, %s10549_s14  ;;  %v3478_v35 = vadd.f32 %v13355_v22, %v3231_v4  ;;  %v13360_v36 = vpop.permute.xlu1 %3331  ;;  %v3778_v49 = vpop.f32.mrb[82].mxu1  ;;  %v4010_v23 = vsel %vm1148_vm4, %v3774_v47, 0.0  ;;  %v4015_v47 = vsel %vm1146_vm5, %v3679_v41, 0.0  ;;  %v19873_v22 = vld [vmem:[#allocation18_spill] sm:$0xff] }
 0x24d   :  { %19844 = vst [vmem:[#allocation146_spill] sm:$0xff] %v13360_v36  ;;  %10026 = vmatpush1.bf16.msra.mxu1 %v10635_v12  ;;  %5420 = vmatmul.mubr.f32.gmra.mrb[134].mxu0 %v13133_v63  ;;  %v3780_v28 = vpop.f32.mrb[83].mxu1 }
 0x24e   :  { %9982 = vmatpush1.bf16.msra.mxu0 %v10650_v17  ;;  %4163 = vrot.lane.b32.xlu1 %v4008_v58, %s10549_s14  ;;  %3522 = vst.msk [vmem:[#allocation2 + $0x70] sm:$0xff] %vm3506_vm6, %v3478_v35  ;;  %v4017_v41 = vsel %vm1148_vm4, %v3780_v28, 0.0 }
 0x24f   :  { %10028 = vmatprep.subr.bf16.mxu1 %v10662_v21  ;;  %8782 = vmatprep.mubr.msk.f32.mxu1 %vm1164_vm0, %v13114_v1  ;;  %v13374_v9 = vpop.permute.xlu0 %3333  ;;  %v4014_v1 = vsel %vm1145_vm2, %v3677_v14, 0.0 }
 0x250   :  { %19845 = vst [vmem:[#allocation147_spill] sm:$0xff] %v13374_v9  ;;  %9984 = vmatprep.subr.bf16.mxu0 %v10676_v26  ;;  %5520 = vmatmul.mubr.f32.gmra.mrb[134].mxu1 %v13133_v63  ;;  %v13378_v58 = vpop.permute.xlu1 %3335 }
 0x251   :  { %19846 = vst [vmem:[#allocation148_spill] sm:$0xff] %v13378_v58  ;;  %10030 = vmatpush1.bf16.msra.mxu1 %v10674_v25  ;;  %4165 = vrot.lane.b32.xlu0 %v4009_v13, %s10549_s14  ;;  %v4016_v13 = vsel %vm1147_vm3, %v3778_v49, 0.0  ;;  %v19865_v58 = vld [vmem:[#allocation12_spill] sm:$0xff] }
 0x252   :  { %9986 = vmatpush1.bf16.msra.mxu0 %v10698_v33  ;;  %4167 = vrot.lane.b32.xlu1 %v4010_v23, %s10549_s14 }
 0x253   :  { %8777 = vmatprep.mubr.msk.f32.mxu0 %vm1164_vm0, %v13151_v24  ;;  %10032 = vmatprep.subr.bf16.mxu1 %v10700_v34  ;;  %v13391_v63 = vpop.permute.xlu0 %3345 }
 0x254   :  { %19847 = vst [vmem:[#allocation149_spill] sm:$0xff] %v13391_v63  ;;  %5426 = vmatmul.mubr.f32.gmra.mrb[136].mxu0 %v13161_v31  ;;  %9988 = vmatprep.subr.bf16.mxu0 %v10715_v39  ;;  %v13395_v4 = vpop.permute.xlu1 %3343 }
 0x255   :  { %19848 = vst [vmem:[#allocation150_spill] sm:$0xff] %v13395_v4  ;;  %10034 = vmatpush1.bf16.msra.mxu1 %v10713_v38  ;;  %4177 = vrot.lane.b32.xlu0 %v4015_v47, %s10549_s14  ;;  %v3485_v14 = vadd.f32 %v13395_v4, %v3238_v55  ;;  %v19864_v4 = vld [vmem:[#allocation13_spill] sm:$0xff] }
 0x256   :  { %9990 = vmatpush1.bf16.msra.mxu0 %v10742_v48  ;;  %4175 = vrot.lane.b32.xlu1 %v4014_v1, %s10549_s14  ;;  %v3245_v1 = vld [vmem:[#allocation2 + $0xe0] sm:$0xff] }
 0x257   :  { %8783 = vmatprep.mubr.msk.f32.mxu1 %vm1164_vm0, %v13151_v24  ;;  %10036 = vmatprep.subr.bf16.mxu1 %v10727_v43  ;;  %3529 = vst.msk [vmem:[#allocation2 + $0xa8] sm:$0xff] %vm3506_vm6, %v3485_v14  ;;  %v13408_v35 = vpop.permute.xlu0 %3349 }
 0x258   :  { %19849 = vst [vmem:[#allocation151_spill] sm:$0xff] %v13408_v35  ;;  %8778 = vmatprep.mubr.msk.f32.mxu0 %vm1164_vm0, %v13176_v42  ;;  %5525 = vmatmul.mubr.f32.gmra.mrb[136].mxu1 %v13161_v31  ;;  %v13415_v23 = vpop.permute.xlu1 %3347  ;;  %v19859_v35 = vld [vmem:[#allocation136_spill] sm:$0xff] }
 0x259   :  { %19850 = vst [vmem:[#allocation152_spill] sm:$0xff] %v13415_v23  ;;  %9992 = vmatprep.subr.bf16.mxu0 %v10754_v52  ;;  %10038 = vmatpush1.bf16.msra.mxu1 %v10752_v51  ;;  %v3849_v24 = vpop.f32.mrb[84].mxu0  ;;  %v3252_v23 = vld [vmem:[#allocation2 + $0x118] sm:$0xff] }
 0x25a   :  { %5432 = vmatmul.mubr.f32.gmra.mrb[138].mxu0 %v13185_v40  ;;  %4181 = vrot.lane.b32.xlu0 %v4017_v41, %s10549_s14  ;;  %v3851_v28 = vpop.f32.mrb[85].mxu0  ;;  %v3983_v49 = vsel %vm1149_vm8, %v3849_v24, 0.0 }
 0x25b   :  { %9994 = vmatpush1.bf16.msra.mxu0 %v10784_v62  ;;  %4179 = vrot.lane.b32.xlu1 %v4016_v13, %s10549_s14  ;;  %v3984_v31 = vsel %vm1150_vm9, %v3851_v28, 0.0 }
 0x25c   :  { %10040 = vmatprep.subr.bf16.mxu1 %v10766_v56  ;;  %8784 = vmatprep.mubr.msk.f32.mxu1 %vm1164_vm0, %v13176_v42  ;;  %v3950_v47 = vpop.f32.mrb[84].mxu1 }
 0x25d   :  { %9996 = vmatprep.subr.bf16.mxu0 %v10790_v0  ;;  %10042 = vmatpush1.bf16.msra.mxu1 %v19585_v20  ;;  %v13432_v55 = vpop.permute.xlu0 %3357  ;;  %v3952_v14 = vpop.f32.mrb[85].mxu1  ;;  %v3985_v24 = vsel %vm19292_vm10, %v3950_v47, 0.0 }
 0x25e   :  { %19851 = vst [vmem:[#allocation153_spill] sm:$0xff] %v13432_v55  ;;  %5530 = vmatmul.mubr.f32.gmra.mrb[138].mxu1 %v13185_v40  ;;  %4113 = vrot.lane.b32.xlu0 %v3983_v49, %s10549_s14  ;;  %v3492_v41 = vadd.f32 %v13432_v55, %v3245_v1  ;;  %v13437_v13 = vpop.permute.xlu1 %3359  ;;  %v3855_v42 = vpop.f32.mrb[86].mxu0  ;;  %v19853_v49 = vld [vmem:[#allocation7_spill] sm:$0xff]  ;;  %v19857_v55 = vld [vmem:[#allocation9_spill] sm:$0xff] }
 0x25f   :  { %19852 = vst [vmem:[#allocation154_spill] sm:$0xff] %v13437_v13  ;;  %9998 = vmatpush1.bf16.msra.mxu0 %v19587_v10  ;;  %4115 = vrot.lane.b32.xlu1 %v3984_v31, %s10549_s14  ;;  %v3857_v28 = vpop.f32.mrb[87].mxu0  ;;  %v3990_v40 = vsel %vm1149_vm8, %v3855_v42, 0.0  ;;  %v19855_v31 = vld [vmem:[#allocation6_spill] sm:$0xff]  ;;  %v19858_v13 = vld [vmem:[#allocation8_spill] sm:$0xff] }
 0x260   :  { %8779 = vmatprep.mubr.msk.f32.mxu0 %vm1164_vm0, %v13205_v15  ;;  %10044 = vmatprep.subr.bf16.mxu1 %v19588_v37  ;;  %3536 = vst.msk [vmem:[#allocation2 + $0xe0] sm:$0xff] %vm3506_vm6, %v3492_v41  ;;  %v3991_v42 = vsel %vm1150_vm9, %v3857_v28, 0.0 }
 0x261   :  { %5438 = vmatmul.mubr.f32.gmra.mrb[140].mxu0 %v13225_v18  ;;  %10000 = vmatprep.subr.bf16.mxu0 %v19853_v49  ;;  %v13451_v1 = vpop.permute.xlu0 %3361 }
 0x262   :  { %19854 = vst [vmem:[#allocation7_spill] sm:$0xff] %v13451_v1  ;;  %10046 = vmatpush1.bf16.msra.mxu1 %v19855_v31  ;;  %4117 = vrot.lane.b32.xlu0 %v3985_v24, %s10549_s14  ;;  %v3955_v47 = vpop.f32.mrb[86].mxu1  ;;  %v13455_v14 = vpop.permute.xlu1 %3363 }
 0x263   :  { %19856 = vst [vmem:[#allocation6_spill] sm:$0xff] %v13455_v14  ;;  %10002 = vmatpush1.bf16.msra.mxu0 %v19857_v55  ;;  %4127 = vrot.lane.b32.xlu1 %v3990_v40, %s10549_s14  ;;  %v3957_v41 = vpop.f32.mrb[87].mxu1  ;;  %v3992_v24 = vsel %vm19292_vm10, %v3955_v47, 0.0  ;;  %v19860_v40 = vld [vmem:[#allocation11_spill] sm:$0xff] }
 0x264   :  { %8785 = vmatprep.mubr.msk.f32.mxu1 %vm1164_vm0, %v13205_v15  ;;  %10048 = vmatprep.subr.bf16.mxu1 %v19858_v13  ;;  %v3861_v1 = vpop.f32.mrb[88].mxu0  ;;  %v19861_v41 = vld [vmem:[#allocation10_spill] sm:$0xff] }
 0x265   :  { %8780 = vmatprep.mubr.msk.f32.mxu0 %vm1164_vm0, %v19859_v35  ;;  %5535 = vmatmul.mubr.f32.gmra.mrb[140].mxu1 %v13225_v18  ;;  %v3863_v14 = vpop.f32.mrb[89].mxu0  ;;  %v3997_v18 = vsel %vm1149_vm8, %v3861_v1, 0.0 }
 0x266   :  { %10004 = vmatprep.subr.bf16.mxu0 %v19860_v40  ;;  %10050 = vmatpush1.bf16.msra.mxu1 %v19861_v41  ;;  %v13471_v28 = vpop.permute.xlu0 %3373  ;;  %v13473_v15 = vpop.permute.xlu1 %3371 }
 0x267   :  { %19862 = vst [vmem:[#allocation9_spill] sm:$0xff] %v13471_v28  ;;  %19863 = vst [vmem:[#allocation136_spill] sm:$0xff] %v13473_v15  ;;  %5444 = vmatmul.mubr.f32.gmra.mrb[142].mxu0 %v13269_v53  ;;  %4129 = vrot.lane.b32.xlu0 %v3991_v42, %s10549_s14  ;;  %v3499_v47 = vadd.f32 %v13473_v15, %v3252_v23  ;;  %v3998_v42 = vsel %vm1150_vm9, %v3863_v14, 0.0  ;;  %v19866_v23 = vld [vmem:[#allocation15_spill] sm:$0xff]  ;;  %v19867_v15 = vld [vmem:[#allocation14_spill] sm:$0xff] }
 0x268   :  { %10006 = vmatpush1.bf16.msra.mxu0 %v19864_v4  ;;  %4131 = vrot.lane.b32.xlu1 %v3992_v24, %s10549_s14  ;;  %v3960_v63 = vpop.f32.mrb[88].mxu1 }
 0x269   :  { %10052 = vmatprep.subr.bf16.mxu1 %v19865_v58  ;;  %8786 = vmatprep.mubr.msk.f32.mxu1 %vm1164_vm0, %v19859_v35  ;;  %3543 = vst.msk [vmem:[#allocation2 + $0x118] sm:$0xff] %vm3506_vm6, %v3499_v47  ;;  %v3962_v28 = vpop.f32.mrb[89].mxu1  ;;  %v13497_v35 = vld [vmem:[%s18957_s1 + $0x248] sm:$0xff]  ;;  %v19869_v47 = vld [vmem:[#allocation17_spill] sm:$0xff]  ;;  %v3999_v14 = vsel %vm19292_vm10, %v3960_v63, 0.0  ;;  %vm19278_vm6 = vcmask 482304  }
 0x26a   :  { %10008 = vmatprep.subr.bf16.mxu0 %v19866_v23  ;;  %10054 = vmatpush1.bf16.msra.mxu1 %v19867_v15  ;;  %v3867_v24 = vpop.f32.mrb[90].mxu0 }
 0x26b   :  { %5540 = vmatmul.mubr.f32.gmra.mrb[142].mxu1 %v13269_v53  ;;  %4141 = vrot.lane.b32.xlu0 %v3997_v18, %s10549_s14  ;;  %v13492_v1 = vpop.permute.xlu0 %3377  ;;  %v3869_v9 = vpop.f32.mrb[91].mxu0  ;;  %v19871_v53 = vld [vmem:[#allocation16_spill] sm:$0xff]  ;;  %v19872_v18 = vld [vmem:[#allocation19_spill] sm:$0xff] }
 0x26c   :  { %19868 = vst [vmem:[#allocation155_spill] sm:$0xff] %v13492_v1  ;;  %10010 = vmatpush1.bf16.msra.mxu0 %v19869_v47  ;;  %4143 = vrot.lane.b32.xlu1 %v3998_v42, %s10549_s14  ;;  %v13503_v28 = vpop.permute.xlu1 %3375  ;;  %v4004_v1 = vsel %vm1149_vm8, %v3867_v24, 0.0  ;;  %v19874_v42 = vld [vmem:[#allocation20_spill] sm:$0xff] }
 0x26d   :  { %19870 = vst [vmem:[#allocation156_spill] sm:$0xff] %v13503_v28  ;;  %10056 = vmatprep.subr.bf16.mxu1 %v19871_v53  ;;  %10012 = vmatprep.subr.bf16.mxu0 %v19872_v18  ;;  %v4005_v28 = vsel %vm1150_vm9, %v3869_v9, 0.0  ;;  %v19881_v9 = vld [vmem:[#allocation25_spill] sm:$0xff] }
 0x26e   :  { %10058 = vmatpush1.bf16.msra.mxu1 %v19873_v22  ;;  %v3965_v36 = vpop.f32.mrb[90].mxu1  ;;  %8799 = vmatprep.mubr.msk.f32.mxu0 %vm1164_vm0, %v13497_v35  ;;  %v19884_v22 = vld [vmem:[#allocation26_spill] sm:$0xff]  ;;  %v19886_v18 = vld [vmem:[#allocation29_spill] sm:$0xff] }
 0x26f   :  { %4145 = vrot.lane.b32.xlu0 %v3999_v14, %s10549_s14  ;;  %10060 = vmatprep.subr.bf16.mxu1 %v19874_v42  ;;  %v3967_v63 = vpop.f32.mrb[91].mxu1  ;;  %v4006_v11 = vsel %vm19292_vm10, %v3965_v36, 0.0  ;;  %v19883_v42 = vld [vmem:[#allocation27_spill] sm:$0xff] }
 0x270   :  { %10014 = vmatpush1.bf16.msra.mxu0 %v19875_v54  ;;  %4155 = vrot.lane.b32.xlu1 %v4004_v1, %s10549_s14  ;;  %v13518_v5 = vpop.permute.xlu0 %3309  ;;  %v13520_v24 = vpop.permute.xlu1 %3311  ;;  %v19879_v63 = vld [vmem:[#allocation22_spill] sm:$0xff]  ;;  %v19880_v1 = vld [vmem:[#allocation24_spill] sm:$0xff]  ;;  %v3223_v54 = vld [vmem:[#allocation2 + $0x30] sm:$0xff] }
 0x271   :  { %19876 = vst [vmem:[#allocation157_spill] sm:$0xff] %v13518_v5  ;;  %19877 = vst [vmem:[#allocation158_spill] sm:$0xff] %v13520_v24  ;;  %10016 = vmatprep.subr.bf16.mxu0 %v19878_v57  ;;  %v3873_v14 = vpop.f32.mrb[92].mxu0  ;;  %8805 = vmatprep.mubr.msk.f32.mxu1 %vm1164_vm0, %v13497_v35 }
 0x272   :  { %10062 = vmatpush1.bf16.msra.mxu1 %v19879_v63  ;;  %v3875_v44 = vpop.f32.mrb[93].mxu0  ;;  %v4011_v36 = vsel %vm1149_vm8, %v3873_v14, 0.0  ;;  %v19885_v14 = vld [vmem:[#allocation28_spill] sm:$0xff] }
 0x273   :  { %4157 = vrot.lane.b32.xlu0 %v4005_v28, %s10549_s14  ;;  %10064 = vmatprep.subr.bf16.mxu1 %v19880_v1  ;;  %v4012_v28 = vsel %vm1150_vm9, %v3875_v44, 0.0 }
 0x274   :  { %10018 = vmatpush1.bf16.msra.mxu0 %v19881_v9  ;;  %4159 = vrot.lane.b32.xlu1 %v4006_v11, %s10549_s14  ;;  %v3314_v5 = vpop.permute.xlu0 %3313  ;;  %v13534_v57 = vpop.permute.xlu1 %3323 }
 0x275   :  { %19882 = vst [vmem:[#allocation159_spill] sm:$0xff] %v13534_v57  ;;  %v3391_v63 = vsel %vm19278_vm6, %v13520_v24, %v3314_v5  ;;  %10020 = vmatprep.subr.bf16.mxu0 %v19883_v42  ;;  %v3970_v1 = vpop.f32.mrb[92].mxu1  ;;  %v19889_v24 = vld [vmem:[#allocation30_spill] sm:$0xff] }
 0x276   :  { %v3470_v9 = vadd.f32 %v3391_v63, %v3223_v54  ;;  %10066 = vmatpush1.bf16.msra.mxu1 %v19884_v22  ;;  %v3972_v11 = vpop.f32.mrb[93].mxu1  ;;  %v4013_v5 = vsel %vm19292_vm10, %v3970_v1, 0.0  ;;  %v13554_v54 = vld [vmem:[%s18957_s1 + $0x240] sm:$0xff]  ;;  %v19890_v22 = vld [vmem:[#allocation32_spill] sm:$0xff]  ;;  %v19911_v42 = vld [vmem:[#allocation46_spill] sm:$0xff] }
 0x277   :  { %4169 = vrot.lane.b32.xlu0 %v4011_v36, %s10549_s14  ;;  %10068 = vmatprep.subr.bf16.mxu1 %v19885_v14  ;;  %v3879_v57 = vpop.f32.mrb[94].mxu0  ;;  %v19888_v36 = vld [vmem:[#allocation31_spill] sm:$0xff] }
 0x278   :  { %3514 = vst.msk [vmem:[#allocation2 + $0x30] sm:$0xff] %vm3513_vm7, %v3470_v9  ;;  %10022 = vmatpush1.bf16.msra.mxu0 %v19886_v18  ;;  %4171 = vrot.lane.b32.xlu1 %v4012_v28, %s10549_s14  ;;  %v13549_v44 = vpop.permute.xlu0 %3325  ;;  %v3881_v63 = vpop.f32.mrb[95].mxu0  ;;  %v4018_v9 = vsel %vm1149_vm8, %v3879_v57, 0.0  ;;  %v3230_v28 = vld [vmem:[#allocation2 + $0x68] sm:$0xff]  ;;  %v13571_v57 = vld [vmem:[%s18957_s1 + $0x258] sm:$0xff] }
 0x279   :  { %19887 = vst [vmem:[#allocation160_spill] sm:$0xff] %v13549_v44  ;;  %10072 = vmatprep.subr.bf16.mxu0 %v19888_v36  ;;  %v3328_v11 = vpop.permute.xlu1 %3327  ;;  %v4019_v27 = vsel %vm1150_vm9, %v3881_v63, 0.0  ;;  %v19893_v63 = vld [vmem:[#allocation33_spill] sm:$0xff] }
 0x27a   :  { %10070 = vmatpush1.bf16.msra.mxu1 %v19889_v24  ;;  %v3397_v1 = vsel %vm19278_vm6, %v13549_v44, %v3328_v11 }
 0x27b   :  { %6016 = vmatmul.mubr.f32.vlgmr.msra.gmra.mrb[144].mxu0 %v13554_v54  ;;  %v3477_v18 = vadd.f32 %v3397_v1, %v3230_v28  ;;  %4173 = vrot.lane.b32.xlu0 %v4013_v5, %s10549_s14  ;;  %v3975_v14 = vpop.f32.mrb[94].mxu1  ;;  %v19894_v28 = vld [vmem:[#allocation34_spill] sm:$0xff] }
 0x27c   :  { %10074 = vmatpush1.bf16.msra.mxu0 %v19890_v22  ;;  %4183 = vrot.lane.b32.xlu1 %v4018_v9, %s10549_s14  ;;  %v3977_v24 = vpop.f32.mrb[95].mxu1  ;;  %v4020_v5 = vsel %vm19292_vm10, %v3975_v14, 0.0  ;;  %v3251_v22 = vld [vmem:[#allocation2 + $0x110] sm:$0xff] }
 0x27d   :  { %3521 = vst.msk [vmem:[#allocation2 + $0x68] sm:$0xff] %vm3513_vm7, %v3477_v18  ;;  %10119 = vmatprep.subr.bf16.mxu1 %v19474_v2  ;;  %v13575_v11 = vpop.permute.xlu0 %3337  ;;  %6117 = vmatmul.mubr.f32.vlgmr.msra.gmra.mrb[144].mxu1 %v13554_v54  ;;  %v13580_v9 = vpop.permute.xlu1 %3339  ;;  %v13587_v24 = vld [vmem:[%s18957_s1 + $0x250] sm:$0xff] }
 0x27e   :  { %19891 = vst [vmem:[#allocation161_spill] sm:$0xff] %v13575_v11  ;;  %19892 = vst [vmem:[#allocation162_spill] sm:$0xff] %v13580_v9  ;;  %10076 = vmatprep.subr.bf16.mxu0 %v19893_v63  ;;  %10121 = vmatpush1.bf16.msra.mxu1 %v19894_v28  ;;  %v19895_v18 = vld [vmem:[#allocation35_spill] sm:$0xff]  ;;  %v3237_v11 = vld [vmem:[#allocation2 + $0xa0] sm:$0xff] }
 0x27f   :  { %4185 = vrot.lane.b32.xlu0 %v4019_v27, %s10549_s14  ;;  %8800 = vmatprep.mubr.msk.f32.mxu0 %vm1164_vm0, %v13571_v57  ;;  %v19898_v27 = vld [vmem:[#allocation37_spill] sm:$0xff] }
 0x280   :  { %10078 = vmatpush1.bf16.msra.mxu0 %v19895_v18  ;;  %4187 = vrot.lane.b32.xlu1 %v4020_v5, %s10549_s14 }
 0x281   :  { %6022 = vmatmul.mubr.f32.gmra.mrb[146].mxu0 %v13587_v24  ;;  %10122 = vmatprep.subr.bf16.mxu1 %v19474_v2  ;;  %v3342_v14 = vpop.permute.xlu0 %3341  ;;  %v13596_v1 = vpop.permute.xlu1 %3351 }
 0x282   :  { %19896 = vst [vmem:[#allocation163_spill] sm:$0xff] %v13596_v1  ;;  %v3403_v44 = vsel %vm19278_vm6, %v13580_v9, %v3342_v14  ;;  %10080 = vmatprep.subr.bf16.mxu0 %v19897_v46  ;;  %10124 = vmatpush1.bf16.msra.mxu1 %v19898_v27  ;;  %v13613_v1 = vld [vmem:[%s18957_s1 + $0x260] sm:$0xff]  ;;  %v19899_v14 = vld [vmem:[#allocation38_spill] sm:$0xff]  ;;  %v19901_v27 = vld [vmem:[#allocation39_spill] sm:$0xff] }
 0x283   :  { %v3484_v5 = vadd.f32 %v3403_v44, %v3237_v11  ;;  %8806 = vmatprep.mubr.msk.f32.mxu1 %vm1164_vm0, %v13571_v57  ;;  %10125 = vmatprep.subr.bf16.mxu1 %v19474_v2  ;;  %v19902_v11 = vld [vmem:[#allocation40_spill] sm:$0xff] }
 0x284   :  { %10082 = vmatpush1.bf16.msra.mxu0 %v19899_v14  ;;  %6123 = vmatmul.mubr.f32.gmra.mrb[146].mxu1 %v13587_v24  ;;  %v3244_v46 = vld [vmem:[#allocation2 + $0xd8] sm:$0xff] }
 0x285   :  { %3528 = vst.msk [vmem:[#allocation2 + $0xa0] sm:$0xff] %vm3513_vm7, %v3484_v5  ;;  %v13618_v9 = vpop.permute.xlu0 %3353  ;;  %10084 = vmatprep.subr.bf16.mxu0 %v19901_v27  ;;  %v3356_v44 = vpop.permute.xlu1 %3355  ;;  %8801 = vmatprep.mubr.msk.f32.mxu0 %vm1164_vm0, %v13605_v50  ;;  %v13630_v5 = vld [vmem:[%s18957_s1 + $0x278] sm:$0xff]  ;;  %v19903_v27 = vld [vmem:[#allocation41_spill] sm:$0xff] }
 0x286   :  { %19900 = vst [vmem:[#allocation164_spill] sm:$0xff] %v13618_v9  ;;  %10127 = vmatpush1.bf16.msra.mxu1 %v19902_v11  ;;  %v3409_v18 = vsel %vm19278_vm6, %v13618_v9, %v3356_v44  ;;  %6028 = vmatmul.mubr.f32.gmra.mrb[148].mxu0 %v13613_v1  ;;  %v13638_v11 = vld [vmem:[%s18957_s1 + $0x270] sm:$0xff]  ;;  %v19905_v9 = vld [vmem:[#allocation42_spill] sm:$0xff] }
 0x287   :  { %v3491_v14 = vadd.f32 %v3409_v18, %v3244_v46  ;;  %10128 = vmatprep.subr.bf16.mxu1 %v19474_v2  ;;  %8807 = vmatprep.mubr.msk.f32.mxu1 %vm1164_vm0, %v13605_v50  ;;  %v19907_v18 = vld [vmem:[#allocation43_spill] sm:$0xff] }
 0x288   :  { %10086 = vmatpush1.bf16.msra.mxu0 %v19903_v27  ;;  %6129 = vmatmul.mubr.f32.gmra.mrb[148].mxu1 %v13613_v1  ;;  %v19909_v27 = vld [vmem:[#allocation45_spill] sm:$0xff] }
 0x289   :  { %3535 = vst.msk [vmem:[#allocation2 + $0xd8] sm:$0xff] %vm3513_vm7, %v3491_v14  ;;  %v13643_v44 = vpop.permute.xlu0 %3365  ;;  %10088 = vmatprep.subr.bf16.mxu0 %v19905_v9  ;;  %v13646_v46 = vpop.permute.xlu1 %3367  ;;  %8802 = vmatprep.mubr.msk.f32.mxu0 %vm1164_vm0, %v13630_v5  ;;  %v13658_v14 = vld [vmem:[%s18957_s1 + $0x288] sm:$0xff] }
 0x28a   :  { %19904 = vst [vmem:[#allocation165_spill] sm:$0xff] %v13643_v44  ;;  %19906 = vst [vmem:[#allocation166_spill] sm:$0xff] %v13646_v46  ;;  %10130 = vmatpush1.bf16.msra.mxu1 %v19907_v18  ;;  %6034 = vmatmul.mubr.f32.gmra.mrb[150].mxu0 %v13638_v11  ;;  %v19908_v44 = vld [vmem:[#allocation44_spill] sm:$0xff] }
 0x28b   :  { %v4451_v28 = vpop.f32.mrb[96].mxu0  ;;  %10131 = vmatprep.subr.bf16.mxu1 %v19474_v2  ;;  %8808 = vmatprep.mubr.msk.f32.mxu1 %vm1164_vm0, %v13630_v5 }
 0x28c   :  { %10090 = vmatpush1.bf16.msra.mxu0 %v19908_v44  ;;  %v4453_v9 = vpop.f32.mrb[97].mxu0  ;;  %4867 = vrot.lane.b32.xlu0 %v4451_v28, %s10550_s16 }
 0x28d   :  { %v3370_v18 = vpop.permute.xlu0 %3369  ;;  %10092 = vmatprep.subr.bf16.mxu0 %v19909_v27  ;;  %v13663_v63 = vpop.permute.xlu1 %3379  ;;  %4869 = vrot.lane.b32.xlu1 %v4453_v9, %s10550_s16  ;;  %v13676_v9 = vld [vmem:[%s18957_s1 + $0x280] sm:$0xff] }
 0x28e   :  { %19910 = vst [vmem:[#allocation167_spill] sm:$0xff] %v13663_v63  ;;  %v3415_v36 = vsel %vm19278_vm6, %v13646_v46, %v3370_v18  ;;  %10133 = vmatpush1.bf16.msra.mxu1 %v19911_v42  ;;  %v4552_v53 = vpop.f32.mrb[96].mxu1  ;;  %8803 = vmatprep.mubr.msk.f32.mxu0 %vm1164_vm0, %v13658_v14  ;;  %v19912_v63 = vld [vmem:[#allocation47_spill] sm:$0xff]  ;;  %v19914_v46 = vld [vmem:[#allocation48_spill] sm:$0xff]  ;;  %v3258_v42 = vld [vmem:[#allocation2 + $0x148] sm:$0xff] }
 0x28f   :  { %v3498_v44 = vadd.f32 %v3415_v36, %v3251_v22  ;;  %10134 = vmatprep.subr.bf16.mxu1 %v19474_v2  ;;  %v4554_v28 = vpop.f32.mrb[97].mxu1  ;;  %6135 = vmatmul.mubr.f32.gmra.mrb[150].mxu1 %v13638_v11  ;;  %v19915_v36 = vld [vmem:[#allocation49_spill] sm:$0xff] }
 0x290   :  { %10094 = vmatpush1.bf16.msra.mxu0 %v19912_v63  ;;  %4871 = vrot.lane.b32.xlu0 %v4552_v53, %s10550_s16 }
 0x291   :  { %3542 = vst.msk [vmem:[#allocation2 + $0x110] sm:$0xff] %vm3513_vm7, %v3498_v44  ;;  %v13681_v18 = vpop.permute.xlu0 %3381  ;;  %10096 = vmatprep.subr.bf16.mxu0 %v19914_v46  ;;  %v3384_v22 = vpop.permute.xlu1 %3383  ;;  %4873 = vrot.lane.b32.xlu1 %v4554_v28, %s10550_s16  ;;  %v13695_v44 = vld [vmem:[%s18957_s1 + $0x298] sm:$0xff]  ;;  %v19916_v28 = vld [vmem:[#allocation50_spill] sm:$0xff] }
 0x292   :  { %19913 = vst [vmem:[#allocation168_spill] sm:$0xff] %v13681_v18  ;;  %10136 = vmatpush1.bf16.msra.mxu1 %v19915_v36  ;;  %v3421_v27 = vsel %vm19278_vm6, %v13681_v18, %v3384_v22  ;;  %v4457_v47 = vpop.f32.mrb[98].mxu0  ;;  %6040 = vmatmul.mubr.f32.gmra.mrb[152].mxu0 %v13676_v9  ;;  %v19917_v18 = vld [vmem:[#allocation51_spill] sm:$0xff]  ;;  %vm4317_vm6 = vcmask 400384  }
 0x293   :  { %v3505_v63 = vadd.f32 %v3421_v27, %v3258_v42  ;;  %v4459_v53 = vpop.f32.mrb[99].mxu0  ;;  %10137 = vmatprep.subr.bf16.mxu1 %v19474_v2  ;;  %8809 = vmatprep.mubr.msk.f32.mxu1 %vm1164_vm0, %v13658_v14  ;;  %v19918_v27 = vld [vmem:[#allocation52_spill] sm:$0xff] }
 0x294   :  { %10098 = vmatpush1.bf16.msra.mxu0 %v19916_v28  ;;  %4883 = vrot.lane.b32.xlu0 %v4459_v53, %s10550_s16  ;;  %v4558_v22 = vpop.f32.mrb[98].mxu1  ;;  %v19919_v53 = vld [vmem:[#allocation53_spill] sm:$0xff]  ;;  %v19921_v28 = vld [vmem:[#allocation55_spill] sm:$0xff] }
 0x295   :  { %3549 = vst.msk [vmem:[#allocation2 + $0x148] sm:$0xff] %vm3513_vm7, %v3505_v63  ;;  %10100 = vmatprep.subr.bf16.mxu0 %v19917_v18  ;;  %4881 = vrot.lane.b32.xlu1 %v4457_v47, %s10550_s16  ;;  %v4560_v42 = vpop.f32.mrb[99].mxu1  ;;  %v13710_v63 = vld [vmem:[%s18957_s1 + $0x290] sm:$0xff]  ;;  %vm4310_vm7 = vcmask 1047816  }
 0x296   :  { %10139 = vmatpush1.bf16.msra.mxu1 %v19918_v27  ;;  %v4463_v36 = vpop.f32.mrb[100].mxu0  ;;  %8804 = vmatprep.mubr.msk.f32.mxu0 %vm1164_vm0, %v13695_v44  ;;  %v19920_v27 = vld [vmem:[#allocation54_spill] sm:$0xff] }
 0x297   :  { %10140 = vmatprep.subr.bf16.mxu1 %v19474_v2  ;;  %v4465_v46 = vpop.f32.mrb[101].mxu0  ;;  %6141 = vmatmul.mubr.f32.gmra.mrb[152].mxu1 %v13676_v9 }
 0x298   :  { %10102 = vmatpush1.bf16.msra.mxu0 %v19919_v53  ;;  %4887 = vrot.lane.b32.xlu0 %v4560_v42, %s10550_s16  ;;  %v4564_v47 = vpop.f32.mrb[100].mxu1  ;;  %v19922_v53 = vld [vmem:[#allocation56_spill] sm:$0xff]  ;;  %v19923_v42 = vld [vmem:[#allocation57_spill] sm:$0xff] }
 0x299   :  { %10104 = vmatprep.subr.bf16.mxu0 %v19920_v27  ;;  %4885 = vrot.lane.b32.xlu1 %v4558_v22, %s10550_s16  ;;  %v4566_v18 = vpop.f32.mrb[101].mxu1  ;;  %v4021_v22 = vld [vmem:[#allocation2] sm:$0xff] }
 0x29a   :  { %10142 = vmatpush1.bf16.msra.mxu1 %v19921_v28  ;;  %6046 = vmatmul.mubr.f32.gmra.mrb[154].mxu0 %v13710_v63  ;;  %v4469_v15 = vpop.f32.mrb[102].mxu0 }
 0x29b   :  { %10143 = vmatprep.subr.bf16.mxu1 %v19474_v2  ;;  %8810 = vmatprep.mubr.msk.f32.mxu1 %vm1164_vm0, %v13695_v44  ;;  %v4471_v23 = vpop.f32.mrb[103].mxu0 }
 0x29c   :  { %10106 = vmatpush1.bf16.msra.mxu0 %v19922_v53  ;;  %4895 = vrot.lane.b32.xlu0 %v4463_v36, %s10550_s16 }
 0x29d   :  { %10108 = vmatprep.subr.bf16.mxu0 %v19923_v42  ;;  %4897 = vrot.lane.b32.xlu1 %v4465_v46, %s10550_s16  ;;  %v13725_v28 = vpop.permute.xlu0 %4105 }
 0x29e   :  { %19924 = vst [vmem:[#allocation57_spill] sm:$0xff] %v13725_v28  ;;  %10145 = vmatpush1.bf16.msra.mxu1 %v19740_v60  ;;  %v4268_v27 = vadd.f32 %v13725_v28, %v4021_v22  ;;  %v13729_v58 = vpop.permute.xlu1 %4107  ;;  %8811 = vmatprep.mubr.msk.f32.mxu0 %vm1164_vm0, %v13497_v35 }
 0x29f   :  { %19925 = vst [vmem:[#allocation169_spill] sm:$0xff] %v13729_v58  ;;  %10146 = vmatprep.subr.bf16.mxu1 %v19474_v2  ;;  %6147 = vmatmul.mubr.f32.gmra.mrb[154].mxu1 %v13710_v63  ;;  %v4570_v36 = vpop.f32.mrb[102].mxu1 }
 0x2a0   :  { %10110 = vmatpush1.bf16.msra.mxu0 %v19742_v6  ;;  %4311 = vst.msk [vmem:[#allocation2] sm:$0xff] %vm4310_vm7, %v4268_v27  ;;  %4899 = vrot.lane.b32.xlu0 %v4564_v47, %s10550_s16  ;;  %v4572_v46 = vpop.f32.mrb[103].mxu1  ;;  %v4028_v47 = vld [vmem:[#allocation2 + $0x38] sm:$0xff] }
 0x2a1   :  { %10112 = vmatprep.subr.bf16.mxu0 %v19649_v29  ;;  %4901 = vrot.lane.b32.xlu1 %v4566_v18, %s10550_s16  ;;  %v13740_v22 = vpop.permute.xlu0 %4109 }
 0x2a2   :  { %19926 = vst [vmem:[#allocation170_spill] sm:$0xff] %v13740_v22  ;;  %10148 = vmatpush1.bf16.msra.mxu1 %v19650_v32  ;;  %v13743_v28 = vpop.permute.xlu1 %4111  ;;  %v4475_v58 = vpop.f32.mrb[104].mxu0  ;;  %8817 = vmatprep.mubr.msk.f32.mxu1 %vm1164_vm0, %v13497_v35 }
 0x2a3   :  { %19927 = vst [vmem:[#allocation171_spill] sm:$0xff] %v13743_v28  ;;  %10149 = vmatprep.subr.bf16.mxu1 %v19474_v2  ;;  %v4477_v27 = vpop.f32.mrb[105].mxu0 }
 0x2a4   :  { %10114 = vmatpush1.bf16.msra.mxu0 %v11438_v30  ;;  %4911 = vrot.lane.b32.xlu0 %v4471_v23, %s10550_s16 }
 0x2a5   :  { %10116 = vmatprep.subr.bf16.mxu0 %v11442_v61  ;;  %4909 = vrot.lane.b32.xlu1 %v4469_v15, %s10550_s16  ;;  %v13752_v18 = vpop.permute.xlu0 %4121 }
 0x2a6   :  { %19928 = vst [vmem:[#allocation172_spill] sm:$0xff] %v13752_v18  ;;  %10151 = vmatpush1.bf16.msra.mxu1 %v11444_v59  ;;  %v13755_v28 = vpop.permute.xlu1 %4119 }
 0x2a7   :  { %19929 = vst [vmem:[#allocation173_spill] sm:$0xff] %v13755_v28  ;;  %10152 = vmatprep.subr.bf16.mxu1 %v19474_v2  ;;  %v4275_v35 = vadd.f32 %v13755_v28, %v4028_v47  ;;  %v4576_v22 = vpop.f32.mrb[104].mxu1  ;;  %v19963_v28 = vld [vmem:[#allocation25_spill] sm:$0xff] }
 0x2a8   :  { %10118 = vmatpush1.bf16.msra.mxu0 %v11460_v45  ;;  %4915 = vrot.lane.b32.xlu0 %v4572_v46, %s10550_s16  ;;  %v4578_v23 = vpop.f32.mrb[105].mxu1 }
 0x2a9   :  { %10156 = vmatprep.subr.bf16.mxu0 %v10610_v3  ;;  %4319 = vst.msk [vmem:[#allocation2 + $0x38] sm:$0xff] %vm4310_vm7, %v4275_v35  ;;  %4913 = vrot.lane.b32.xlu1 %v4570_v36, %s10550_s16  ;;  %v13764_v15 = vpop.permute.xlu0 %4125  ;;  %v4035_v36 = vld [vmem:[#allocation2 + $0x70] sm:$0xff] }
 0x2aa   :  { %19930 = vst [vmem:[#allocation174_spill] sm:$0xff] %v13764_v15  ;;  %10154 = vmatpush1.bf16.msra.mxu1 %v11464_v19  ;;  %v13767_v18 = vpop.permute.xlu1 %4123  ;;  %v4481_v59 = vpop.f32.mrb[106].mxu0 }
 0x2ab   :  { %19931 = vst [vmem:[#allocation175_spill] sm:$0xff] %v13767_v18  ;;  %6218 = vmatmul.mubr.f32.vlgmr.msra.gmra.mrb[156].mxu0 %v13554_v54  ;;  %10204 = vmatprep.subr.bf16.mxu1 %v10623_v8  ;;  %v4483_v47 = vpop.f32.mrb[107].mxu0 }
 0x2ac   :  { %10158 = vmatpush1.bf16.msra.mxu0 %v10621_v7  ;;  %8812 = vmatprep.mubr.msk.f32.mxu0 %vm1164_vm0, %v13571_v57 }
 0x2ad   :  { %6319 = vmatmul.mubr.f32.vlgmr.msra.gmra.mrb[156].mxu1 %v13554_v54  ;;  %10160 = vmatprep.subr.bf16.mxu0 %v10648_v16  ;;  %v13776_v46 = vpop.permute.xlu0 %4133 }
 0x2ae   :  { %19932 = vst [vmem:[#allocation176_spill] sm:$0xff] %v13776_v46  ;;  %10206 = vmatpush1.bf16.msra.mxu1 %v10635_v12  ;;  %4923 = vrot.lane.b32.xlu0 %v4475_v58, %s10550_s16  ;;  %v4282_v35 = vadd.f32 %v13776_v46, %v4035_v36  ;;  %v13781_v15 = vpop.permute.xlu1 %4135 }
 0x2af   :  { %19933 = vst [vmem:[#allocation177_spill] sm:$0xff] %v13781_v15  ;;  %6224 = vmatmul.mubr.f32.gmra.mrb[158].mxu0 %v13587_v24  ;;  %4925 = vrot.lane.b32.xlu1 %v4477_v27, %s10550_s16  ;;  %v4582_v18 = vpop.f32.mrb[106].mxu1 }
 0x2b0   :  { %10162 = vmatpush1.bf16.msra.mxu0 %v10650_v17  ;;  %10208 = vmatprep.subr.bf16.mxu1 %v10662_v21  ;;  %4326 = vst.msk [vmem:[#allocation2 + $0x70] sm:$0xff] %vm4310_vm7, %v4282_v35  ;;  %v4584_v54 = vpop.f32.mrb[107].mxu1 }
 0x2b1   :  { %8818 = vmatprep.mubr.msk.f32.mxu1 %vm1164_vm0, %v13571_v57  ;;  %10164 = vmatprep.subr.bf16.mxu0 %v10676_v26  ;;  %v13791_v58 = vpop.permute.xlu0 %4137 }
 0x2b2   :  { %19934 = vst [vmem:[#allocation178_spill] sm:$0xff] %v13791_v58  ;;  %10210 = vmatpush1.bf16.msra.mxu1 %v10674_v25  ;;  %4927 = vrot.lane.b32.xlu0 %v4576_v22, %s10550_s16  ;;  %v13795_v27 = vpop.permute.xlu1 %4139  ;;  %v4042_v22 = vld [vmem:[#allocation2 + $0xa8] sm:$0xff] }
 0x2b3   :  { %19935 = vst [vmem:[#allocation179_spill] sm:$0xff] %v13795_v27  ;;  %6324 = vmatmul.mubr.f32.gmra.mrb[158].mxu1 %v13587_v24  ;;  %4929 = vrot.lane.b32.xlu1 %v4578_v23, %s10550_s16  ;;  %v19959_v27 = vld [vmem:[#allocation23_spill] sm:$0xff] }
 0x2b4   :  { %10166 = vmatpush1.bf16.msra.mxu0 %v10698_v33  ;;  %8813 = vmatprep.mubr.msk.f32.mxu0 %vm1164_vm0, %v13605_v50 }
 0x2b5   :  { %10212 = vmatprep.subr.bf16.mxu1 %v10700_v34  ;;  %6230 = vmatmul.mubr.f32.gmra.mrb[160].mxu0 %v13613_v1  ;;  %v13804_v57 = vpop.permute.xlu0 %4149 }
 0x2b6   :  { %19936 = vst [vmem:[#allocation180_spill] sm:$0xff] %v13804_v57  ;;  %10168 = vmatprep.subr.bf16.mxu0 %v10715_v39  ;;  %10214 = vmatpush1.bf16.msra.mxu1 %v10713_v38  ;;  %v13808_v36 = vpop.permute.xlu1 %4147 }
 0x2b7   :  { %19937 = vst [vmem:[#allocation181_spill] sm:$0xff] %v13808_v36  ;;  %4939 = vrot.lane.b32.xlu0 %v4483_v47, %s10550_s16  ;;  %4937 = vrot.lane.b32.xlu1 %v4481_v59, %s10550_s16  ;;  %v4289_v24 = vadd.f32 %v13808_v36, %v4042_v22  ;;  %v19958_v36 = vld [vmem:[#allocation21_spill] sm:$0xff] }
 0x2b8   :  { %10170 = vmatpush1.bf16.msra.mxu0 %v10742_v48  ;;  %8819 = vmatprep.mubr.msk.f32.mxu1 %vm1164_vm0, %v13605_v50 }
 0x2b9   :  { %10216 = vmatprep.subr.bf16.mxu1 %v10727_v43  ;;  %8814 = vmatprep.mubr.msk.f32.mxu0 %vm1164_vm0, %v13630_v5  ;;  %4333 = vst.msk [vmem:[#allocation2 + $0xa8] sm:$0xff] %vm4310_vm7, %v4289_v24  ;;  %v13820_v23 = vpop.permute.xlu0 %4153 }
 0x2ba   :  { %19938 = vst [vmem:[#allocation182_spill] sm:$0xff] %v13820_v23  ;;  %6329 = vmatmul.mubr.f32.gmra.mrb[160].mxu1 %v13613_v1  ;;  %10172 = vmatprep.subr.bf16.mxu0 %v10754_v52  ;;  %v13824_v59 = vpop.permute.xlu1 %4151  ;;  %v4049_v1 = vld [vmem:[#allocation2 + $0xe0] sm:$0xff] }
 0x2bb   :  { %19939 = vst [vmem:[#allocation183_spill] sm:$0xff] %v13824_v59  ;;  %10218 = vmatpush1.bf16.msra.mxu1 %v10752_v51  ;;  %4943 = vrot.lane.b32.xlu0 %v4584_v54, %s10550_s16  ;;  %v4653_v50 = vpop.f32.mrb[108].mxu0 }
 0x2bc   :  { %6236 = vmatmul.mubr.f32.gmra.mrb[162].mxu0 %v13638_v11  ;;  %4941 = vrot.lane.b32.xlu1 %v4582_v18, %s10550_s16  ;;  %v4655_v47 = vpop.f32.mrb[109].mxu0 }
 0x2bd   :  { %10174 = vmatpush1.bf16.msra.mxu0 %v10784_v62  ;;  %10220 = vmatprep.subr.bf16.mxu1 %v10766_v56  ;;  %v4754_v35 = vpop.f32.mrb[108].mxu1 }
 0x2be   :  { %8820 = vmatprep.mubr.msk.f32.mxu1 %vm1164_vm0, %v13630_v5  ;;  %10176 = vmatprep.subr.bf16.mxu0 %v10790_v0  ;;  %v13835_v22 = vpop.permute.xlu0 %4161  ;;  %v4756_v54 = vpop.f32.mrb[109].mxu1 }
 0x2bf   :  { %19940 = vst [vmem:[#allocation184_spill] sm:$0xff] %v13835_v22  ;;  %10222 = vmatpush1.bf16.msra.mxu1 %v19585_v20  ;;  %4875 = vrot.lane.b32.xlu0 %v4653_v50, %s10550_s16  ;;  %v4296_v18 = vadd.f32 %v13835_v22, %v4049_v1  ;;  %v4659_v24 = vpop.f32.mrb[110].mxu0  ;;  %v19948_v22 = vld [vmem:[#allocation14_spill] sm:$0xff] }
 0x2c0   :  { %6334 = vmatmul.mubr.f32.gmra.mrb[162].mxu1 %v13638_v11  ;;  %4877 = vrot.lane.b32.xlu1 %v4655_v47, %s10550_s16  ;;  %v13842_v23 = vpop.permute.xlu1 %4163  ;;  %v4661_v5 = vpop.f32.mrb[111].mxu0 }
 0x2c1   :  { %19941 = vst [vmem:[#allocation185_spill] sm:$0xff] %v13842_v23  ;;  %10178 = vmatpush1.bf16.msra.mxu0 %v19587_v10  ;;  %8815 = vmatprep.mubr.msk.f32.mxu0 %vm1164_vm0, %v13658_v14  ;;  %4340 = vst.msk [vmem:[#allocation2 + $0xe0] sm:$0xff] %vm4310_vm7, %v4296_v18  ;;  %v19953_v23 = vld [vmem:[#allocation19_spill] sm:$0xff] }
 0x2c2   :  { %10224 = vmatprep.subr.bf16.mxu1 %v19588_v37  ;;  %6242 = vmatmul.mubr.f32.gmra.mrb[164].mxu0 %v13676_v9 }
 0x2c3   :  { %10180 = vmatprep.subr.bf16.mxu0 %v19853_v49  ;;  %10226 = vmatpush1.bf16.msra.mxu1 %v19855_v31  ;;  %v13852_v11 = vpop.permute.xlu0 %4165  ;;  %v4759_v50 = vpop.f32.mrb[110].mxu1 }
 0x2c4   :  { %19942 = vst [vmem:[#allocation186_spill] sm:$0xff] %v13852_v11  ;;  %4879 = vrot.lane.b32.xlu0 %v4754_v35, %s10550_s16  ;;  %4889 = vrot.lane.b32.xlu1 %v4659_v24, %s10550_s16  ;;  %v13856_v47 = vpop.permute.xlu1 %4167  ;;  %v4761_v1 = vpop.f32.mrb[111].mxu1  ;;  %v4056_v24 = vld [vmem:[#allocation2 + $0x118] sm:$0xff] }
 0x2c5   :  { %19943 = vst [vmem:[#allocation187_spill] sm:$0xff] %v13856_v47  ;;  %10182 = vmatpush1.bf16.msra.mxu0 %v19857_v55  ;;  %8821 = vmatprep.mubr.msk.f32.mxu1 %vm1164_vm0, %v13658_v14  ;;  %v4665_v54 = vpop.f32.mrb[112].mxu0 }
 0x2c6   :  { %10228 = vmatprep.subr.bf16.mxu1 %v19858_v13  ;;  %8816 = vmatprep.mubr.msk.f32.mxu0 %vm1164_vm0, %v13695_v44  ;;  %v4667_v18 = vpop.f32.mrb[113].mxu0 }
 0x2c7   :  { %6339 = vmatmul.mubr.f32.gmra.mrb[164].mxu1 %v13676_v9  ;;  %10184 = vmatprep.subr.bf16.mxu0 %v19860_v40  ;;  %v13866_v35 = vpop.permute.xlu0 %4177  ;;  %v19946_v9 = vld [vmem:[#allocation12_spill] sm:$0xff] }
 0x2c8   :  { %19944 = vst [vmem:[#allocation188_spill] sm:$0xff] %v13866_v35  ;;  %10230 = vmatpush1.bf16.msra.mxu1 %v19861_v41  ;;  %4891 = vrot.lane.b32.xlu0 %v4661_v5, %s10550_s16  ;;  %v13870_v1 = vpop.permute.xlu1 %4175  ;;  %v19947_v35 = vld [vmem:[#allocation15_spill] sm:$0xff]  ;;  %v20001_v41 = vld [vmem:[#allocation49_spill] sm:$0xff] }
 0x2c9   :  { %19945 = vst [vmem:[#allocation189_spill] sm:$0xff] %v13870_v1  ;;  %6248 = vmatmul.mubr.f32.gmra.mrb[166].mxu0 %v13710_v63  ;;  %4893 = vrot.lane.b32.xlu1 %v4759_v50, %s10550_s16  ;;  %v4303_v14 = vadd.f32 %v13870_v1, %v4056_v24  ;;  %v13888_v1 = vld [vmem:[%s18957_s1 + $0x2a8] sm:$0xff] }
 0x2ca   :  { %10186 = vmatpush1.bf16.msra.mxu0 %v19864_v4  ;;  %10232 = vmatprep.subr.bf16.mxu1 %v19946_v9  ;;  %v4764_v47 = vpop.f32.mrb[112].mxu1  ;;  %v19993_v9 = vld [vmem:[#allocation45_spill] sm:$0xff] }
 0x2cb   :  { %8822 = vmatprep.mubr.msk.f32.mxu1 %vm1164_vm0, %v13695_v44  ;;  %10188 = vmatprep.subr.bf16.mxu0 %v19947_v35  ;;  %4347 = vst.msk [vmem:[#allocation2 + $0x118] sm:$0xff] %vm4310_vm7, %v4303_v14  ;;  %v4671_v5 = vpop.f32.mrb[114].mxu0  ;;  %v4766_v11 = vpop.f32.mrb[113].mxu1  ;;  %v19951_v14 = vld [vmem:[#allocation17_spill] sm:$0xff]  ;;  %vm4189_vm7 = vcmask 269312  }
 0x2cc   :  { %10234 = vmatpush1.bf16.msra.mxu1 %v19948_v22  ;;  %4903 = vrot.lane.b32.xlu0 %v4665_v54, %s10550_s16  ;;  %v13883_v50 = vpop.permute.xlu0 %4181  ;;  %v4673_v24 = vpop.f32.mrb[115].mxu0  ;;  %v19952_v11 = vld [vmem:[#allocation16_spill] sm:$0xff]  ;;  %v19954_v54 = vld [vmem:[#allocation18_spill] sm:$0xff]  ;;  %v14046_v22 = vld [vmem:[%s18957_s1 + $0x2e0] sm:$0xff] }
 0x2cd   :  { %19949 = vst [vmem:[#allocation190_spill] sm:$0xff] %v13883_v50  ;;  %6344 = vmatmul.mubr.f32.gmra.mrb[166].mxu1 %v13710_v63  ;;  %4905 = vrot.lane.b32.xlu1 %v4667_v18, %s10550_s16  ;;  %v13892_v44 = vpop.permute.xlu1 %4179  ;;  %v19956_v18 = vld [vmem:[#allocation20_spill] sm:$0xff] }
 0x2ce   :  { %19950 = vst [vmem:[#allocation191_spill] sm:$0xff] %v13892_v44  ;;  %10190 = vmatpush1.bf16.msra.mxu0 %v19951_v14  ;;  %10236 = vmatprep.subr.bf16.mxu1 %v19952_v11 }
 0x2cf   :  { %10192 = vmatprep.subr.bf16.mxu0 %v19953_v23  ;;  %8835 = vmatprep.mubr.msk.f32.mxu0 %vm1164_vm0, %v13888_v1 }
 0x2d0   :  { %10238 = vmatpush1.bf16.msra.mxu1 %v19954_v54  ;;  %4907 = vrot.lane.b32.xlu0 %v4764_v47, %s10550_s16  ;;  %v13901_v50 = vpop.permute.xlu0 %4113  ;;  %v4769_v63 = vpop.f32.mrb[114].mxu1  ;;  %v19960_v47 = vld [vmem:[#allocation22_spill] sm:$0xff]  ;;  %v19990_v54 = vld [vmem:[#allocation44_spill] sm:$0xff] }
 0x2d1   :  { %19955 = vst [vmem:[#allocation192_spill] sm:$0xff] %v13901_v50  ;;  %4917 = vrot.lane.b32.xlu1 %v4671_v5, %s10550_s16  ;;  %10240 = vmatprep.subr.bf16.mxu1 %v19956_v18  ;;  %v13905_v44 = vpop.permute.xlu1 %4115  ;;  %v4771_v59 = vpop.f32.mrb[115].mxu1  ;;  %v19961_v50 = vld [vmem:[#allocation24_spill] sm:$0xff]  ;;  %v19964_v18 = vld [vmem:[#allocation27_spill] sm:$0xff] }
 0x2d2   :  { %19957 = vst [vmem:[#allocation193_spill] sm:$0xff] %v13905_v44  ;;  %10194 = vmatpush1.bf16.msra.mxu0 %v19958_v36  ;;  %v4677_v57 = vpop.f32.mrb[116].mxu0  ;;  %8841 = vmatprep.mubr.msk.f32.mxu1 %vm1164_vm0, %v13888_v1  ;;  %v4027_v59 = vld [vmem:[#allocation2 + $0x30] sm:$0xff]  ;;  %v19966_v36 = vld [vmem:[#allocation28_spill] sm:$0xff] }
 0x2d3   :  { %10196 = vmatprep.subr.bf16.mxu0 %v19959_v27  ;;  %v4679_v58 = vpop.f32.mrb[117].mxu0 }
 0x2d4   :  { %10242 = vmatpush1.bf16.msra.mxu1 %v19960_v47  ;;  %4919 = vrot.lane.b32.xlu0 %v4673_v24, %s10550_s16  ;;  %v4118_v5 = vpop.permute.xlu0 %4117  ;;  %v19965_v24 = vld [vmem:[#allocation26_spill] sm:$0xff] }
 0x2d5   :  { %4921 = vrot.lane.b32.xlu1 %v4769_v63, %s10550_s16  ;;  %10244 = vmatprep.subr.bf16.mxu1 %v19961_v50  ;;  %v4195_v46 = vsel %vm4189_vm7, %v13905_v44, %v4118_v5  ;;  %v13917_v15 = vpop.permute.xlu1 %4127  ;;  %v19968_v44 = vld [vmem:[#allocation29_spill] sm:$0xff] }
 0x2d6   :  { %19962 = vst [vmem:[#allocation194_spill] sm:$0xff] %v13917_v15  ;;  %10198 = vmatpush1.bf16.msra.mxu0 %v19963_v28  ;;  %v4274_v27 = vadd.f32 %v4195_v46, %v4027_v59  ;;  %v13932_v46 = vld [vmem:[%s18957_s1 + $0x2a0] sm:$0xff]  ;;  %v19969_v59 = vld [vmem:[#allocation31_spill] sm:$0xff] }
 0x2d7   :  { %10200 = vmatprep.subr.bf16.mxu0 %v19964_v18  ;;  %v4774_v47 = vpop.f32.mrb[116].mxu1  ;;  %v19972_v18 = vld [vmem:[#allocation32_spill] sm:$0xff] }
 0x2d8   :  { %4318 = vst.msk [vmem:[#allocation2 + $0x30] sm:$0xff] %vm4317_vm6, %v4274_v27  ;;  %10246 = vmatpush1.bf16.msra.mxu1 %v19965_v24  ;;  %4931 = vrot.lane.b32.xlu0 %v4677_v57, %s10550_s16  ;;  %v4683_v63 = vpop.f32.mrb[118].mxu0  ;;  %v4776_v50 = vpop.f32.mrb[117].mxu1  ;;  %v4034_v57 = vld [vmem:[#allocation2 + $0x68] sm:$0xff] }
 0x2d9   :  { %4933 = vrot.lane.b32.xlu1 %v4679_v58, %s10550_s16  ;;  %10248 = vmatprep.subr.bf16.mxu1 %v19966_v36  ;;  %v13926_v5 = vpop.permute.xlu0 %4129  ;;  %v4685_v15 = vpop.f32.mrb[119].mxu0  ;;  %v19970_v58 = vld [vmem:[#allocation30_spill] sm:$0xff] }
 0x2da   :  { %19967 = vst [vmem:[#allocation195_spill] sm:$0xff] %v13926_v5  ;;  %10202 = vmatpush1.bf16.msra.mxu0 %v19968_v44  ;;  %v4132_v27 = vpop.permute.xlu1 %4131 }
 0x2db   :  { %10252 = vmatprep.subr.bf16.mxu0 %v19969_v59  ;;  %v4201_v50 = vsel %vm4189_vm7, %v13926_v5, %v4132_v27  ;;  %v13951_v27 = vld [vmem:[%s18957_s1 + $0x2b8] sm:$0xff] }
 0x2dc   :  { %10250 = vmatpush1.bf16.msra.mxu1 %v19970_v58  ;;  %v4281_v36 = vadd.f32 %v4201_v50, %v4034_v57  ;;  %4935 = vrot.lane.b32.xlu0 %v4774_v47, %s10550_s16  ;;  %v19975_v57 = vld [vmem:[#allocation34_spill] sm:$0xff] }
 0x2dd   :  { %6820 = vmatmul.mubr.f32.vlgmr.msra.gmra.mrb[168].mxu0 %v13932_v46  ;;  %4945 = vrot.lane.b32.xlu1 %v4683_v63, %s10550_s16  ;;  %v13941_v44 = vpop.permute.xlu0 %4141  ;;  %v4779_v24 = vpop.f32.mrb[118].mxu1  ;;  %v19974_v63 = vld [vmem:[#allocation33_spill] sm:$0xff] }
 0x2de   :  { %19971 = vst [vmem:[#allocation196_spill] sm:$0xff] %v13941_v44  ;;  %4325 = vst.msk [vmem:[#allocation2 + $0x68] sm:$0xff] %vm4317_vm6, %v4281_v36  ;;  %10254 = vmatpush1.bf16.msra.mxu0 %v19972_v18  ;;  %10299 = vmatprep.subr.bf16.mxu1 %v19474_v2  ;;  %v13946_v59 = vpop.permute.xlu1 %4143  ;;  %v4781_v47 = vpop.f32.mrb[119].mxu1  ;;  %v13960_v36 = vld [vmem:[%s18957_s1 + $0x2b0] sm:$0xff]  ;;  %v4041_v44 = vld [vmem:[#allocation2 + $0xa0] sm:$0xff] }
 0x2df   :  { %19973 = vst [vmem:[#allocation197_spill] sm:$0xff] %v13946_v59  ;;  %6921 = vmatmul.mubr.f32.vlgmr.msra.gmra.mrb[168].mxu1 %v13932_v46  ;;  %10256 = vmatprep.subr.bf16.mxu0 %v19974_v63  ;;  %v19976_v47 = vld [vmem:[#allocation35_spill] sm:$0xff]  ;;  %v19978_v63 = vld [vmem:[#allocation36_spill] sm:$0xff]  ;;  %v19979_v18 = vld [vmem:[#allocation37_spill] sm:$0xff] }
 0x2e0   :  { %10301 = vmatpush1.bf16.msra.mxu1 %v19975_v57  ;;  %4947 = vrot.lane.b32.xlu0 %v4685_v15, %s10550_s16 }
 0x2e1   :  { %4949 = vrot.lane.b32.xlu1 %v4779_v24, %s10550_s16  ;;  %8836 = vmatprep.mubr.msk.f32.mxu0 %vm1164_vm0, %v13951_v27  ;;  %v4146_v50 = vpop.permute.xlu0 %4145  ;;  %v13976_v24 = vld [vmem:[%s18957_s1 + $0x2c8] sm:$0xff] }
 0x2e2   :  { %10258 = vmatpush1.bf16.msra.mxu0 %v19976_v47  ;;  %10302 = vmatprep.subr.bf16.mxu1 %v19474_v2  ;;  %v4207_v5 = vsel %vm4189_vm7, %v13946_v59, %v4146_v50  ;;  %v13969_v15 = vpop.permute.xlu1 %4155  ;;  %v13984_v50 = vld [vmem:[%s18957_s1 + $0x2c0] sm:$0xff]  ;;  %v19982_v59 = vld [vmem:[#allocation39_spill] sm:$0xff]  ;;  %v19983_v47 = vld [vmem:[#allocation40_spill] sm:$0xff] }
 0x2e3   :  { %19977 = vst [vmem:[#allocation198_spill] sm:$0xff] %v13969_v15  ;;  %6826 = vmatmul.mubr.f32.gmra.mrb[170].mxu0 %v13960_v36  ;;  %v4288_v57 = vadd.f32 %v4207_v5, %v4041_v44  ;;  %10260 = vmatprep.subr.bf16.mxu0 %v19978_v63  ;;  %v19981_v5 = vld [vmem:[#allocation38_spill] sm:$0xff] }
 0x2e4   :  { %10304 = vmatpush1.bf16.msra.mxu1 %v19979_v18  ;;  %8842 = vmatprep.mubr.msk.f32.mxu1 %vm1164_vm0, %v13951_v27  ;;  %v4048_v18 = vld [vmem:[#allocation2 + $0xd8] sm:$0xff] }
 0x2e5   :  { %4332 = vst.msk [vmem:[#allocation2 + $0xa0] sm:$0xff] %vm4317_vm6, %v4288_v57  ;;  %6927 = vmatmul.mubr.f32.gmra.mrb[170].mxu1 %v13960_v36  ;;  %10305 = vmatprep.subr.bf16.mxu1 %v19474_v2  ;;  %v13989_v44 = vpop.permute.xlu0 %4157  ;;  %v14001_v57 = vld [vmem:[%s18957_s1 + $0x2d8] sm:$0xff] }
 0x2e6   :  { %19980 = vst [vmem:[#allocation199_spill] sm:$0xff] %v13989_v44  ;;  %10262 = vmatpush1.bf16.msra.mxu0 %v19981_v5  ;;  %v4160_v15 = vpop.permute.xlu1 %4159  ;;  %8837 = vmatprep.mubr.msk.f32.mxu0 %vm1164_vm0, %v13976_v24 }
 0x2e7   :  { %10264 = vmatprep.subr.bf16.mxu0 %v19982_v59  ;;  %v4213_v63 = vsel %vm4189_vm7, %v13989_v44, %v4160_v15  ;;  %6832 = vmatmul.mubr.f32.gmra.mrb[172].mxu0 %v13984_v50  ;;  %v14009_v59 = vld [vmem:[%s18957_s1 + $0x2d0] sm:$0xff]  ;;  %v19985_v44 = vld [vmem:[#allocation41_spill] sm:$0xff] }
 0x2e8   :  { %10307 = vmatpush1.bf16.msra.mxu1 %v19983_v47  ;;  %v4295_v5 = vadd.f32 %v4213_v63, %v4048_v18  ;;  %8843 = vmatprep.mubr.msk.f32.mxu1 %vm1164_vm0, %v13976_v24  ;;  %v19987_v18 = vld [vmem:[#allocation42_spill] sm:$0xff]  ;;  %v19988_v63 = vld [vmem:[#allocation43_spill] sm:$0xff] }
 0x2e9   :  { %10308 = vmatprep.subr.bf16.mxu1 %v19474_v2  ;;  %v14012_v15 = vpop.permute.xlu0 %4169  ;;  %6933 = vmatmul.mubr.f32.gmra.mrb[172].mxu1 %v13984_v50 }
 0x2ea   :  { %19984 = vst [vmem:[#allocation200_spill] sm:$0xff] %v14012_v15  ;;  %4339 = vst.msk [vmem:[#allocation2 + $0xd8] sm:$0xff] %vm4317_vm6, %v4295_v5  ;;  %10266 = vmatpush1.bf16.msra.mxu0 %v19985_v44  ;;  %v14017_v47 = vpop.permute.xlu1 %4171  ;;  %8838 = vmatprep.mubr.msk.f32.mxu0 %vm1164_vm0, %v14001_v57 }
 0x2eb   :  { %19986 = vst [vmem:[#allocation201_spill] sm:$0xff] %v14017_v47  ;;  %10268 = vmatprep.subr.bf16.mxu0 %v19987_v18  ;;  %6838 = vmatmul.mubr.f32.gmra.mrb[174].mxu0 %v14009_v59  ;;  %v14033_v18 = vld [vmem:[%s18957_s1 + $0x2e8] sm:$0xff] }
 0x2ec   :  { %10310 = vmatpush1.bf16.msra.mxu1 %v19988_v63  ;;  %v5213_v58 = vpop.f32.mrb[120].mxu0  ;;  %8844 = vmatprep.mubr.msk.f32.mxu1 %vm1164_vm0, %v14001_v57  ;;  %v4055_v63 = vld [vmem:[#allocation2 + $0x110] sm:$0xff] }
 0x2ed   :  { %v5545_v5 = vsel %vm1138_vm14, %v5213_v58, 0.0  ;;  %10311 = vmatprep.subr.bf16.mxu1 %v19474_v2  ;;  %v4174_v44 = vpop.permute.xlu0 %4173  ;;  %v5215_v28 = vpop.f32.mrb[121].mxu0  ;;  %6939 = vmatmul.mubr.f32.gmra.mrb[174].mxu1 %v14009_v59 }
 0x2ee   :  { %10270 = vmatpush1.bf16.msra.mxu0 %v19990_v54  ;;  %v4219_v23 = vsel %vm4189_vm7, %v14017_v47, %v4174_v44  ;;  %v14038_v11 = vpop.permute.xlu1 %4183  ;;  %v5546_v14 = vsel %vm1139_vm15, %v5215_v28, 0.0  ;;  %5671 = vrot.lane.b32.xlu0 %v5545_v5, %s10551_s18  ;;  %v19994_v44 = vld [vmem:[#allocation46_spill] sm:$0xff] }
 0x2ef   :  { %19991 = vst [vmem:[#allocation65_spill] sm:$0xff] %v14038_v11  ;;  %v4302_v35 = vadd.f32 %v4219_v23, %v4055_v63  ;;  %10272 = vmatprep.subr.bf16.mxu0 %v19993_v9  ;;  %5673 = vrot.lane.b32.xlu1 %v5546_v14, %s10551_s18  ;;  %v5314_v54 = vpop.f32.mrb[120].mxu1  ;;  %v19997_v23 = vld [vmem:[#allocation68_spill] sm:$0xff]  ;;  %v19999_v14 = vld [vmem:[#allocation47_spill] sm:$0xff]  ;;  %v4062_v9 = vld [vmem:[#allocation2 + $0x148] sm:$0xff] }
 0x2f0   :  { %10313 = vmatpush1.bf16.msra.mxu1 %v19994_v44  ;;  %v5547_v47 = vsel %vm1140_vm1, %v5314_v54, 0.0  ;;  %v5316_v28 = vpop.f32.mrb[121].mxu1  ;;  %8839 = vmatprep.mubr.msk.f32.mxu0 %vm1164_vm0, %v14033_v18  ;;  %vm19998_vm10 = vcmp.ne.s32.totalorder %v19997_v23, 0  ;;  %v20000_v54 = vld [vmem:[#allocation48_spill] sm:$0xff]  ;;  %v20209_v11 = vld [vmem:[#allocation75_spill] sm:$0xff] }
 0x2f1   :  { %4346 = vst.msk [vmem:[#allocation2 + $0x110] sm:$0xff] %vm4317_vm6, %v4302_v35  ;;  %10314 = vmatprep.subr.bf16.mxu1 %v19474_v2  ;;  %v14057_v5 = vpop.permute.xlu0 %4185  ;;  %v5548_v63 = vsel %vm19998_vm10, %v5316_v28, 0.0  ;;  %6844 = vmatmul.mubr.f32.gmra.mrb[176].mxu0 %v14046_v22 }
 0x2f2   :  { %19996 = vst [vmem:[#allocation70_spill] sm:$0xff] %v14057_v5  ;;  %10274 = vmatpush1.bf16.msra.mxu0 %v19999_v14  ;;  %v4188_v44 = vpop.permute.xlu1 %4187  ;;  %5675 = vrot.lane.b32.xlu0 %v5547_v47, %s10551_s18 }
 0x2f3   :  { %10276 = vmatprep.subr.bf16.mxu0 %v20000_v54  ;;  %v4225_v35 = vsel %vm4189_vm7, %v14057_v5, %v4188_v44  ;;  %5677 = vrot.lane.b32.xlu1 %v5548_v63, %s10551_s18  ;;  %v5219_v4 = vpop.f32.mrb[122].mxu0  ;;  %v14080_v44 = vld [vmem:[%s18957_s1 + $0x2f8] sm:$0xff]  ;;  %v20004_v63 = vld [vmem:[#allocation51_spill] sm:$0xff] }
 0x2f4   :  { %10316 = vmatpush1.bf16.msra.mxu1 %v20001_v41  ;;  %v4309_v40 = vadd.f32 %v4225_v35, %v4062_v9  ;;  %v5552_v28 = vsel %vm1138_vm14, %v5219_v4, 0.0  ;;  %v5221_v13 = vpop.f32.mrb[123].mxu0  ;;  %8845 = vmatprep.mubr.msk.f32.mxu1 %vm1164_vm0, %v14033_v18  ;;  %v20002_v4 = vld [vmem:[#allocation50_spill] sm:$0xff]  ;;  %v20005_v5 = vld [vmem:[#allocation52_spill] sm:$0xff]  ;;  %v20008_v41 = vld [vmem:[#allocation55_spill] sm:$0xff] }
 0x2f5   :  { %v5553_v47 = vsel %vm1139_vm15, %v5221_v13, 0.0  ;;  %10317 = vmatprep.subr.bf16.mxu1 %v19474_v2  ;;  %v5320_v54 = vpop.f32.mrb[122].mxu1  ;;  %6945 = vmatmul.mubr.f32.gmra.mrb[176].mxu1 %v14046_v22  ;;  %v14088_v13 = vld [vmem:[%s18957_s1 + $0x2f0] sm:$0xff] }
 0x2f6   :  { %4353 = vst.msk [vmem:[#allocation2 + $0x148] sm:$0xff] %vm4317_vm6, %v4309_v40  ;;  %10278 = vmatpush1.bf16.msra.mxu0 %v20002_v4  ;;  %5687 = vrot.lane.b32.xlu0 %v5553_v47, %s10551_s18  ;;  %v5322_v9 = vpop.f32.mrb[123].mxu1  ;;  %20003 = vst [vmem:[#allocation67_spill] sm:$0xff] %v14088_v13  ;;  %v5554_v40 = vsel %vm1140_vm1, %v5320_v54, 0.0  ;;  %vm5072_vm6 = vcmask 1047808  }
 0x2f7   :  { %10280 = vmatprep.subr.bf16.mxu0 %v20004_v63  ;;  %5685 = vrot.lane.b32.xlu1 %v5552_v28, %s10551_s18  ;;  %v5555_v35 = vsel %vm19998_vm10, %v5322_v9, 0.0  ;;  %v20006_v63 = vld [vmem:[#allocation53_spill] sm:$0xff]  ;;  %v20007_v9 = vld [vmem:[#allocation54_spill] sm:$0xff] }
 0x2f8   :  { %10319 = vmatpush1.bf16.msra.mxu1 %v20005_v5  ;;  %v5225_v4 = vpop.f32.mrb[124].mxu0  ;;  %8840 = vmatprep.mubr.msk.f32.mxu0 %vm1164_vm0, %v14080_v44 }
 0x2f9   :  { %10320 = vmatprep.subr.bf16.mxu1 %v19474_v2  ;;  %v5227_v47 = vpop.f32.mrb[125].mxu0  ;;  %6850 = vmatmul.mubr.f32.gmra.mrb[178].mxu0 %v14088_v13  ;;  %v5559_v54 = vsel %vm1138_vm14, %v5225_v4, 0.0  ;;  %v4783_v4 = vld [vmem:[#allocation2] sm:$0xff] }
 0x2fa   :  { %10282 = vmatpush1.bf16.msra.mxu0 %v20006_v63  ;;  %5691 = vrot.lane.b32.xlu0 %v5555_v35, %s10551_s18  ;;  %v5326_v28 = vpop.f32.mrb[124].mxu1  ;;  %v5560_v14 = vsel %vm1139_vm15, %v5227_v47, 0.0 }
 0x2fb   :  { %10284 = vmatprep.subr.bf16.mxu0 %v20007_v9  ;;  %5689 = vrot.lane.b32.xlu1 %v5554_v40, %s10551_s18  ;;  %v5328_v5 = vpop.f32.mrb[125].mxu1 }
 0x2fc   :  { %10322 = vmatpush1.bf16.msra.mxu1 %v20008_v41  ;;  %8846 = vmatprep.mubr.msk.f32.mxu1 %vm1164_vm0, %v14080_v44  ;;  %v5231_v63 = vpop.f32.mrb[126].mxu0  ;;  %v5561_v41 = vsel %vm1140_vm1, %v5326_v28, 0.0 }
 0x2fd   :  { %10323 = vmatprep.subr.bf16.mxu1 %v19474_v2  ;;  %6951 = vmatmul.mubr.f32.gmra.mrb[178].mxu1 %v14088_v13  ;;  %v5233_v35 = vpop.f32.mrb[127].mxu0 }
 0x2fe   :  { %10286 = vmatpush1.bf16.msra.mxu0 %v19922_v53  ;;  %5699 = vrot.lane.b32.xlu0 %v5559_v54, %s10551_s18  ;;  %v14116_v40 = vpop.permute.xlu0 %4867  ;;  %v5562_v54 = vsel %vm19998_vm10, %v5328_v5, 0.0  ;;  %v5567_v28 = vsel %vm1139_vm15, %v5233_v35, 0.0 }
 0x2ff   :  { %20009 = vst [vmem:[#allocation68_spill] sm:$0xff] %v14116_v40  ;;  %10288 = vmatprep.subr.bf16.mxu0 %v19923_v42  ;;  %5701 = vrot.lane.b32.xlu1 %v5560_v14, %s10551_s18  ;;  %v5030_v47 = vadd.f32 %v14116_v40, %v4783_v4  ;;  %v14123_v9 = vpop.permute.xlu1 %4869  ;;  %v5332_v13 = vpop.f32.mrb[126].mxu1 }
 0x300   :  { %20010 = vst [vmem:[#allocation202_spill] sm:$0xff] %v14123_v9  ;;  %10325 = vmatpush1.bf16.msra.mxu1 %v19740_v60  ;;  %v5334_v53 = vpop.f32.mrb[127].mxu1  ;;  %8847 = vmatprep.mubr.msk.f32.mxu0 %vm1164_vm0, %v13888_v1  ;;  %v5568_v40 = vsel %vm1140_vm1, %v5332_v13, 0.0 }
 0x301   :  { %5073 = vst.msk [vmem:[#allocation2] sm:$0xff] %vm5072_vm6, %v5030_v47  ;;  %10326 = vmatprep.subr.bf16.mxu1 %v19474_v2  ;;  %8853 = vmatprep.mubr.msk.f32.mxu1 %vm1164_vm0, %v13888_v1  ;;  %v5566_v1 = vsel %vm1138_vm14, %v5231_v63, 0.0  ;;  %v5569_v35 = vsel %vm19998_vm10, %v5334_v53, 0.0 }
 0x302   :  { %10290 = vmatpush1.bf16.msra.mxu0 %v19742_v6  ;;  %5703 = vrot.lane.b32.xlu0 %v5561_v41, %s10551_s18  ;;  %v14136_v14 = vpop.permute.xlu0 %4871 }
 0x303   :  { %20011 = vst [vmem:[#allocation203_spill] sm:$0xff] %v14136_v14  ;;  %10292 = vmatprep.subr.bf16.mxu0 %v19649_v29  ;;  %5705 = vrot.lane.b32.xlu1 %v5562_v54, %s10551_s18  ;;  %v14140_v5 = vpop.permute.xlu1 %4873  ;;  %v5237_v4 = vpop.f32.mrb[128].mxu0  ;;  %v4790_v54 = vld [vmem:[#allocation2 + $0x38] sm:$0xff]  ;;  %v20015_v14 = vld [vmem:[#allocation62_spill] sm:$0xff] }
 0x304   :  { %20012 = vst [vmem:[#allocation204_spill] sm:$0xff] %v14140_v5  ;;  %10328 = vmatpush1.bf16.msra.mxu1 %v19650_v32  ;;  %v5239_v47 = vpop.f32.mrb[129].mxu0 }
 0x305   :  { %10329 = vmatprep.subr.bf16.mxu1 %v19474_v2 }
 0x306   :  { %10294 = vmatpush1.bf16.msra.mxu0 %v11438_v30  ;;  %5715 = vrot.lane.b32.xlu0 %v5567_v28, %s10551_s18  ;;  %v14150_v41 = vpop.permute.xlu0 %4883 }
 0x307   :  { %20013 = vst [vmem:[#allocation205_spill] sm:$0xff] %v14150_v41  ;;  %10296 = vmatprep.subr.bf16.mxu0 %v11442_v61  ;;  %5713 = vrot.lane.b32.xlu1 %v5566_v1, %s10551_s18  ;;  %v14156_v5 = vpop.permute.xlu1 %4881  ;;  %v5338_v63 = vpop.f32.mrb[128].mxu1  ;;  %v20288_v41 = vld [vmem:[#allocation113_spill] sm:$0xff] }
 0x308   :  { %20014 = vst [vmem:[#allocation206_spill] sm:$0xff] %v14156_v5  ;;  %10331 = vmatpush1.bf16.msra.mxu1 %v20015_v14  ;;  %v5037_v28 = vadd.f32 %v14156_v5, %v4790_v54  ;;  %v5340_v9 = vpop.f32.mrb[129].mxu1  ;;  %v20286_v5 = vld [vmem:[#allocation112_spill] sm:$0xff] }
 0x309   :  { %10332 = vmatprep.subr.bf16.mxu1 %v19474_v2 }
 0x30a   :  { %10298 = vmatpush1.bf16.msra.mxu0 %v11460_v45  ;;  %5081 = vst.msk [vmem:[#allocation2 + $0x38] sm:$0xff] %vm5072_vm6, %v5037_v28  ;;  %5719 = vrot.lane.b32.xlu0 %v5569_v35, %s10551_s18  ;;  %v14166_v53 = vpop.permute.xlu0 %4887  ;;  %v5573_v28 = vsel %vm1138_vm14, %v5237_v4, 0.0 }
 0x30b   :  { %20016 = vst [vmem:[#allocation62_spill] sm:$0xff] %v14166_v53  ;;  %10336 = vmatprep.subr.bf16.mxu0 %v10610_v3  ;;  %5717 = vrot.lane.b32.xlu1 %v5568_v40, %s10551_s18  ;;  %v14170_v1 = vpop.permute.xlu1 %4885  ;;  %v5243_v13 = vpop.f32.mrb[130].mxu0  ;;  %v5574_v3 = vsel %vm1139_vm15, %v5239_v47, 0.0  ;;  %v4797_v40 = vld [vmem:[#allocation2 + $0x70] sm:$0xff] }
 0x30c   :  { %20017 = vst [vmem:[#allocation207_spill] sm:$0xff] %v14170_v1  ;;  %10334 = vmatpush1.bf16.msra.mxu1 %v11464_v19  ;;  %v5245_v54 = vpop.f32.mrb[131].mxu0  ;;  %v20280_v1 = vld [vmem:[#allocation108_spill] sm:$0xff] }
 0x30d   :  { %7022 = vmatmul.mubr.f32.vlgmr.msra.gmra.mrb[180].mxu0 %v13932_v46  ;;  %10384 = vmatprep.subr.bf16.mxu1 %v10623_v8 }
 0x30e   :  { %10338 = vmatpush1.bf16.msra.mxu0 %v10621_v7  ;;  %8848 = vmatprep.mubr.msk.f32.mxu0 %vm1164_vm0, %v13951_v27  ;;  %v14182_v35 = vpop.permute.xlu0 %4895 }
 0x30f   :  { %20018 = vst [vmem:[#allocation208_spill] sm:$0xff] %v14182_v35  ;;  %7123 = vmatmul.mubr.f32.vlgmr.msra.gmra.mrb[180].mxu1 %v13932_v46  ;;  %10340 = vmatprep.subr.bf16.mxu0 %v10648_v16  ;;  %v5044_v8 = vadd.f32 %v14182_v35, %v4797_v40  ;;  %v14187_v53 = vpop.permute.xlu1 %4897  ;;  %v5344_v4 = vpop.f32.mrb[130].mxu1  ;;  %v5575_v46 = vsel %vm1140_vm1, %v5338_v63, 0.0  ;;  %v5576_v16 = vsel %vm19998_vm10, %v5340_v9, 0.0  ;;  %v20330_v9 = vld [vmem:[#allocation133_spill] sm:$0xff]  ;;  %v20347_v63 = vld [vmem:[#allocation144_spill] sm:$0xff] }
 0x310   :  { %20019 = vst [vmem:[#allocation209_spill] sm:$0xff] %v14187_v53  ;;  %10386 = vmatpush1.bf16.msra.mxu1 %v10635_v12  ;;  %5727 = vrot.lane.b32.xlu0 %v5573_v28, %s10551_s18  ;;  %v5346_v7 = vpop.f32.mrb[131].mxu1  ;;  %v20250_v53 = vld [vmem:[#allocation94_spill] sm:$0xff] }
 0x311   :  { %7028 = vmatmul.mubr.f32.gmra.mrb[182].mxu0 %v13960_v36  ;;  %5729 = vrot.lane.b32.xlu1 %v5574_v3, %s10551_s18  ;;  %5088 = vst.msk [vmem:[#allocation2 + $0x70] sm:$0xff] %vm5072_vm6, %v5044_v8 }
 0x312   :  { %10342 = vmatpush1.bf16.msra.mxu0 %v10650_v17  ;;  %10388 = vmatprep.subr.bf16.mxu1 %v10662_v21  ;;  %v14200_v12 = vpop.permute.xlu0 %4899  ;;  %v5580_v17 = vsel %vm1138_vm14, %v5243_v13, 0.0  ;;  %v5581_v21 = vsel %vm1139_vm15, %v5245_v54, 0.0 }
 0x313   :  { %20020 = vst [vmem:[#allocation210_spill] sm:$0xff] %v14200_v12  ;;  %8854 = vmatprep.mubr.msk.f32.mxu1 %vm1164_vm0, %v13951_v27  ;;  %10344 = vmatprep.subr.bf16.mxu0 %v10676_v26  ;;  %v14205_v47 = vpop.permute.xlu1 %4901 }
 0x314   :  { %20021 = vst [vmem:[#allocation211_spill] sm:$0xff] %v14205_v47  ;;  %10390 = vmatpush1.bf16.msra.mxu1 %v10674_v25  ;;  %5731 = vrot.lane.b32.xlu0 %v5575_v46, %s10551_s18  ;;  %v4804_v25 = vld [vmem:[#allocation2 + $0xa8] sm:$0xff]  ;;  %v4818_v46 = vld [vmem:[#allocation2 + $0x118] sm:$0xff] }
 0x315   :  { %7128 = vmatmul.mubr.f32.gmra.mrb[182].mxu1 %v13960_v36  ;;  %5733 = vrot.lane.b32.xlu1 %v5576_v16, %s10551_s18 }
 0x316   :  { %10346 = vmatpush1.bf16.msra.mxu0 %v10698_v33  ;;  %8849 = vmatprep.mubr.msk.f32.mxu0 %vm1164_vm0, %v13976_v24  ;;  %v14218_v26 = vpop.permute.xlu0 %4911 }
 0x317   :  { %20022 = vst [vmem:[#allocation212_spill] sm:$0xff] %v14218_v26  ;;  %10392 = vmatprep.subr.bf16.mxu1 %v10700_v34  ;;  %7034 = vmatmul.mubr.f32.gmra.mrb[184].mxu0 %v13984_v50  ;;  %v14222_v27 = vpop.permute.xlu1 %4909  ;;  %v20229_v26 = vld [vmem:[#allocation85_spill] sm:$0xff] }
 0x318   :  { %20023 = vst [vmem:[#allocation213_spill] sm:$0xff] %v14222_v27  ;;  %10348 = vmatprep.subr.bf16.mxu0 %v10715_v39  ;;  %10394 = vmatpush1.bf16.msra.mxu1 %v10713_v38  ;;  %v5051_v33 = vadd.f32 %v14222_v27, %v4804_v25  ;;  %v5583_v39 = vsel %vm19998_vm10, %v5346_v7, 0.0  ;;  %vm5079_vm10 = vcmask 392192   ;;  %v20227_v27 = vld [vmem:[#allocation83_spill] sm:$0xff] }
 0x319   :  { %5743 = vrot.lane.b32.xlu0 %v5581_v21, %s10551_s18  ;;  %5741 = vrot.lane.b32.xlu1 %v5580_v17, %s10551_s18  ;;  %v20037_v17 = vld [vmem:[#allocation10_spill] sm:$0xff]  ;;  %v20038_v21 = vld [vmem:[#allocation67_spill] sm:$0xff] }
 0x31a   :  { %10350 = vmatpush1.bf16.msra.mxu0 %v10742_v48  ;;  %8855 = vmatprep.mubr.msk.f32.mxu1 %vm1164_vm0, %v13976_v24  ;;  %5095 = vst.msk [vmem:[#allocation2 + $0xa8] sm:$0xff] %vm5072_vm6, %v5051_v33  ;;  %v14233_v34 = vpop.permute.xlu0 %4915  ;;  %v5582_v48 = vsel %vm1140_vm1, %v5344_v4, 0.0  ;;  %v20033_v4 = vld [vmem:[#allocation8_spill] sm:$0xff]  ;;  %v20039_v33 = vld [vmem:[#allocation13_spill] sm:$0xff] }
 0x31b   :  { %20024 = vst [vmem:[#allocation214_spill] sm:$0xff] %v14233_v34  ;;  %10396 = vmatprep.subr.bf16.mxu1 %v10727_v43  ;;  %8850 = vmatprep.mubr.msk.f32.mxu0 %vm1164_vm0, %v14001_v57  ;;  %v14240_v38 = vpop.permute.xlu1 %4913  ;;  %v20205_v34 = vld [vmem:[#allocation61_spill] sm:$0xff] }
 0x31c   :  { %20025 = vst [vmem:[#allocation215_spill] sm:$0xff] %v14240_v38  ;;  %7133 = vmatmul.mubr.f32.gmra.mrb[184].mxu1 %v13984_v50  ;;  %10352 = vmatprep.subr.bf16.mxu0 %v10754_v52  ;;  %v5415_v36 = vpop.f32.mrb[132].mxu0  ;;  %v20207_v38 = vld [vmem:[#allocation60_spill] sm:$0xff] }
 0x31d   :  { %10398 = vmatpush1.bf16.msra.mxu1 %v10752_v51  ;;  %7040 = vmatmul.mubr.f32.gmra.mrb[186].mxu0 %v14009_v59  ;;  %v5417_v24 = vpop.f32.mrb[133].mxu0  ;;  %v5549_v50 = vsel %vm1142_vm11, %v5415_v36, 0.0  ;;  %v4811_v51 = vld [vmem:[#allocation2 + $0xe0] sm:$0xff] }
 0x31e   :  { %10354 = vmatpush1.bf16.msra.mxu0 %v10784_v62  ;;  %5747 = vrot.lane.b32.xlu0 %v5583_v39, %s10551_s18  ;;  %v5550_v52 = vsel %vm1143_vm13, %v5417_v24, 0.0 }
 0x31f   :  { %5745 = vrot.lane.b32.xlu1 %v5582_v48, %s10551_s18  ;;  %10400 = vmatprep.subr.bf16.mxu1 %v10766_v56  ;;  %v5516_v43 = vpop.f32.mrb[132].mxu1  ;;  %v20040_v48 = vld [vmem:[#allocation12_spill] sm:$0xff] }
 0x320   :  { %8856 = vmatprep.mubr.msk.f32.mxu1 %vm1164_vm0, %v14001_v57  ;;  %10356 = vmatprep.subr.bf16.mxu0 %v10790_v0  ;;  %v14259_v62 = vpop.permute.xlu0 %4923  ;;  %v5421_v13 = vpop.f32.mrb[134].mxu0  ;;  %v5551_v3 = vsel %vm1144_vm12, %v5516_v43, 0.0 }
 0x321   :  { %20028 = vst [vmem:[#allocation71_spill] sm:$0xff] %v14259_v62  ;;  %10402 = vmatpush1.bf16.msra.mxu1 %v19585_v20  ;;  %v5058_v56 = vadd.f32 %v14259_v62, %v4811_v51  ;;  %8851 = vmatprep.mubr.msk.f32.mxu0 %vm1164_vm0, %v14033_v18  ;;  %v14265_v54 = vpop.permute.xlu1 %4925  ;;  %v5518_v28 = vpop.f32.mrb[133].mxu1  ;;  %v20030_v20 = vld [vmem:[#allocation73_spill] sm:$0xff]  ;;  %v5556_v40 = vsel %vm1142_vm11, %v5421_v13, 0.0  ;;  %v20043_v13 = vld [vmem:[#allocation14_spill] sm:$0xff] }
 0x322   :  { %20029 = vst [vmem:[#allocation72_spill] sm:$0xff] %v14265_v54  ;;  %7138 = vmatmul.mubr.f32.gmra.mrb[186].mxu1 %v14009_v59  ;;  %10358 = vmatpush1.bf16.msra.mxu0 %v19587_v10  ;;  %v5423_v57 = vpop.f32.mrb[135].mxu0 }
 0x323   :  { %5679 = vrot.lane.b32.xlu0 %v5549_v50, %s10551_s18  ;;  %5681 = vrot.lane.b32.xlu1 %v5550_v52, %s10551_s18  ;;  %5102 = vst.msk [vmem:[#allocation2 + $0xe0] sm:$0xff] %vm5072_vm6, %v5058_v56  ;;  %v5521_v0 = vpop.f32.mrb[134].mxu1  ;;  %v5557_v7 = vsel %vm1143_vm13, %v5423_v57, 0.0  ;;  %v20041_v50 = vld [vmem:[#allocation15_spill] sm:$0xff]  ;;  %v20045_v57 = vld [vmem:[#allocation17_spill] sm:$0xff] }
 0x324   :  { %10404 = vmatprep.subr.bf16.mxu1 %v19588_v37  ;;  %7046 = vmatmul.mubr.f32.gmra.mrb[188].mxu0 %v14046_v22  ;;  %v14278_v59 = vpop.permute.xlu0 %4927  ;;  %v5523_v10 = vpop.f32.mrb[135].mxu1 }
 0x325   :  { %20031 = vst [vmem:[#allocation73_spill] sm:$0xff] %v14278_v59  ;;  %10360 = vmatprep.subr.bf16.mxu0 %v19853_v49  ;;  %10406 = vmatpush1.bf16.msra.mxu1 %v19855_v31  ;;  %v14282_v8 = vpop.permute.xlu1 %4929  ;;  %v20034_v31 = vld [vmem:[#allocation11_spill] sm:$0xff] }
 0x326   :  { %20032 = vst [vmem:[#allocation216_spill] sm:$0xff] %v14282_v8  ;;  %10362 = vmatpush1.bf16.msra.mxu0 %v19857_v55  ;;  %8857 = vmatprep.mubr.msk.f32.mxu1 %vm1164_vm0, %v14033_v18  ;;  %v5558_v55 = vsel %vm1144_vm12, %v5521_v0, 0.0  ;;  %v20046_v0 = vld [vmem:[#allocation16_spill] sm:$0xff] }
 0x327   :  { %5683 = vrot.lane.b32.xlu0 %v5551_v3, %s10551_s18  ;;  %5693 = vrot.lane.b32.xlu1 %v5556_v40, %s10551_s18  ;;  %v5427_v37 = vpop.f32.mrb[136].mxu0  ;;  %v20047_v40 = vld [vmem:[#allocation19_spill] sm:$0xff] }
 0x328   :  { %10408 = vmatprep.subr.bf16.mxu1 %v20033_v4  ;;  %8852 = vmatprep.mubr.msk.f32.mxu0 %vm1164_vm0, %v14080_v44  ;;  %v5429_v49 = vpop.f32.mrb[137].mxu0  ;;  %v5563_v24 = vsel %vm1142_vm11, %v5427_v37, 0.0  ;;  %v20049_v4 = vld [vmem:[#allocation18_spill] sm:$0xff] }
 0x329   :  { %7143 = vmatmul.mubr.f32.gmra.mrb[188].mxu1 %v14046_v22  ;;  %10364 = vmatprep.subr.bf16.mxu0 %v20034_v31  ;;  %v14298_v18 = vpop.permute.xlu0 %4939  ;;  %v14300_v16 = vpop.permute.xlu1 %4937  ;;  %v14310_v22 = vld [vmem:[%s18957_s1 + $0x308] sm:$0xff]  ;;  %v5564_v43 = vsel %vm1143_vm13, %v5429_v49, 0.0  ;;  %v20052_v31 = vld [vmem:[#allocation20_spill] sm:$0xff] }
 0x32a   :  { %20035 = vst [vmem:[#allocation8_spill] sm:$0xff] %v14298_v18  ;;  %20036 = vst [vmem:[#allocation11_spill] sm:$0xff] %v14300_v16  ;;  %10410 = vmatpush1.bf16.msra.mxu1 %v20037_v17  ;;  %7052 = vmatmul.mubr.f32.gmra.mrb[190].mxu0 %v20038_v21  ;;  %v5065_v25 = vadd.f32 %v14300_v16, %v4818_v46 }
 0x32b   :  { %10366 = vmatpush1.bf16.msra.mxu0 %v20039_v33  ;;  %5695 = vrot.lane.b32.xlu0 %v5557_v7, %s10551_s18  ;;  %v5526_v39 = vpop.f32.mrb[136].mxu1 }
 0x32c   :  { %5697 = vrot.lane.b32.xlu1 %v5558_v55, %s10551_s18  ;;  %10412 = vmatprep.subr.bf16.mxu1 %v20040_v48  ;;  %5109 = vst.msk [vmem:[#allocation2 + $0x118] sm:$0xff] %vm5072_vm6, %v5065_v25  ;;  %v5528_v36 = vpop.f32.mrb[137].mxu1  ;;  %v20051_v55 = vld [vmem:[#allocation21_spill] sm:$0xff]  ;;  %v20053_v25 = vld [vmem:[#allocation23_spill] sm:$0xff]  ;;  %vm4951_vm6 = vcmask 261120  }
 0x32d   :  { %8858 = vmatprep.mubr.msk.f32.mxu1 %vm1164_vm0, %v14080_v44  ;;  %10368 = vmatprep.subr.bf16.mxu0 %v20041_v50  ;;  %v14322_v52 = vpop.permute.xlu0 %4943  ;;  %v5433_v51 = vpop.f32.mrb[138].mxu0  ;;  %v5565_v44 = vsel %vm1144_vm12, %v5526_v39, 0.0  ;;  %v20054_v39 = vld [vmem:[#allocation22_spill] sm:$0xff] }
 0x32e   :  { %20042 = vst [vmem:[#allocation10_spill] sm:$0xff] %v14322_v52  ;;  %10414 = vmatpush1.bf16.msra.mxu1 %v20043_v13  ;;  %v14325_v56 = vpop.permute.xlu1 %4941  ;;  %v5435_v28 = vpop.f32.mrb[139].mxu0  ;;  %8871 = vmatprep.mubr.msk.f32.mxu0 %vm1164_vm0, %v14310_v22  ;;  %v5570_v3 = vsel %vm1142_vm11, %v5433_v51, 0.0  ;;  %v20057_v51 = vld [vmem:[#allocation24_spill] sm:$0xff] }
 0x32f   :  { %20044 = vst [vmem:[#allocation67_spill] sm:$0xff] %v14325_v56  ;;  %7148 = vmatmul.mubr.f32.gmra.mrb[190].mxu1 %v20038_v21  ;;  %10370 = vmatpush1.bf16.msra.mxu0 %v20045_v57  ;;  %v5571_v17 = vsel %vm1143_vm13, %v5435_v28, 0.0 }
 0x330   :  { %5707 = vrot.lane.b32.xlu0 %v5563_v24, %s10551_s18  ;;  %5709 = vrot.lane.b32.xlu1 %v5564_v43, %s10551_s18  ;;  %v20056_v24 = vld [vmem:[#allocation25_spill] sm:$0xff]  ;;  %v4789_v43 = vld [vmem:[#allocation2 + $0x30] sm:$0xff] }
 0x331   :  { %10416 = vmatprep.subr.bf16.mxu1 %v20046_v0  ;;  %10372 = vmatprep.subr.bf16.mxu0 %v20047_v40  ;;  %v14339_v10 = vpop.permute.xlu0 %4875  ;;  %v5531_v37 = vpop.f32.mrb[138].mxu1  ;;  %v20058_v0 = vld [vmem:[#allocation27_spill] sm:$0xff]  ;;  %v20059_v40 = vld [vmem:[#allocation26_spill] sm:$0xff] }
 0x332   :  { %20048 = vst [vmem:[#allocation13_spill] sm:$0xff] %v14339_v10  ;;  %10418 = vmatpush1.bf16.msra.mxu1 %v20049_v4  ;;  %v14342_v7 = vpop.permute.xlu1 %4877  ;;  %v5533_v49 = vpop.f32.mrb[139].mxu1  ;;  %8877 = vmatprep.mubr.msk.f32.mxu1 %vm1164_vm0, %v14310_v22  ;;  %v5572_v21 = vsel %vm1144_vm12, %v5531_v37, 0.0 }
 0x333   :  { %20050 = vst [vmem:[#allocation12_spill] sm:$0xff] %v14342_v7  ;;  %10374 = vmatpush1.bf16.msra.mxu0 %v20051_v55  ;;  %10420 = vmatprep.subr.bf16.mxu1 %v20052_v31  ;;  %v20061_v49 = vld [vmem:[#allocation29_spill] sm:$0xff]  ;;  %v20062_v55 = vld [vmem:[#allocation28_spill] sm:$0xff] }
 0x334   :  { %5711 = vrot.lane.b32.xlu0 %v5565_v44, %s10551_s18  ;;  %5721 = vrot.lane.b32.xlu1 %v5570_v3, %s10551_s18  ;;  %v5439_v46 = vpop.f32.mrb[140].mxu0 }
 0x335   :  { %10376 = vmatprep.subr.bf16.mxu0 %v20053_v25  ;;  %v5441_v33 = vpop.f32.mrb[141].mxu0  ;;  %v5577_v57 = vsel %vm1142_vm11, %v5439_v46, 0.0  ;;  %v14378_v46 = vld [vmem:[%s18957_s1 + $0x300] sm:$0xff] }
 0x336   :  { %10422 = vmatpush1.bf16.msra.mxu1 %v20054_v39  ;;  %v4880_v48 = vpop.permute.xlu0 %4879  ;;  %v14356_v36 = vpop.permute.xlu1 %4889  ;;  %v5578_v44 = vsel %vm1143_vm13, %v5441_v33, 0.0 }
 0x337   :  { %20055 = vst [vmem:[#allocation15_spill] sm:$0xff] %v14356_v36  ;;  %10378 = vmatpush1.bf16.msra.mxu0 %v20056_v24  ;;  %v4957_v50 = vsel %vm4951_vm6, %v14342_v7, %v4880_v48  ;;  %10424 = vmatprep.subr.bf16.mxu1 %v20057_v51  ;;  %v20063_v24 = vld [vmem:[#allocation31_spill] sm:$0xff] }
 0x338   :  { %5723 = vrot.lane.b32.xlu0 %v5571_v17, %s10551_s18  ;;  %5725 = vrot.lane.b32.xlu1 %v5572_v21, %s10551_s18  ;;  %v5036_v13 = vadd.f32 %v4957_v50, %v4789_v43  ;;  %v5536_v28 = vpop.f32.mrb[140].mxu1  ;;  %v4796_v21 = vld [vmem:[#allocation2 + $0x68] sm:$0xff] }
 0x339   :  { %10380 = vmatprep.subr.bf16.mxu0 %v20058_v0  ;;  %v5538_v3 = vpop.f32.mrb[141].mxu1  ;;  %v5579_v33 = vsel %vm1144_vm12, %v5536_v28, 0.0  ;;  %v20064_v43 = vld [vmem:[#allocation30_spill] sm:$0xff]  ;;  %v14401_v28 = vld [vmem:[%s18957_s1 + $0x318] sm:$0xff] }
 0x33a   :  { %5080 = vst.msk [vmem:[#allocation2 + $0x30] sm:$0xff] %vm5079_vm10, %v5036_v13  ;;  %10426 = vmatpush1.bf16.msra.mxu1 %v20059_v40  ;;  %v14371_v37 = vpop.permute.xlu0 %4891  ;;  %v5445_v4 = vpop.f32.mrb[142].mxu0  ;;  %v20066_v13 = vld [vmem:[#allocation32_spill] sm:$0xff]  ;;  %v20068_v40 = vld [vmem:[#allocation33_spill] sm:$0xff] }
 0x33b   :  { %20060 = vst [vmem:[#allocation14_spill] sm:$0xff] %v14371_v37  ;;  %10382 = vmatpush1.bf16.msra.mxu0 %v20061_v49  ;;  %10428 = vmatprep.subr.bf16.mxu1 %v20062_v55  ;;  %v4894_v31 = vpop.permute.xlu1 %4893  ;;  %v5447_v17 = vpop.f32.mrb[143].mxu0  ;;  %v5584_v48 = vsel %vm1142_vm11, %v5445_v4, 0.0  ;;  %v20069_v4 = vld [vmem:[#allocation34_spill] sm:$0xff]  ;;  %v14417_v55 = vld [vmem:[%s18957_s1 + $0x310] sm:$0xff] }
 0x33c   :  { %5735 = vrot.lane.b32.xlu0 %v5577_v57, %s10551_s18  ;;  %5737 = vrot.lane.b32.xlu1 %v5578_v44, %s10551_s18  ;;  %v4963_v25 = vsel %vm4951_vm6, %v14371_v37, %v4894_v31  ;;  %v5585_v0 = vsel %vm1143_vm13, %v5447_v17, 0.0  ;;  %v20070_v31 = vld [vmem:[#allocation35_spill] sm:$0xff]  ;;  %v20097_v37 = vld [vmem:[#allocation56_spill] sm:$0xff] }
 0x33d   :  { %v5043_v39 = vadd.f32 %v4963_v25, %v4796_v21  ;;  %10432 = vmatprep.subr.bf16.mxu0 %v20063_v24  ;;  %v4803_v21 = vld [vmem:[#allocation2 + $0xa0] sm:$0xff] }
 0x33e   :  { %7582 = vmatmul.mubr.f32.vlgmr.msra.gmra.mrb[192].mxu0 %v14378_v46  ;;  %10430 = vmatpush1.bf16.msra.mxu1 %v20064_v43  ;;  %v14391_v50 = vpop.permute.xlu0 %4903  ;;  %v5541_v51 = vpop.f32.mrb[142].mxu1  ;;  %v14438_v43 = vld [vmem:[%s18957_s1 + $0x328] sm:$0xff] }
 0x33f   :  { %20065 = vst [vmem:[#allocation17_spill] sm:$0xff] %v14391_v50  ;;  %5087 = vst.msk [vmem:[#allocation2 + $0x68] sm:$0xff] %vm5079_vm10, %v5043_v39  ;;  %10434 = vmatpush1.bf16.msra.mxu0 %v20066_v13  ;;  %v14395_v57 = vpop.permute.xlu1 %4905  ;;  %10479 = vmatprep.subr.bf16.mxu1 %v19474_v2  ;;  %v5543_v44 = vpop.f32.mrb[143].mxu1  ;;  %v5586_v3 = vsel %vm1144_vm12, %v5541_v51, 0.0  ;;  %v20072_v39 = vld [vmem:[#allocation36_spill] sm:$0xff]  ;;  %v20075_v51 = vld [vmem:[#allocation38_spill] sm:$0xff] }
 0x340   :  { %20067 = vst [vmem:[#allocation16_spill] sm:$0xff] %v14395_v57  ;;  %5739 = vrot.lane.b32.xlu0 %v5579_v33, %s10551_s18  ;;  %5749 = vrot.lane.b32.xlu1 %v5584_v48, %s10551_s18  ;;  %v20073_v48 = vld [vmem:[#allocation37_spill] sm:$0xff] }
 0x341   :  { %7683 = vmatmul.mubr.f32.vlgmr.msra.gmra.mrb[192].mxu1 %v14378_v46  ;;  %10436 = vmatprep.subr.bf16.mxu0 %v20068_v40  ;;  %v14445_v44 = vld [vmem:[%s18957_s1 + $0x320] sm:$0xff]  ;;  %v20076_v40 = vld [vmem:[#allocation39_spill] sm:$0xff] }
 0x342   :  { %10481 = vmatpush1.bf16.msra.mxu1 %v20069_v4  ;;  %8872 = vmatprep.mubr.msk.f32.mxu0 %vm1164_vm0, %v14401_v28  ;;  %v4908_v49 = vpop.permute.xlu0 %4907 }
 0x343   :  { %10438 = vmatpush1.bf16.msra.mxu0 %v20070_v31  ;;  %v4969_v17 = vsel %vm4951_vm6, %v14395_v57, %v4908_v49  ;;  %v14422_v25 = vpop.permute.xlu1 %4917  ;;  %10482 = vmatprep.subr.bf16.mxu1 %v19474_v2  ;;  %v20077_v49 = vld [vmem:[#allocation40_spill] sm:$0xff]  ;;  %v20090_v57 = vld [vmem:[#allocation49_spill] sm:$0xff] }
 0x344   :  { %20071 = vst [vmem:[#allocation19_spill] sm:$0xff] %v14422_v25  ;;  %5751 = vrot.lane.b32.xlu0 %v5585_v0, %s10551_s18  ;;  %5753 = vrot.lane.b32.xlu1 %v5586_v3, %s10551_s18  ;;  %v5050_v33 = vadd.f32 %v4969_v17, %v4803_v21  ;;  %v4810_v0 = vld [vmem:[#allocation2 + $0xd8] sm:$0xff]  ;;  %v20079_v17 = vld [vmem:[#allocation41_spill] sm:$0xff] }
 0x345   :  { %7588 = vmatmul.mubr.f32.gmra.mrb[194].mxu0 %v14417_v55  ;;  %10440 = vmatprep.subr.bf16.mxu0 %v20072_v39  ;;  %v14462_v21 = vld [vmem:[%s18957_s1 + $0x338] sm:$0xff]  ;;  %v14472_v39 = vld [vmem:[%s18957_s1 + $0x330] sm:$0xff] }
 0x346   :  { %5094 = vst.msk [vmem:[#allocation2 + $0xa0] sm:$0xff] %vm5079_vm10, %v5050_v33  ;;  %10484 = vmatpush1.bf16.msra.mxu1 %v20073_v48  ;;  %8878 = vmatprep.mubr.msk.f32.mxu1 %vm1164_vm0, %v14401_v28  ;;  %v14433_v24 = vpop.permute.xlu0 %4919  ;;  %v20081_v48 = vld [vmem:[#allocation42_spill] sm:$0xff] }
 0x347   :  { %20074 = vst [vmem:[#allocation18_spill] sm:$0xff] %v14433_v24  ;;  %10442 = vmatpush1.bf16.msra.mxu0 %v20075_v51  ;;  %7689 = vmatmul.mubr.f32.gmra.mrb[194].mxu1 %v14417_v55  ;;  %v4922_v13 = vpop.permute.xlu1 %4921  ;;  %v20082_v51 = vld [vmem:[#allocation43_spill] sm:$0xff] }
 0x348   :  { %v4975_v3 = vsel %vm4951_vm6, %v14433_v24, %v4922_v13  ;;  %10444 = vmatprep.subr.bf16.mxu0 %v20076_v40  ;;  %10485 = vmatprep.subr.bf16.mxu1 %v19474_v2  ;;  %v4817_v40 = vld [vmem:[#allocation2 + $0x110] sm:$0xff]  ;;  %v20085_v24 = vld [vmem:[#allocation45_spill] sm:$0xff] }
 0x349   :  { %v5057_v4 = vadd.f32 %v4975_v3, %v4810_v0  ;;  %8873 = vmatprep.mubr.msk.f32.mxu0 %vm1164_vm0, %v14438_v43  ;;  %8879 = vmatprep.mubr.msk.f32.mxu1 %vm1164_vm0, %v14438_v43  ;;  %v20083_v3 = vld [vmem:[#allocation44_spill] sm:$0xff] }
 0x34a   :  { %10487 = vmatpush1.bf16.msra.mxu1 %v20077_v49  ;;  %v14456_v31 = vpop.permute.xlu0 %4931  ;;  %7594 = vmatmul.mubr.f32.gmra.mrb[196].mxu0 %v14445_v44 }
 0x34b   :  { %20078 = vst [vmem:[#allocation21_spill] sm:$0xff] %v14456_v31  ;;  %5101 = vst.msk [vmem:[#allocation2 + $0xd8] sm:$0xff] %vm5079_vm10, %v5057_v4  ;;  %10446 = vmatpush1.bf16.msra.mxu0 %v20079_v17  ;;  %v14466_v33 = vpop.permute.xlu1 %4933  ;;  %10488 = vmatprep.subr.bf16.mxu1 %v19474_v2 }
 0x34c   :  { %20080 = vst [vmem:[#allocation20_spill] sm:$0xff] %v14466_v33  ;;  %10448 = vmatprep.subr.bf16.mxu0 %v20081_v48  ;;  %7695 = vmatmul.mubr.f32.gmra.mrb[196].mxu1 %v14445_v44 }
 0x34d   :  { %8874 = vmatprep.mubr.msk.f32.mxu0 %vm1164_vm0, %v14462_v21  ;;  %8880 = vmatprep.mubr.msk.f32.mxu1 %vm1164_vm0, %v14462_v21 }
 0x34e   :  { %10490 = vmatpush1.bf16.msra.mxu1 %v20082_v51  ;;  %v4936_v13 = vpop.permute.xlu0 %4935  ;;  %v6017_v0 = vpop.f32.mrb[144].mxu0  ;;  %7600 = vmatmul.mubr.f32.gmra.mrb[198].mxu0 %v14472_v39  ;;  %v14493_v51 = vld [vmem:[%s18957_s1 + $0x348] sm:$0xff] }
 0x34f   :  { %10450 = vmatpush1.bf16.msra.mxu0 %v20083_v3  ;;  %v4981_v4 = vsel %vm4951_vm6, %v14466_v33, %v4936_v13  ;;  %v14485_v49 = vpop.permute.xlu1 %4945  ;;  %v6349_v17 = vsel %vm1145_vm2, %v6017_v0, 0.0  ;;  %v6019_v48 = vpop.f32.mrb[145].mxu0  ;;  %10491 = vmatprep.subr.bf16.mxu1 %v19474_v2 }
 0x350   :  { %20084 = vst [vmem:[#allocation23_spill] sm:$0xff] %v14485_v49  ;;  %v5064_v31 = vadd.f32 %v4981_v4, %v4817_v40  ;;  %v6350_v3 = vsel %vm1146_vm5, %v6019_v48, 0.0  ;;  %10452 = vmatprep.subr.bf16.mxu0 %v20085_v24  ;;  %6475 = vrot.lane.b32.xlu0 %v6349_v17, %s10552_s20  ;;  %v6118_v13 = vpop.f32.mrb[144].mxu1  ;;  %v20086_v40 = vld [vmem:[#allocation46_spill] sm:$0xff]  ;;  %v14514_v17 = vld [vmem:[%s18957_s1 + $0x340] sm:$0xff]  ;;  %v20088_v48 = vld [vmem:[#allocation47_spill] sm:$0xff] }
 0x351   :  { %6477 = vrot.lane.b32.xlu1 %v6350_v3, %s10552_s20  ;;  %v6351_v0 = vsel %vm1147_vm3, %v6118_v13, 0.0  ;;  %v6120_v49 = vpop.f32.mrb[145].mxu1  ;;  %7701 = vmatmul.mubr.f32.gmra.mrb[198].mxu1 %v14472_v39 }
 0x352   :  { %5108 = vst.msk [vmem:[#allocation2 + $0x110] sm:$0xff] %vm5079_vm10, %v5064_v31  ;;  %10493 = vmatpush1.bf16.msra.mxu1 %v20086_v40  ;;  %v14505_v4 = vpop.permute.xlu0 %4947  ;;  %v6352_v24 = vsel %vm1148_vm4, %v6120_v49, 0.0  ;;  %8875 = vmatprep.mubr.msk.f32.mxu0 %vm1164_vm0, %v14493_v51  ;;  %v4824_v31 = vld [vmem:[#allocation2 + $0x148] sm:$0xff]  ;;  %v20089_v40 = vld [vmem:[#allocation48_spill] sm:$0xff] }
 0x353   :  { %20087 = vst [vmem:[#allocation22_spill] sm:$0xff] %v14505_v4  ;;  %10454 = vmatpush1.bf16.msra.mxu0 %v20088_v48  ;;  %v4950_v3 = vpop.permute.xlu1 %4949  ;;  %10494 = vmatprep.subr.bf16.mxu1 %v19474_v2 }
 0x354   :  { %v4987_v13 = vsel %vm4951_vm6, %v14505_v4, %v4950_v3  ;;  %10456 = vmatprep.subr.bf16.mxu0 %v20089_v40  ;;  %6479 = vrot.lane.b32.xlu0 %v6351_v0, %s10552_s20  ;;  %v6023_v49 = vpop.f32.mrb[146].mxu0  ;;  %v20091_v0 = vld [vmem:[#allocation50_spill] sm:$0xff]  ;;  %v20092_v3 = vld [vmem:[#allocation51_spill] sm:$0xff] }
 0x355   :  { %v5071_v33 = vadd.f32 %v4987_v13, %v4824_v31  ;;  %6481 = vrot.lane.b32.xlu1 %v6352_v24, %s10552_s20  ;;  %v6025_v25 = vpop.f32.mrb[147].mxu0  ;;  %7606 = vmatmul.mubr.f32.gmra.mrb[200].mxu0 %v14514_v17  ;;  %v6356_v48 = vsel %vm1145_vm2, %v6023_v49, 0.0  ;;  %v20093_v13 = vld [vmem:[#allocation52_spill] sm:$0xff]  ;;  %v20096_v4 = vld [vmem:[#allocation55_spill] sm:$0xff] }
 0x356   :  { %10496 = vmatpush1.bf16.msra.mxu1 %v20090_v57  ;;  %v6357_v50 = vsel %vm1146_vm5, %v6025_v25, 0.0  ;;  %8881 = vmatprep.mubr.msk.f32.mxu1 %vm1164_vm0, %v14493_v51  ;;  %v14537_v57 = vld [vmem:[%s18957_s1 + $0x358] sm:$0xff] }
 0x357   :  { %5115 = vst.msk [vmem:[#allocation2 + $0x148] sm:$0xff] %vm5079_vm10, %v5071_v33  ;;  %10458 = vmatpush1.bf16.msra.mxu0 %v20091_v0  ;;  %10497 = vmatprep.subr.bf16.mxu1 %v19474_v2  ;;  %v6124_v24 = vpop.f32.mrb[146].mxu1  ;;  %vm5876_vm10 = vcmask 1047800  }
 0x358   :  { %10460 = vmatprep.subr.bf16.mxu0 %v20092_v3  ;;  %6491 = vrot.lane.b32.xlu0 %v6357_v50, %s10552_s20  ;;  %v6126_v25 = vpop.f32.mrb[147].mxu1  ;;  %v6358_v40 = vsel %vm1147_vm3, %v6124_v24, 0.0  ;;  %v14553_v50 = vld [vmem:[%s18957_s1 + $0x350] sm:$0xff]  ;;  %v20095_v3 = vld [vmem:[#allocation54_spill] sm:$0xff]  ;;  %s10553_s1 = smov 4  }
 0x359   :  { %6489 = vrot.lane.b32.xlu1 %v6356_v48, %s10552_s20  ;;  %v6359_v33 = vsel %vm1148_vm4, %v6126_v25, 0.0  ;;  %v6029_v31 = vpop.f32.mrb[148].mxu0  ;;  %7707 = vmatmul.mubr.f32.gmra.mrb[200].mxu1 %v14514_v17  ;;  %v20094_v48 = vld [vmem:[#allocation53_spill] sm:$0xff] }
 0x35a   :  { %10499 = vmatpush1.bf16.msra.mxu1 %v20093_v13  ;;  %v6031_v49 = vpop.f32.mrb[149].mxu0  ;;  %8876 = vmatprep.mubr.msk.f32.mxu0 %vm1164_vm0, %v14537_v57  ;;  %v6363_v24 = vsel %vm1145_vm2, %v6029_v31, 0.0 }
 0x35b   :  { %10462 = vmatpush1.bf16.msra.mxu0 %v20094_v48  ;;  %10500 = vmatprep.subr.bf16.mxu1 %v19474_v2  ;;  %v6130_v0 = vpop.f32.mrb[148].mxu1  ;;  %v6364_v48 = vsel %vm1146_vm5, %v6031_v49, 0.0 }
 0x35c   :  { %10464 = vmatprep.subr.bf16.mxu0 %v20095_v3  ;;  %6495 = vrot.lane.b32.xlu0 %v6359_v33, %s10552_s20  ;;  %v6132_v25 = vpop.f32.mrb[149].mxu1  ;;  %v5587_v33 = vld [vmem:[#allocation2] sm:$0xff] }
 0x35d   :  { %6493 = vrot.lane.b32.xlu1 %v6358_v40, %s10552_s20  ;;  %7612 = vmatmul.mubr.f32.gmra.mrb[202].mxu0 %v14553_v50  ;;  %v6035_v13 = vpop.f32.mrb[150].mxu0 }
 0x35e   :  { %10502 = vmatpush1.bf16.msra.mxu1 %v20096_v4  ;;  %8882 = vmatprep.mubr.msk.f32.mxu1 %vm1164_vm0, %v14537_v57  ;;  %v6037_v3 = vpop.f32.mrb[151].mxu0  ;;  %v6365_v4 = vsel %vm1147_vm3, %v6130_v0, 0.0 }
 0x35f   :  { %10466 = vmatpush1.bf16.msra.mxu0 %v20097_v37  ;;  %10503 = vmatprep.subr.bf16.mxu1 %v19474_v2 }
 0x360   :  { %10468 = vmatprep.subr.bf16.mxu0 %v19923_v42  ;;  %6503 = vrot.lane.b32.xlu0 %v6363_v24, %s10552_s20  ;;  %v14572_v31 = vpop.permute.xlu0 %5671  ;;  %v6366_v42 = vsel %vm1148_vm4, %v6132_v25, 0.0 }
 0x361   :  { %20098 = vst [vmem:[#allocation25_spill] sm:$0xff] %v14572_v31  ;;  %6505 = vrot.lane.b32.xlu1 %v6364_v48, %s10552_s20  ;;  %v5834_v40 = vadd.f32 %v14572_v31, %v5587_v33  ;;  %v14578_v49 = vpop.permute.xlu1 %5673  ;;  %7713 = vmatmul.mubr.f32.gmra.mrb[202].mxu1 %v14553_v50 }
 0x362   :  { %20099 = vst [vmem:[#allocation24_spill] sm:$0xff] %v14578_v49  ;;  %10505 = vmatpush1.bf16.msra.mxu1 %v19740_v60  ;;  %v6136_v37 = vpop.f32.mrb[150].mxu1  ;;  %8883 = vmatprep.mubr.msk.f32.mxu0 %vm1164_vm0, %v14310_v22  ;;  %v6371_v60 = vsel %vm1146_vm5, %v6037_v3, 0.0 }
 0x363   :  { %10470 = vmatpush1.bf16.msra.mxu0 %v19742_v6  ;;  %5877 = vst.msk [vmem:[#allocation2] sm:$0xff] %vm5876_vm10, %v5834_v40  ;;  %10506 = vmatprep.subr.bf16.mxu1 %v19474_v2  ;;  %v6138_v0 = vpop.f32.mrb[151].mxu1 }
 0x364   :  { %10472 = vmatprep.subr.bf16.mxu0 %v19649_v29  ;;  %6507 = vrot.lane.b32.xlu0 %v6365_v4, %s10552_s20  ;;  %v14591_v24 = vpop.permute.xlu0 %5675  ;;  %v6370_v29 = vsel %vm1145_vm2, %v6035_v13, 0.0 }
 0x365   :  { %20100 = vst [vmem:[#allocation27_spill] sm:$0xff] %v14591_v24  ;;  %6509 = vrot.lane.b32.xlu1 %v6366_v42, %s10552_s20  ;;  %v14596_v25 = vpop.permute.xlu1 %5677  ;;  %v6041_v48 = vpop.f32.mrb[152].mxu0  ;;  %8889 = vmatprep.mubr.msk.f32.mxu1 %vm1164_vm0, %v14310_v22  ;;  %v6373_v22 = vsel %vm1148_vm4, %v6138_v0, 0.0  ;;  %v5601_v0 = vld [vmem:[#allocation2 + $0x70] sm:$0xff] }
 0x366   :  { %20101 = vst [vmem:[#allocation26_spill] sm:$0xff] %v14596_v25  ;;  %10508 = vmatpush1.bf16.msra.mxu1 %v19650_v32  ;;  %v6043_v6 = vpop.f32.mrb[153].mxu0  ;;  %v5594_v32 = vld [vmem:[#allocation2 + $0x38] sm:$0xff]  ;;  %v20290_v25 = vld [vmem:[#allocation114_spill] sm:$0xff] }
 0x367   :  { %10474 = vmatpush1.bf16.msra.mxu0 %v11438_v30  ;;  %10509 = vmatprep.subr.bf16.mxu1 %v19474_v2  ;;  %v6372_v30 = vsel %vm1147_vm3, %v6136_v37, 0.0 }
 0x368   :  { %10476 = vmatprep.subr.bf16.mxu0 %v11442_v61  ;;  %6519 = vrot.lane.b32.xlu0 %v6371_v60, %s10552_s20  ;;  %v14607_v3 = vpop.permute.xlu0 %5687 }
 0x369   :  { %20102 = vst [vmem:[#allocation29_spill] sm:$0xff] %v14607_v3  ;;  %6517 = vrot.lane.b32.xlu1 %v6370_v29, %s10552_s20  ;;  %v14612_v33 = vpop.permute.xlu1 %5685  ;;  %v20272_v3 = vld [vmem:[#allocation105_spill] sm:$0xff] }
 0x36a   :  { %20103 = vst [vmem:[#allocation28_spill] sm:$0xff] %v14612_v33  ;;  %10511 = vmatpush1.bf16.msra.mxu1 %v20015_v14  ;;  %v5841_v13 = vadd.f32 %v14612_v33, %v5594_v32  ;;  %v6142_v61 = vpop.f32.mrb[152].mxu1  ;;  %v6377_v14 = vsel %vm1145_vm2, %v6041_v48, 0.0  ;;  %v20270_v33 = vld [vmem:[#allocation59_spill] sm:$0xff] }
 0x36b   :  { %10478 = vmatpush1.bf16.msra.mxu0 %v11460_v45  ;;  %10512 = vmatprep.subr.bf16.mxu1 %v19474_v2  ;;  %v6144_v4 = vpop.f32.mrb[153].mxu1  ;;  %v6378_v2 = vsel %vm1146_vm5, %v6043_v6, 0.0  ;;  %v6379_v48 = vsel %vm1147_vm3, %v6142_v61, 0.0 }
 0x36c   :  { %5885 = vst.msk [vmem:[#allocation2 + $0x38] sm:$0xff] %vm5876_vm10, %v5841_v13  ;;  %6523 = vrot.lane.b32.xlu0 %v6373_v22, %s10552_s20  ;;  %v14622_v40 = vpop.permute.xlu0 %5691  ;;  %v6380_v6 = vsel %vm1148_vm4, %v6144_v4, 0.0  ;;  %v5608_v4 = vld [vmem:[#allocation2 + $0xa8] sm:$0xff] }
 0x36d   :  { %20104 = vst [vmem:[#allocation31_spill] sm:$0xff] %v14622_v40  ;;  %6521 = vrot.lane.b32.xlu1 %v6372_v30, %s10552_s20  ;;  %v14627_v42 = vpop.permute.xlu1 %5689  ;;  %v6047_v37 = vpop.f32.mrb[154].mxu0 }
 0x36e   :  { %20105 = vst [vmem:[#allocation30_spill] sm:$0xff] %v14627_v42  ;;  %7784 = vmatmul.mubr.f32.vlgmr.msra.gmra.mrb[204].mxu0 %v14378_v46  ;;  %10514 = vmatpush1.bf16.msra.mxu1 %v11464_v19  ;;  %v6049_v45 = vpop.f32.mrb[155].mxu0  ;;  %v6384_v13 = vsel %vm1145_vm2, %v6047_v37, 0.0  ;;  %vm20114_vm2 = vcmp.ne.s32.totalorder %v20030_v20, 27 }
 0x36f   :  { %8884 = vmatprep.mubr.msk.f32.mxu0 %vm1164_vm0, %v14401_v28 }
 0x370   :  { %6531 = vrot.lane.b32.xlu0 %v6377_v14, %s10552_s20  ;;  %v14636_v60 = vpop.permute.xlu0 %5699 }
 0x371   :  { %20106 = vst [vmem:[#allocation32_spill] sm:$0xff] %v14636_v60  ;;  %7885 = vmatmul.mubr.f32.vlgmr.msra.gmra.mrb[204].mxu1 %v14378_v46  ;;  %6533 = vrot.lane.b32.xlu1 %v6378_v2, %s10552_s20  ;;  %v5848_v19 = vadd.f32 %v14636_v60, %v5601_v0  ;;  %v14643_v29 = vpop.permute.xlu1 %5701  ;;  %v20234_v60 = vld [vmem:[#allocation3_spill] sm:$0xff] }
 0x372   :  { %20107 = vst [vmem:[#allocation33_spill] sm:$0xff] %v14643_v29  ;;  %7790 = vmatmul.mubr.f32.gmra.mrb[206].mxu0 %v14417_v55  ;;  %8890 = vmatprep.mubr.msk.f32.mxu1 %vm1164_vm0, %v14401_v28  ;;  %v6148_v22 = vpop.f32.mrb[154].mxu1  ;;  %v6385_v28 = vsel %vm1146_vm5, %v6049_v45, 0.0  ;;  %vm5755_vm5 = vcmask 252928   ;;  %v20235_v29 = vld [vmem:[#allocation87_spill] sm:$0xff] }
 0x373   :  { %5892 = vst.msk [vmem:[#allocation2 + $0x70] sm:$0xff] %vm5876_vm10, %v5848_v19  ;;  %8885 = vmatprep.mubr.msk.f32.mxu0 %vm1164_vm0, %v14438_v43  ;;  %v6150_v46 = vpop.f32.mrb[155].mxu1 }
 0x374   :  { %6535 = vrot.lane.b32.xlu0 %v6379_v48, %s10552_s20  ;;  %v14654_v32 = vpop.permute.xlu0 %5703  ;;  %v6387_v61 = vsel %vm1148_vm4, %v6150_v46, 0.0 }
 0x375   :  { %20108 = vst [vmem:[#allocation34_spill] sm:$0xff] %v14654_v32  ;;  %7890 = vmatmul.mubr.f32.gmra.mrb[206].mxu1 %v14417_v55  ;;  %6537 = vrot.lane.b32.xlu1 %v6380_v6, %s10552_s20  ;;  %v14660_v30 = vpop.permute.xlu1 %5705 }
 0x376   :  { %20109 = vst [vmem:[#allocation35_spill] sm:$0xff] %v14660_v30  ;;  %7796 = vmatmul.mubr.f32.gmra.mrb[208].mxu0 %v14445_v44  ;;  %8891 = vmatprep.mubr.msk.f32.mxu1 %vm1164_vm0, %v14438_v43  ;;  %v6386_v43 = vsel %vm1147_vm3, %v6148_v22, 0.0 }
 0x377   :  { %8886 = vmatprep.mubr.msk.f32.mxu0 %vm1164_vm0, %v14462_v21 }
 0x378   :  { %6547 = vrot.lane.b32.xlu0 %v6385_v28, %s10552_s20  ;;  %v14670_v55 = vpop.permute.xlu0 %5715 }
 0x379   :  { %20110 = vst [vmem:[#allocation36_spill] sm:$0xff] %v14670_v55  ;;  %6545 = vrot.lane.b32.xlu1 %v6384_v13, %s10552_s20  ;;  %7895 = vmatmul.mubr.f32.gmra.mrb[208].mxu1 %v14445_v44  ;;  %v14676_v14 = vpop.permute.xlu1 %5713 }
 0x37a   :  { %20111 = vst [vmem:[#allocation37_spill] sm:$0xff] %v14676_v14  ;;  %7802 = vmatmul.mubr.f32.gmra.mrb[210].mxu0 %v14472_v39  ;;  %v5855_v37 = vadd.f32 %v14676_v14, %v5608_v4  ;;  %8892 = vmatprep.mubr.msk.f32.mxu1 %vm1164_vm0, %v14462_v21 }
 0x37b   :  { %8887 = vmatprep.mubr.msk.f32.mxu0 %vm1164_vm0, %v14493_v51 }
 0x37c   :  { %5899 = vst.msk [vmem:[#allocation2 + $0xa8] sm:$0xff] %vm5876_vm10, %v5855_v37  ;;  %6551 = vrot.lane.b32.xlu0 %v6387_v61, %s10552_s20  ;;  %v14688_v44 = vpop.permute.xlu0 %5719 }
 0x37d   :  { %20112 = vst [vmem:[#allocation38_spill] sm:$0xff] %v14688_v44  ;;  %6549 = vrot.lane.b32.xlu1 %v6386_v43, %s10552_s20  ;;  %7900 = vmatmul.mubr.f32.gmra.mrb[210].mxu1 %v14472_v39  ;;  %v14692_v2 = vpop.permute.xlu1 %5717 }
 0x37e   :  { %20113 = vst [vmem:[#allocation39_spill] sm:$0xff] %v14692_v2  ;;  %v6219_v45 = vpop.f32.mrb[156].mxu0  ;;  %7808 = vmatmul.mubr.f32.gmra.mrb[212].mxu0 %v14514_v17  ;;  %8893 = vmatprep.mubr.msk.f32.mxu1 %vm1164_vm0, %v14493_v51  ;;  %v5615_v51 = vld [vmem:[#allocation2 + $0xe0] sm:$0xff] }
 0x37f   :  { %v6353_v21 = vsel %vm1149_vm8, %v6219_v45, 0.0  ;;  %v6221_v0 = vpop.f32.mrb[157].mxu0  ;;  %8888 = vmatprep.mubr.msk.f32.mxu0 %vm1164_vm0, %v14537_v57 }
 0x380   :  { %v6354_v48 = vsel %vm1150_vm9, %v6221_v0, 0.0  ;;  %6483 = vrot.lane.b32.xlu0 %v6353_v21, %s10552_s20  ;;  %v6320_v39 = vpop.f32.mrb[156].mxu1 }
 0x381   :  { %6485 = vrot.lane.b32.xlu1 %v6354_v48, %s10552_s20  ;;  %v6355_v19 = vsel %vm20114_vm2, %v6320_v39, 0.0  ;;  %v6322_v6 = vpop.f32.mrb[157].mxu1  ;;  %7905 = vmatmul.mubr.f32.gmra.mrb[212].mxu1 %v14514_v17 }
 0x382   :  { %v14708_v22 = vpop.permute.xlu0 %5727  ;;  %v6225_v46 = vpop.f32.mrb[158].mxu0  ;;  %7814 = vmatmul.mubr.f32.gmra.mrb[214].mxu0 %v14553_v50  ;;  %8894 = vmatprep.mubr.msk.f32.mxu1 %vm1164_vm0, %v14537_v57  ;;  %vm20118_vm0 = vmmov %vm20114_vm2  ;;  %v5622_v6 = vld [vmem:[#allocation2 + $0x118] sm:$0xff] }
 0x383   :  { %20115 = vst [vmem:[#allocation40_spill] sm:$0xff] %v14708_v22  ;;  %v5862_v28 = vadd.f32 %v14708_v22, %v5615_v51  ;;  %v14714_v13 = vpop.permute.xlu1 %5729  ;;  %v6360_v61 = vsel %vm1149_vm8, %v6225_v46, 0.0  ;;  %v6227_v4 = vpop.f32.mrb[159].mxu0  ;;  %vm20122_vm3 = vmmov %vm20118_vm0 }
 0x384   :  { %20116 = vst [vmem:[#allocation41_spill] sm:$0xff] %v14714_v13  ;;  %6487 = vrot.lane.b32.xlu0 %v6355_v19, %s10552_s20  ;;  %v6361_v17 = vsel %vm1150_vm9, %v6227_v4, 0.0  ;;  %vm20125_vm4 = vmmov %vm20118_vm0 }
 0x385   :  { %5906 = vst.msk [vmem:[#allocation2 + $0xe0] sm:$0xff] %vm5876_vm10, %v5862_v28  ;;  %6497 = vrot.lane.b32.xlu1 %v6360_v61, %s10552_s20  ;;  %7910 = vmatmul.mubr.f32.gmra.mrb[214].mxu1 %v14553_v50  ;;  %vm20129_vm2 = vmmov %vm20118_vm0 }
 0x386   :  { %v14724_v57 = vpop.permute.xlu0 %5731  ;;  %v6325_v43 = vpop.f32.mrb[158].mxu1 }
 0x387   :  { %20117 = vst [vmem:[#allocation42_spill] sm:$0xff] %v14724_v57  ;;  %v6362_v37 = vsel %vm20118_vm0, %v6325_v43, 0.0  ;;  %v14728_v45 = vpop.permute.xlu1 %5733  ;;  %v6327_v21 = vpop.f32.mrb[159].mxu1 }
 0x388   :  { %20119 = vst [vmem:[#allocation43_spill] sm:$0xff] %v14728_v45  ;;  %6499 = vrot.lane.b32.xlu0 %v6361_v17, %s10552_s20  ;;  %v6231_v0 = vpop.f32.mrb[160].mxu0  ;;  %v6405_v45 = vld [vmem:[#allocation2 + $0x70] sm:$0xff] }
 0x389   :  { %6501 = vrot.lane.b32.xlu1 %v6362_v37, %s10552_s20  ;;  %v6367_v48 = vsel %vm1149_vm8, %v6231_v0, 0.0  ;;  %v6233_v39 = vpop.f32.mrb[161].mxu0 }
 0x38a   :  { %v6368_v50 = vsel %vm1150_vm9, %v6233_v39, 0.0 }
 0x38b   :  { %v14736_v19 = vpop.permute.xlu0 %5743  ;;  %v14738_v51 = vpop.permute.xlu1 %5741 }
 0x38c   :  { %20120 = vst [vmem:[#allocation44_spill] sm:$0xff] %v14736_v19  ;;  %20121 = vst [vmem:[#allocation45_spill] sm:$0xff] %v14738_v51  ;;  %v5869_v46 = vadd.f32 %v14738_v51, %v5622_v6  ;;  %6511 = vrot.lane.b32.xlu0 %v6367_v48, %s10552_s20  ;;  %v6398_v51 = vld [vmem:[#allocation2 + $0x38] sm:$0xff]  ;;  %v6419_v13 = vld [vmem:[#allocation2 + $0xe0] sm:$0xff] }
 0x38d   :  { %6513 = vrot.lane.b32.xlu1 %v6368_v50, %s10552_s20  ;;  %v6330_v28 = vpop.f32.mrb[160].mxu1 }
 0x38e   :  { %5913 = vst.msk [vmem:[#allocation2 + $0x118] sm:$0xff] %vm5876_vm10, %v5869_v46  ;;  %v6369_v61 = vsel %vm20122_vm3, %v6330_v28, 0.0  ;;  %v6332_v4 = vpop.f32.mrb[161].mxu1  ;;  %vm5883_vm10 = vcmask 384000   ;;  %vm6687_vm3 = vcmask 171008  }
 0x38f   :  { %v6237_v17 = vpop.f32.mrb[162].mxu0 }
 0x390   :  { %v14746_v43 = vpop.permute.xlu0 %5747  ;;  %v6374_v37 = vsel %vm1149_vm8, %v6237_v17, 0.0  ;;  %6515 = vrot.lane.b32.xlu0 %v6369_v61, %s10552_s20  ;;  %v6239_v21 = vpop.f32.mrb[163].mxu0 }
 0x391   :  { %20123 = vst [vmem:[#allocation46_spill] sm:$0xff] %v14746_v43  ;;  %v14751_v0 = vpop.permute.xlu1 %5745  ;;  %6525 = vrot.lane.b32.xlu1 %v6374_v37, %s10552_s20  ;;  %v6375_v48 = vsel %vm1150_vm9, %v6239_v21, 0.0 }
 0x392   :  { %20124 = vst [vmem:[#allocation47_spill] sm:$0xff] %v14751_v0 }
 0x393   :  { %v6335_v39 = vpop.f32.mrb[162].mxu1 }
 0x394   :  { %v6376_v50 = vsel %vm20125_vm4, %v6335_v39, 0.0  ;;  %6527 = vrot.lane.b32.xlu0 %v6375_v48, %s10552_s20  ;;  %v6337_v6 = vpop.f32.mrb[163].mxu1  ;;  %v5593_v39 = vld [vmem:[#allocation2 + $0x30] sm:$0xff]  ;;  %vm20175_vm4 = vcmp.ne.s32.totalorder %v19997_v23, 0 }
 0x395   :  { %v14759_v46 = vpop.permute.xlu0 %5679  ;;  %v14761_v28 = vpop.permute.xlu1 %5681  ;;  %6529 = vrot.lane.b32.xlu1 %v6376_v50, %s10552_s20 }
 0x396   :  { %20126 = vst [vmem:[#allocation48_spill] sm:$0xff] %v14759_v46  ;;  %20127 = vst [vmem:[#allocation49_spill] sm:$0xff] %v14761_v28  ;;  %v6243_v61 = vpop.f32.mrb[164].mxu0 }
 0x397   :  { %v6381_v4 = vsel %vm1149_vm8, %v6243_v61, 0.0  ;;  %v6245_v17 = vpop.f32.mrb[165].mxu0 }
 0x398   :  { %v6382_v37 = vsel %vm1150_vm9, %v6245_v17, 0.0  ;;  %6539 = vrot.lane.b32.xlu0 %v6381_v4, %s10552_s20 }
 0x399   :  { %v5684_v21 = vpop.permute.xlu0 %5683  ;;  %v14769_v48 = vpop.permute.xlu1 %5693  ;;  %6541 = vrot.lane.b32.xlu1 %v6382_v37, %s10552_s20 }
 0x39a   :  { %20128 = vst [vmem:[#allocation50_spill] sm:$0xff] %v14769_v48  ;;  %v5761_v50 = vsel %vm5755_vm5, %v14761_v28, %v5684_v21  ;;  %v6340_v6 = vpop.f32.mrb[164].mxu1 }
 0x39b   :  { %v5840_v46 = vadd.f32 %v5761_v50, %v5593_v39  ;;  %v6383_v61 = vsel %vm20129_vm2, %v6340_v6, 0.0  ;;  %v6342_v36 = vpop.f32.mrb[165].mxu1  ;;  %v5600_v39 = vld [vmem:[#allocation2 + $0x68] sm:$0xff]  ;;  %vm7442_vm2 = vcmask 1047584  }
 0x39c   :  { %v6249_v17 = vpop.f32.mrb[166].mxu0  ;;  %6543 = vrot.lane.b32.xlu0 %v6383_v61, %s10552_s20 }
 0x39d   :  { %5884 = vst.msk [vmem:[#allocation2 + $0x30] sm:$0xff] %vm5883_vm10, %v5840_v46  ;;  %v14778_v4 = vpop.permute.xlu0 %5695  ;;  %v6388_v37 = vsel %vm1149_vm8, %v6249_v17, 0.0  ;;  %v6251_v48 = vpop.f32.mrb[167].mxu0  ;;  %vm6680_vm8 = vcmask 1047592  }
 0x39e   :  { %20130 = vst [vmem:[#allocation51_spill] sm:$0xff] %v14778_v4  ;;  %v5698_v43 = vpop.permute.xlu1 %5697  ;;  %6553 = vrot.lane.b32.xlu1 %v6388_v37, %s10552_s20  ;;  %v6389_v21 = vsel %vm1150_vm9, %v6251_v48, 0.0  ;;  %vm6559_vm9 = vcmask 39936  }
 0x39f   :  { %v5767_v36 = vsel %vm5755_vm5, %v14778_v4, %v5698_v43  ;;  %v5607_v43 = vld [vmem:[#allocation2 + $0xa0] sm:$0xff] }
 0x3a0   :  { %v5847_v50 = vadd.f32 %v5767_v36, %v5600_v39  ;;  %v6345_v6 = vpop.f32.mrb[166].mxu1  ;;  %6555 = vrot.lane.b32.xlu0 %v6389_v21, %s10552_s20 }
 0x3a1   :  { %v6390_v46 = vsel %vm20118_vm0, %v6345_v6, 0.0  ;;  %v6347_v61 = vpop.f32.mrb[167].mxu1  ;;  %vm20179_vm0 = vmmov %vm20175_vm4 }
 0x3a2   :  { %5891 = vst.msk [vmem:[#allocation2 + $0x68] sm:$0xff] %vm5883_vm10, %v5847_v50  ;;  %v14791_v17 = vpop.permute.xlu0 %5707  ;;  %v14793_v37 = vpop.permute.xlu1 %5709  ;;  %6557 = vrot.lane.b32.xlu1 %v6390_v46, %s10552_s20  ;;  %v5614_v50 = vld [vmem:[#allocation2 + $0xd8] sm:$0xff] }
 0x3a3   :  { %20131 = vst [vmem:[#allocation52_spill] sm:$0xff] %v14791_v17  ;;  %20132 = vst [vmem:[#allocation53_spill] sm:$0xff] %v14793_v37 }
 0x3a6   :  { %v5712_v48 = vpop.permute.xlu0 %5711  ;;  %v14796_v28 = vpop.permute.xlu1 %5721 }
 0x3a7   :  { %20133 = vst [vmem:[#allocation54_spill] sm:$0xff] %v14796_v28  ;;  %v5773_v39 = vsel %vm5755_vm5, %v14793_v37, %v5712_v48 }
 0x3a8   :  { %v5854_v21 = vadd.f32 %v5773_v39, %v5607_v43  ;;  %v5621_v39 = vld [vmem:[#allocation2 + $0x110] sm:$0xff] }
 0x3aa   :  { %5898 = vst.msk [vmem:[#allocation2 + $0xa0] sm:$0xff] %vm5883_vm10, %v5854_v21  ;;  %v14801_v36 = vpop.permute.xlu0 %5723  ;;  %v5726_v6 = vpop.permute.xlu1 %5725 }
 0x3ab   :  { %20134 = vst [vmem:[#allocation55_spill] sm:$0xff] %v14801_v36  ;;  %v5779_v61 = vsel %vm5755_vm5, %v14801_v36, %v5726_v6 }
 0x3ac   :  { %v5861_v17 = vadd.f32 %v5779_v61, %v5614_v50 }
 0x3ae   :  { %5905 = vst.msk [vmem:[#allocation2 + $0xd8] sm:$0xff] %vm5883_vm10, %v5861_v17  ;;  %v14806_v46 = vpop.permute.xlu0 %5735  ;;  %v14808_v28 = vpop.permute.xlu1 %5737 }
 0x3af   :  { %20135 = vst [vmem:[#allocation56_spill] sm:$0xff] %v14806_v46  ;;  %20136 = vst [vmem:[#allocation217_spill] sm:$0xff] %v14808_v28 }
 0x3b0   :  { %v6821_v4 = vpop.f32.mrb[168].mxu0 }
 0x3b1   :  { %v6823_v0 = vpop.f32.mrb[169].mxu0  ;;  %7237 = vrot.lane.b32.xlu0 %v6821_v4, %s10553_s1  ;;  %v5628_v4 = vld [vmem:[#allocation2 + $0x148] sm:$0xff] }
 0x3b2   :  { %v5740_v48 = vpop.permute.xlu0 %5739  ;;  %v14811_v43 = vpop.permute.xlu1 %5749  ;;  %7239 = vrot.lane.b32.xlu1 %v6823_v0, %s10553_s1 }
 0x3b3   :  { %20137 = vst [vmem:[#allocation218_spill] sm:$0xff] %v14811_v43  ;;  %v5785_v21 = vsel %vm5755_vm5, %v14808_v28, %v5740_v48  ;;  %v6922_v6 = vpop.f32.mrb[168].mxu1 }
 0x3b4   :  { %v5868_v17 = vadd.f32 %v5785_v21, %v5621_v39  ;;  %v6924_v50 = vpop.f32.mrb[169].mxu1 }
 0x3b5   :  { %7241 = vrot.lane.b32.xlu0 %v6922_v6, %s10553_s1 }
 0x3b6   :  { %5912 = vst.msk [vmem:[#allocation2 + $0x110] sm:$0xff] %vm5883_vm10, %v5868_v17  ;;  %v14818_v61 = vpop.permute.xlu0 %5751  ;;  %v5754_v46 = vpop.permute.xlu1 %5753  ;;  %7243 = vrot.lane.b32.xlu1 %v6924_v50, %s10553_s1 }
 0x3b7   :  { %20138 = vst [vmem:[#allocation219_spill] sm:$0xff] %v14818_v61  ;;  %v5791_v0 = vsel %vm5755_vm5, %v14818_v61, %v5754_v46  ;;  %v6827_v43 = vpop.f32.mrb[170].mxu0 }
 0x3b8   :  { %v5875_v36 = vadd.f32 %v5791_v0, %v5628_v4  ;;  %v6829_v37 = vpop.f32.mrb[171].mxu0  ;;  %v6928_v48 = vpop.f32.mrb[170].mxu1 }
 0x3b9   :  { %7253 = vrot.lane.b32.xlu0 %v6829_v37, %s10553_s1  ;;  %v6930_v39 = vpop.f32.mrb[171].mxu1  ;;  %v6391_v37 = vld [vmem:[#allocation2] sm:$0xff] }
 0x3ba   :  { %5919 = vst.msk [vmem:[#allocation2 + $0x148] sm:$0xff] %vm5883_vm10, %v5875_v36  ;;  %7251 = vrot.lane.b32.xlu1 %v6827_v43, %s10553_s1  ;;  %v6833_v21 = vpop.f32.mrb[172].mxu0  ;;  %vm20176_vm10 = vmmov %vm20175_vm4 }
 0x3bb   :  { %v6835_v6 = vpop.f32.mrb[173].mxu0 }
 0x3bc   :  { %v6934_v17 = vpop.f32.mrb[172].mxu1 }
 0x3bd   :  { %7257 = vrot.lane.b32.xlu0 %v6930_v39, %s10553_s1  ;;  %v6936_v50 = vpop.f32.mrb[173].mxu1 }
 0x3be   :  { %7255 = vrot.lane.b32.xlu1 %v6928_v48, %s10553_s1  ;;  %v6839_v46 = vpop.f32.mrb[174].mxu0 }
 0x3bf   :  { %v6841_v61 = vpop.f32.mrb[175].mxu0 }
 0x3c0   :  { %v6940_v4 = vpop.f32.mrb[174].mxu1 }
 0x3c1   :  { %7265 = vrot.lane.b32.xlu0 %v6833_v21, %s10553_s1  ;;  %v6942_v0 = vpop.f32.mrb[175].mxu1 }
 0x3c2   :  { %7267 = vrot.lane.b32.xlu1 %v6835_v6, %s10553_s1  ;;  %v14830_v36 = vpop.permute.xlu0 %6475 }
 0x3c3   :  { %20139 = vst [vmem:[#allocation220_spill] sm:$0xff] %v14830_v36  ;;  %v6638_v43 = vadd.f32 %v14830_v36, %v6391_v37  ;;  %v14833_v28 = vpop.permute.xlu1 %6477 }
 0x3c4   :  { %20140 = vst [vmem:[#allocation221_spill] sm:$0xff] %v14833_v28  ;;  %v6845_v39 = vpop.f32.mrb[176].mxu0 }
 0x3c5   :  { %6681 = vst.msk [vmem:[#allocation2] sm:$0xff] %vm6680_vm8, %v6638_v43  ;;  %7269 = vrot.lane.b32.xlu0 %v6934_v17, %s10553_s1  ;;  %v6847_v48 = vpop.f32.mrb[177].mxu0 }
 0x3c6   :  { %7271 = vrot.lane.b32.xlu1 %v6936_v50, %s10553_s1  ;;  %v14838_v21 = vpop.permute.xlu0 %6479 }
 0x3c7   :  { %20141 = vst [vmem:[#allocation222_spill] sm:$0xff] %v14838_v21  ;;  %v14840_v7 = vpop.permute.xlu1 %6481  ;;  %v20284_v21 = vld [vmem:[#allocation110_spill] sm:$0xff] }
 0x3c8   :  { %20142 = vst [vmem:[#allocation223_spill] sm:$0xff] %v14840_v7  ;;  %v6946_v6 = vpop.f32.mrb[176].mxu1  ;;  %v20278_v7 = vld [vmem:[#allocation109_spill] sm:$0xff] }
 0x3c9   :  { %7281 = vrot.lane.b32.xlu0 %v6841_v61, %s10553_s1  ;;  %v6948_v10 = vpop.f32.mrb[177].mxu1 }
 0x3ca   :  { %7279 = vrot.lane.b32.xlu1 %v6839_v46, %s10553_s1  ;;  %v14844_v37 = vpop.permute.xlu0 %6491 }
 0x3cb   :  { %20143 = vst [vmem:[#allocation224_spill] sm:$0xff] %v14844_v37  ;;  %v14846_v19 = vpop.permute.xlu1 %6489 }
 0x3cc   :  { %20144 = vst [vmem:[#allocation225_spill] sm:$0xff] %v14846_v19  ;;  %v6645_v17 = vadd.f32 %v14846_v19, %v6398_v51  ;;  %v6851_v43 = vpop.f32.mrb[178].mxu0 }
 0x3cd   :  { %7285 = vrot.lane.b32.xlu0 %v6942_v0, %s10553_s1  ;;  %v6853_v50 = vpop.f32.mrb[179].mxu0 }
 0x3ce   :  { %6689 = vst.msk [vmem:[#allocation2 + $0x38] sm:$0xff] %vm6680_vm8, %v6645_v17  ;;  %7283 = vrot.lane.b32.xlu1 %v6940_v4, %s10553_s1  ;;  %v14852_v52 = vpop.permute.xlu0 %6495 }
 0x3cf   :  { %20145 = vst [vmem:[#allocation226_spill] sm:$0xff] %v14852_v52  ;;  %v14854_v61 = vpop.permute.xlu1 %6493 }
 0x3d0   :  { %20146 = vst [vmem:[#allocation227_spill] sm:$0xff] %v14854_v61  ;;  %v6952_v46 = vpop.f32.mrb[178].mxu1 }
 0x3d1   :  { %7293 = vrot.lane.b32.xlu0 %v6845_v39, %s10553_s1  ;;  %v6954_v56 = vpop.f32.mrb[179].mxu1 }
 0x3d2   :  { %7295 = vrot.lane.b32.xlu1 %v6847_v48, %s10553_s1  ;;  %v14858_v51 = vpop.permute.xlu0 %6503  ;;  %v6412_v48 = vld [vmem:[#allocation2 + $0xa8] sm:$0xff] }
 0x3d3   :  { %20147 = vst [vmem:[#allocation228_spill] sm:$0xff] %v14858_v51  ;;  %v6652_v0 = vadd.f32 %v14858_v51, %v6405_v45  ;;  %v14861_v57 = vpop.permute.xlu1 %6505 }
 0x3d4   :  { %20148 = vst [vmem:[#allocation229_spill] sm:$0xff] %v14861_v57  ;;  %v20226_v57 = vld [vmem:[#allocation84_spill] sm:$0xff] }
 0x3d5   :  { %6696 = vst.msk [vmem:[#allocation2 + $0x70] sm:$0xff] %vm6680_vm8, %v6652_v0  ;;  %7297 = vrot.lane.b32.xlu0 %v6946_v6, %s10553_s1 }
 0x3d6   :  { %7299 = vrot.lane.b32.xlu1 %v6948_v10, %s10553_s1  ;;  %v14866_v4 = vpop.permute.xlu0 %6507 }
 0x3d7   :  { %20149 = vst [vmem:[#allocation230_spill] sm:$0xff] %v14866_v4  ;;  %v14868_v17 = vpop.permute.xlu1 %6509  ;;  %v20214_v4 = vld [vmem:[#allocation77_spill] sm:$0xff] }
 0x3d8   :  { %20150 = vst [vmem:[#allocation231_spill] sm:$0xff] %v14868_v17 }
 0x3d9   :  { %7309 = vrot.lane.b32.xlu0 %v6853_v50, %s10553_s1 }
 0x3da   :  { %7307 = vrot.lane.b32.xlu1 %v6851_v43, %s10553_s1  ;;  %v14872_v39 = vpop.permute.xlu0 %6519 }
 0x3db   :  { %20151 = vst [vmem:[#allocation232_spill] sm:$0xff] %v14872_v39  ;;  %v14874_v45 = vpop.permute.xlu1 %6517 }
 0x3dc   :  { %20152 = vst [vmem:[#allocation233_spill] sm:$0xff] %v14874_v45  ;;  %v6659_v22 = vadd.f32 %v14874_v45, %v6412_v48 }
 0x3dd   :  { %7313 = vrot.lane.b32.xlu0 %v6954_v56, %s10553_s1 }
 0x3de   :  { %6703 = vst.msk [vmem:[#allocation2 + $0xa8] sm:$0xff] %vm6680_vm8, %v6659_v22  ;;  %7311 = vrot.lane.b32.xlu1 %v6952_v46, %s10553_s1  ;;  %v14880_v10 = vpop.permute.xlu0 %6523 }
 0x3df   :  { %20153 = vst [vmem:[#allocation234_spill] sm:$0xff] %v14880_v10  ;;  %v14882_v6 = vpop.permute.xlu1 %6521 }
 0x3e0   :  { %20154 = vst [vmem:[#allocation235_spill] sm:$0xff] %v14882_v6  ;;  %v7023_v50 = vpop.f32.mrb[180].mxu0 }
 0x3e1   :  { %v7025_v0 = vpop.f32.mrb[181].mxu0  ;;  %7245 = vrot.lane.b32.xlu0 %v7023_v50, %s10553_s1 }
 0x3e2   :  { %7247 = vrot.lane.b32.xlu1 %v7025_v0, %s10553_s1  ;;  %v7124_v43 = vpop.f32.mrb[180].mxu1  ;;  %v14886_v16 = vpop.permute.xlu0 %6531 }
 0x3e3   :  { %20155 = vst [vmem:[#allocation236_spill] sm:$0xff] %v14886_v16  ;;  %v6666_v56 = vadd.f32 %v14886_v16, %v6419_v13  ;;  %v7126_v48 = vpop.f32.mrb[181].mxu1  ;;  %v14889_v22 = vpop.permute.xlu1 %6533  ;;  %v6426_v16 = vld [vmem:[#allocation2 + $0x118] sm:$0xff] }
 0x3e4   :  { %20156 = vst [vmem:[#allocation237_spill] sm:$0xff] %v14889_v22  ;;  %v7029_v46 = vpop.f32.mrb[182].mxu0 }
 0x3e5   :  { %6710 = vst.msk [vmem:[#allocation2 + $0xe0] sm:$0xff] %vm6680_vm8, %v6666_v56  ;;  %7249 = vrot.lane.b32.xlu0 %v7124_v43, %s10553_s1  ;;  %v7031_v10 = vpop.f32.mrb[183].mxu0 }
 0x3e6   :  { %7259 = vrot.lane.b32.xlu1 %v7029_v46, %s10553_s1  ;;  %v14894_v50 = vpop.permute.xlu0 %6535 }
 0x3e7   :  { %20157 = vst [vmem:[#allocation238_spill] sm:$0xff] %v14894_v50  ;;  %v14896_v0 = vpop.permute.xlu1 %6537 }
 0x3e8   :  { %20158 = vst [vmem:[#allocation239_spill] sm:$0xff] %v14896_v0  ;;  %v7129_v6 = vpop.f32.mrb[182].mxu1 }
 0x3e9   :  { %7261 = vrot.lane.b32.xlu0 %v7031_v10, %s10553_s1  ;;  %v7131_v18 = vpop.f32.mrb[183].mxu1 }
 0x3ea   :  { %7263 = vrot.lane.b32.xlu1 %v7129_v6, %s10553_s1  ;;  %v7035_v13 = vpop.f32.mrb[184].mxu0  ;;  %v14900_v48 = vpop.permute.xlu0 %6547 }
 0x3eb   :  { %20159 = vst [vmem:[#allocation240_spill] sm:$0xff] %v14900_v48  ;;  %v14902_v56 = vpop.permute.xlu1 %6545  ;;  %v7037_v43 = vpop.f32.mrb[185].mxu0 }
 0x3ec   :  { %20160 = vst [vmem:[#allocation241_spill] sm:$0xff] %v14902_v56  ;;  %v6673_v22 = vadd.f32 %v14902_v56, %v6426_v16  ;;  %v6404_v56 = vld [vmem:[#allocation2 + $0x68] sm:$0xff]  ;;  %v7181_v51 = vld [vmem:[#allocation2 + $0xe0] sm:$0xff] }
 0x3ed   :  { %7273 = vrot.lane.b32.xlu0 %v7035_v13, %s10553_s1 }
 0x3ee   :  { %6717 = vst.msk [vmem:[#allocation2 + $0x118] sm:$0xff] %vm6680_vm8, %v6673_v22  ;;  %7275 = vrot.lane.b32.xlu1 %v7037_v43, %s10553_s1  ;;  %v14908_v46 = vpop.permute.xlu0 %6551  ;;  %vm20183_vm8 = vmmov %vm20179_vm0 }
 0x3ef   :  { %20161 = vst [vmem:[#allocation242_spill] sm:$0xff] %v14908_v46  ;;  %v7134_v18 = vpop.f32.mrb[184].mxu1  ;;  %v14910_v10 = vpop.permute.xlu1 %6549 }
 0x3f0   :  { %20162 = vst [vmem:[#allocation243_spill] sm:$0xff] %v14910_v10  ;;  %v7041_v6 = vpop.f32.mrb[186].mxu0  ;;  %v7136_v0 = vpop.f32.mrb[185].mxu1  ;;  %v6397_v10 = vld [vmem:[#allocation2 + $0x30] sm:$0xff] }
 0x3f1   :  { %7277 = vrot.lane.b32.xlu0 %v7134_v18, %s10553_s1  ;;  %v7043_v48 = vpop.f32.mrb[187].mxu0 }
 0x3f2   :  { %7287 = vrot.lane.b32.xlu1 %v7041_v6, %s10553_s1  ;;  %v14914_v50 = vpop.permute.xlu0 %6483 }
 0x3f3   :  { %20163 = vst [vmem:[#allocation244_spill] sm:$0xff] %v14914_v50  ;;  %v14916_v16 = vpop.permute.xlu1 %6485 }
 0x3f4   :  { %20164 = vst [vmem:[#allocation245_spill] sm:$0xff] %v14916_v16 }
 0x3f5   :  { %v7139_v13 = vpop.f32.mrb[186].mxu1  ;;  %7289 = vrot.lane.b32.xlu0 %v7043_v48, %s10553_s1 }
 0x3f6   :  { %7291 = vrot.lane.b32.xlu1 %v7139_v13, %s10553_s1  ;;  %v6488_v22 = vpop.permute.xlu0 %6487  ;;  %v7141_v43 = vpop.f32.mrb[187].mxu1 }
 0x3f7   :  { %v7047_v46 = vpop.f32.mrb[188].mxu0  ;;  %v6565_v0 = vsel %vm6559_vm9, %v14916_v16, %v6488_v22  ;;  %v14922_v18 = vpop.permute.xlu1 %6497 }
 0x3f8   :  { %20165 = vst [vmem:[#allocation246_spill] sm:$0xff] %v14922_v18  ;;  %v6644_v6 = vadd.f32 %v6565_v0, %v6397_v10  ;;  %v7049_v50 = vpop.f32.mrb[189].mxu0 }
 0x3f9   :  { %7301 = vrot.lane.b32.xlu0 %v7047_v46, %s10553_s1 }
 0x3fa   :  { %6688 = vst.msk [vmem:[#allocation2 + $0x30] sm:$0xff] %vm6687_vm3, %v6644_v6  ;;  %7303 = vrot.lane.b32.xlu1 %v7049_v50, %s10553_s1  ;;  %v14927_v48 = vpop.permute.xlu0 %6499 }
 0x3fb   :  { %20166 = vst [vmem:[#allocation247_spill] sm:$0xff] %v14927_v48  ;;  %v6502_v13 = vpop.permute.xlu1 %6501 }
 0x3fc   :  { %v7144_v43 = vpop.f32.mrb[188].mxu1  ;;  %v6571_v8 = vsel %vm6559_vm9, %v14927_v48, %v6502_v13 }
 0x3fd   :  { %v6651_v59 = vadd.f32 %v6571_v8, %v6404_v56  ;;  %v7053_v22 = vpop.f32.mrb[190].mxu0  ;;  %7305 = vrot.lane.b32.xlu0 %v7144_v43, %s10553_s1  ;;  %v7146_v10 = vpop.f32.mrb[189].mxu1  ;;  %v6411_v8 = vld [vmem:[#allocation2 + $0xa0] sm:$0xff] }
 0x3fe   :  { %7315 = vrot.lane.b32.xlu1 %v7053_v22, %s10553_s1  ;;  %v7055_v46 = vpop.f32.mrb[191].mxu0  ;;  %v14933_v0 = vpop.permute.xlu0 %6511 }
 0x3ff   :  { %20167 = vst [vmem:[#allocation248_spill] sm:$0xff] %v14933_v0  ;;  %6695 = vst.msk [vmem:[#allocation2 + $0x68] sm:$0xff] %vm6687_vm3, %v6651_v59  ;;  %v14936_v50 = vpop.permute.xlu1 %6513  ;;  %v6418_v0 = vld [vmem:[#allocation2 + $0xd8] sm:$0xff] }
 0x400   :  { %20168 = vst [vmem:[#allocation249_spill] sm:$0xff] %v14936_v50 }
 0x401   :  { %7317 = vrot.lane.b32.xlu0 %v7055_v46, %s10553_s1  ;;  %v7159_v28 = vld [vmem:[#allocation2 + $0x30] sm:$0xff] }
 0x402   :  { %v7149_v6 = vpop.f32.mrb[190].mxu1  ;;  %v6516_v18 = vpop.permute.xlu0 %6515 }
 0x403   :  { %7319 = vrot.lane.b32.xlu1 %v7149_v6, %s10553_s1  ;;  %v6577_v56 = vsel %vm6559_vm9, %v14936_v50, %v6516_v18  ;;  %v14942_v13 = vpop.permute.xlu1 %6525  ;;  %v7151_v43 = vpop.f32.mrb[191].mxu1 }
 0x404   :  { %20169 = vst [vmem:[#allocation250_spill] sm:$0xff] %v14942_v13  ;;  %v6658_v22 = vadd.f32 %v6577_v56, %v6411_v8  ;;  %v6425_v13 = vld [vmem:[#allocation2 + $0x110] sm:$0xff] }
 0x406   :  { %6702 = vst.msk [vmem:[#allocation2 + $0xa0] sm:$0xff] %vm6687_vm3, %v6658_v22  ;;  %v14945_v10 = vpop.permute.xlu0 %6527 }
 0x407   :  { %20170 = vst [vmem:[#allocation251_spill] sm:$0xff] %v14945_v10  ;;  %v6530_v59 = vpop.permute.xlu1 %6529 }
 0x408   :  { %v6583_v46 = vsel %vm6559_vm9, %v14945_v10, %v6530_v59 }
 0x409   :  { %v6665_v48 = vadd.f32 %v6583_v46, %v6418_v0 }
 0x40a   :  { %v14949_v16 = vpop.permute.xlu0 %6539 }
 0x40b   :  { %20171 = vst [vmem:[#allocation252_spill] sm:$0xff] %v14949_v16  ;;  %6709 = vst.msk [vmem:[#allocation2 + $0xd8] sm:$0xff] %vm6687_vm3, %v6665_v48  ;;  %v14952_v6 = vpop.permute.xlu1 %6541 }
 0x40c   :  { %20172 = vst [vmem:[#allocation253_spill] sm:$0xff] %v14952_v6 }
 0x40e   :  { %v6544_v18 = vpop.permute.xlu0 %6543 }
 0x40f   :  { %v6589_v8 = vsel %vm6559_vm9, %v14952_v6, %v6544_v18 }
 0x410   :  { %v6672_v56 = vadd.f32 %v6589_v8, %v6425_v13  ;;  %v14956_v43 = vpop.permute.xlu1 %6553 }
 0x411   :  { %20173 = vst [vmem:[#allocation254_spill] sm:$0xff] %v14956_v43  ;;  %v7583_v22 = vpop.f32.mrb[192].mxu0 }
 0x412   :  { %v7915_v50 = vsel %vm1138_vm14, %v7583_v22, 0.0  ;;  %6716 = vst.msk [vmem:[#allocation2 + $0x110] sm:$0xff] %vm6687_vm3, %v6672_v56  ;;  %v7585_v0 = vpop.f32.mrb[193].mxu0  ;;  %v14961_v59 = vpop.permute.xlu0 %6555  ;;  %v6432_v22 = vld [vmem:[#allocation2 + $0x148] sm:$0xff] }
 0x413   :  { %20174 = vst [vmem:[#allocation255_spill] sm:$0xff] %v14961_v59  ;;  %v7916_v48 = vsel %vm1139_vm15, %v7585_v0, 0.0  ;;  %8041 = vrot.lane.b32.xlu0 %v7915_v50, %s10554_s27 }
 0x414   :  { %v7684_v46 = vpop.f32.mrb[192].mxu1  ;;  %8043 = vrot.lane.b32.xlu1 %v7916_v48, %s10554_s27  ;;  %v6558_v13 = vpop.permute.xlu1 %6557 }
 0x415   :  { %v7917_v18 = vsel %vm1140_vm1, %v7684_v46, 0.0  ;;  %v7686_v8 = vpop.f32.mrb[193].mxu1  ;;  %v6595_v56 = vsel %vm6559_vm9, %v14961_v59, %v6558_v13 }
 0x416   :  { %v7918_v43 = vsel %vm20175_vm4, %v7686_v8, 0.0  ;;  %v6679_v6 = vadd.f32 %v6595_v56, %v6432_v22  ;;  %vm20193_vm4 = vmmov %vm20179_vm0 }
 0x417   :  { %8045 = vrot.lane.b32.xlu0 %v7917_v18, %s10554_s27 }
 0x418   :  { %6723 = vst.msk [vmem:[#allocation2 + $0x148] sm:$0xff] %vm6687_vm3, %v6679_v6  ;;  %8047 = vrot.lane.b32.xlu1 %v7918_v43, %s10554_s27  ;;  %v7589_v50 = vpop.f32.mrb[194].mxu0  ;;  %vm20189_vm3 = vmmov %vm20179_vm0 }
 0x419   :  { %v7922_v0 = vsel %vm1138_vm14, %v7589_v50, 0.0  ;;  %v7591_v48 = vpop.f32.mrb[195].mxu0 }
 0x41a   :  { %v7923_v46 = vsel %vm1139_vm15, %v7591_v48, 0.0  ;;  %v7690_v16 = vpop.f32.mrb[194].mxu1 }
 0x41b   :  { %8057 = vrot.lane.b32.xlu0 %v7923_v46, %s10554_s27  ;;  %v7692_v13 = vpop.f32.mrb[195].mxu1  ;;  %v7924_v6 = vsel %vm1140_vm1, %v7690_v16, 0.0 }
 0x41c   :  { %8055 = vrot.lane.b32.xlu1 %v7922_v0, %s10554_s27  ;;  %v7925_v18 = vsel %vm20176_vm10, %v7692_v13, 0.0  ;;  %v7153_v13 = vld [vmem:[#allocation2] sm:$0xff]  ;;  %vm20197_vm10 = vcmask 498688  }
 0x41d   :  { %v7595_v43 = vpop.f32.mrb[196].mxu0 }
 0x41e   :  { %v7597_v8 = vpop.f32.mrb[197].mxu0  ;;  %v7929_v56 = vsel %vm1138_vm14, %v7595_v43, 0.0 }
 0x41f   :  { %8061 = vrot.lane.b32.xlu0 %v7925_v18, %s10554_s27  ;;  %v7696_v22 = vpop.f32.mrb[196].mxu1  ;;  %v7930_v0 = vsel %vm1139_vm15, %v7597_v8, 0.0 }
 0x420   :  { %8059 = vrot.lane.b32.xlu1 %v7924_v6, %s10554_s27  ;;  %v7698_v50 = vpop.f32.mrb[197].mxu1  ;;  %v7931_v18 = vsel %vm1140_vm1, %v7696_v22, 0.0 }
 0x421   :  { %v7601_v48 = vpop.f32.mrb[198].mxu0  ;;  %v7932_v8 = vsel %vm20179_vm0, %v7698_v50, 0.0  ;;  %vm20204_vm0 = vmmov %vm20197_vm10 }
 0x422   :  { %v7603_v46 = vpop.f32.mrb[199].mxu0  ;;  %v7936_v62 = vsel %vm1138_vm14, %v7601_v48, 0.0 }
 0x423   :  { %8069 = vrot.lane.b32.xlu0 %v7929_v56, %s10554_s27  ;;  %v14993_v16 = vpop.permute.xlu0 %7237 }
 0x424   :  { %20177 = vst [vmem:[#allocation256_spill] sm:$0xff] %v14993_v16  ;;  %8071 = vrot.lane.b32.xlu1 %v7930_v0, %s10554_s27  ;;  %v7400_v6 = vadd.f32 %v14993_v16, %v7153_v13  ;;  %v14999_v43 = vpop.permute.xlu1 %7239  ;;  %v7702_v59 = vpop.f32.mrb[198].mxu1  ;;  %v7937_v0 = vsel %vm1139_vm15, %v7603_v46, 0.0 }
 0x425   :  { %20178 = vst [vmem:[#allocation257_spill] sm:$0xff] %v14999_v43  ;;  %v7704_v10 = vpop.f32.mrb[199].mxu1  ;;  %v7938_v46 = vsel %vm1140_vm1, %v7702_v59, 0.0 }
 0x426   :  { %7443 = vst.msk [vmem:[#allocation2] sm:$0xff] %vm7442_vm2, %v7400_v6  ;;  %v7160_v6 = vld [vmem:[#allocation2 + $0x38] sm:$0xff] }
 0x427   :  { %8073 = vrot.lane.b32.xlu0 %v7931_v18, %s10554_s27  ;;  %v15005_v56 = vpop.permute.xlu0 %7241  ;;  %v7939_v18 = vsel %vm20183_vm8, %v7704_v10, 0.0  ;;  %vm20206_vm8 = vmmov %vm20204_vm0 }
 0x428   :  { %20180 = vst [vmem:[#allocation258_spill] sm:$0xff] %v15005_v56  ;;  %8075 = vrot.lane.b32.xlu1 %v7932_v8, %s10554_s27  ;;  %v15008_v22 = vpop.permute.xlu1 %7243  ;;  %v7607_v13 = vpop.f32.mrb[200].mxu0  ;;  %v20275_v56 = vld [vmem:[#allocation106_spill] sm:$0xff] }
 0x429   :  { %20181 = vst [vmem:[#allocation259_spill] sm:$0xff] %v15008_v22  ;;  %v7609_v54 = vpop.f32.mrb[201].mxu0 }
 0x42a   :  { %v7944_v59 = vsel %vm1139_vm15, %v7609_v54, 0.0 }
 0x42b   :  { %8085 = vrot.lane.b32.xlu0 %v7937_v0, %s10554_s27  ;;  %v15015_v50 = vpop.permute.xlu0 %7253 }
 0x42c   :  { %20182 = vst [vmem:[#allocation260_spill] sm:$0xff] %v15015_v50  ;;  %8083 = vrot.lane.b32.xlu1 %v7936_v62, %s10554_s27  ;;  %v15020_v8 = vpop.permute.xlu1 %7251  ;;  %v7708_v44 = vpop.f32.mrb[200].mxu1  ;;  %v7943_v62 = vsel %vm1138_vm14, %v7607_v13, 0.0  ;;  %v20254_v50 = vld [vmem:[#allocation96_spill] sm:$0xff] }
 0x42d   :  { %20184 = vst [vmem:[#allocation261_spill] sm:$0xff] %v15020_v8  ;;  %v7407_v2 = vadd.f32 %v15020_v8, %v7160_v6  ;;  %v7710_v48 = vpop.f32.mrb[201].mxu1  ;;  %v7167_v6 = vld [vmem:[#allocation2 + $0x70] sm:$0xff] }
 0x42e   :  { %v7946_v55 = vsel %vm20189_vm3, %v7710_v48, 0.0  ;;  %vm20208_vm3 = vmmov %vm20204_vm0 }
 0x42f   :  { %7451 = vst.msk [vmem:[#allocation2 + $0x38] sm:$0xff] %vm7442_vm2, %v7407_v2  ;;  %8089 = vrot.lane.b32.xlu0 %v7939_v18, %s10554_s27  ;;  %v15027_v0 = vpop.permute.xlu0 %7257  ;;  %v7945_v18 = vsel %vm1140_vm1, %v7708_v44, 0.0 }
 0x430   :  { %20185 = vst [vmem:[#allocation262_spill] sm:$0xff] %v15027_v0  ;;  %8087 = vrot.lane.b32.xlu1 %v7938_v46, %s10554_s27  ;;  %v15032_v10 = vpop.permute.xlu1 %7255  ;;  %v7613_v45 = vpop.f32.mrb[202].mxu0  ;;  %v20231_v0 = vld [vmem:[#allocation86_spill] sm:$0xff] }
 0x431   :  { %20186 = vst [vmem:[#allocation263_spill] sm:$0xff] %v15032_v10  ;;  %v7615_v39 = vpop.f32.mrb[203].mxu0 }
 0x433   :  { %8097 = vrot.lane.b32.xlu0 %v7943_v62, %s10554_s27  ;;  %v15037_v2 = vpop.permute.xlu0 %7265 }
 0x434   :  { %20187 = vst [vmem:[#allocation264_spill] sm:$0xff] %v15037_v2  ;;  %8099 = vrot.lane.b32.xlu1 %v7944_v59, %s10554_s27  ;;  %v7414_v46 = vadd.f32 %v15037_v2, %v7167_v6  ;;  %v15043_v13 = vpop.permute.xlu1 %7267  ;;  %v7714_v14 = vpop.f32.mrb[202].mxu1  ;;  %v7951_v59 = vsel %vm1139_vm15, %v7615_v39, 0.0  ;;  %v7950_v6 = vsel %vm1138_vm14, %v7613_v45, 0.0  ;;  %v20198_v39 = vld [vmem:[#allocation5_spill] sm:$0xff]  ;;  %vm20199_vm15 = vmmov %vm20197_vm10  ;;  %v20217_v2 = vld [vmem:[#allocation80_spill] sm:$0xff] }
 0x435   :  { %20188 = vst [vmem:[#allocation265_spill] sm:$0xff] %v15043_v13  ;;  %v7716_v54 = vpop.f32.mrb[203].mxu1  ;;  %v7952_v45 = vsel %vm1140_vm1, %v7714_v14, 0.0  ;;  %vm20201_vm14 = vmmov %vm20197_vm10  ;;  %v20210_v14 = vld [vmem:[#allocation74_spill] sm:$0xff] }
 0x436   :  { %7458 = vst.msk [vmem:[#allocation2 + $0x70] sm:$0xff] %vm7442_vm2, %v7414_v46  ;;  %v7174_v46 = vld [vmem:[#allocation2 + $0xa8] sm:$0xff]  ;;  %vm20211_vm1 = vmmov %vm20204_vm0 }
 0x437   :  { %8101 = vrot.lane.b32.xlu0 %v7945_v18, %s10554_s27  ;;  %v15049_v62 = vpop.permute.xlu0 %7269  ;;  %v7953_v18 = vsel %vm20193_vm4, %v7716_v54, 0.0  ;;  %v20202_v54 = vld [vmem:[#allocation66_spill] sm:$0xff]  ;;  %vm20213_vm4 = vmmov %vm20204_vm0 }
 0x438   :  { %20190 = vst [vmem:[#allocation266_spill] sm:$0xff] %v15049_v62  ;;  %8103 = vrot.lane.b32.xlu1 %v7946_v55, %s10554_s27  ;;  %v15052_v44 = vpop.permute.xlu1 %7271  ;;  %v20195_v55 = vld [vmem:[#allocation4_spill] sm:$0xff] }
 0x439   :  { %20191 = vst [vmem:[#allocation267_spill] sm:$0xff] %v15052_v44  ;;  %v20196_v44 = vld [vmem:[#allocation63_spill] sm:$0xff]  ;;  %v1807_v15 = vsel %vm20199_vm15, %v20195_v55, %v20198_v39  ;;  %vm20221_vm15 = vmmov %vm20204_vm0 }
 0x43a   :  { %v1806_v58 = vsel %vm20197_vm10, %v20196_v44, %v20195_v55  ;;  %v1813_v44 = vsel %vm20206_vm8, %v20202_v54, %v20205_v34  ;;  %v1814_v55 = vsel %vm20208_vm3, %v20205_v34, %v20207_v38  ;;  %vm20215_vm10 = vmmov %vm20204_vm0  ;;  %v15104_v13 = vadd.f32 %v20217_v2, %v1807_v15 }
 0x43b   :  { %8113 = vrot.lane.b32.xlu0 %v7951_v59, %s10554_s27  ;;  %v15059_v48 = vpop.permute.xlu0 %7281  ;;  %v15101_v34 = vadd.f32 %v20217_v2, %v1806_v58  ;;  %vm20228_vm8 = vmmov %vm20204_vm0 }
 0x43c   :  { %20192 = vst [vmem:[#allocation268_spill] sm:$0xff] %v15059_v48  ;;  %8111 = vrot.lane.b32.xlu1 %v7950_v6, %s10554_s27  ;;  %v15064_v62 = vpop.permute.xlu1 %7279  ;;  %v20200_v6 = vld [vmem:[#allocation64_spill] sm:$0xff]  ;;  %v20203_v48 = vld [vmem:[#allocation69_spill] sm:$0xff]  ;;  %vm20230_vm3 = vmmov %vm20204_vm0 }
 0x43d   :  { %20194 = vst [vmem:[#allocation269_spill] sm:$0xff] %v15064_v62  ;;  %v7421_v59 = vadd.f32 %v15064_v62, %v7174_v46  ;;  %v1808_v23 = vsel %vm20201_vm14, %v20198_v39, %v20200_v6  ;;  %v1812_v17 = vsel %vm20204_vm0, %v20203_v48, %v20202_v54  ;;  %v1818_v46 = vsel %vm20211_vm1, %v20210_v14, %v20209_v11  ;;  %v20212_v62 = vld [vmem:[#allocation76_spill] sm:$0xff]  ;;  %vm20223_vm14 = vmmov %vm20204_vm0 }
 0x43e   :  { %v1819_v39 = vsel %vm20213_vm4, %v20209_v11, %v20212_v62  ;;  %v1820_v48 = vsel %vm20215_vm10, %v20212_v62, %v20214_v4  ;;  %v15110_v11 = vadd.f32 %v20217_v2, %v1808_v23  ;;  %v15113_v62 = vadd.f32 %v20217_v2, %v1812_v17  ;;  %vm20232_vm1 = vmmov %vm20204_vm0 }
 0x43f   :  { %7465 = vst.msk [vmem:[#allocation2 + $0xa8] sm:$0xff] %vm7442_vm2, %v7421_v59  ;;  %8117 = vrot.lane.b32.xlu0 %v7953_v18, %s10554_s27  ;;  %v15098_v54 = vpop.permute.xlu0 %7285  ;;  %v15116_v18 = vadd.f32 %v20217_v2, %v1813_v44  ;;  %v15119_v59 = vadd.f32 %v20217_v2, %v1814_v55  ;;  %v15122_v15 = vadd.f32 %v20217_v2, %v1818_v46  ;;  %v20220_v44 = vld [vmem:[#allocation79_spill] sm:$0xff]  ;;  %v20222_v55 = vld [vmem:[#allocation82_spill] sm:$0xff]  ;;  %v20224_v46 = vld [vmem:[#allocation81_spill] sm:$0xff] }
 0x440   :  { %20216 = vst [vmem:[#allocation4_spill] sm:$0xff] %v15098_v54  ;;  %8115 = vrot.lane.b32.xlu1 %v7952_v45, %s10554_s27  ;;  %v15107_v14 = vpop.permute.xlu1 %7283  ;;  %v15125_v45 = vadd.f32 %v20217_v2, %v1819_v39  ;;  %v15128_v54 = vadd.f32 %v20217_v2, %v1820_v48  ;;  %v1826_v39 = vsel %vm20204_vm0, %v20222_v55, %v20224_v46  ;;  %vm20236_vm4 = vmmov %vm20204_vm0 }
 0x441   :  { %20218 = vst [vmem:[#allocation63_spill] sm:$0xff] %v15107_v14  ;;  %v7785_v58 = vpop.f32.mrb[204].mxu0  ;;  %v20219_v14 = vld [vmem:[#allocation78_spill] sm:$0xff]  ;;  %v1836_v52 = vsel %vm20236_vm4, %v20235_v29, %v20234_v60  ;;  %vm20238_vm10 = vmmov %vm20204_vm0  ;;  %v15177_v29 = vadd.f32 %v20217_v2, %v1826_v39 }
 0x442   :  { %v7919_v17 = vsel %vm1142_vm11, %v7785_v58, 0.0  ;;  %v7787_v23 = vpop.f32.mrb[205].mxu0  ;;  %v1824_v30 = vsel %vm20221_vm15, %v20220_v44, %v20219_v14  ;;  %v1825_v32 = vsel %vm20223_vm14, %v20219_v14, %v20222_v55  ;;  %v1830_v44 = vsel %vm20228_vm8, %v20227_v27, %v20226_v57  ;;  %v20237_v27 = vld [vmem:[#allocation89_spill] sm:$0xff]  ;;  %vm20240_vm15 = vmmov %vm20204_vm0 }
 0x443   :  { %v7920_v48 = vsel %vm1143_vm13, %v7787_v23, 0.0  ;;  %8049 = vrot.lane.b32.xlu0 %v7919_v17, %s10554_s27  ;;  %v15144_v58 = vpop.permute.xlu0 %7293  ;;  %v1831_v14 = vsel %vm20230_vm3, %v20226_v57, %v20229_v26  ;;  %v1832_v55 = vsel %vm20232_vm1, %v20229_v26, %v20231_v0  ;;  %v1837_v61 = vsel %vm20238_vm10, %v20234_v60, %v20237_v27  ;;  %v20239_v57 = vld [vmem:[#allocation88_spill] sm:$0xff]  ;;  %vm20242_vm14 = vmmov %vm20204_vm0 }
 0x444   :  { %20225 = vst [vmem:[#allocation5_spill] sm:$0xff] %v15144_v58  ;;  %8051 = vrot.lane.b32.xlu1 %v7920_v48, %s10554_s27  ;;  %v7428_v23 = vadd.f32 %v15144_v58, %v7181_v51  ;;  %v7886_v17 = vpop.f32.mrb[204].mxu1  ;;  %v15157_v10 = vpop.permute.xlu1 %7295  ;;  %v1838_v47 = vsel %vm20240_vm15, %v20237_v27, %v20239_v57  ;;  %v15171_v58 = vadd.f32 %v20217_v2, %v1824_v30  ;;  %vm20247_vm8 = vmmov %vm20204_vm0 }
 0x445   :  { %20233 = vst [vmem:[#allocation64_spill] sm:$0xff] %v15157_v10  ;;  %v7921_v26 = vsel %vm1144_vm12, %v7886_v17, 0.0  ;;  %v7791_v48 = vpop.f32.mrb[206].mxu0  ;;  %v7888_v51 = vpop.f32.mrb[205].mxu1  ;;  %v15174_v10 = vadd.f32 %v20217_v2, %v1825_v32  ;;  %v15183_v12 = vadd.f32 %v20217_v2, %v1830_v44  ;;  %v15186_v17 = vadd.f32 %v20217_v2, %v1831_v14  ;;  %v20241_v32 = vld [vmem:[#allocation90_spill] sm:$0xff]  ;;  %vm20249_vm3 = vmmov %vm20204_vm0 }
 0x446   :  { %7472 = vst.msk [vmem:[#allocation2 + $0xe0] sm:$0xff] %vm7442_vm2, %v7428_v23  ;;  %v7926_v60 = vsel %vm1142_vm11, %v7791_v48, 0.0  ;;  %v7793_v27 = vpop.f32.mrb[207].mxu0  ;;  %v15189_v30 = vadd.f32 %v20217_v2, %v1832_v55  ;;  %v1809_v39 = vsel %vm20242_vm14, %v20200_v6, %v20241_v32  ;;  %v15198_v48 = vadd.f32 %v20217_v2, %v1836_v52  ;;  %v20244_v51 = vld [vmem:[#allocation91_spill] sm:$0xff]  ;;  %vm20251_vm1 = vmmov %vm20204_vm0 }
 0x447   :  { %8053 = vrot.lane.b32.xlu0 %v7921_v26, %s10554_s27  ;;  %v15195_v23 = vpop.permute.xlu0 %7297  ;;  %v15201_v44 = vadd.f32 %v20217_v2, %v1837_v61  ;;  %v15204_v14 = vadd.f32 %v20217_v2, %v1838_v47  ;;  %v1810_v55 = vsel %vm20204_vm0, %v20241_v32, %v20244_v51  ;;  %v20246_v26 = vld [vmem:[#allocation92_spill] sm:$0xff]  ;;  %v1821_v47 = vsel %vm20251_vm1, %v20214_v4, %v20250_v53  ;;  %vm20253_vm4 = vmmov %vm20204_vm0 }
 0x448   :  { %20243 = vst [vmem:[#allocation66_spill] sm:$0xff] %v15195_v23  ;;  %8063 = vrot.lane.b32.xlu1 %v7926_v60, %s10554_s27  ;;  %v7891_v6 = vpop.f32.mrb[206].mxu1  ;;  %v15210_v35 = vpop.permute.xlu1 %7299  ;;  %v1815_v52 = vsel %vm20247_vm8, %v20207_v38, %v20246_v26  ;;  %v20248_v23 = vld [vmem:[#allocation93_spill] sm:$0xff]  ;;  %v15224_v8 = vadd.f32 %v20217_v2, %v1809_v39  ;;  %vm20255_vm10 = vmmov %vm20204_vm0  ;;  %v15235_v40 = vadd.f32 %v20217_v2, %v1810_v55  ;;  %vm20269_vm1 = vcmask 490496  }
 0x449   :  { %20245 = vst [vmem:[#allocation69_spill] sm:$0xff] %v15210_v35  ;;  %v1816_v61 = vsel %vm20249_vm3, %v20246_v26, %v20248_v23  ;;  %v7928_v32 = vsel %vm1144_vm12, %v7891_v6, 0.0  ;;  %v7893_v51 = vpop.f32.mrb[207].mxu1  ;;  %v7797_v60 = vpop.f32.mrb[208].mxu0  ;;  %v20252_v35 = vld [vmem:[#allocation95_spill] sm:$0xff]  ;;  %v1827_v23 = vsel %vm20255_vm10, %v20224_v46, %v20254_v50  ;;  %v7927_v26 = vsel %vm1143_vm13, %v7793_v27, 0.0  ;;  %vm20257_vm15 = vmmov %vm20204_vm0 }
 0x44a   :  { %v1822_v38 = vsel %vm20253_vm4, %v20250_v53, %v20252_v35  ;;  %v7799_v4 = vpop.f32.mrb[209].mxu0  ;;  %v20256_v6 = vld [vmem:[#allocation97_spill] sm:$0xff]  ;;  %v20258_v51 = vld [vmem:[#allocation99_spill] sm:$0xff]  ;;  %vm20259_vm14 = vmmov %vm20204_vm0  ;;  %v15250_v27 = vadd.f32 %v20217_v2, %v1815_v52  ;;  %v15253_v55 = vadd.f32 %v20217_v2, %v1816_v61  ;;  %v15267_v52 = vadd.f32 %v20217_v2, %v1827_v23 }
 0x44b   :  { %v1828_v39 = vsel %vm20257_vm15, %v20254_v50, %v20256_v6  ;;  %v1833_v42 = vsel %vm20259_vm14, %v20231_v0, %v20258_v51  ;;  %v20260_v53 = vld [vmem:[#allocation98_spill] sm:$0xff]  ;;  %8065 = vrot.lane.b32.xlu0 %v7927_v26, %s10554_s27  ;;  %v15247_v46 = vpop.permute.xlu0 %7309  ;;  %v15256_v50 = vadd.f32 %v20217_v2, %v1821_v47  ;;  %v7933_v0 = vsel %vm1142_vm11, %v7797_v60, 0.0  ;;  %v7188_v6 = vld [vmem:[#allocation2 + $0x118] sm:$0xff]  ;;  %vm20264_vm8 = vmmov %vm20204_vm0 }
 0x44c   :  { %v1834_v35 = vsel %vm20204_vm0, %v20258_v51, %v20260_v53  ;;  %20261 = vst [vmem:[#allocation61_spill] sm:$0xff] %v15247_v46  ;;  %8067 = vrot.lane.b32.xlu1 %v7928_v32, %s10554_s27  ;;  %v15261_v51 = vpop.permute.xlu1 %7307  ;;  %v7896_v26 = vpop.f32.mrb[208].mxu1  ;;  %v15264_v53 = vadd.f32 %v20217_v2, %v1822_v38  ;;  %v7934_v47 = vsel %vm1143_vm13, %v7799_v4, 0.0  ;;  %v15273_v19 = vadd.f32 %v20217_v2, %v1828_v39  ;;  %v20263_v38 = vld [vmem:[#allocation101_spill] sm:$0xff]  ;;  %vm20266_vm3 = vmmov %vm20204_vm0 }
 0x44d   :  { %20262 = vst [vmem:[#allocation60_spill] sm:$0xff] %v15261_v51  ;;  %v7435_v61 = vadd.f32 %v15261_v51, %v7188_v6  ;;  %v7803_v46 = vpop.f32.mrb[210].mxu0  ;;  %v7898_v32 = vpop.f32.mrb[209].mxu1  ;;  %v15276_v60 = vadd.f32 %v20217_v2, %v1833_v42  ;;  %v15279_v37 = vadd.f32 %v20217_v2, %v1834_v35  ;;  %v1839_v23 = vsel %vm20264_vm8, %v20239_v57, %v20263_v38  ;;  %v20265_v6 = vld [vmem:[#allocation103_spill] sm:$0xff]  ;;  %v20267_v51 = vld [vmem:[#allocation58_spill] sm:$0xff]  ;;  %vm20271_vm4 = vmmov %vm20269_vm1 }
 0x44e   :  { %v7805_v22 = vpop.f32.mrb[211].mxu0  ;;  %v1840_v4 = vsel %vm20266_vm3, %v20263_v38, %v20265_v6  ;;  %v20268_v32 = vld [vmem:[#allocation104_spill] sm:$0xff]  ;;  %v2569_v42 = vsel %vm20271_vm4, %v20267_v51, %v20270_v33  ;;  %vm20273_vm10 = vmmov %vm20269_vm1  ;;  %v20276_v38 = vld [vmem:[#allocation107_spill] sm:$0xff] }
 0x44f   :  { %v2568_v39 = vsel %vm20269_vm1, %v20268_v32, %v20267_v51  ;;  %v2570_v35 = vsel %vm20273_vm10, %v20270_v33, %v20272_v3  ;;  %7479 = vst.msk [vmem:[#allocation2 + $0x118] sm:$0xff] %vm7442_vm2, %v7435_v61  ;;  %8077 = vrot.lane.b32.xlu0 %v7933_v0, %s10554_s27  ;;  %v15298_v57 = vpop.permute.xlu0 %7313  ;;  %vm20277_vm15 = vmmov %vm20269_vm1  ;;  %v7935_v33 = vsel %vm1144_vm12, %v7896_v26, 0.0  ;;  %v15329_v43 = vadd.f32 %v20217_v2, %v1840_v4 }
 0x450   :  { %20274 = vst [vmem:[#allocation75_spill] sm:$0xff] %v15298_v57  ;;  %v2574_v6 = vsel %vm20277_vm15, %v20276_v38, %v20275_v56  ;;  %vm20279_vm14 = vmmov %vm20269_vm1  ;;  %8079 = vrot.lane.b32.xlu1 %v7934_v47, %s10554_s27  ;;  %v15312_v0 = vpop.permute.xlu1 %7311  ;;  %v7901_v61 = vpop.f32.mrb[210].mxu1  ;;  %v20283_v57 = vld [vmem:[#allocation111_spill] sm:$0xff]  ;;  %v7940_v47 = vsel %vm1142_vm11, %v7803_v46, 0.0 }
 0x451   :  { %v2575_v32 = vsel %vm20279_vm14, %v20275_v56, %v20278_v7  ;;  %vm20281_vm0 = vmmov %vm20269_vm1  ;;  %20282 = vst [vmem:[#allocation74_spill] sm:$0xff] %v15312_v0  ;;  %v7903_v16 = vpop.f32.mrb[211].mxu1  ;;  %v7809_v26 = vpop.f32.mrb[212].mxu0  ;;  %v15326_v0 = vadd.f32 %v20217_v2, %v1839_v23  ;;  %v15344_v46 = vadd.f32 %v2574_v6, %v15113_v62 }
 0x452   :  { %v2576_v51 = vsel %vm20281_vm0, %v20278_v7, %v20280_v1  ;;  %vm20285_vm2 = vmmov %vm20281_vm0  ;;  %v7811_v36 = vpop.f32.mrb[213].mxu0  ;;  %v15341_v16 = vadd.f32 %v2570_v35, %v15110_v11  ;;  %v15347_v2 = vadd.f32 %v2575_v32, %v15116_v18  ;;  %v20300_v32 = vld [vmem:[#allocation119_spill] sm:$0xff] }
 0x453   :  { %v2580_v38 = vsel %vm20285_vm2, %v20284_v21, %v20283_v57  ;;  %vm20287_vm8 = vmmov %vm20281_vm0  ;;  %v15332_v21 = vadd.f32 %v2568_v39, %v15101_v34  ;;  %8081 = vrot.lane.b32.xlu0 %v7935_v33, %s10554_s27  ;;  %v15350_v34 = vpop.permute.xlu0 %7245  ;;  %v15353_v23 = vadd.f32 %v2576_v51, %v15119_v59  ;;  %v20301_v51 = vld [vmem:[#allocation118_spill] sm:$0xff] }
 0x454   :  { %v2581_v56 = vsel %vm20287_vm8, %v20283_v57, %v20286_v5  ;;  %vm20289_vm3 = vmmov %vm20281_vm0  ;;  %v20291_v57 = vld [vmem:[#allocation115_spill] sm:$0xff]  ;;  %20293 = vst [vmem:[#allocation76_spill] sm:$0xff] %v15350_v34  ;;  %v15356_v4 = vadd.f32 %v2580_v38, %v15122_v15  ;;  %8091 = vrot.lane.b32.xlu1 %v7940_v47, %s10554_s27  ;;  %v15365_v62 = vpop.permute.xlu1 %7247  ;;  %v7906_v18 = vpop.f32.mrb[212].mxu1  ;;  %v20298_v15 = vld [vmem:[#allocation116_spill] sm:$0xff] }
 0x455   :  { %v2582_v7 = vsel %vm20289_vm3, %v20286_v5, %v20288_v41  ;;  %vm20292_vm1 = vmmov %vm20281_vm0  ;;  %v15338_v5 = vadd.f32 %v2569_v42, %v15104_v13  ;;  %v15359_v13 = vadd.f32 %v2581_v56, %v15125_v45  ;;  %v20296_v42 = vld [vmem:[#allocation117_spill] sm:$0xff]  ;;  %v7815_v35 = vpop.f32.mrb[214].mxu0  ;;  %v7908_v6 = vpop.f32.mrb[213].mxu1  ;;  %v20303_v38 = vld [vmem:[#allocation100_spill] sm:$0xff]  ;;  %v7941_v56 = vsel %vm1143_vm13, %v7805_v22, 0.0 }
 0x456   :  { %v2586_v24 = vsel %vm20292_vm1, %v20291_v57, %v20290_v25  ;;  %v15362_v11 = vadd.f32 %v2582_v7, %v15128_v54  ;;  %vm20297_vm4 = vmmov %vm20281_vm0  ;;  %v7942_v54 = vsel %vm1144_vm12, %v7901_v61, 0.0  ;;  %v15389_v7 = vpop.f32.mrb[215].mxu0  ;;  %v20306_v61 = vld [vmem:[#allocation102_spill] sm:$0xff]  ;;  %v20307_v47 = vld [vmem:[#allocation121_spill] sm:$0xff]  ;;  %vm7321_vm1 = vcmask 31744  }
 0x457   :  { %v15368_v39 = vadd.f32 %v2586_v24, %v15171_v58  ;;  %v2587_v59 = vsel %vm20297_vm4, %v20290_v25, %v20296_v42  ;;  %vm20299_vm10 = vmmov %vm20281_vm0  ;;  %v20305_v58 = vld [vmem:[#allocation120_spill] sm:$0xff]  ;;  %8093 = vrot.lane.b32.xlu0 %v7941_v56, %s10554_s27 }
 0x458   :  { %20294 = vst [vmem:[#allocation77_spill] sm:$0xff] %v15362_v11  ;;  %v2588_v45 = vsel %vm20299_vm10, %v20296_v42, %v20298_v15  ;;  %vm20302_vm15 = vmmov %vm20281_vm0  ;;  %v2594_v25 = vsel %vm20281_vm0, %v20303_v38, %v20305_v58  ;;  %v20309_v42 = vld [vmem:[#allocation123_spill] sm:$0xff]  ;;  %v20313_v34 = vld [vmem:[#allocation124_spill] sm:$0xff]  ;;  %8095 = vrot.lane.b32.xlu1 %v7942_v54, %s10554_s27  ;;  %vm7449_vm10 = vcmask 162816   ;;  %v15409_v31 = vpop.permute.xlu1 %7259  ;;  %v15412_v56 = vadd.f32 %v2587_v59, %v15174_v10 }
 0x459   :  { %20295 = vst [vmem:[#allocation80_spill] sm:$0xff] %v15368_v39  ;;  %v2592_v33 = vsel %vm20302_vm15, %v20301_v51, %v20300_v32  ;;  %vm20304_vm14 = vmmov %vm20281_vm0  ;;  %v20311_v51 = vld [vmem:[#allocation122_spill] sm:$0xff]  ;;  %v15415_v49 = vadd.f32 %v2588_v45, %v15177_v29  ;;  %v7948_v54 = vsel %vm1143_vm13, %v7811_v36, 0.0 }
 0x45a   :  { %v2593_v24 = vsel %vm20304_vm14, %v20300_v32, %v20303_v38  ;;  %vm20308_vm2 = vmmov %vm20281_vm0  ;;  %v7250_v38 = vpop.permute.xlu0 %7249 }
 0x45b   :  { %v2598_v57 = vsel %vm20308_vm2, %v20307_v47, %v20306_v61  ;;  %vm20310_vm8 = vmmov %vm20281_vm0  ;;  %v7947_v47 = vsel %vm1142_vm11, %v7809_v26, 0.0  ;;  %v15420_v26 = vadd.f32 %v2592_v33, %v15183_v12  ;;  %v15423_v11 = vadd.f32 %v2593_v24, %v15186_v17  ;;  %v20315_v12 = vld [vmem:[#allocation125_spill] sm:$0xff] }
 0x45c   :  { %v2599_v6 = vsel %vm20310_vm8, %v20306_v61, %v20309_v42  ;;  %vm20312_vm3 = vmmov %vm20281_vm0  ;;  %v7327_v61 = vsel %vm7321_vm1, %v15365_v62, %v7250_v38  ;;  %v15426_v38 = vadd.f32 %v2594_v25, %v15189_v30  ;;  %v15429_v10 = vadd.f32 %v2598_v57, %v15198_v48  ;;  %8105 = vrot.lane.b32.xlu0 %v7947_v47, %s10554_s27  ;;  %v20317_v48 = vld [vmem:[#allocation126_spill] sm:$0xff]  ;;  %v7264_v45 = vpop.permute.xlu1 %7263  ;;  %v20322_v33 = vld [vmem:[#allocation129_spill] sm:$0xff] }
 0x45d   :  { %v2600_v32 = vsel %vm20312_vm3, %v20309_v42, %v20311_v51  ;;  %vm20314_vm4 = vmmov %vm20281_vm0  ;;  %v7911_v42 = vpop.f32.mrb[214].mxu1  ;;  %v15432_v29 = vadd.f32 %v2599_v6, %v15201_v44  ;;  %8107 = vrot.lane.b32.xlu1 %v7948_v54, %s10554_s27  ;;  %v20324_v25 = vld [vmem:[#allocation130_spill] sm:$0xff]  ;;  %v20328_v47 = vld [vmem:[#allocation132_spill] sm:$0xff] }
 0x45e   :  { %v2571_v22 = vsel %vm20314_vm4, %v20272_v3, %v20313_v34  ;;  %v7406_v3 = vadd.f32 %v7327_v61, %v7159_v28  ;;  %v7913_v39 = vpop.f32.mrb[215].mxu1  ;;  %v15435_v28 = vadd.f32 %v2600_v32, %v15204_v14  ;;  %vm20316_vm15 = vmmov %vm20281_vm0  ;;  %v15445_v30 = vpop.permute.xlu0 %7261  ;;  %v7166_v57 = vld [vmem:[#allocation2 + $0x68] sm:$0xff] }
 0x45f   :  { %v15438_v36 = vadd.f32 %v2571_v22, %v15224_v8  ;;  %v2572_v17 = vsel %vm20316_vm15, %v20313_v34, %v20315_v12  ;;  %vm20318_vm14 = vmmov %vm20281_vm0  ;;  %v20319_v39 = vld [vmem:[#allocation127_spill] sm:$0xff]  ;;  %v20320_v8 = vld [vmem:[#allocation128_spill] sm:$0xff]  ;;  %v7949_v34 = vsel %vm1144_vm12, %v7906_v18, 0.0  ;;  %v7333_v6 = vsel %vm7321_vm1, %v15445_v30, %v7264_v45 }
 0x460   :  { %7450 = vst.msk [vmem:[#allocation2 + $0x30] sm:$0xff] %vm7449_vm10, %v7406_v3  ;;  %v2577_v44 = vsel %vm20318_vm14, %v20280_v1, %v20317_v48  ;;  %v2578_v14 = vsel %vm20281_vm0, %v20317_v48, %v20319_v39  ;;  %vm20321_vm2 = vmmov %vm20281_vm0  ;;  %v15470_v32 = vadd.f32 %v2572_v17, %v15235_v40  ;;  %v20326_v18 = vld [vmem:[#allocation131_spill] sm:$0xff]  ;;  %v7413_v3 = vadd.f32 %v7333_v6, %v7166_v57  ;;  %v20351_v6 = vld [vmem:[#allocation146_spill] sm:$0xff] }
 0x461   :  { %v2583_v59 = vsel %vm20321_vm2, %v20288_v41, %v20320_v8  ;;  %vm20323_vm8 = vmmov %vm20281_vm0  ;;  %v7954_v41 = vsel %vm1142_vm11, %v7815_v35, 0.0  ;;  %v15482_v54 = vadd.f32 %v2578_v14, %v15253_v55  ;;  %v20332_v35 = vld [vmem:[#allocation134_spill] sm:$0xff]  ;;  %8109 = vrot.lane.b32.xlu0 %v7949_v34, %s10554_s27  ;;  %v20335_v48 = vld [vmem:[#allocation135_spill] sm:$0xff]  ;;  %vm20339_vm2 = vcmask 482304  }
 0x462   :  { %v2584_v24 = vsel %vm20323_vm8, %v20320_v8, %v20322_v33  ;;  %vm20325_vm3 = vmmov %vm20281_vm0  ;;  %v15491_v17 = vpop.permute.xlu0 %7273  ;;  %7457 = vst.msk [vmem:[#allocation2 + $0x68] sm:$0xff] %vm7449_vm10, %v7413_v3  ;;  %8119 = vrot.lane.b32.xlu1 %v7954_v41, %s10554_s27  ;;  %v20338_v34 = vld [vmem:[#allocation137_spill] sm:$0xff] }
 0x463   :  { %v2589_v1 = vsel %vm20325_vm3, %v20298_v15, %v20324_v25  ;;  %vm20327_vm4 = vmmov %vm20281_vm0  ;;  %v15479_v15 = vadd.f32 %v2577_v44, %v15250_v27  ;;  %20334 = vst [vmem:[#allocation78_spill] sm:$0xff] %v15491_v17  ;;  %v15497_v27 = vadd.f32 %v2584_v24, %v15264_v53  ;;  %v2602_v44 = vsel %vm20281_vm0, %v20332_v35, %v20335_v48  ;;  %v20344_v33 = vld [vmem:[#allocation141_spill] sm:$0xff]  ;;  %v20345_v24 = vld [vmem:[#allocation142_spill] sm:$0xff] }
 0x464   :  { %v2590_v22 = vsel %vm20327_vm4, %v20324_v25, %v20326_v18  ;;  %vm20329_vm15 = vmmov %vm20281_vm0  ;;  %v15500_v55 = vadd.f32 %v2589_v1, %v15267_v52  ;;  %v7956_v53 = vsel %vm1144_vm12, %v7911_v42, 0.0  ;;  %v15532_v20 = vadd.f32 %v2602_v44, %v15329_v43  ;;  %v20340_v42 = vld [vmem:[#allocation139_spill] sm:$0xff]  ;;  %v20352_v41 = vld [vmem:[#allocation145_spill] sm:$0xff] }
 0x465   :  { %v2595_v61 = vsel %vm20329_vm15, %v20305_v58, %v20328_v47  ;;  %vm20331_vm11 = vmmov %vm20281_vm0  ;;  %v15494_v58 = vadd.f32 %v2583_v59, %v15256_v50  ;;  %v15508_v39 = vadd.f32 %v2590_v22, %v15273_v19  ;;  %v20337_v59 = vld [vmem:[#allocation138_spill] sm:$0xff]  ;;  %v7173_v22 = vld [vmem:[#allocation2 + $0xa0] sm:$0xff] }
 0x466   :  { %v2596_v40 = vsel %vm20331_vm11, %v20328_v47, %v20330_v9  ;;  %vm20333_vm14 = vmmov %vm20281_vm0  ;;  %v15511_v50 = vadd.f32 %v2595_v61, %v15276_v60  ;;  %v3386_v19 = vsel %vm20339_vm2, %v20338_v34, %v20337_v59  ;;  %v7955_v60 = vsel %vm1143_vm13, %v15389_v7, 0.0  ;;  %v7278_v1 = vpop.permute.xlu0 %7277  ;;  %v20349_v7 = vld [vmem:[#allocation143_spill] sm:$0xff]  ;;  %8123 = vrot.lane.b32.xlu1 %v7956_v53, %s10554_s27  ;;  %v20362_v34 = vld [vmem:[#allocation152_spill] sm:$0xff] }
 0x467   :  { %v2601_v12 = vsel %vm20333_vm14, %v20311_v51, %v20332_v35  ;;  %v7276_v51 = vpop.permute.xlu1 %7275  ;;  %v15520_v14 = vadd.f32 %v2596_v40, %v15279_v37  ;;  %vm20341_vm12 = vmmov %vm20339_vm2  ;;  %v20342_v37 = vld [vmem:[#allocation140_spill] sm:$0xff]  ;;  %8121 = vrot.lane.b32.xlu0 %v7955_v60, %s10554_s27  ;;  %v15558_v3 = vadd.f32 %v3386_v19, %v15332_v21  ;;  %v20355_v9 = vld [vmem:[#allocation147_spill] sm:$0xff] }
 0x468   :  { %v15517_v52 = vsel %vm7321_vm1, %v15491_v17, %v7276_v51  ;;  %v15523_v8 = vadd.f32 %v2601_v12, %v15326_v0  ;;  %v3387_v45 = vsel %vm20341_vm12, %v20337_v59, %v20340_v42  ;;  %vm20343_vm8 = vmmov %vm20339_vm2  ;;  %v7339_v47 = vsel %vm7321_vm1, %v7276_v51, %v7278_v1  ;;  %v20357_v35 = vld [vmem:[#allocation148_spill] sm:$0xff]  ;;  %v20359_v51 = vld [vmem:[#allocation149_spill] sm:$0xff] }
 0x469   :  { %20336 = vst [vmem:[#allocation79_spill] sm:$0xff] %v15517_v52  ;;  %v3388_v0 = vsel %vm20343_vm8, %v20340_v42, %v20342_v37  ;;  %vm20346_vm3 = vmmov %vm20339_vm2  ;;  %v7420_v48 = vadd.f32 %v7339_v47, %v7173_v22  ;;  %v15567_v44 = vadd.f32 %v3387_v45, %v15338_v5  ;;  %v20360_v59 = vld [vmem:[#allocation150_spill] sm:$0xff]  ;;  %v20486_v17 = vld [vmem:[#allocation228_spill] sm:$0xff] }
 0x46a   :  { %v3392_v25 = vsel %vm20346_vm3, %v20345_v24, %v20344_v33  ;;  %vm20348_vm13 = vmmov %vm20339_vm2  ;;  %v15570_v53 = vadd.f32 %v3388_v0, %v15341_v16  ;;  %v7290_v45 = vpop.permute.xlu0 %7289  ;;  %v20374_v47 = vld [vmem:[#allocation6_spill] sm:$0xff] }
 0x46b   :  { %v3393_v43 = vsel %vm20348_vm13, %v20344_v33, %v20347_v63  ;;  %vm20350_vm4 = vmmov %vm20339_vm2  ;;  %v15555_v61 = vpop.permute.xlu1 %7287  ;;  %v15579_v60 = vadd.f32 %v3392_v25, %v15344_v46  ;;  %7464 = vst.msk [vmem:[#allocation2 + $0xa0] sm:$0xff] %vm7449_vm10, %v7420_v48  ;;  %v20364_v33 = vld [vmem:[#allocation77_spill] sm:$0xff]  ;;  %v20365_v46 = vld [vmem:[#allocation151_spill] sm:$0xff] }
 0x46c   :  { %v3394_v57 = vsel %vm20350_vm4, %v20347_v63, %v20349_v7  ;;  %vm20353_vm15 = vmmov %vm20339_vm2  ;;  %20354 = vst [vmem:[#allocation82_spill] sm:$0xff] %v15555_v61  ;;  %v15582_v42 = vadd.f32 %v3393_v43, %v15347_v2  ;;  %v20370_v43 = vld [vmem:[#allocation153_spill] sm:$0xff] }
 0x46d   :  { %v3398_v18 = vsel %vm20353_vm15, %v20352_v41, %v20351_v6  ;;  %vm20356_vm11 = vmmov %vm20339_vm2  ;;  %v15585_v5 = vadd.f32 %v3394_v57, %v15353_v23  ;;  %v15602_v23 = vsel %vm7321_vm1, %v15555_v61, %v7290_v45  ;;  %v20482_v61 = vld [vmem:[#allocation262_spill] sm:$0xff] }
 0x46e   :  { %v3399_v40 = vsel %vm20356_vm11, %v20351_v6, %v20355_v9  ;;  %vm20358_vm14 = vmmov %vm20339_vm2  ;;  %v15588_v16 = vadd.f32 %v3398_v18, %v15356_v4  ;;  %20367 = vst [vmem:[#allocation81_spill] sm:$0xff] %v15602_v23  ;;  %v20368_v4 = vld [vmem:[#allocation80_spill] sm:$0xff]  ;;  %v20372_v18 = vld [vmem:[#allocation7_spill] sm:$0xff] }
 0x46f   :  { %v3400_v12 = vsel %vm20358_vm14, %v20355_v9, %v20357_v35  ;;  %vm20361_vm0 = vmmov %vm20339_vm2  ;;  %v15592_v0 = vadd.f32 %v3399_v40, %v15359_v13  ;;  %v7292_v25 = vpop.permute.xlu1 %7291  ;;  %v20369_v13 = vld [vmem:[#allocation154_spill] sm:$0xff]  ;;  %v7180_v6 = vld [vmem:[#allocation2 + $0xd8] sm:$0xff] }
 0x470   :  { %v3404_v21 = vsel %vm20361_vm0, %v20360_v59, %v20359_v51  ;;  %vm20363_vm2 = vmmov %vm20361_vm0  ;;  %v15595_v24 = vadd.f32 %v3400_v12, %v20364_v33  ;;  %v7345_v41 = vsel %vm7321_vm1, %v7290_v45, %v7292_v25  ;;  %v20376_v40 = vld [vmem:[#allocation9_spill] sm:$0xff]  ;;  %v20377_v12 = vld [vmem:[#allocation136_spill] sm:$0xff]  ;;  %v15635_v25 = vpop.permute.xlu0 %7301 }
 0x471   :  { %v3405_v19 = vsel %vm20363_vm2, %v20359_v51, %v20362_v34  ;;  %vm20366_vm12 = vmmov %vm20361_vm0  ;;  %v15605_v1 = vadd.f32 %v3404_v21, %v20368_v4  ;;  %v7427_v48 = vadd.f32 %v7345_v41, %v7180_v6  ;;  %v20379_v59 = vld [vmem:[#allocation156_spill] sm:$0xff]  ;;  %v20383_v45 = vld [vmem:[#allocation157_spill] sm:$0xff]  ;;  %20385 = vst [vmem:[#allocation84_spill] sm:$0xff] %v15635_v25 }
 0x472   :  { %v3406_v2 = vsel %vm20366_vm12, %v20362_v34, %v20365_v46  ;;  %v15608_v63 = vadd.f32 %v3405_v19, %v15412_v56  ;;  %vm20371_vm8 = vmmov %vm20361_vm0  ;;  %v20381_v34 = vld [vmem:[#allocation155_spill] sm:$0xff]  ;;  %v20389_v6 = vld [vmem:[#allocation160_spill] sm:$0xff] }
 0x473   :  { %v3410_v57 = vsel %vm20371_vm8, %v20370_v43, %v20369_v13  ;;  %vm20373_vm3 = vmmov %vm20361_vm0  ;;  %v15624_v51 = vadd.f32 %v3406_v2, %v15415_v49  ;;  %v20387_v2 = vld [vmem:[#allocation159_spill] sm:$0xff]  ;;  %7471 = vst.msk [vmem:[#allocation2 + $0xd8] sm:$0xff] %vm7449_vm10, %v7427_v48  ;;  %v20463_v23 = vld [vmem:[#allocation28_spill] sm:$0xff] }
 0x474   :  { %v3411_v22 = vsel %vm20373_vm3, %v20369_v13, %v20372_v18  ;;  %vm20375_vm13 = vmmov %vm20361_vm0  ;;  %v15638_v4 = vadd.f32 %v3410_v57, %v15420_v26  ;;  %v20386_v13 = vld [vmem:[#allocation158_spill] sm:$0xff] }
 0x475   :  { %v3412_v9 = vsel %vm20375_vm13, %v20372_v18, %v20374_v47  ;;  %vm20378_vm4 = vmmov %vm20361_vm0  ;;  %v3390_v49 = vsel %vm20361_vm0, %v20383_v45, %v20386_v13  ;;  %v15651_v18 = vadd.f32 %v3411_v22, %v15423_v11  ;;  %v20392_v11 = vld [vmem:[#allocation161_spill] sm:$0xff]  ;;  %v20403_v13 = vld [vmem:[#allocation166_spill] sm:$0xff] }
 0x476   :  { %v3416_v56 = vsel %vm20378_vm4, %v20377_v12, %v20376_v40  ;;  %vm20380_vm15 = vmmov %vm20361_vm0  ;;  %v15654_v26 = vadd.f32 %v3412_v9, %v15426_v38 }
 0x477   :  { %v3417_v21 = vsel %vm20380_vm15, %v20376_v40, %v20379_v59  ;;  %vm20382_vm11 = vmmov %vm20361_vm0  ;;  %v15657_v57 = vadd.f32 %v3416_v56, %v15429_v10  ;;  %v15676_v10 = vadd.f32 %v3390_v49, %v15470_v32  ;;  %v7306_v56 = vpop.permute.xlu0 %7305  ;;  %v20405_v49 = vld [vmem:[#allocation167_spill] sm:$0xff] }
 0x478   :  { %v3418_v19 = vsel %vm20382_vm11, %v20379_v59, %v20381_v34  ;;  %vm20384_vm14 = vmmov %vm20361_vm0 }
 0x479   :  { %v3389_v33 = vsel %vm20384_vm14, %v20342_v37, %v20383_v45  ;;  %vm20388_vm2 = vmmov %vm20361_vm0  ;;  %v7304_v37 = vpop.permute.xlu1 %7303  ;;  %v15667_v12 = vadd.f32 %v3418_v19, %v15435_v28  ;;  %v7187_v19 = vld [vmem:[#allocation2 + $0x110] sm:$0xff] }
 0x47a   :  { %v3395_v43 = vsel %vm20388_vm2, %v20349_v7, %v20387_v2  ;;  %vm20390_vm12 = vmmov %vm20361_vm0  ;;  %v15661_v40 = vsel %vm7321_vm1, %v15635_v25, %v7304_v37  ;;  %v15664_v7 = vadd.f32 %v3417_v21, %v15432_v29  ;;  %v15670_v48 = vadd.f32 %v3389_v33, %v15438_v36  ;;  %v20394_v29 = vld [vmem:[#allocation162_spill] sm:$0xff]  ;;  %v20396_v36 = vld [vmem:[#allocation163_spill] sm:$0xff] }
 0x47b   :  { %v3396_v41 = vsel %vm20390_vm12, %v20387_v2, %v20389_v6  ;;  %20391 = vst [vmem:[#allocation83_spill] sm:$0xff] %v15661_v40  ;;  %vm20393_vm8 = vmmov %vm20361_vm0  ;;  %v15679_v22 = vadd.f32 %v3395_v43, %v15479_v15  ;;  %v20398_v21 = vld [vmem:[#allocation164_spill] sm:$0xff]  ;;  %vm8246_vm2 = vcmask 1047576   ;;  %v20462_v25 = vld [vmem:[#allocation29_spill] sm:$0xff]  ;;  %vm8253_vm12 = vcmask 154624  }
 0x47c   :  { %v3401_v38 = vsel %vm20393_vm8, %v20357_v35, %v20392_v11  ;;  %v15682_v9 = vadd.f32 %v3396_v41, %v15482_v54  ;;  %vm20395_vm3 = vmmov %vm20361_vm0  ;;  %v20400_v35 = vld [vmem:[#allocation165_spill] sm:$0xff]  ;;  %v7351_v54 = vsel %vm7321_vm1, %v7304_v37, %v7306_v56  ;;  %vm203_vm8 = vcmask 130048  }
 0x47d   :  { %v3402_v28 = vsel %vm20395_vm3, %v20392_v11, %v20394_v29  ;;  %vm20397_vm13 = vmmov %vm20361_vm0  ;;  %v15697_v45 = vpop.permute.xlu1 %7315  ;;  %v15700_v33 = vadd.f32 %v3401_v38, %v15494_v58  ;;  %v7434_v43 = vadd.f32 %v7351_v54, %v7187_v19  ;;  %v20408_v37 = vld [vmem:[#allocation169_spill] sm:$0xff]  ;;  %v20410_v38 = vld [vmem:[#allocation170_spill] sm:$0xff] }
 0x47e   :  { %v3407_v59 = vsel %vm20397_vm13, %v20365_v46, %v20396_v36  ;;  %vm20399_vm4 = vmmov %vm20361_vm0  ;;  %20402 = vst [vmem:[#allocation85_spill] sm:$0xff] %v15697_v45  ;;  %v15709_v6 = vadd.f32 %v3402_v28, %v15497_v27  ;;  %v20409_v11 = vld [vmem:[#allocation57_spill] sm:$0xff]  ;;  %v4191_v29 = vsel %vm4189_vm7, %v20408_v37, %v20410_v38  ;;  %v20412_v28 = vld [vmem:[#allocation171_spill] sm:$0xff] }
 0x47f   :  { %v3408_v32 = vsel %vm20399_vm4, %v20396_v36, %v20398_v21  ;;  %vm20401_vm15 = vmmov %vm20361_vm0  ;;  %v4190_v58 = vsel %vm4189_vm7, %v20409_v11, %v20408_v37  ;;  %v15721_v56 = vadd.f32 %v3407_v59, %v15500_v55  ;;  %v4192_v36 = vsel %vm4189_vm7, %v20410_v38, %v20412_v28  ;;  %7478 = vst.msk [vmem:[#allocation2 + $0x110] sm:$0xff] %vm7449_vm10, %v7434_v43  ;;  %v7318_v21 = vpop.permute.xlu0 %7317  ;;  %v20415_v55 = vld [vmem:[#allocation172_spill] sm:$0xff]  ;;  %v20416_v59 = vld [vmem:[#allocation173_spill] sm:$0xff] }
 0x480   :  { %v3413_v15 = vsel %vm20401_vm15, %v20374_v47, %v20400_v35  ;;  %vm20404_vm11 = vmmov %vm20361_vm0  ;;  %v20407_v47 = vld [vmem:[#allocation168_spill] sm:$0xff]  ;;  %v4270_v54 = vadd.f32 %v4191_v29, %v15567_v44  ;;  %v20421_v43 = vld [vmem:[#allocation177_spill] sm:$0xff] }
 0x481   :  { %v3414_v46 = vsel %vm20404_vm11, %v20400_v35, %v20403_v13  ;;  %vm20406_vm14 = vmmov %vm20361_vm0  ;;  %v3420_v41 = vsel %vm20361_vm0, %v20405_v49, %v20407_v47  ;;  %v15727_v27 = vadd.f32 %v3413_v15, %v15511_v50  ;;  %v15744_v50 = vsel %vm7321_vm1, %v15697_v45, %v7318_v21  ;;  %v7320_v13 = vpop.permute.xlu1 %7319  ;;  %v20422_v47 = vld [vmem:[#allocation176_spill] sm:$0xff]  ;;  %v20423_v37 = vld [vmem:[#allocation178_spill] sm:$0xff] }
 0x482   :  { %v3419_v2 = vsel %vm20406_vm14, %v20381_v34, %v20405_v49  ;;  %v15724_v34 = vadd.f32 %v3408_v32, %v15508_v39  ;;  %v15734_v35 = vadd.f32 %v3414_v46, %v15520_v14  ;;  %v4196_v39 = vsel %vm4189_vm7, %v20416_v59, %v20415_v55  ;;  %20417 = vst [vmem:[#allocation89_spill] sm:$0xff] %v15744_v50  ;;  %v20419_v14 = vld [vmem:[#allocation175_spill] sm:$0xff]  ;;  %v20420_v49 = vld [vmem:[#allocation174_spill] sm:$0xff] }
 0x483   :  { %20411 = vst [vmem:[#allocation86_spill] sm:$0xff] %v15727_v27  ;;  %v15737_v19 = vadd.f32 %v3419_v2, %v15523_v8  ;;  %v15747_v32 = vadd.f32 %v3420_v41, %v15532_v20  ;;  %v4269_v15 = vadd.f32 %v4190_v58, %v15558_v3  ;;  %v4197_v8 = vsel %vm4189_vm7, %v20415_v55, %v20419_v14  ;;  %v7194_v41 = vld [vmem:[#allocation2 + $0x148] sm:$0xff]  ;;  %v20424_v58 = vld [vmem:[#allocation179_spill] sm:$0xff]  ;;  %v20426_v55 = vld [vmem:[#allocation181_spill] sm:$0xff] }
 0x484   :  { %20413 = vst [vmem:[#allocation3_spill] sm:$0xff] %v15734_v35  ;;  %v4271_v46 = vadd.f32 %v4192_v36, %v15570_v53  ;;  %v4198_v2 = vsel %vm4189_vm7, %v20419_v14, %v20420_v49  ;;  %v4202_v20 = vsel %vm4189_vm7, %v20422_v47, %v20421_v43  ;;  %v7357_v3 = vsel %vm7321_vm1, %v7318_v21, %v7320_v13  ;;  %v20425_v36 = vld [vmem:[#allocation180_spill] sm:$0xff]  ;;  %v20427_v21 = vld [vmem:[#allocation183_spill] sm:$0xff]  ;;  %v20457_v50 = vld [vmem:[#allocation206_spill] sm:$0xff] }
 0x485   :  { %20414 = vst [vmem:[#allocation87_spill] sm:$0xff] %v15737_v19  ;;  %20418 = vst [vmem:[#allocation88_spill] sm:$0xff] %v15747_v32  ;;  %v15763_v44 = vadd.f32 %v4196_v39, %v15579_v60  ;;  %v4203_v11 = vsel %vm4189_vm7, %v20421_v43, %v20423_v37  ;;  %v4204_v53 = vsel %vm4189_vm7, %v20423_v37, %v20424_v58  ;;  %v20428_v39 = vld [vmem:[#allocation182_spill] sm:$0xff] }
 0x486   :  { %v7441_v38 = vadd.f32 %v7357_v3, %v7194_v41  ;;  %v15772_v29 = vadd.f32 %v4197_v8, %v15582_v42  ;;  %v4208_v59 = vsel %vm4189_vm7, %v20426_v55, %v20425_v36  ;;  %v4209_v60 = vsel %vm4189_vm7, %v20425_v36, %v20427_v21  ;;  %v20429_v42 = vld [vmem:[#allocation185_spill] sm:$0xff]  ;;  %v20430_v8 = vld [vmem:[#allocation184_spill] sm:$0xff]  ;;  %v20431_v41 = vld [vmem:[#allocation186_spill] sm:$0xff]  ;;  %v8044_v32 = vpop.permute.xlu1 %8043 }
 0x487   :  { %v4210_v14 = vsel %vm4189_vm7, %v20427_v21, %v20428_v39  ;;  %v15784_v13 = vadd.f32 %v4198_v2, %v15585_v5  ;;  %v15787_v43 = vadd.f32 %v4202_v20, %v15588_v16  ;;  %v4214_v47 = vsel %vm4189_vm7, %v20430_v8, %v20429_v42  ;;  %v20432_v5 = vld [vmem:[#allocation187_spill] sm:$0xff]  ;;  %v20433_v2 = vld [vmem:[#allocation188_spill] sm:$0xff]  ;;  %v20434_v20 = vld [vmem:[#allocation189_spill] sm:$0xff] }
 0x488   :  { %v4215_v3 = vsel %vm4189_vm7, %v20429_v42, %v20431_v41  ;;  %7485 = vst.msk [vmem:[#allocation2 + $0x148] sm:$0xff] %vm7449_vm10, %v7441_v38  ;;  %v15797_v37 = vadd.f32 %v4203_v11, %v15592_v0  ;;  %v15800_v36 = vadd.f32 %v4204_v53, %v15595_v24  ;;  %v4216_v16 = vsel %vm4189_vm7, %v20431_v41, %v20432_v5  ;;  %v20435_v11 = vld [vmem:[#allocation191_spill] sm:$0xff]  ;;  %v20436_v8 = vld [vmem:[#allocation190_spill] sm:$0xff] }
 0x489   :  { %v4220_v55 = vsel %vm4189_vm7, %v20434_v20, %v20433_v2  ;;  %v15809_v21 = vadd.f32 %v4208_v59, %v15605_v1  ;;  %v15812_v42 = vadd.f32 %v4209_v60, %v15608_v63  ;;  %v15815_v0 = vadd.f32 %v4210_v14, %v15624_v51  ;;  %v20437_v59 = vld [vmem:[#allocation192_spill] sm:$0xff]  ;;  %v20438_v14 = vld [vmem:[#allocation193_spill] sm:$0xff] }
 0x48a   :  { %v4221_v24 = vsel %vm4189_vm7, %v20433_v2, %v20435_v11  ;;  %v15821_v53 = vadd.f32 %v4214_v47, %v15638_v4  ;;  %v15824_v38 = vadd.f32 %v4215_v3, %v15651_v18  ;;  %v4222_v1 = vsel %vm4189_vm7, %v20435_v11, %v20436_v8  ;;  %v20439_v18 = vld [vmem:[#allocation202_spill] sm:$0xff]  ;;  %v20440_v47 = vld [vmem:[#allocation68_spill] sm:$0xff] }
 0x48b   :  { %v4193_v63 = vsel %vm4189_vm7, %v20412_v28, %v20437_v59  ;;  %v15833_v51 = vadd.f32 %v4216_v16, %v15654_v26  ;;  %v15836_v60 = vadd.f32 %v4220_v55, %v15657_v57  ;;  %v4194_v4 = vsel %vm4189_vm7, %v20437_v59, %v20438_v14  ;;  %v20441_v2 = vld [vmem:[#allocation194_spill] sm:$0xff]  ;;  %v20442_v26 = vld [vmem:[#allocation195_spill] sm:$0xff]  ;;  %v20443_v16 = vld [vmem:[#allocation196_spill] sm:$0xff] }
 0x48c   :  { %v4952_v41 = vsel %vm4951_vm6, %v20440_v47, %v20439_v18  ;;  %v15845_v3 = vadd.f32 %v4221_v24, %v15664_v7  ;;  %v4199_v28 = vsel %vm4189_vm7, %v20420_v49, %v20441_v2  ;;  %v4200_v57 = vsel %vm4189_vm7, %v20441_v2, %v20442_v26  ;;  %v20444_v7 = vld [vmem:[#allocation197_spill] sm:$0xff]  ;;  %v20445_v59 = vld [vmem:[#allocation24_spill] sm:$0xff]  ;;  %v20447_v26 = vld [vmem:[#allocation203_spill] sm:$0xff] }
 0x48d   :  { %v4205_v20 = vsel %vm4189_vm7, %v20424_v58, %v20443_v16  ;;  %v15857_v55 = vadd.f32 %v4222_v1, %v15667_v12  ;;  %v15860_v11 = vadd.f32 %v4193_v63, %v15670_v48  ;;  %v4206_v24 = vsel %vm4189_vm7, %v20443_v16, %v20444_v7  ;;  %v20446_v49 = vld [vmem:[#allocation25_spill] sm:$0xff]  ;;  %v20448_v58 = vld [vmem:[#allocation204_spill] sm:$0xff] }
 0x48e   :  { %v5756_v14 = vsel %vm5755_vm5, %v20446_v49, %v20445_v59  ;;  %v15869_v47 = vadd.f32 %v4194_v4, %v15676_v10  ;;  %v5031_v2 = vadd.f32 %v4952_v41, %v4269_v15  ;;  %v4953_v12 = vsel %vm4951_vm6, %v20439_v18, %v20447_v26  ;;  %v20449_v10 = vld [vmem:[#allocation221_spill] sm:$0xff]  ;;  %v20450_v4 = vld [vmem:[#allocation220_spill] sm:$0xff]  ;;  %v20451_v18 = vld [vmem:[#allocation198_spill] sm:$0xff] }
 0x48f   :  { %v4954_v48 = vsel %vm4951_vm6, %v20447_v26, %v20448_v58  ;;  %v15878_v1 = vadd.f32 %v4199_v28, %v15679_v22  ;;  %v15881_v63 = vadd.f32 %v4200_v57, %v15682_v9  ;;  %v15884_v16 = vadd.f32 %v4205_v20, %v15700_v33  ;;  %v20452_v22 = vld [vmem:[#allocation27_spill] sm:$0xff]  ;;  %v20453_v33 = vld [vmem:[#allocation26_spill] sm:$0xff]  ;;  %v20454_v26 = vld [vmem:[#allocation257_spill] sm:$0xff] }
 0x490   :  { %v6560_v15 = vsel %vm6559_vm9, %v20450_v4, %v20449_v10  ;;  %v15890_v41 = vadd.f32 %v4206_v24, %v15709_v6  ;;  %v4211_v7 = vsel %vm4189_vm7, %v20428_v39, %v20451_v18  ;;  %v5835_v49 = vadd.f32 %v5756_v14, %v5031_v2  ;;  %v20455_v4 = vld [vmem:[#allocation256_spill] sm:$0xff]  ;;  %v20456_v24 = vld [vmem:[#allocation205_spill] sm:$0xff]  ;;  %v20458_v14 = vld [vmem:[#allocation222_spill] sm:$0xff] }
 0x491   :  { %v5757_v9 = vsel %vm5755_vm5, %v20445_v59, %v20452_v22  ;;  %v5032_v28 = vadd.f32 %v4953_v12, %v4270_v54  ;;  %v5033_v57 = vadd.f32 %v4954_v48, %v4271_v46  ;;  %v5758_v20 = vsel %vm5755_vm5, %v20452_v22, %v20453_v33  ;;  %v20459_v54 = vld [vmem:[#allocation207_spill] sm:$0xff]  ;;  %v7957_v22 = vld [vmem:[#allocation2] sm:$0xff] }
 0x492   :  { %v7322_v6 = vsel %vm7321_vm1, %v20455_v4, %v20454_v26  ;;  %v4958_v45 = vsel %vm4951_vm6, %v20457_v50, %v20456_v24  ;;  %v6639_v39 = vadd.f32 %v6560_v15, %v5835_v49  ;;  %v6561_v2 = vsel %vm6559_vm9, %v20449_v10, %v20458_v14  ;;  %v20460_v12 = vld [vmem:[#allocation223_spill] sm:$0xff]  ;;  %v8042_v4 = vpop.permute.xlu0 %8041  ;;  %v20461_v15 = vld [vmem:[#allocation258_spill] sm:$0xff] }
 0x493   :  { %vm8125_vm10 = vcmask 23552   ;;  %v4959_v46 = vsel %vm4951_vm6, %v20456_v24, %v20459_v54  ;;  %v5836_v59 = vadd.f32 %v5757_v9, %v5032_v28  ;;  %v6562_v48 = vsel %vm6559_vm9, %v20458_v14, %v20460_v12  ;;  %v20464_v28 = vld [vmem:[#allocation259_spill] sm:$0xff] }
 0x494   :  { %v5837_v40 = vadd.f32 %v5758_v20, %v5033_v57  ;;  %v7401_v50 = vadd.f32 %v7322_v6, %v6639_v39  ;;  %v7323_v49 = vsel %vm7321_vm1, %v20454_v26, %v20461_v15  ;;  %v8204_v10 = vadd.f32 %v8042_v4, %v7957_v22  ;;  %v20466_v39 = vld [vmem:[#allocation62_spill] sm:$0xff]  ;;  %v20468_v22 = vld [vmem:[#allocation225_spill] sm:$0xff] }
 0x495   :  { %v5762_v24 = vsel %vm5755_vm5, %v20463_v23, %v20462_v25  ;;  %v6640_v9 = vadd.f32 %v6561_v2, %v5836_v59  ;;  %v7324_v14 = vsel %vm7321_vm1, %v20461_v15, %v20464_v28  ;;  %v8126_v19 = vsel %vm8125_vm10, %v8042_v4, %v8044_v32  ;;  %v20467_v59 = vld [vmem:[#allocation224_spill] sm:$0xff] }
 0x496   :  { %v15927_v57 = vadd.f32 %v4211_v7, %v15721_v56  ;;  %v5038_v20 = vadd.f32 %v4958_v45, %v15763_v44  ;;  %v6641_v6 = vadd.f32 %v6562_v48, %v5837_v40  ;;  %8247 = vst.msk [vmem:[#allocation2] sm:$0xff] %vm8246_vm2, %v8204_v10  ;;  %v8205_v26 = vadd.f32 %v8126_v19, %v7401_v50  ;;  %v8046_v8 = vpop.permute.xlu0 %8045  ;;  %v20469_v7 = vld [vmem:[#allocation30_spill] sm:$0xff]  ;;  %v15942_v44 = vpop.permute.xlu1 %8047  ;;  %v20472_v48 = vld [vmem:[#allocation261_spill] sm:$0xff] }
 0x497   :  { %v4960_v23 = vsel %vm4951_vm6, %v20459_v54, %v20466_v39  ;;  %v5039_v2 = vadd.f32 %v4959_v46, %v15772_v29  ;;  %v6566_v15 = vsel %vm6559_vm9, %v20468_v22, %v20467_v59  ;;  %v7402_v4 = vadd.f32 %v7323_v49, %v6640_v9  ;;  %v20470_v29 = vld [vmem:[#allocation31_spill] sm:$0xff]  ;;  %v20471_v46 = vld [vmem:[#allocation260_spill] sm:$0xff] }
 0x498   :  { %20465 = vst [vmem:[#allocation90_spill] sm:$0xff] %v15927_v57  ;;  %v5842_v56 = vadd.f32 %v5762_v24, %v5038_v20  ;;  %v5763_v40 = vsel %vm5755_vm5, %v20462_v25, %v20469_v7  ;;  %v7403_v45 = vadd.f32 %v7324_v14, %v6641_v6  ;;  %v8127_v19 = vsel %vm8125_vm10, %v8044_v32, %v8046_v8  ;;  %v20473_v32 = vld [vmem:[#allocation209_spill] sm:$0xff]  ;;  %v20474_v24 = vld [vmem:[#allocation208_spill] sm:$0xff]  ;;  %v20475_v6 = vld [vmem:[#allocation210_spill] sm:$0xff] }
 0x499   :  { %8376 = vrot.lane.b32.xlu1 %v8205_v26, %s10555_s28  ;;  %v5764_v54 = vsel %vm5755_vm5, %v20469_v7, %v20470_v29  ;;  %v7328_v50 = vsel %vm7321_vm1, %v20472_v48, %v20471_v46  ;;  %v8206_v49 = vadd.f32 %v8127_v19, %v7402_v4  ;;  %v8128_v25 = vsel %vm8125_vm10, %v8046_v8, %v15942_v44  ;;  %v20476_v22 = vld [vmem:[#allocation211_spill] sm:$0xff]  ;;  %v20478_v19 = vld [vmem:[#allocation226_spill] sm:$0xff]  ;;  %v20484_v57 = vld [vmem:[#allocation213_spill] sm:$0xff] }
 0x49a   :  { %v5040_v10 = vadd.f32 %v4960_v23, %v15784_v13  ;;  %v4964_v9 = vsel %vm4951_vm6, %v20474_v24, %v20473_v32  ;;  %v6646_v14 = vadd.f32 %v6566_v15, %v5842_v56  ;;  %v8207_v20 = vadd.f32 %v8128_v25, %v7403_v45  ;;  %v20477_v4 = vld [vmem:[#allocation227_spill] sm:$0xff]  ;;  %v8058_v23 = vpop.permute.xlu0 %8057  ;;  %v20479_v56 = vld [vmem:[#allocation33_spill] sm:$0xff]  ;;  %v20480_v45 = vld [vmem:[#allocation32_spill] sm:$0xff]  ;;  %v8056_v35 = vpop.permute.xlu1 %8055 }
 0x49b   :  { %v4965_v26 = vsel %vm4951_vm6, %v20473_v32, %v20475_v6  ;;  %v4966_v7 = vsel %vm4951_vm6, %v20475_v6, %v20476_v22  ;;  %v6567_v8 = vsel %vm6559_vm9, %v20467_v59, %v20477_v4  ;;  %v6568_v13 = vsel %vm6559_vm9, %v20477_v4, %v20478_v19  ;;  %v7964_v24 = vld [vmem:[#allocation2 + $0x38] sm:$0xff]  ;;  %v20481_v6 = vld [vmem:[#allocation263_spill] sm:$0xff] }
 0x49c   :  { %v5843_v48 = vadd.f32 %v5763_v40, %v5039_v2  ;;  %v5844_v15 = vadd.f32 %v5764_v54, %v5040_v10  ;;  %v5768_v25 = vsel %vm5755_vm5, %v20480_v45, %v20479_v56  ;;  %v7408_v32 = vadd.f32 %v7328_v50, %v6646_v14 }
 0x49d   :  { %8380 = vrot.lane.b32.xlu1 %v8207_v20, %s10555_s28  ;;  %v7329_v59 = vsel %vm7321_vm1, %v20471_v46, %v20481_v6  ;;  %v7330_v4 = vsel %vm7321_vm1, %v20481_v6, %v20482_v61  ;;  %v8132_v2 = vsel %vm8125_vm10, %v8056_v35, %v8058_v23  ;;  %v8211_v40 = vadd.f32 %v8056_v35, %v7964_v24  ;;  %v8290_v54 = vld [vmem:[#allocation2] sm:$0xff]  ;;  %v20483_v46 = vld [vmem:[#allocation212_spill] sm:$0xff] }
 0x49e   :  { %v5045_v10 = vadd.f32 %v4964_v9, %v15787_v43  ;;  %v6647_v45 = vadd.f32 %v6567_v8, %v5843_v48  ;;  %v6648_v50 = vadd.f32 %v6568_v13, %v5844_v15  ;;  %v8212_v14 = vadd.f32 %v8132_v2, %v7408_v32  ;;  %8374 = vrot.lane.b32.xlu0 %v8290_v54, %s10555_s28  ;;  %v20485_v6 = vld [vmem:[#allocation229_spill] sm:$0xff]  ;;  %v15991_v43 = vpop.permute.xlu0 %8061  ;;  %v20487_v8 = vld [vmem:[#allocation34_spill] sm:$0xff]  ;;  %v20490_v15 = vld [vmem:[#allocation264_spill] sm:$0xff] }
 0x49f   :  { %v5046_v20 = vadd.f32 %v4965_v26, %v15797_v37  ;;  %v5047_v52 = vadd.f32 %v4966_v7, %v15800_v36  ;;  %v4970_v27 = vsel %vm4951_vm6, %v20484_v57, %v20483_v46  ;;  %v6572_v35 = vsel %vm6559_vm9, %v20486_v17, %v20485_v6  ;;  %8255 = vst.msk [vmem:[#allocation2 + $0x38] sm:$0xff] %vm8246_vm2, %v8211_v40  ;;  %v8060_v36 = vpop.permute.xlu1 %8059  ;;  %v20488_v7 = vld [vmem:[#allocation35_spill] sm:$0xff]  ;;  %v20489_v48 = vld [vmem:[#allocation265_spill] sm:$0xff]  ;;  %v20491_v2 = vld [vmem:[#allocation230_spill] sm:$0xff] }
 0x4a0   :  { %v5849_v9 = vadd.f32 %v5768_v25, %v5045_v10  ;;  %v5769_v13 = vsel %vm5755_vm5, %v20479_v56, %v20487_v8  ;;  %v7409_v37 = vadd.f32 %v7329_v59, %v6647_v45  ;;  %v7410_v26 = vadd.f32 %v7330_v4, %v6648_v50  ;;  %v20492_v40 = vld [vmem:[#allocation215_spill] sm:$0xff]  ;;  %v20493_v10 = vld [vmem:[#allocation214_spill] sm:$0xff] }
 0x4a1   :  { %v5770_v57 = vsel %vm5755_vm5, %v20487_v8, %v20488_v7  ;;  %v7334_v17 = vsel %vm7321_vm1, %v20490_v15, %v20489_v48  ;;  %v8133_v32 = vsel %vm8125_vm10, %v8058_v23, %v8060_v36  ;;  %v8134_v25 = vsel %vm8125_vm10, %v8060_v36, %v15991_v43  ;;  %v20494_v50 = vld [vmem:[#allocation231_spill] sm:$0xff] }
 0x4a2   :  { %v6653_v24 = vadd.f32 %v6572_v35, %v5849_v9  ;;  %v6573_v56 = vsel %vm6559_vm9, %v20485_v6, %v20491_v2  ;;  %v8213_v59 = vadd.f32 %v8133_v32, %v7409_v37  ;;  %v8214_v4 = vadd.f32 %v8134_v25, %v7410_v26  ;;  %8378 = vrot.lane.b32.xlu0 %v8206_v49, %s10555_s28  ;;  %v7971_v9 = vld [vmem:[#allocation2 + $0x70] sm:$0xff]  ;;  %v8070_v8 = vpop.permute.xlu0 %8069  ;;  %v20495_v26 = vld [vmem:[#allocation266_spill] sm:$0xff]  ;;  %v20497_v32 = vld [vmem:[#allocation37_spill] sm:$0xff] }
 0x4a3   :  { %v4971_v54 = vsel %vm4951_vm6, %v20483_v46, %v20492_v40  ;;  %v4972_v23 = vsel %vm4951_vm6, %v20492_v40, %v20493_v10  ;;  %v5850_v45 = vadd.f32 %v5769_v13, %v5046_v20  ;;  %v6574_v35 = vsel %vm6559_vm9, %v20491_v2, %v20494_v50  ;;  %v8072_v15 = vpop.permute.xlu1 %8071  ;;  %v20496_v46 = vld [vmem:[#allocation36_spill] sm:$0xff]  ;;  %v20498_v20 = vld [vmem:[#allocation267_spill] sm:$0xff] }
 0x4a4   :  { %v5851_v6 = vadd.f32 %v5770_v57, %v5047_v52  ;;  %v7415_v37 = vadd.f32 %v7334_v17, %v6653_v24  ;;  %v7335_v49 = vsel %vm7321_vm1, %v20489_v48, %v20495_v26  ;;  %v8218_v36 = vadd.f32 %v8070_v8, %v7971_v9  ;;  %v20499_v10 = vld [vmem:[#allocation199_spill] sm:$0xff]  ;;  %v20500_v9 = vld [vmem:[#allocation232_spill] sm:$0xff] }
 0x4a5   :  { %v5774_v25 = vsel %vm5755_vm5, %v20497_v32, %v20496_v46  ;;  %v6654_v40 = vadd.f32 %v6573_v56, %v5850_v45  ;;  %v7336_v13 = vsel %vm7321_vm1, %v20495_v26, %v20498_v20  ;;  %v8138_v2 = vsel %vm8125_vm10, %v8070_v8, %v8072_v15  ;;  %v20501_v8 = vld [vmem:[#allocation233_spill] sm:$0xff]  ;;  %v20520_v50 = vld [vmem:[#allocation236_spill] sm:$0xff] }
 0x4a6   :  { %v16031_v52 = vsel %vm4189_vm7, %v20451_v18, %v20499_v10  ;;  %v5052_v57 = vadd.f32 %v4970_v27, %v15809_v21  ;;  %v6655_v48 = vadd.f32 %v6574_v35, %v5851_v6  ;;  %8262 = vst.msk [vmem:[#allocation2 + $0x70] sm:$0xff] %vm8246_vm2, %v8218_v36  ;;  %v8219_v17 = vadd.f32 %v8138_v2, %v7415_v37  ;;  %v8297_v24 = vld [vmem:[#allocation2 + $0x38] sm:$0xff]  ;;  %v8074_v18 = vpop.permute.xlu0 %8073  ;;  %v20502_v21 = vld [vmem:[#allocation39_spill] sm:$0xff]  ;;  %v20519_v20 = vld [vmem:[#allocation237_spill] sm:$0xff] }
 0x4a7   :  { %8390 = vrot.lane.b32.xlu0 %v8212_v14, %s10555_s28  ;;  %v5053_v56 = vadd.f32 %v4971_v54, %v15812_v42  ;;  %v5054_v45 = vadd.f32 %v4972_v23, %v15815_v0  ;;  %v6578_v26 = vsel %vm6559_vm9, %v20501_v8, %v20500_v9  ;;  %v7416_v32 = vadd.f32 %v7335_v49, %v6654_v40  ;;  %v16046_v6 = vpop.permute.xlu1 %8075  ;;  %v20504_v42 = vld [vmem:[#allocation38_spill] sm:$0xff]  ;;  %v20505_v54 = vld [vmem:[#allocation268_spill] sm:$0xff]  ;;  %v20506_v23 = vld [vmem:[#allocation269_spill] sm:$0xff] }
 0x4a8   :  { %8388 = vrot.lane.b32.xlu1 %v8297_v24, %s10555_s28  ;;  %v5856_v27 = vadd.f32 %v5774_v25, %v5052_v57  ;;  %v5775_v10 = vsel %vm5755_vm5, %v20496_v46, %v20502_v21  ;;  %v7417_v35 = vadd.f32 %v7336_v13, %v6655_v48  ;;  %v8139_v14 = vsel %vm8125_vm10, %v8072_v15, %v8074_v18  ;;  %v20507_v25 = vld [vmem:[#allocation72_spill] sm:$0xff]  ;;  %v20508_v40 = vld [vmem:[#allocation71_spill] sm:$0xff]  ;;  %v20509_v13 = vld [vmem:[#allocation73_spill] sm:$0xff] }
 0x4a9   :  { %20503 = vst [vmem:[#allocation91_spill] sm:$0xff] %v16046_v6  ;;  %v5776_v0 = vsel %vm5755_vm5, %v20502_v21, %v20504_v42  ;;  %v7340_v37 = vsel %vm7321_vm1, %v20506_v23, %v20505_v54  ;;  %v8220_v49 = vadd.f32 %v8139_v14, %v7416_v32  ;;  %v8140_v36 = vsel %vm8125_vm10, %v8074_v18, %v16046_v6  ;;  %v20510_v48 = vld [vmem:[#allocation216_spill] sm:$0xff]  ;;  %v20512_v32 = vld [vmem:[#allocation11_spill] sm:$0xff]  ;;  %v20514_v23 = vld [vmem:[#allocation234_spill] sm:$0xff] }
 0x4aa   :  { %v4976_v46 = vsel %vm4951_vm6, %v20508_v40, %v20507_v25  ;;  %v4977_v15 = vsel %vm4951_vm6, %v20507_v25, %v20509_v13  ;;  %v6660_v2 = vadd.f32 %v6578_v26, %v5856_v27  ;;  %v8221_v57 = vadd.f32 %v8140_v36, %v7417_v35  ;;  %v20511_v8 = vld [vmem:[#allocation8_spill] sm:$0xff]  ;;  %v20513_v21 = vld [vmem:[#allocation235_spill] sm:$0xff]  ;;  %v8086_v26 = vpop.permute.xlu0 %8085  ;;  %v20515_v35 = vld [vmem:[#allocation41_spill] sm:$0xff] }
 0x4ab   :  { %8394 = vrot.lane.b32.xlu0 %v8214_v4, %s10555_s28  ;;  %v4978_v24 = vsel %vm4951_vm6, %v20509_v13, %v20510_v48  ;;  %v4982_v18 = vsel %vm4951_vm6, %v20512_v32, %v20511_v8  ;;  %v6579_v14 = vsel %vm6559_vm9, %v20500_v9, %v20513_v21  ;;  %v6580_v25 = vsel %vm6559_vm9, %v20513_v21, %v20514_v23  ;;  %v20516_v36 = vld [vmem:[#allocation40_spill] sm:$0xff]  ;;  %v7978_v48 = vld [vmem:[#allocation2 + $0xa8] sm:$0xff]  ;;  %v8084_v32 = vpop.permute.xlu1 %8083  ;;  %v20517_v6 = vld [vmem:[#allocation63_spill] sm:$0xff] }
 0x4ac   :  { %8392 = vrot.lane.b32.xlu1 %v8213_v59, %s10555_s28  ;;  %v5857_v4 = vadd.f32 %v5775_v10, %v5053_v56  ;;  %v5858_v27 = vadd.f32 %v5776_v0, %v5054_v45  ;;  %v5780_v40 = vsel %vm5755_vm5, %v20516_v36, %v20515_v35  ;;  %v7422_v13 = vadd.f32 %v7340_v37, %v6660_v2  ;;  %v20518_v42 = vld [vmem:[#allocation4_spill] sm:$0xff] }
 0x4ad   :  { %v7341_v9 = vsel %vm7321_vm1, %v20505_v54, %v20517_v6  ;;  %v7342_v21 = vsel %vm7321_vm1, %v20517_v6, %v20518_v42  ;;  %v8144_v23 = vsel %vm8125_vm10, %v8084_v32, %v8086_v26  ;;  %v8225_v59 = vadd.f32 %v8084_v32, %v7978_v48  ;;  %v8304_v56 = vld [vmem:[#allocation2 + $0x70] sm:$0xff] }
 0x4ae   :  { %v5059_v45 = vadd.f32 %v4976_v46, %v15821_v53  ;;  %v6661_v10 = vadd.f32 %v6579_v14, %v5857_v4  ;;  %v6662_v0 = vadd.f32 %v6580_v25, %v5858_v27  ;;  %v8226_v36 = vadd.f32 %v8144_v23, %v7422_v13  ;;  %v16095_v48 = vpop.permute.xlu0 %8089  ;;  %v20521_v46 = vld [vmem:[#allocation42_spill] sm:$0xff]  ;;  %v20526_v32 = vld [vmem:[#allocation67_spill] sm:$0xff] }
 0x4af   :  { %8402 = vrot.lane.b32.xlu0 %v8304_v56, %s10555_s28  ;;  %v5060_v37 = vadd.f32 %v4977_v15, %v15824_v38  ;;  %v5061_v2 = vadd.f32 %v4978_v24, %v15833_v51  ;;  %v5066_v54 = vadd.f32 %v4982_v18, %v15836_v60  ;;  %v6584_v6 = vsel %vm6559_vm9, %v20520_v50, %v20519_v20  ;;  %v8088_v51 = vpop.permute.xlu1 %8087  ;;  %v20522_v24 = vld [vmem:[#allocation43_spill] sm:$0xff]  ;;  %v20523_v18 = vld [vmem:[#allocation64_spill] sm:$0xff]  ;;  %v20524_v50 = vld [vmem:[#allocation5_spill] sm:$0xff] }
 0x4b0   :  { %8269 = vst.msk [vmem:[#allocation2 + $0xa8] sm:$0xff] %vm8246_vm2, %v8225_v59  ;;  %8404 = vrot.lane.b32.xlu1 %v8219_v17, %s10555_s28  ;;  %v5863_v53 = vadd.f32 %v5780_v40, %v5059_v45  ;;  %v5781_v14 = vsel %vm5755_vm5, %v20515_v35, %v20521_v46  ;;  %v7423_v38 = vadd.f32 %v7341_v9, %v6661_v10  ;;  %v20525_v27 = vld [vmem:[#allocation238_spill] sm:$0xff]  ;;  %v20528_v56 = vld [vmem:[#allocation239_spill] sm:$0xff]  ;;  %v7985_v10 = vld [vmem:[#allocation2 + $0xe0] sm:$0xff] }
 0x4b1   :  { %v7424_v15 = vadd.f32 %v7342_v21, %v6662_v0  ;;  %v5782_v60 = vsel %vm5755_vm5, %v20521_v46, %v20522_v24  ;;  %v7346_v23 = vsel %vm7321_vm1, %v20524_v50, %v20523_v18  ;;  %v8145_v25 = vsel %vm8125_vm10, %v8086_v26, %v8088_v51  ;;  %v20527_v21 = vld [vmem:[#allocation10_spill] sm:$0xff] }
 0x4b2   :  { %v8146_v17 = vsel %vm8125_vm10, %v8088_v51, %v16095_v48  ;;  %v6667_v4 = vadd.f32 %v6584_v6, %v5863_v53  ;;  %v6585_v35 = vsel %vm6559_vm9, %v20519_v20, %v20525_v27  ;;  %v8227_v40 = vadd.f32 %v8145_v25, %v7423_v38  ;;  %v8098_v0 = vpop.permute.xlu0 %8097  ;;  %v20530_v38 = vld [vmem:[#allocation44_spill] sm:$0xff]  ;;  %v20532_v51 = vld [vmem:[#allocation69_spill] sm:$0xff] }
 0x4b3   :  { %v8228_v13 = vadd.f32 %v8146_v17, %v7424_v15  ;;  %8406 = vrot.lane.b32.xlu0 %v8220_v49, %s10555_s28  ;;  %v4983_v9 = vsel %vm4951_vm6, %v20511_v8, %v20526_v32  ;;  %v4984_v26 = vsel %vm4951_vm6, %v20526_v32, %v20527_v21  ;;  %v5864_v59 = vadd.f32 %v5781_v14, %v5060_v37  ;;  %v20529_v49 = vld [vmem:[#allocation66_spill] sm:$0xff]  ;;  %v8100_v46 = vpop.permute.xlu1 %8099  ;;  %v20531_v15 = vld [vmem:[#allocation45_spill] sm:$0xff]  ;;  %v20535_v32 = vld [vmem:[#allocation240_spill] sm:$0xff] }
 0x4b4   :  { %v6586_v45 = vsel %vm6559_vm9, %v20525_v27, %v20528_v56  ;;  %8408 = vrot.lane.b32.xlu1 %v8221_v57, %s10555_s28  ;;  %v5865_v20 = vadd.f32 %v5782_v60, %v5061_v2  ;;  %v7429_v6 = vadd.f32 %v7346_v23, %v6667_v4  ;;  %v7347_v53 = vsel %vm7321_vm1, %v20523_v18, %v20529_v49  ;;  %v20533_v17 = vld [vmem:[#allocation13_spill] sm:$0xff]  ;;  %v20534_v27 = vld [vmem:[#allocation12_spill] sm:$0xff] }
 0x4b5   :  { %v8232_v8 = vadd.f32 %v8098_v0, %v7985_v10  ;;  %v5786_v37 = vsel %vm5755_vm5, %v20531_v15, %v20530_v38  ;;  %v6668_v14 = vadd.f32 %v6585_v35, %v5864_v59  ;;  %v7348_v50 = vsel %vm7321_vm1, %v20529_v49, %v20532_v51  ;;  %v20536_v59 = vld [vmem:[#allocation241_spill] sm:$0xff] }
 0x4b6   :  { %v8150_v25 = vsel %vm8125_vm10, %v8098_v0, %v8100_v46  ;;  %v5067_v57 = vadd.f32 %v4983_v9, %v15845_v3  ;;  %v5068_v2 = vadd.f32 %v4984_v26, %v15857_v55  ;;  %v6669_v60 = vadd.f32 %v6586_v45, %v5865_v20  ;;  %v8102_v9 = vpop.permute.xlu0 %8101  ;;  %v20537_v45 = vld [vmem:[#allocation47_spill] sm:$0xff]  ;;  %v20538_v20 = vld [vmem:[#allocation46_spill] sm:$0xff]  ;;  %v20539_v49 = vld [vmem:[#allocation61_spill] sm:$0xff] }
 0x4b7   :  { %8276 = vst.msk [vmem:[#allocation2 + $0xe0] sm:$0xff] %vm8246_vm2, %v8232_v8  ;;  %v8233_v18 = vadd.f32 %v8150_v25, %v7429_v6  ;;  %v8311_v23 = vld [vmem:[#allocation2 + $0xa8] sm:$0xff]  ;;  %8418 = vrot.lane.b32.xlu0 %v8226_v36, %s10555_s28  ;;  %v4955_v4 = vsel %vm4951_vm6, %v20448_v58, %v20533_v17  ;;  %v4956_v35 = vsel %vm4951_vm6, %v20533_v17, %v20534_v27  ;;  %v16152_v0 = vpop.permute.xlu1 %8103  ;;  %v20540_v8 = vld [vmem:[#allocation60_spill] sm:$0xff] }
 0x4b8   :  { %v6590_v3 = vsel %vm6559_vm9, %v20536_v59, %v20535_v32  ;;  %v7430_v55 = vadd.f32 %v7347_v53, %v6668_v14  ;;  %8416 = vrot.lane.b32.xlu1 %v8311_v23, %s10555_s28  ;;  %v5870_v26 = vadd.f32 %v5786_v37, %v5066_v54  ;;  %v5787_v36 = vsel %vm5755_vm5, %v20530_v38, %v20537_v45  ;;  %v20542_v23 = vld [vmem:[#allocation243_spill] sm:$0xff]  ;;  %v20543_v27 = vld [vmem:[#allocation242_spill] sm:$0xff] }
 0x4b9   :  { %v7431_v10 = vadd.f32 %v7348_v50, %v6669_v60  ;;  %v8151_v58 = vsel %vm8125_vm10, %v8100_v46, %v8102_v9  ;;  %v5788_v6 = vsel %vm5755_vm5, %v20537_v45, %v20538_v20  ;;  %v7352_v53 = vsel %vm7321_vm1, %v20540_v8, %v20539_v49  ;;  %v20541_v50 = vld [vmem:[#allocation15_spill] sm:$0xff] }
 0x4ba   :  { %v8234_v15 = vadd.f32 %v8151_v58, %v7430_v55  ;;  %v8152_v54 = vsel %vm8125_vm10, %v8102_v9, %v16152_v0  ;;  %v5034_v37 = vadd.f32 %v4955_v4, %v15860_v11  ;;  %v5035_v38 = vadd.f32 %v4956_v35, %v15869_v47  ;;  %v8114_v11 = vpop.permute.xlu0 %8113  ;;  %v20544_v4 = vld [vmem:[#allocation48_spill] sm:$0xff]  ;;  %v20545_v35 = vld [vmem:[#allocation49_spill] sm:$0xff] }
 0x4bb   :  { %v6674_v14 = vadd.f32 %v6590_v3, %v5870_v26  ;;  %v8235_v46 = vadd.f32 %v8152_v54, %v7431_v10  ;;  %8422 = vrot.lane.b32.xlu0 %v8228_v13, %s10555_s28  ;;  %v4961_v25 = vsel %vm4951_vm6, %v20466_v39, %v20541_v50  ;;  %v5871_v60 = vadd.f32 %v5787_v36, %v5067_v57  ;;  %v7992_v3 = vld [vmem:[#allocation2 + $0x118] sm:$0xff]  ;;  %v8112_v55 = vpop.permute.xlu1 %8111  ;;  %v20547_v26 = vld [vmem:[#allocation75_spill] sm:$0xff] }
 0x4bc   :  { %v6591_v17 = vsel %vm6559_vm9, %v20535_v32, %v20542_v23  ;;  %v6592_v59 = vsel %vm6559_vm9, %v20542_v23, %v20543_v27  ;;  %8420 = vrot.lane.b32.xlu1 %v8227_v40, %s10555_s28  ;;  %v5872_v47 = vadd.f32 %v5788_v6, %v5068_v2  ;;  %v5759_v13 = vsel %vm5755_vm5, %v20453_v33, %v20544_v4  ;;  %v20546_v32 = vld [vmem:[#allocation74_spill] sm:$0xff]  ;;  %v20548_v58 = vld [vmem:[#allocation244_spill] sm:$0xff] }
 0x4bd   :  { %v5760_v39 = vsel %vm5755_vm5, %v20544_v4, %v20545_v35  ;;  %v7436_v57 = vadd.f32 %v7352_v53, %v6674_v14  ;;  %v7353_v9 = vsel %vm7321_vm1, %v20539_v49, %v20546_v32  ;;  %v7354_v40 = vsel %vm7321_vm1, %v20546_v32, %v20547_v26  ;;  %v20549_v14 = vld [vmem:[#allocation245_spill] sm:$0xff]  ;;  %v20552_v35 = vld [vmem:[#allocation14_spill] sm:$0xff] }
 0x4be   :  { %v8156_v2 = vsel %vm8125_vm10, %v8112_v55, %v8114_v11  ;;  %v8239_v45 = vadd.f32 %v8112_v55, %v7992_v3  ;;  %v8318_v36 = vld [vmem:[#allocation2 + $0xe0] sm:$0xff]  ;;  %v6675_v33 = vadd.f32 %v6591_v17, %v5871_v60  ;;  %v6676_v10 = vadd.f32 %v6592_v59, %v5872_v47  ;;  %v16197_v4 = vpop.permute.xlu0 %8117  ;;  %v20550_v60 = vld [vmem:[#allocation50_spill] sm:$0xff]  ;;  %v20551_v47 = vld [vmem:[#allocation76_spill] sm:$0xff] }
 0x4bf   :  { %v6563_v6 = vsel %vm6559_vm9, %v20460_v12, %v20548_v58  ;;  %v8240_v8 = vadd.f32 %v8156_v2, %v7436_v57  ;;  %8430 = vrot.lane.b32.xlu0 %v8318_v36, %s10555_s28  ;;  %v5041_v53 = vadd.f32 %v4961_v25, %v15878_v1  ;;  %v5838_v49 = vadd.f32 %v5759_v13, %v5034_v37  ;;  %v8116_v37 = vpop.permute.xlu1 %8115  ;;  %v20554_v55 = vld [vmem:[#allocation246_spill] sm:$0xff]  ;;  %v20555_v2 = vld [vmem:[#allocation51_spill] sm:$0xff] }
 0x4c0   :  { %v5839_v54 = vadd.f32 %v5760_v39, %v5035_v38  ;;  %v6564_v23 = vsel %vm6559_vm9, %v20548_v58, %v20549_v14  ;;  %8283 = vst.msk [vmem:[#allocation2 + $0x118] sm:$0xff] %vm8246_vm2, %v8239_v45  ;;  %8432 = vrot.lane.b32.xlu1 %v8233_v18, %s10555_s28  ;;  %v5765_v12 = vsel %vm5755_vm5, %v20470_v29, %v20550_v60 }
 0x4c1   :  { %v7437_v17 = vadd.f32 %v7353_v9, %v6675_v33  ;;  %v7438_v59 = vadd.f32 %v7354_v40, %v6676_v10  ;;  %v7325_v1 = vsel %vm7321_vm1, %v20464_v28, %v20551_v47  ;;  %v6642_v38 = vadd.f32 %v6563_v6, %v5838_v49  ;;  %v20556_v33 = vld [vmem:[#allocation200_spill] sm:$0xff]  ;;  %v20557_v6 = vld [vmem:[#allocation247_spill] sm:$0xff] }
 0x4c2   :  { %v7326_v25 = vsel %vm7321_vm1, %v20551_v47, %v15365_v62  ;;  %v8157_v13 = vsel %vm8125_vm10, %v8114_v11, %v8116_v37  ;;  %v8158_v18 = vsel %vm8125_vm10, %v8116_v37, %v16197_v4  ;;  %v4962_v29 = vsel %vm4951_vm6, %v20541_v50, %v20552_v35  ;;  %v20553_v62 = vld [vmem:[#allocation17_spill] sm:$0xff]  ;;  %v8050_v50 = vpop.permute.xlu0 %8049  ;;  %v20558_v49 = vld [vmem:[#allocation16_spill] sm:$0xff]  ;;  %v34_v35 = vld [vmem:[%s18958_s2 + $0x28] sm:$0xff] }
 0x4c3   :  { %v6643_v39 = vadd.f32 %v6564_v23, %v5839_v54  ;;  %v16215_v57 = vadd.f32 %v8157_v13, %v7437_v17  ;;  %v8242_v3 = vadd.f32 %v8158_v18, %v7438_v59  ;;  %8434 = vrot.lane.b32.xlu0 %v8234_v15, %s10555_s28  ;;  %v16220_v28 = vadd.f32 %v16031_v52, %v15724_v34  ;;  %v8052_v52 = vpop.permute.xlu1 %8051  ;;  %v20559_v23 = vld [vmem:[#allocation52_spill] sm:$0xff]  ;;  %v29_v47 = vld [vmem:[%s18958_s2] sm:$0xff] }
 0x4c4   :  { %v4967_v11 = vsel %vm4951_vm6, %v20476_v22, %v20553_v62  ;;  %v6569_v32 = vsel %vm6559_vm9, %v20478_v19, %v20554_v55  ;;  %v7404_v9 = vadd.f32 %v7325_v1, %v6642_v38  ;;  %8436 = vrot.lane.b32.xlu1 %v8235_v46, %s10555_s28  ;;  %v5845_v40 = vadd.f32 %v5765_v12, %v5041_v53  ;;  %v31_v1 = vld [vmem:[%s18958_s2 + $0x10] sm:$0xff]  ;;  %v20560_v37 = vld [vmem:[#allocation53_spill] sm:$0xff]  ;;  %v32_v13 = vld [vmem:[%s18958_s2 + $0x18] sm:$0xff] }
 0x4c5   :  { %v5766_v15 = vsel %vm5755_vm5, %v20550_v60, %v20555_v2  ;;  %v7405_v45 = vadd.f32 %v7326_v25, %v6643_v39  ;;  %v8129_v34 = vsel %vm8125_vm10, %v15942_v44, %v8050_v50  ;;  %v5042_v22 = vadd.f32 %v4962_v29, %v15881_v63  ;;  %v7963_v60 = vld [vmem:[#allocation2 + $0x30] sm:$0xff]  ;;  %v33_v18 = vld [vmem:[%s18958_s2 + $0x20] sm:$0xff]  ;;  %197 = vst [vmem:[%s18959_s8] sm:$0xff] %v29_v47  ;;  %v20561_v29 = vld [vmem:[#allocation248_spill] sm:$0xff] }
 0x4c6   :  { %v7331_v19 = vsel %vm7321_vm1, %v20482_v61, %v15409_v31  ;;  %v16238_v36 = vadd.f32 %v8129_v34, %v7404_v9  ;;  %v8130_v46 = vsel %vm8125_vm10, %v8050_v50, %v8052_v52  ;;  %v16244_v10 = vsel %vm4189_vm7, %v20432_v5, %v20556_v33  ;;  %v8054_v12 = vpop.permute.xlu0 %8053  ;;  %199 = vst [vmem:[%s18959_s8 + $0x10] sm:$0xff] %v31_v1  ;;  %v20562_v39 = vld [vmem:[#allocation231_spill] sm:$0xff]  ;;  %v20564_v9 = vld [vmem:[#allocation214_spill] sm:$0xff]  ;;  %v20565_v2 = vld [vmem:[#allocation249_spill] sm:$0xff] }
 0x4c7   :  { %v6649_v58 = vadd.f32 %v6569_v32, %v5845_v40  ;;  %v6570_v44 = vsel %vm6559_vm9, %v20554_v55, %v20557_v6  ;;  %v16249_v53 = vadd.f32 %v8130_v46, %v7405_v45  ;;  %v8325_v63 = vld [vmem:[#allocation2 + $0x118] sm:$0xff]  ;;  %8446 = vrot.lane.b32.xlu0 %v8240_v8, %s10555_s28  ;;  %v5048_v61 = vadd.f32 %v4967_v11, %v15884_v16  ;;  %v8064_v59 = vpop.permute.xlu1 %8063  ;;  %v35_v55 = vld [vmem:[%s18958_s2 + $0x30] sm:$0xff]  ;;  %v46_v1 = vld [vmem:[%s18958_s2 + $0x88] sm:$0xff] }
 0x4c8   :  { %v4968_v54 = vsel %vm4951_vm6, %v20553_v62, %v20558_v49  ;;  %v5846_v14 = vadd.f32 %v5766_v15, %v5042_v22  ;;  %v5771_v5 = vsel %vm5755_vm5, %v20488_v7, %v20559_v23  ;;  %8444 = vrot.lane.b32.xlu1 %v8325_v63, %s10555_s28  ;;  %v7332_v8 = vsel %vm7321_vm1, %v15409_v31, %v15445_v30  ;;  %v30_v7 = vld [vmem:[%s18958_s2 + $0x8] sm:$0xff]  ;;  %v36_v32 = vld [vmem:[%s18958_s2 + $0x38] sm:$0xff]  ;;  %v20568_v63 = vld [vmem:[#allocation267_spill] sm:$0xff] }
 0x4c9   :  { %v7411_v17 = vadd.f32 %v7331_v19, %v6649_v58  ;;  %v8131_v16 = vsel %vm8125_vm10, %v8052_v52, %v8054_v12  ;;  %v5772_v31 = vsel %vm5755_vm5, %v20559_v23, %v20560_v37  ;;  %v8135_v25 = vsel %vm8125_vm10, %v15991_v43, %v8064_v59  ;;  %198 = vst [vmem:[%s18959_s8 + $0x8] sm:$0xff] %v30_v7  ;;  %v7970_v52 = vld [vmem:[#allocation2 + $0x68] sm:$0xff]  ;;  %v39_v19 = vld [vmem:[%s18958_s2 + $0x50] sm:$0xff]  ;;  %v40_v46 = vld [vmem:[%s18958_s2 + $0x58] sm:$0xff] }
 0x4ca   :  { %v6650_v30 = vadd.f32 %v6570_v44, %v5846_v14  ;;  %v8210_v38 = vadd.f32 %v8131_v16, %v7963_v60  ;;  %v5049_v43 = vadd.f32 %v4968_v54, %v15890_v41  ;;  %v6575_v62 = vsel %vm6559_vm9, %v20562_v39, %v20561_v29  ;;  %v37_v41 = vld [vmem:[%s18958_s2 + $0x40] sm:$0xff]  ;;  %200 = vst [vmem:[%s18959_s8 + $0x18] sm:$0xff] %v32_v13  ;;  %v8066_v34 = vpop.permute.xlu0 %8065  ;;  %v38_v22 = vld [vmem:[%s18958_s2 + $0x48] sm:$0xff]  ;;  %v44_v47 = vld [vmem:[%s18958_s2 + $0x78] sm:$0xff] }
 0x4cb   :  { %v16300_v11 = vadd.f32 %v8135_v25, %v7411_v17  ;;  %8450 = vrot.lane.b32.xlu0 %v8242_v3, %s10555_s28  ;;  %201 = vst [vmem:[%s18959_s8 + $0x20] sm:$0xff] %v33_v18  ;;  %202 = vst [vmem:[%s18959_s8 + $0x28] sm:$0xff] %v34_v35  ;;  %v20563_v3 = vld [vmem:[#allocation19_spill] sm:$0xff]  ;;  %v5852_v40 = vadd.f32 %v5771_v5, %v5048_v61  ;;  %v6576_v15 = vsel %vm6559_vm9, %v20561_v29, %v20565_v2  ;;  %v20567_v44 = vld [vmem:[#allocation78_spill] sm:$0xff]  ;;  %v8068_v54 = vpop.permute.xlu1 %8067 }
 0x4cc   :  { %v4973_v50 = vsel %vm4951_vm6, %v20564_v9, %v20563_v3  ;;  %v7412_v45 = vadd.f32 %v7332_v8, %v6650_v30  ;;  %8254 = vst.msk [vmem:[#allocation2 + $0x30] sm:$0xff] %vm8253_vm12, %v8210_v38  ;;  %8448 = vrot.lane.b32.xlu1 %v16215_v57, %s10555_s28  ;;  %205 = vst [vmem:[%s18959_s8 + $0x38] sm:$0xff] %v36_v32  ;;  %v20566_v57 = vld [vmem:[#allocation18_spill] sm:$0xff]  ;;  %v5853_v6 = vadd.f32 %v5772_v31, %v5049_v43  ;;  %v41_v14 = vld [vmem:[%s18958_s2 + $0x60] sm:$0xff] }
 0x4cd   :  { %204 = vst.msk [vmem:[%s18959_s8 + $0x30] sm:$0xff] %vm203_vm8, %v35_v55  ;;  %206 = vst [vmem:[%s18959_s8 + $0x40] sm:$0xff] %v37_v41  ;;  %v4974_v58 = vsel %vm4951_vm6, %v20563_v3, %v20566_v57  ;;  %v7337_v61 = vsel %vm7321_vm1, %v20568_v63, %v20567_v44  ;;  %v8136_v49 = vsel %vm8125_vm10, %v8064_v59, %v8066_v34  ;;  %v42_v23 = vld [vmem:[%s18958_s2 + $0x68] sm:$0xff]  ;;  %v43_v5 = vld [vmem:[%s18958_s2 + $0x70] sm:$0xff] }
 0x4ce   :  { %207 = vst [vmem:[%s18959_s8 + $0x48] sm:$0xff] %v38_v22  ;;  %208 = vst [vmem:[%s18959_s8 + $0x50] sm:$0xff] %v39_v19  ;;  %v20569_v60 = vld [vmem:[#allocation54_spill] sm:$0xff]  ;;  %v6656_v8 = vadd.f32 %v6575_v62, %v5852_v40  ;;  %v16377_v16 = vadd.f32 %v8136_v49, %v7412_v45  ;;  %v8137_v59 = vsel %vm8125_vm10, %v8066_v34, %v8068_v54  ;;  %v45_v7 = vld [vmem:[%s18958_s2 + $0x80] sm:$0xff]  ;;  %v8078_v41 = vpop.permute.xlu0 %8077 }
 0x4cf   :  { %209 = vst [vmem:[%s18959_s8 + $0x58] sm:$0xff] %v40_v46  ;;  %v20570_v12 = vld [vmem:[#allocation38_spill] sm:$0xff]  ;;  %210 = vst [vmem:[%s18959_s8 + $0x60] sm:$0xff] %v41_v14  ;;  %v6657_v25 = vadd.f32 %v6576_v15, %v5853_v6  ;;  %v8217_v13 = vadd.f32 %v8137_v59, %v7970_v52  ;;  %8382 = vrot.lane.b32.xlu0 %v16238_v36, %s10555_s28  ;;  %v47_v18 = vld [vmem:[%s18958_s2 + $0x90] sm:$0xff]  ;;  %v5056_v29 = vadd.f32 %v4974_v58, %v16220_v28  ;;  %v8080_v34 = vpop.permute.xlu1 %8079 }
 0x4d0   :  { %v5777_v17 = vsel %vm5755_vm5, %v20570_v12, %v20569_v60  ;;  %211 = vst.msk [vmem:[%s18959_s8 + $0x68] sm:$0xff] %vm203_vm8, %v42_v23  ;;  %212 = vst [vmem:[%s18959_s8 + $0x70] sm:$0xff] %v43_v5  ;;  %v20571_v37 = vld [vmem:[#allocation86_spill] sm:$0xff]  ;;  %v48_v35 = vld [vmem:[%s18958_s2 + $0x98] sm:$0xff]  ;;  %v7418_v32 = vadd.f32 %v7337_v61, %v6656_v8  ;;  %8384 = vrot.lane.b32.xlu1 %v16249_v53, %s10555_s28  ;;  %v8142_v61 = vsel %vm8125_vm10, %v8078_v41, %v8080_v34 }
 0x4d1   :  { %v16401_v31 = vadd.f32 %v16244_v10, %v20571_v37  ;;  %v20572_v30 = vld [vmem:[#allocation90_spill] sm:$0xff]  ;;  %v49_v10 = vld [vmem:[%s18958_s2 + $0xa0] sm:$0xff]  ;;  %213 = vst [vmem:[%s18959_s8 + $0x78] sm:$0xff] %v44_v47  ;;  %214 = vst [vmem:[%s18959_s8 + $0x80] sm:$0xff] %v45_v7 }
 0x4d2   :  { %v5055_v38 = vadd.f32 %v4973_v50, %v20572_v30  ;;  %215 = vst [vmem:[%s18959_s8 + $0x88] sm:$0xff] %v46_v1  ;;  %v20573_v36 = vld [vmem:[#allocation201_spill] sm:$0xff]  ;;  %v20574_v39 = vld [vmem:[#allocation250_spill] sm:$0xff]  ;;  %v51_v9 = vld [vmem:[%s18958_s2 + $0xb0] sm:$0xff] }
 0x4d3   :  { %v4218_v43 = vsel %vm4189_vm7, %v20556_v33, %v20573_v36  ;;  %v20575_v62 = vld [vmem:[#allocation234_spill] sm:$0xff]  ;;  %v52_v28 = vld [vmem:[%s18958_s2 + $0xb8] sm:$0xff]  ;;  %216 = vst [vmem:[%s18959_s8 + $0x90] sm:$0xff] %v47_v18  ;;  %217 = vst [vmem:[%s18959_s8 + $0x98] sm:$0xff] %v48_v35  ;;  %v8082_v18 = vpop.permute.xlu0 %8081 }
 0x4d4   :  { %v6581_v55 = vsel %vm6559_vm9, %v20575_v62, %v20574_v39  ;;  %v50_v3 = vld [vmem:[%s18958_s2 + $0xa8] sm:$0xff]  ;;  %218 = vst.msk [vmem:[%s18959_s8 + $0xa0] sm:$0xff] %vm203_vm8, %v49_v10  ;;  %v5859_v33 = vadd.f32 %v5777_v17, %v5055_v38  ;;  %v20576_v53 = vld [vmem:[#allocation55_spill] sm:$0xff]  ;;  %v53_v52 = vld [vmem:[%s18958_s2 + $0xc0] sm:$0xff]  ;;  %8396 = vrot.lane.b32.xlu1 %v16300_v11, %s10555_s28  ;;  %v8092_v62 = vpop.permute.xlu1 %8091 }
 0x4d5   :  { %v5778_v50 = vsel %vm5755_vm5, %v20569_v60, %v20576_v53  ;;  %v20577_v40 = vld [vmem:[#allocation79_spill] sm:$0xff]  ;;  %8261 = vst.msk [vmem:[#allocation2 + $0x68] sm:$0xff] %vm8253_vm12, %v8217_v13  ;;  %v54_v22 = vld [vmem:[%s18958_s2 + $0xc8] sm:$0xff]  ;;  %219 = vst [vmem:[%s18959_s8 + $0xa8] sm:$0xff] %v50_v3 }
 0x4d6   :  { %v7419_v2 = vadd.f32 %v20577_v40, %v6657_v25  ;;  %v20578_v15 = vld [vmem:[#allocation91_spill] sm:$0xff]  ;;  %220 = vst [vmem:[%s18959_s8 + $0xb0] sm:$0xff] %v51_v9  ;;  %221 = vst [vmem:[%s18959_s8 + $0xb8] sm:$0xff] %v52_v28  ;;  %v20579_v46 = vld [vmem:[#allocation21_spill] sm:$0xff]  ;;  %v6663_v5 = vadd.f32 %v6581_v55, %v5859_v33  ;;  %v5860_v25 = vadd.f32 %v5778_v50, %v5056_v29 }
 0x4d7   :  { %v8141_v45 = vsel %vm8125_vm10, %v20578_v15, %v8078_v41  ;;  %v55_v19 = vld [vmem:[%s18958_s2 + $0xd0] sm:$0xff]  ;;  %v20580_v57 = vld [vmem:[#allocation216_spill] sm:$0xff]  ;;  %v20581_v6 = vld [vmem:[#allocation82_spill] sm:$0xff]  ;;  %222 = vst [vmem:[%s18959_s8 + $0xc0] sm:$0xff] %v53_v52  ;;  %v8147_v28 = vsel %vm8125_vm10, %v16095_v48, %v8092_v62 }
 0x4d8   :  { %v4979_v58 = vsel %vm4951_vm6, %v20580_v57, %v20579_v46  ;;  %v7343_v44 = vsel %vm7321_vm1, %v20518_v42, %v20581_v6  ;;  %v16483_v63 = vadd.f32 %v8141_v45, %v7418_v32  ;;  %v56_v49 = vld [vmem:[%s18958_s2 + $0xd8] sm:$0xff]  ;;  %v57_v54 = vld [vmem:[%s18958_s2 + $0xe0] sm:$0xff]  ;;  %v58_v14 = vld [vmem:[%s18958_s2 + $0xe8] sm:$0xff]  ;;  %223 = vst [vmem:[%s18959_s8 + $0xc8] sm:$0xff] %v54_v22  ;;  %v16508_v17 = vadd.f32 %v8142_v61, %v7419_v2 }
 0x4d9   :  { %224 = vst [vmem:[%s18959_s8 + $0xd0] sm:$0xff] %v55_v19  ;;  %v20582_v42 = vld [vmem:[#allocation3_spill] sm:$0xff]  ;;  %v60_v47 = vld [vmem:[%s18958_s2 + $0xf8] sm:$0xff]  ;;  %225 = vst.msk [vmem:[%s18959_s8 + $0xd8] sm:$0xff] %vm203_vm8, %v56_v49  ;;  %v5062_v11 = vadd.f32 %v4979_v58, %v16401_v31  ;;  %v7425_v29 = vadd.f32 %v7343_v44, %v6663_v5  ;;  %v8094_v49 = vpop.permute.xlu0 %8093 }
 0x4da   :  { %v4301_v23 = vadd.f32 %v4218_v43, %v20582_v42  ;;  %v20583_v60 = vld [vmem:[#allocation251_spill] sm:$0xff]  ;;  %226 = vst [vmem:[%s18959_s8 + $0xe0] sm:$0xff] %v57_v54  ;;  %227 = vst [vmem:[%s18959_s8 + $0xe8] sm:$0xff] %v58_v14  ;;  %v20584_v7 = vld [vmem:[#allocation65_spill] sm:$0xff] }
 0x4db   :  { %v6582_v12 = vsel %vm6559_vm9, %v20574_v39, %v20583_v60  ;;  %v8296_v8 = vld [vmem:[#allocation2 + $0x30] sm:$0xff]  ;;  %v20585_v1 = vld [vmem:[#allocation190_spill] sm:$0xff]  ;;  %v20586_v30 = vld [vmem:[#allocation20_spill] sm:$0xff]  ;;  %229 = vst [vmem:[%s18959_s8 + $0xf8] sm:$0xff] %v60_v47  ;;  %v8143_v39 = vsel %vm8125_vm10, %v8080_v34, %v8082_v18  ;;  %v16595_v34 = vadd.f32 %v8147_v28, %v7425_v29 }
 0x4dc   :  { %v59_v59 = vld [vmem:[%s18958_s2 + $0xf0] sm:$0xff]  ;;  %v4223_v37 = vsel %vm4189_vm7, %v20585_v1, %v20584_v7  ;;  %v4980_v38 = vsel %vm4951_vm6, %v20579_v46, %v20586_v30  ;;  %v7977_v13 = vld [vmem:[#allocation2 + $0xa0] sm:$0xff]  ;;  %8386 = vrot.lane.b32.xlu0 %v8296_v8, %s10555_s28  ;;  %v62_v10 = vld [vmem:[%s18958_s2 + $0x108] sm:$0xff]  ;;  %v6664_v3 = vadd.f32 %v6582_v12, %v5860_v25  ;;  %v8148_v8 = vsel %vm8125_vm10, %v8092_v62, %v8094_v49 }
 0x4dd   :  { %v61_v35 = vld [vmem:[%s18958_s2 + $0x100] sm:$0xff]  ;;  %228 = vst [vmem:[%s18959_s8 + $0xf0] sm:$0xff] %v59_v59  ;;  %v20587_v36 = vld [vmem:[#allocation56_spill] sm:$0xff]  ;;  %v63_v55 = vld [vmem:[%s18958_s2 + $0x110] sm:$0xff]  ;;  %v8224_v9 = vadd.f32 %v8143_v39, %v7977_v13  ;;  %v5063_v2 = vadd.f32 %v4980_v38, %v4301_v23  ;;  %v8096_v59 = vpop.permute.xlu1 %8095 }
 0x4de   :  { %v5783_v43 = vsel %vm5755_vm5, %v20522_v24, %v20587_v36  ;;  %v64_v32 = vld [vmem:[%s18958_s2 + $0x118] sm:$0xff]  ;;  %v65_v31 = vld [vmem:[%s18958_s2 + $0x120] sm:$0xff]  ;;  %230 = vst [vmem:[%s18959_s8 + $0x100] sm:$0xff] %v61_v35  ;;  %231 = vst [vmem:[%s18959_s8 + $0x108] sm:$0xff] %v62_v10  ;;  %v8149_v25 = vsel %vm8125_vm10, %v8094_v49, %v8096_v59 }
 0x4df   :  { %v20588_v24 = vld [vmem:[#allocation217_spill] sm:$0xff]  ;;  %v66_v33 = vld [vmem:[%s18958_s2 + $0x128] sm:$0xff]  ;;  %v67_v53 = vld [vmem:[%s18958_s2 + $0x130] sm:$0xff]  ;;  %232 = vst.msk [vmem:[%s18959_s8 + $0x110] sm:$0xff] %vm203_vm8, %v63_v55  ;;  %v5866_v57 = vadd.f32 %v5783_v43, %v5062_v11 }
 0x4e0   :  { %v5784_v41 = vsel %vm5755_vm5, %v20587_v36, %v20588_v24  ;;  %v68_v50 = vld [vmem:[%s18958_s2 + $0x138] sm:$0xff]  ;;  %233 = vst [vmem:[%s18959_s8 + $0x118] sm:$0xff] %v64_v32  ;;  %234 = vst [vmem:[%s18959_s8 + $0x120] sm:$0xff] %v65_v31  ;;  %v20589_v48 = vld [vmem:[#allocation87_spill] sm:$0xff]  ;;  %8398 = vrot.lane.b32.xlu0 %v16377_v16, %s10555_s28 }
 0x4e1   :  { %v4307_v40 = vadd.f32 %v4223_v37, %v20589_v48  ;;  %v20590_v15 = vld [vmem:[#allocation252_spill] sm:$0xff]  ;;  %v69_v52 = vld [vmem:[%s18958_s2 + $0x140] sm:$0xff]  ;;  %v70_v22 = vld [vmem:[%s18958_s2 + $0x148] sm:$0xff]  ;;  %235 = vst [vmem:[%s18959_s8 + $0x128] sm:$0xff] %v66_v33  ;;  %v5867_v5 = vadd.f32 %v5784_v41, %v5063_v2  ;;  %v8108_v2 = vpop.permute.xlu1 %8107 }
 0x4e2   :  { %v6587_v45 = vsel %vm6559_vm9, %v20528_v56, %v20590_v15  ;;  %v71_v19 = vld [vmem:[%s18958_s2 + $0x150] sm:$0xff]  ;;  %236 = vst [vmem:[%s18959_s8 + $0x130] sm:$0xff] %v67_v53  ;;  %237 = vst [vmem:[%s18959_s8 + $0x138] sm:$0xff] %v68_v50  ;;  %v20592_v58 = vld [vmem:[#allocation253_spill] sm:$0xff] }
 0x4e3   :  { %v20591_v56 = vld [vmem:[#allocation23_spill] sm:$0xff]  ;;  %v6588_v6 = vsel %vm6559_vm9, %v20590_v15, %v20592_v58  ;;  %v20593_v44 = vld [vmem:[#allocation81_spill] sm:$0xff]  ;;  %8268 = vst.msk [vmem:[#allocation2 + $0xa0] sm:$0xff] %vm8253_vm12, %v8224_v9  ;;  %v7984_v54 = vld [vmem:[#allocation2 + $0xd8] sm:$0xff]  ;;  %v6670_v30 = vadd.f32 %v6587_v45, %v5866_v57 }
 0x4e4   :  { %v4985_v46 = vsel %vm4951_vm6, %v20527_v21, %v20591_v56  ;;  %v7426_v61 = vadd.f32 %v20593_v44, %v6664_v3  ;;  %v8303_v14 = vld [vmem:[#allocation2 + $0x68] sm:$0xff]  ;;  %v72_v42 = vld [vmem:[%s18958_s2 + $0x158] sm:$0xff]  ;;  %v73_v21 = vld [vmem:[%s18958_s2 + $0x160] sm:$0xff]  ;;  %238 = vst [vmem:[%s18959_s8 + $0x140] sm:$0xff] %v69_v52  ;;  %v6671_v36 = vadd.f32 %v6588_v6, %v5867_v5  ;;  %v8231_v43 = vadd.f32 %v8149_v25, %v7984_v54  ;;  %v8106_v3 = vpop.permute.xlu0 %8105 }
 0x4e5   :  { %239 = vst.msk [vmem:[%s18959_s8 + $0x148] sm:$0xff] %vm203_vm8, %v70_v22  ;;  %240 = vst [vmem:[%s18959_s8 + $0x150] sm:$0xff] %v71_v19  ;;  %v20594_v16 = vld [vmem:[#allocation70_spill] sm:$0xff]  ;;  %v20595_v60 = vld [vmem:[#allocation84_spill] sm:$0xff]  ;;  %8400 = vrot.lane.b32.xlu1 %v8303_v14, %s10555_s28  ;;  %8410 = vrot.lane.b32.xlu0 %v16483_v63, %s10555_s28  ;;  %v8120_v59 = vpop.permute.xlu1 %8119 }
 0x4e6   :  { %v4224_v23 = vsel %vm4189_vm7, %v20584_v7, %v20594_v16  ;;  %v7349_v12 = vsel %vm7321_vm1, %v20532_v51, %v20595_v60  ;;  %v74_v47 = vld [vmem:[%s18958_s2 + $0x168] sm:$0xff]  ;;  %v75_v1 = vld [vmem:[%s18958_s2 + $0x170] sm:$0xff]  ;;  %v76_v7 = vld [vmem:[%s18958_s2 + $0x178] sm:$0xff]  ;;  %241 = vst [vmem:[%s18959_s8 + $0x158] sm:$0xff] %v72_v42  ;;  %v16667_v38 = vadd.f32 %v8148_v8, %v7426_v61  ;;  %vm8458_vm7 = vcmask 785408  }
 0x4e7   :  { %242 = vst [vmem:[%s18959_s8 + $0x160] sm:$0xff] %v73_v21  ;;  %v20596_v51 = vld [vmem:[#allocation218_spill] sm:$0xff]  ;;  %v77_v13 = vld [vmem:[%s18958_s2 + $0x180] sm:$0xff]  ;;  %v79_v35 = vld [vmem:[%s18958_s2 + $0x190] sm:$0xff]  ;;  %v7432_v41 = vadd.f32 %v7349_v12, %v6670_v30 }
 0x4e8   :  { %v5789_v37 = vsel %vm5755_vm5, %v20538_v20, %v20596_v51  ;;  %v78_v18 = vld [vmem:[%s18958_s2 + $0x188] sm:$0xff]  ;;  %243 = vst [vmem:[%s18959_s8 + $0x168] sm:$0xff] %v74_v47  ;;  %244 = vst [vmem:[%s18959_s8 + $0x170] sm:$0xff] %v75_v1  ;;  %v5069_v20 = vadd.f32 %v4985_v46, %v4307_v40  ;;  %v80_v29 = vld [vmem:[%s18958_s2 + $0x198] sm:$0xff]  ;;  %v8153_v40 = vsel %vm8125_vm10, %v16152_v0, %v8106_v3  ;;  %v8110_v16 = vpop.permute.xlu0 %8109 }
 0x4e9   :  { %245 = vst [vmem:[%s18959_s8 + $0x178] sm:$0xff] %v76_v7  ;;  %v20597_v10 = vld [vmem:[#allocation22_spill] sm:$0xff]  ;;  %v81_v39 = vld [vmem:[%s18958_s2 + $0x1a0] sm:$0xff]  ;;  %246 = vst.msk [vmem:[%s18959_s8 + $0x180] sm:$0xff] %vm203_vm8, %v77_v13  ;;  %8412 = vrot.lane.b32.xlu1 %v16508_v17, %s10555_s28  ;;  %v16765_v19 = vadd.f32 %v8153_v40, %v7432_v41  ;;  %v8155_v8 = vsel %vm8125_vm10, %v8108_v2, %v8110_v16 }
 0x4ea   :  { %v4986_v11 = vsel %vm4951_vm6, %v20591_v56, %v20597_v10  ;;  %v82_v62 = vld [vmem:[%s18958_s2 + $0x1a8] sm:$0xff]  ;;  %247 = vst [vmem:[%s18959_s8 + $0x188] sm:$0xff] %v78_v18  ;;  %248 = vst [vmem:[%s18959_s8 + $0x190] sm:$0xff] %v79_v35  ;;  %v20598_v55 = vld [vmem:[#allocation88_spill] sm:$0xff]  ;;  %v8154_v56 = vsel %vm8125_vm10, %v8106_v3, %v8108_v2 }
 0x4eb   :  { %v4308_v32 = vadd.f32 %v4224_v23, %v20598_v55  ;;  %v20599_v31 = vld [vmem:[#allocation254_spill] sm:$0xff]  ;;  %v83_v9 = vld [vmem:[%s18958_s2 + $0x1b0] sm:$0xff]  ;;  %v84_v28 = vld [vmem:[%s18958_s2 + $0x1b8] sm:$0xff]  ;;  %249 = vst [vmem:[%s18959_s8 + $0x198] sm:$0xff] %v80_v29  ;;  %v8124_v55 = vpop.permute.xlu1 %8123 }
 0x4ec   :  { %v6593_v24 = vsel %vm6559_vm9, %v20543_v27, %v20599_v31  ;;  %v85_v33 = vld [vmem:[%s18958_s2 + $0x1c0] sm:$0xff]  ;;  %250 = vst [vmem:[%s18959_s8 + $0x1a0] sm:$0xff] %v81_v39  ;;  %251 = vst [vmem:[%s18959_s8 + $0x1a8] sm:$0xff] %v82_v62  ;;  %v5873_v27 = vadd.f32 %v5789_v37, %v5069_v20  ;;  %v20600_v63 = vld [vmem:[#allocation219_spill] sm:$0xff]  ;;  %v8159_v37 = vsel %vm8125_vm10, %v16197_v4, %v8120_v59 }
 0x4ed   :  { %v5790_v53 = vsel %vm5755_vm5, %v20596_v51, %v20600_v63  ;;  %v20601_v50 = vld [vmem:[#allocation83_spill] sm:$0xff]  ;;  %8275 = vst.msk [vmem:[#allocation2 + $0xd8] sm:$0xff] %vm8253_vm12, %v8231_v43  ;;  %v86_v15 = vld [vmem:[%s18958_s2 + $0x1c8] sm:$0xff]  ;;  %v88_v52 = vld [vmem:[%s18958_s2 + $0x1d8] sm:$0xff]  ;;  %v5070_v0 = vadd.f32 %v4986_v11, %v4308_v32  ;;  %8424 = vrot.lane.b32.xlu1 %v16595_v34, %s10555_s28 }
 0x4ee   :  { %v7433_v48 = vadd.f32 %v20601_v50, %v6671_v36  ;;  %v87_v45 = vld [vmem:[%s18958_s2 + $0x1d0] sm:$0xff]  ;;  %252 = vst [vmem:[%s18959_s8 + $0x1b0] sm:$0xff] %v83_v9  ;;  %253 = vst.msk [vmem:[%s18959_s8 + $0x1b8] sm:$0xff] %vm203_vm8, %v84_v28  ;;  %v20602_v17 = vld [vmem:[#allocation85_spill] sm:$0xff]  ;;  %v8122_v36 = vpop.permute.xlu0 %8121 }
 0x4ef   :  { %254 = vst [vmem:[%s18959_s8 + $0x1c0] sm:$0xff] %v85_v33  ;;  %v7355_v22 = vsel %vm7321_vm1, %v20547_v26, %v20602_v17  ;;  %v89_v46 = vld [vmem:[%s18958_s2 + $0x1e0] sm:$0xff]  ;;  %v90_v57 = vld [vmem:[%s18958_s2 + $0x1e8] sm:$0xff]  ;;  %v91_v58 = vld [vmem:[%s18958_s2 + $0x1f0] sm:$0xff]  ;;  %v6677_v26 = vadd.f32 %v6593_v24, %v5873_v27  ;;  %v5874_v21 = vadd.f32 %v5790_v53, %v5070_v0  ;;  %v8161_v3 = vsel %vm8125_vm10, %v8122_v36, %v8124_v55 }
 0x4f0   :  { %255 = vst [vmem:[%s18959_s8 + $0x1c8] sm:$0xff] %v86_v15  ;;  %256 = vst [vmem:[%s18959_s8 + $0x1d0] sm:$0xff] %v87_v45  ;;  %v20603_v6 = vld [vmem:[#allocation255_spill] sm:$0xff]  ;;  %v16789_v61 = vadd.f32 %v8154_v56, %v7433_v48  ;;  %v8310_v54 = vld [vmem:[#allocation2 + $0xa0] sm:$0xff] }
 0x4f1   :  { %257 = vst [vmem:[%s18959_s8 + $0x1d8] sm:$0xff] %v88_v52  ;;  %v6594_v44 = vsel %vm6559_vm9, %v20599_v31, %v20603_v6  ;;  %v7991_v49 = vld [vmem:[#allocation2 + $0x110] sm:$0xff]  ;;  %v92_v14 = vld [vmem:[%s18958_s2 + $0x1f8] sm:$0xff]  ;;  %v93_v42 = vld [vmem:[%s18958_s2 + $0x200] sm:$0xff]  ;;  %8414 = vrot.lane.b32.xlu0 %v8310_v54, %s10555_s28  ;;  %v7439_v12 = vadd.f32 %v7355_v22, %v6677_v26 }
 0x4f2   :  { %258 = vst [vmem:[%s18959_s8 + $0x1e0] sm:$0xff] %v89_v46  ;;  %259 = vst [vmem:[%s18959_s8 + $0x1e8] sm:$0xff] %v90_v57  ;;  %v94_v23 = vld [vmem:[%s18958_s2 + $0x208] sm:$0xff]  ;;  %v95_v5 = vld [vmem:[%s18958_s2 + $0x210] sm:$0xff]  ;;  %v6678_v34 = vadd.f32 %v6594_v44, %v5874_v21  ;;  %v8238_v51 = vadd.f32 %v8155_v8, %v7991_v49 }
 0x4f3   :  { %260 = vst.msk [vmem:[%s18959_s8 + $0x1f0] sm:$0xff] %vm203_vm8, %v91_v58  ;;  %v96_v60 = vld [vmem:[%s18958_s2 + $0x218] sm:$0xff]  ;;  %261 = vst [vmem:[%s18959_s8 + $0x1f8] sm:$0xff] %v92_v14  ;;  %v97_v47 = vld [vmem:[%s18958_s2 + $0x220] sm:$0xff]  ;;  %v16865_v4 = vadd.f32 %v8159_v37, %v7439_v12 }
 0x4f4   :  { %262 = vst [vmem:[%s18959_s8 + $0x200] sm:$0xff] %v93_v42  ;;  %v98_v1 = vld [vmem:[%s18958_s2 + $0x228] sm:$0xff]  ;;  %v99_v7 = vld [vmem:[%s18958_s2 + $0x230] sm:$0xff]  ;;  %263 = vst [vmem:[%s18959_s8 + $0x208] sm:$0xff] %v94_v23 }
 0x4f5   :  { %264 = vst [vmem:[%s18959_s8 + $0x210] sm:$0xff] %v95_v5  ;;  %265 = vst [vmem:[%s18959_s8 + $0x218] sm:$0xff] %v96_v60  ;;  %v100_v30 = vld [vmem:[%s18958_s2 + $0x238] sm:$0xff]  ;;  %v101_v25 = vld [vmem:[%s18958_s2 + $0x240] sm:$0xff] }
 0x4f6   :  { %v102_v13 = vld [vmem:[%s18958_s2 + $0x248] sm:$0xff]  ;;  %266 = vst [vmem:[%s18959_s8 + $0x220] sm:$0xff] %v97_v47  ;;  %267 = vst.msk [vmem:[%s18959_s8 + $0x228] sm:$0xff] %vm203_vm8, %v98_v1  ;;  %v103_v18 = vld [vmem:[%s18958_s2 + $0x250] sm:$0xff] }
 0x4f7   :  { %268 = vst [vmem:[%s18959_s8 + $0x230] sm:$0xff] %v99_v7  ;;  %v104_v35 = vld [vmem:[%s18958_s2 + $0x258] sm:$0xff]  ;;  %v105_v20 = vld [vmem:[%s18958_s2 + $0x260] sm:$0xff]  ;;  %269 = vst [vmem:[%s18959_s8 + $0x238] sm:$0xff] %v100_v30 }
 0x4f8   :  { %270 = vst [vmem:[%s18959_s8 + $0x240] sm:$0xff] %v101_v25  ;;  %271 = vst [vmem:[%s18959_s8 + $0x248] sm:$0xff] %v102_v13  ;;  %v20604_v10 = vld [vmem:[#allocation89_spill] sm:$0xff]  ;;  %v7998_v43 = vld [vmem:[#allocation2 + $0x148] sm:$0xff]  ;;  %8426 = vrot.lane.b32.xlu0 %v16667_v38, %s10555_s28  ;;  %v8160_v38 = vsel %vm8125_vm10, %v8120_v59, %v8122_v36 }
 0x4f9   :  { %v7440_v11 = vadd.f32 %v20604_v10, %v6678_v34  ;;  %8282 = vst.msk [vmem:[#allocation2 + $0x110] sm:$0xff] %vm8253_vm12, %v8238_v51  ;;  %v8317_v29 = vld [vmem:[#allocation2 + $0xd8] sm:$0xff]  ;;  %v106_v39 = vld [vmem:[%s18958_s2 + $0x268] sm:$0xff]  ;;  %v107_v62 = vld [vmem:[%s18958_s2 + $0x270] sm:$0xff]  ;;  %v8245_v27 = vadd.f32 %v8161_v3, %v7998_v43 }
 0x4fa   :  { %272 = vst [vmem:[%s18959_s8 + $0x250] sm:$0xff] %v103_v18  ;;  %273 = vst [vmem:[%s18959_s8 + $0x258] sm:$0xff] %v104_v35  ;;  %8428 = vrot.lane.b32.xlu1 %v8317_v29, %s10555_s28  ;;  %v108_v32 = vld [vmem:[%s18958_s2 + $0x278] sm:$0xff] }
 0x4fb   :  { %274 = vst.msk [vmem:[%s18959_s8 + $0x260] sm:$0xff] %vm203_vm8, %v105_v20  ;;  %v109_v31 = vld [vmem:[%s18958_s2 + $0x280] sm:$0xff]  ;;  %v110_v24 = vld [vmem:[%s18958_s2 + $0x288] sm:$0xff]  ;;  %275 = vst [vmem:[%s18959_s8 + $0x268] sm:$0xff] %v106_v39  ;;  %v16922_v41 = vadd.f32 %v8160_v38, %v7440_v11 }
 0x4fc   :  { %276 = vst [vmem:[%s18959_s8 + $0x270] sm:$0xff] %v107_v62  ;;  %v111_v9 = vld [vmem:[%s18958_s2 + $0x290] sm:$0xff]  ;;  %v112_v28 = vld [vmem:[%s18958_s2 + $0x298] sm:$0xff]  ;;  %v113_v33 = vld [vmem:[%s18958_s2 + $0x2a0] sm:$0xff] }
 0x4fd   :  { %277 = vst [vmem:[%s18959_s8 + $0x278] sm:$0xff] %v108_v32  ;;  %278 = vst [vmem:[%s18959_s8 + $0x280] sm:$0xff] %v109_v31  ;;  %v114_v63 = vld [vmem:[%s18958_s2 + $0x2a8] sm:$0xff]  ;;  %v115_v53 = vld [vmem:[%s18958_s2 + $0x2b0] sm:$0xff] }
 0x4fe   :  { %279 = vst [vmem:[%s18959_s8 + $0x288] sm:$0xff] %v110_v24  ;;  %v116_v50 = vld [vmem:[%s18958_s2 + $0x2b8] sm:$0xff]  ;;  %280 = vst [vmem:[%s18959_s8 + $0x290] sm:$0xff] %v111_v9  ;;  %8438 = vrot.lane.b32.xlu0 %v16765_v19, %s10555_s28 }
 0x4ff   :  { %281 = vst.msk [vmem:[%s18959_s8 + $0x298] sm:$0xff] %vm203_vm8, %v112_v28  ;;  %282 = vst [vmem:[%s18959_s8 + $0x2a0] sm:$0xff] %v113_v33  ;;  %v117_v48 = vld [vmem:[%s18958_s2 + $0x2c0] sm:$0xff]  ;;  %v118_v40 = vld [vmem:[%s18958_s2 + $0x2c8] sm:$0xff] }
 0x500   :  { %v119_v2 = vld [vmem:[%s18958_s2 + $0x2d0] sm:$0xff]  ;;  %283 = vst [vmem:[%s18959_s8 + $0x2a8] sm:$0xff] %v114_v63  ;;  %284 = vst [vmem:[%s18959_s8 + $0x2b0] sm:$0xff] %v115_v53  ;;  %8440 = vrot.lane.b32.xlu1 %v16789_v61, %s10555_s28 }
 0x501   :  { %285 = vst [vmem:[%s18959_s8 + $0x2b8] sm:$0xff] %v116_v50  ;;  %8289 = vst.msk [vmem:[#allocation2 + $0x148] sm:$0xff] %vm8253_vm12, %v8245_v27  ;;  %v120_v15 = vld [vmem:[%s18958_s2 + $0x2d8] sm:$0xff]  ;;  %v121_v45 = vld [vmem:[%s18958_s2 + $0x2e0] sm:$0xff] }
 0x502   :  { %v122_v52 = vld [vmem:[%s18958_s2 + $0x2e8] sm:$0xff]  ;;  %286 = vst [vmem:[%s18959_s8 + $0x2c0] sm:$0xff] %v117_v48  ;;  %287 = vst [vmem:[%s18959_s8 + $0x2c8] sm:$0xff] %v118_v40  ;;  %v123_v0 = vld [vmem:[%s18958_s2 + $0x2f0] sm:$0xff] }
 0x503   :  { %288 = vst.msk [vmem:[%s18959_s8 + $0x2d0] sm:$0xff] %vm203_vm8, %v119_v2  ;;  %v124_v17 = vld [vmem:[%s18958_s2 + $0x2f8] sm:$0xff]  ;;  %v125_v22 = vld [vmem:[%s18958_s2 + $0x300] sm:$0xff]  ;;  %289 = vst [vmem:[%s18959_s8 + $0x2d8] sm:$0xff] %v120_v15 }
 0x504   :  { %290 = vst [vmem:[%s18959_s8 + $0x2e0] sm:$0xff] %v121_v45  ;;  %291 = vst [vmem:[%s18959_s8 + $0x2e8] sm:$0xff] %v122_v52  ;;  %v8324_v19 = vld [vmem:[#allocation2 + $0x110] sm:$0xff]  ;;  %v126_v56 = vld [vmem:[%s18958_s2 + $0x308] sm:$0xff]  ;;  %8452 = vrot.lane.b32.xlu1 %v16865_v4, %s10555_s28 }
 0x505   :  { %v127_v46 = vld [vmem:[%s18958_s2 + $0x310] sm:$0xff]  ;;  %292 = vst [vmem:[%s18959_s8 + $0x2f0] sm:$0xff] %v123_v0  ;;  %293 = vst [vmem:[%s18959_s8 + $0x2f8] sm:$0xff] %v124_v17  ;;  %8442 = vrot.lane.b32.xlu0 %v8324_v19, %s10555_s28 }
 0x506   :  { %294 = vst [vmem:[%s18959_s8 + $0x300] sm:$0xff] %v125_v22  ;;  %v128_v57 = vld [vmem:[%s18958_s2 + $0x318] sm:$0xff]  ;;  %v129_v58 = vld [vmem:[%s18958_s2 + $0x320] sm:$0xff]  ;;  %v130_v26 = vld [vmem:[%s18958_s2 + $0x328] sm:$0xff] }
 0x507   :  { %295 = vst.msk [vmem:[%s18959_s8 + $0x308] sm:$0xff] %vm203_vm8, %v126_v56  ;;  %296 = vst [vmem:[%s18959_s8 + $0x310] sm:$0xff] %v127_v46  ;;  %v131_v6 = vld [vmem:[%s18958_s2 + $0x330] sm:$0xff]  ;;  %v132_v44 = vld [vmem:[%s18958_s2 + $0x338] sm:$0xff] }
 0x508   :  { %v133_v61 = vld [vmem:[%s18958_s2 + $0x340] sm:$0xff]  ;;  %297 = vst [vmem:[%s18959_s8 + $0x318] sm:$0xff] %v128_v57  ;;  %298 = vst [vmem:[%s18959_s8 + $0x320] sm:$0xff] %v129_v58  ;;  %v134_v49 = vld [vmem:[%s18958_s2 + $0x348] sm:$0xff] }
 0x509   :  { %299 = vst [vmem:[%s18959_s8 + $0x328] sm:$0xff] %v130_v26  ;;  %v135_v54 = vld [vmem:[%s18958_s2 + $0x350] sm:$0xff]  ;;  %v136_v14 = vld [vmem:[%s18958_s2 + $0x358] sm:$0xff]  ;;  %300 = vst [vmem:[%s18959_s8 + $0x330] sm:$0xff] %v131_v6 }
 0x50a   :  { %301 = vst [vmem:[%s18959_s8 + $0x338] sm:$0xff] %v132_v44  ;;  %302 = vst.msk [vmem:[%s18959_s8 + $0x340] sm:$0xff] %vm203_vm8, %v133_v61  ;;  %v137_v42 = vld [vmem:[%s18958_s2 + $0x360] sm:$0xff]  ;;  %v138_v21 = vld [vmem:[%s18958_s2 + $0x368] sm:$0xff] }
 0x50b   :  { %v139_v16 = vld [vmem:[%s18958_s2 + $0x370] sm:$0xff]  ;;  %303 = vst [vmem:[%s18959_s8 + $0x348] sm:$0xff] %v134_v49  ;;  %304 = vst [vmem:[%s18959_s8 + $0x350] sm:$0xff] %v135_v54  ;;  %v8331_v23 = vld [vmem:[#allocation2 + $0x148] sm:$0xff]  ;;  %8454 = vrot.lane.b32.xlu0 %v16922_v41, %s10555_s28 }
 0x50c   :  { %305 = vst [vmem:[%s18959_s8 + $0x358] sm:$0xff] %v136_v14  ;;  %v140_v5 = vld [vmem:[%s18958_s2 + $0x378] sm:$0xff]  ;;  %v141_v60 = vld [vmem:[%s18958_s2 + $0x380] sm:$0xff]  ;;  %306 = vst [vmem:[%s18959_s8 + $0x360] sm:$0xff] %v137_v42 }
 0x50d   :  { %307 = vst [vmem:[%s18959_s8 + $0x368] sm:$0xff] %v138_v21  ;;  %308 = vst [vmem:[%s18959_s8 + $0x370] sm:$0xff] %v139_v16  ;;  %8456 = vrot.lane.b32.xlu1 %v8331_v23, %s10555_s28  ;;  %v142_v12 = vld [vmem:[%s18958_s2 + $0x388] sm:$0xff] }
 0x50e   :  { %v143_v8 = vld [vmem:[%s18958_s2 + $0x390] sm:$0xff]  ;;  %v144_v59 = vld [vmem:[%s18958_s2 + $0x398] sm:$0xff]  ;;  %309 = vst.msk [vmem:[%s18959_s8 + $0x378] sm:$0xff] %vm203_vm8, %v140_v5  ;;  %310 = vst [vmem:[%s18959_s8 + $0x380] sm:$0xff] %v141_v60 }
 0x50f   :  { %v145_v47 = vld [vmem:[%s18958_s2 + $0x3a0] sm:$0xff]  ;;  %v146_v1 = vld [vmem:[%s18958_s2 + $0x3a8] sm:$0xff]  ;;  %v147_v7 = vld [vmem:[%s18958_s2 + $0x3b0] sm:$0xff]  ;;  %311 = vst [vmem:[%s18959_s8 + $0x388] sm:$0xff] %v142_v12 }
 0x510   :  { %312 = vst [vmem:[%s18959_s8 + $0x390] sm:$0xff] %v143_v8  ;;  %313 = vst [vmem:[%s18959_s8 + $0x398] sm:$0xff] %v144_v59  ;;  %v148_v34 = vld [vmem:[%s18958_s2 + $0x3b8] sm:$0xff]  ;;  %v149_v51 = vld [vmem:[%s18958_s2 + $0x3c0] sm:$0xff] }
 0x511   :  { %v150_v37 = vld [vmem:[%s18958_s2 + $0x3c8] sm:$0xff]  ;;  %314 = vst [vmem:[%s18959_s8 + $0x3a0] sm:$0xff] %v145_v47  ;;  %315 = vst [vmem:[%s18959_s8 + $0x3a8] sm:$0xff] %v146_v1  ;;  %v151_v30 = vld [vmem:[%s18958_s2 + $0x3d0] sm:$0xff] }
 0x512   :  { %316 = vst.msk [vmem:[%s18959_s8 + $0x3b0] sm:$0xff] %vm203_vm8, %v147_v7  ;;  %v152_v25 = vld [vmem:[%s18958_s2 + $0x3d8] sm:$0xff]  ;;  %v153_v13 = vld [vmem:[%s18958_s2 + $0x3e0] sm:$0xff]  ;;  %317 = vst [vmem:[%s18959_s8 + $0x3b8] sm:$0xff] %v148_v34 }
 0x513   :  { %318 = vst [vmem:[%s18959_s8 + $0x3c0] sm:$0xff] %v149_v51  ;;  %319 = vst [vmem:[%s18959_s8 + $0x3c8] sm:$0xff] %v150_v37  ;;  %v154_v4 = vld [vmem:[%s18958_s2 + $0x3e8] sm:$0xff]  ;;  %v155_v18 = vld [vmem:[%s18958_s2 + $0x3f0] sm:$0xff] }
 0x514   :  { %v156_v35 = vld [vmem:[%s18958_s2 + $0x3f8] sm:$0xff]  ;;  %320 = vst [vmem:[%s18959_s8 + $0x3d0] sm:$0xff] %v151_v30  ;;  %321 = vst [vmem:[%s18959_s8 + $0x3d8] sm:$0xff] %v152_v25  ;;  %v157_v20 = vld [vmem:[%s18958_s2 + $0x400] sm:$0xff] }
 0x515   :  { %322 = vst [vmem:[%s18959_s8 + $0x3e0] sm:$0xff] %v153_v13  ;;  %v158_v10 = vld [vmem:[%s18958_s2 + $0x408] sm:$0xff]  ;;  %v159_v11 = vld [vmem:[%s18958_s2 + $0x410] sm:$0xff]  ;;  %323 = vst.msk [vmem:[%s18959_s8 + $0x3e8] sm:$0xff] %vm203_vm8, %v154_v4 }
 0x516   :  { %324 = vst [vmem:[%s18959_s8 + $0x3f0] sm:$0xff] %v155_v18  ;;  %325 = vst [vmem:[%s18959_s8 + $0x3f8] sm:$0xff] %v156_v35  ;;  %v160_v36 = vld [vmem:[%s18958_s2 + $0x418] sm:$0xff]  ;;  %v161_v43 = vld [vmem:[%s18958_s2 + $0x420] sm:$0xff] }
 0x517   :  { %v162_v29 = vld [vmem:[%s18958_s2 + $0x428] sm:$0xff]  ;;  %326 = vst [vmem:[%s18959_s8 + $0x400] sm:$0xff] %v157_v20  ;;  %327 = vst [vmem:[%s18959_s8 + $0x408] sm:$0xff] %v158_v10  ;;  %v163_v39 = vld [vmem:[%s18958_s2 + $0x430] sm:$0xff] }
 0x518   :  { %328 = vst [vmem:[%s18959_s8 + $0x410] sm:$0xff] %v159_v11  ;;  %v164_v62 = vld [vmem:[%s18958_s2 + $0x438] sm:$0xff]  ;;  %v165_v38 = vld [vmem:[%s18958_s2 + $0x440] sm:$0xff]  ;;  %329 = vst [vmem:[%s18959_s8 + $0x418] sm:$0xff] %v160_v36 }
 0x519   :  { %330 = vst.msk [vmem:[%s18959_s8 + $0x420] sm:$0xff] %vm203_vm8, %v161_v43  ;;  %331 = vst [vmem:[%s18959_s8 + $0x428] sm:$0xff] %v162_v29  ;;  %v166_v55 = vld [vmem:[%s18958_s2 + $0x448] sm:$0xff]  ;;  %v167_v32 = vld [vmem:[%s18958_s2 + $0x450] sm:$0xff] }
 0x51a   :  { %v168_v31 = vld [vmem:[%s18958_s2 + $0x458] sm:$0xff]  ;;  %332 = vst [vmem:[%s18959_s8 + $0x430] sm:$0xff] %v163_v39  ;;  %333 = vst [vmem:[%s18959_s8 + $0x438] sm:$0xff] %v164_v62  ;;  %v169_v24 = vld [vmem:[%s18958_s2 + $0x460] sm:$0xff] }
 0x51b   :  { %334 = vst [vmem:[%s18959_s8 + $0x440] sm:$0xff] %v165_v38  ;;  %v170_v41 = vld [vmem:[%s18958_s2 + $0x468] sm:$0xff]  ;;  %v171_v3 = vld [vmem:[%s18958_s2 + $0x470] sm:$0xff]  ;;  %335 = vst [vmem:[%s18959_s8 + $0x448] sm:$0xff] %v166_v55 }
 0x51c   :  { %336 = vst [vmem:[%s18959_s8 + $0x450] sm:$0xff] %v167_v32  ;;  %337 = vst.msk [vmem:[%s18959_s8 + $0x458] sm:$0xff] %vm203_vm8, %v168_v31  ;;  %v172_v9 = vld [vmem:[%s18958_s2 + $0x478] sm:$0xff]  ;;  %v173_v28 = vld [vmem:[%s18958_s2 + $0x480] sm:$0xff]  ;;  %v8377_v31 = vpop.permute.xlu1 %8376 }
 0x51d   :  { %v174_v33 = vld [vmem:[%s18958_s2 + $0x488] sm:$0xff]  ;;  %338 = vst [vmem:[%s18959_s8 + $0x460] sm:$0xff] %v169_v24  ;;  %339 = vst [vmem:[%s18959_s8 + $0x468] sm:$0xff] %v170_v41  ;;  %v175_v27 = vld [vmem:[%s18958_s2 + $0x490] sm:$0xff] }
 0x51e   :  { %340 = vst [vmem:[%s18959_s8 + $0x470] sm:$0xff] %v171_v3  ;;  %v176_v63 = vld [vmem:[%s18958_s2 + $0x498] sm:$0xff]  ;;  %v177_v53 = vld [vmem:[%s18958_s2 + $0x4a0] sm:$0xff]  ;;  %341 = vst [vmem:[%s18959_s8 + $0x478] sm:$0xff] %v172_v9 }
 0x51f   :  { %342 = vst [vmem:[%s18959_s8 + $0x480] sm:$0xff] %v173_v28  ;;  %343 = vst [vmem:[%s18959_s8 + $0x488] sm:$0xff] %v174_v33  ;;  %v178_v50 = vld [vmem:[%s18958_s2 + $0x4a8] sm:$0xff]  ;;  %v179_v48 = vld [vmem:[%s18958_s2 + $0x4b0] sm:$0xff] }
 0x520   :  { %v180_v40 = vld [vmem:[%s18958_s2 + $0x4b8] sm:$0xff]  ;;  %344 = vst.msk [vmem:[%s18959_s8 + $0x490] sm:$0xff] %vm203_vm8, %v175_v27  ;;  %345 = vst [vmem:[%s18959_s8 + $0x498] sm:$0xff] %v176_v63  ;;  %v181_v2 = vld [vmem:[%s18958_s2 + $0x4c0] sm:$0xff]  ;;  %v8375_v27 = vpop.permute.xlu0 %8374 }
 0x521   :  { %346 = vst [vmem:[%s18959_s8 + $0x4a0] sm:$0xff] %v177_v53  ;;  %v182_v15 = vld [vmem:[%s18958_s2 + $0x4c8] sm:$0xff]  ;;  %v183_v45 = vld [vmem:[%s18958_s2 + $0x4d0] sm:$0xff]  ;;  %347 = vst [vmem:[%s18959_s8 + $0x4a8] sm:$0xff] %v178_v50 }
 0x522   :  { %348 = vst [vmem:[%s18959_s8 + $0x4b0] sm:$0xff] %v179_v48  ;;  %349 = vst [vmem:[%s18959_s8 + $0x4b8] sm:$0xff] %v180_v40  ;;  %v184_v52 = vld [vmem:[%s18958_s2 + $0x4d8] sm:$0xff]  ;;  %v185_v0 = vld [vmem:[%s18958_s2 + $0x4e0] sm:$0xff]  ;;  %v8459_v48 = vsel %vm8458_vm7, %v8375_v27, %v8377_v31 }
 0x523   :  { %v186_v17 = vld [vmem:[%s18958_s2 + $0x4e8] sm:$0xff]  ;;  %350 = vst [vmem:[%s18959_s8 + $0x4c0] sm:$0xff] %v181_v2  ;;  %351 = vst.msk [vmem:[%s18959_s8 + $0x4c8] sm:$0xff] %vm203_vm8, %v182_v15  ;;  %v187_v22 = vld [vmem:[%s18958_s2 + $0x4f0] sm:$0xff] }
 0x524   :  { %352 = vst [vmem:[%s18959_s8 + $0x4d0] sm:$0xff] %v183_v45  ;;  %v188_v19 = vld [vmem:[%s18958_s2 + $0x4f8] sm:$0xff]  ;;  %v189_v56 = vld [vmem:[%s18958_s2 + $0x500] sm:$0xff]  ;;  %353 = vst [vmem:[%s18959_s8 + $0x4d8] sm:$0xff] %v184_v52 }
 0x525   :  { %354 = vst [vmem:[%s18959_s8 + $0x4e0] sm:$0xff] %v185_v0  ;;  %355 = vst [vmem:[%s18959_s8 + $0x4e8] sm:$0xff] %v186_v17  ;;  %v190_v46 = vld [vmem:[%s18958_s2 + $0x508] sm:$0xff]  ;;  %v191_v57 = vld [vmem:[%s18958_s2 + $0x510] sm:$0xff] }
 0x526   :  { %v192_v58 = vld [vmem:[%s18958_s2 + $0x518] sm:$0xff]  ;;  %356 = vst [vmem:[%s18959_s8 + $0x4f0] sm:$0xff] %v187_v22  ;;  %357 = vst [vmem:[%s18959_s8 + $0x4f8] sm:$0xff] %v188_v19  ;;  %v193_v26 = vld [vmem:[%s18958_s2 + $0x520] sm:$0xff] }
 0x527   :  { %358 = vst.msk [vmem:[%s18959_s8 + $0x500] sm:$0xff] %vm203_vm8, %v189_v56  ;;  %v194_v6 = vld [vmem:[%s18958_s2 + $0x528] sm:$0xff]  ;;  %v195_v44 = vld [vmem:[%s18958_s2 + $0x530] sm:$0xff]  ;;  %359 = vst [vmem:[%s18959_s8 + $0x508] sm:$0xff] %v190_v46  ;;  %v8379_v56 = vpop.permute.xlu0 %8378  ;;  %v17794_v46 = vpop.permute.xlu1 %8380 }
 0x528   :  { %360 = vst [vmem:[%s18959_s8 + $0x510] sm:$0xff] %v191_v57  ;;  %361 = vst [vmem:[%s18959_s8 + $0x518] sm:$0xff] %v192_v58  ;;  %v196_v61 = vld [vmem:[%s18958_s2 + $0x538] sm:$0xff]  ;;  %v366_v49 = vld [vmem:[%s18960_s3] sm:$0xff] }
 0x529   :  { %362 = vst [vmem:[%s18959_s8 + $0x520] sm:$0xff] %v193_v26  ;;  %363 = vst [vmem:[%s18959_s8 + $0x528] sm:$0xff] %v194_v6  ;;  %v367_v54 = vld [vmem:[%s18960_s3 + $0x8] sm:$0xff]  ;;  %v368_v14 = vld [vmem:[%s18960_s3 + $0x10] sm:$0xff]  ;;  %v8460_v6 = vsel %vm8458_vm7, %v8377_v31, %v8379_v56 }
 0x52a   :  { %364 = vst [vmem:[%s18959_s8 + $0x530] sm:$0xff] %v195_v44  ;;  %365 = vst.msk [vmem:[%s18959_s8 + $0x538] sm:$0xff] %vm203_vm8, %v196_v61  ;;  %v369_v42 = vld [vmem:[%s18960_s3 + $0x18] sm:$0xff]  ;;  %v370_v21 = vld [vmem:[%s18960_s3 + $0x20] sm:$0xff]  ;;  %v8461_v44 = vsel %vm8458_vm7, %v8379_v56, %v17794_v46 }
 0x52b   :  { %408 = vst [vmem:[%s18959_s8 + $0x540] sm:$0xff] %v366_v49  ;;  %409 = vst [vmem:[%s18959_s8 + $0x548] sm:$0xff] %v367_v54  ;;  %v371_v16 = vld [vmem:[%s18960_s3 + $0x28] sm:$0xff]  ;;  %v372_v23 = vld [vmem:[%s18960_s3 + $0x30] sm:$0xff] }
 0x52c   :  { %v373_v5 = vld [vmem:[%s18960_s3 + $0x38] sm:$0xff]  ;;  %410 = vst [vmem:[%s18959_s8 + $0x550] sm:$0xff] %v368_v14  ;;  %411 = vst [vmem:[%s18959_s8 + $0x558] sm:$0xff] %v369_v42  ;;  %v374_v60 = vld [vmem:[%s18960_s3 + $0x40] sm:$0xff] }
 0x52d   :  { %412 = vst [vmem:[%s18959_s8 + $0x560] sm:$0xff] %v370_v21  ;;  %v375_v12 = vld [vmem:[%s18960_s3 + $0x48] sm:$0xff]  ;;  %v376_v8 = vld [vmem:[%s18960_s3 + $0x50] sm:$0xff]  ;;  %413 = vst [vmem:[%s18959_s8 + $0x568] sm:$0xff] %v371_v16 }
 0x52e   :  { %414 = vst.msk [vmem:[%s18959_s8 + $0x570] sm:$0xff] %vm203_vm8, %v372_v23  ;;  %415 = vst [vmem:[%s18959_s8 + $0x578] sm:$0xff] %v373_v5  ;;  %v377_v59 = vld [vmem:[%s18960_s3 + $0x58] sm:$0xff]  ;;  %v378_v47 = vld [vmem:[%s18960_s3 + $0x60] sm:$0xff] }
 0x52f   :  { %v379_v1 = vld [vmem:[%s18960_s3 + $0x68] sm:$0xff]  ;;  %416 = vst [vmem:[%s18959_s8 + $0x580] sm:$0xff] %v374_v60  ;;  %417 = vst [vmem:[%s18959_s8 + $0x588] sm:$0xff] %v375_v12  ;;  %v380_v7 = vld [vmem:[%s18960_s3 + $0x70] sm:$0xff]  ;;  %v8391_v60 = vpop.permute.xlu0 %8390 }
 0x530   :  { %418 = vst [vmem:[%s18959_s8 + $0x590] sm:$0xff] %v376_v8  ;;  %v381_v34 = vld [vmem:[%s18960_s3 + $0x78] sm:$0xff]  ;;  %v382_v51 = vld [vmem:[%s18960_s3 + $0x80] sm:$0xff]  ;;  %419 = vst [vmem:[%s18959_s8 + $0x598] sm:$0xff] %v377_v59 }
 0x531   :  { %420 = vst [vmem:[%s18959_s8 + $0x5a0] sm:$0xff] %v378_v47  ;;  %421 = vst.msk [vmem:[%s18959_s8 + $0x5a8] sm:$0xff] %vm203_vm8, %v379_v1  ;;  %v383_v37 = vld [vmem:[%s18960_s3 + $0x88] sm:$0xff]  ;;  %v384_v30 = vld [vmem:[%s18960_s3 + $0x90] sm:$0xff]  ;;  %v8389_v47 = vpop.permute.xlu1 %8388 }
 0x532   :  { %v385_v25 = vld [vmem:[%s18960_s3 + $0x98] sm:$0xff]  ;;  %422 = vst [vmem:[%s18959_s8 + $0x5b0] sm:$0xff] %v380_v7  ;;  %423 = vst [vmem:[%s18959_s8 + $0x5b8] sm:$0xff] %v381_v34  ;;  %v386_v13 = vld [vmem:[%s18960_s3 + $0xa0] sm:$0xff] }
 0x533   :  { %424 = vst [vmem:[%s18959_s8 + $0x5c0] sm:$0xff] %v382_v51  ;;  %v387_v4 = vld [vmem:[%s18960_s3 + $0xa8] sm:$0xff]  ;;  %v388_v18 = vld [vmem:[%s18960_s3 + $0xb0] sm:$0xff]  ;;  %425 = vst [vmem:[%s18959_s8 + $0x5c8] sm:$0xff] %v383_v37  ;;  %v8465_v51 = vsel %vm8458_vm7, %v8389_v47, %v8391_v60 }
 0x534   :  { %426 = vst [vmem:[%s18959_s8 + $0x5d0] sm:$0xff] %v384_v30  ;;  %427 = vst [vmem:[%s18959_s8 + $0x5d8] sm:$0xff] %v385_v25  ;;  %v389_v35 = vld [vmem:[%s18960_s3 + $0xb8] sm:$0xff]  ;;  %v390_v20 = vld [vmem:[%s18960_s3 + $0xc0] sm:$0xff] }
 0x535   :  { %v391_v10 = vld [vmem:[%s18960_s3 + $0xc8] sm:$0xff]  ;;  %428 = vst.msk [vmem:[%s18959_s8 + $0x5e0] sm:$0xff] %vm203_vm8, %v386_v13  ;;  %429 = vst [vmem:[%s18959_s8 + $0x5e8] sm:$0xff] %v387_v4  ;;  %v392_v11 = vld [vmem:[%s18960_s3 + $0xd0] sm:$0xff] }
 0x536   :  { %430 = vst [vmem:[%s18959_s8 + $0x5f0] sm:$0xff] %v388_v18  ;;  %v393_v36 = vld [vmem:[%s18960_s3 + $0xd8] sm:$0xff]  ;;  %v394_v43 = vld [vmem:[%s18960_s3 + $0xe0] sm:$0xff]  ;;  %431 = vst [vmem:[%s18959_s8 + $0x5f8] sm:$0xff] %v389_v35  ;;  %v17956_v35 = vpop.permute.xlu0 %8394 }
 0x537   :  { %432 = vst [vmem:[%s18959_s8 + $0x600] sm:$0xff] %v390_v20  ;;  %433 = vst [vmem:[%s18959_s8 + $0x608] sm:$0xff] %v391_v10  ;;  %v395_v29 = vld [vmem:[%s18960_s3 + $0xe8] sm:$0xff]  ;;  %v396_v39 = vld [vmem:[%s18960_s3 + $0xf0] sm:$0xff] }
 0x538   :  { %v397_v62 = vld [vmem:[%s18960_s3 + $0xf8] sm:$0xff]  ;;  %434 = vst [vmem:[%s18959_s8 + $0x610] sm:$0xff] %v392_v11  ;;  %435 = vst.msk [vmem:[%s18959_s8 + $0x618] sm:$0xff] %vm203_vm8, %v393_v36  ;;  %v398_v38 = vld [vmem:[%s18960_s3 + $0x100] sm:$0xff]  ;;  %v8393_v36 = vpop.permute.xlu1 %8392 }
 0x539   :  { %436 = vst [vmem:[%s18959_s8 + $0x620] sm:$0xff] %v394_v43  ;;  %v399_v55 = vld [vmem:[%s18960_s3 + $0x108] sm:$0xff]  ;;  %v400_v32 = vld [vmem:[%s18960_s3 + $0x110] sm:$0xff]  ;;  %437 = vst [vmem:[%s18959_s8 + $0x628] sm:$0xff] %v395_v29 }
 0x53a   :  { %438 = vst [vmem:[%s18959_s8 + $0x630] sm:$0xff] %v396_v39  ;;  %439 = vst [vmem:[%s18959_s8 + $0x638] sm:$0xff] %v397_v62  ;;  %v401_v24 = vld [vmem:[%s18960_s3 + $0x118] sm:$0xff]  ;;  %v402_v41 = vld [vmem:[%s18960_s3 + $0x120] sm:$0xff]  ;;  %v8466_v62 = vsel %vm8458_vm7, %v8391_v60, %v8393_v36 }
 0x53b   :  { %v403_v3 = vld [vmem:[%s18960_s3 + $0x128] sm:$0xff]  ;;  %440 = vst [vmem:[%s18959_s8 + $0x640] sm:$0xff] %v398_v38  ;;  %441 = vst [vmem:[%s18959_s8 + $0x648] sm:$0xff] %v399_v55  ;;  %v404_v9 = vld [vmem:[%s18960_s3 + $0x130] sm:$0xff]  ;;  %v8467_v38 = vsel %vm8458_vm7, %v8393_v36, %v17956_v35 }
 0x53c   :  { %442 = vst.msk [vmem:[%s18959_s8 + $0x650] sm:$0xff] %vm203_vm8, %v400_v32  ;;  %v405_v28 = vld [vmem:[%s18960_s3 + $0x138] sm:$0xff]  ;;  %v406_v33 = vld [vmem:[%s18960_s3 + $0x140] sm:$0xff]  ;;  %443 = vst [vmem:[%s18959_s8 + $0x658] sm:$0xff] %v401_v24 }
 0x53d   :  { %444 = vst [vmem:[%s18959_s8 + $0x660] sm:$0xff] %v402_v41  ;;  %445 = vst [vmem:[%s18959_s8 + $0x668] sm:$0xff] %v403_v3  ;;  %v407_v63 = vld [vmem:[%s18960_s3 + $0x148] sm:$0xff]  ;;  %v450_v53 = vld [vmem:[%s18961_s4] sm:$0xff] }
 0x53e   :  { %446 = vst [vmem:[%s18959_s8 + $0x670] sm:$0xff] %v404_v9  ;;  %447 = vst [vmem:[%s18959_s8 + $0x678] sm:$0xff] %v405_v28  ;;  %v451_v50 = vld [vmem:[%s18961_s4 + $0x8] sm:$0xff]  ;;  %v452_v40 = vld [vmem:[%s18961_s4 + $0x10] sm:$0xff]  ;;  %v8403_v9 = vpop.permute.xlu0 %8402 }
 0x53f   :  { %448 = vst [vmem:[%s18959_s8 + $0x680] sm:$0xff] %v406_v33  ;;  %449 = vst.msk [vmem:[%s18959_s8 + $0x688] sm:$0xff] %vm203_vm8, %v407_v63  ;;  %v453_v2 = vld [vmem:[%s18961_s4 + $0x18] sm:$0xff]  ;;  %v454_v15 = vld [vmem:[%s18961_s4 + $0x20] sm:$0xff]  ;;  %v8405_v63 = vpop.permute.xlu1 %8404 }
 0x540   :  { %492 = vst [vmem:[%s18959_s8 + $0x690] sm:$0xff] %v450_v53  ;;  %493 = vst [vmem:[%s18959_s8 + $0x698] sm:$0xff] %v451_v50  ;;  %v455_v45 = vld [vmem:[%s18961_s4 + $0x28] sm:$0xff]  ;;  %v456_v52 = vld [vmem:[%s18961_s4 + $0x30] sm:$0xff] }
 0x541   :  { %8537 = vst [vmem:[%s18959_s8 + $0xa80] sm:$0xff] %v8459_v48  ;;  %v457_v0 = vld [vmem:[%s18961_s4 + $0x38] sm:$0xff]  ;;  %494 = vst [vmem:[%s18959_s8 + $0x6a0] sm:$0xff] %v452_v40  ;;  %v458_v17 = vld [vmem:[%s18961_s4 + $0x40] sm:$0xff]  ;;  %v8471_v40 = vsel %vm8458_vm7, %v8403_v9, %v8405_v63 }
 0x542   :  { %495 = vst [vmem:[%s18959_s8 + $0x6a8] sm:$0xff] %v453_v2  ;;  %496 = vst [vmem:[%s18959_s8 + $0x6b0] sm:$0xff] %v454_v15  ;;  %v459_v22 = vld [vmem:[%s18961_s4 + $0x48] sm:$0xff]  ;;  %v460_v19 = vld [vmem:[%s18961_s4 + $0x50] sm:$0xff] }
 0x543   :  { %497 = vst [vmem:[%s18959_s8 + $0x6b8] sm:$0xff] %v455_v45  ;;  %498 = vst.msk [vmem:[%s18959_s8 + $0x6c0] sm:$0xff] %vm203_vm8, %v456_v52  ;;  %v461_v57 = vld [vmem:[%s18961_s4 + $0x58] sm:$0xff]  ;;  %v462_v58 = vld [vmem:[%s18961_s4 + $0x60] sm:$0xff] }
 0x544   :  { %499 = vst [vmem:[%s18959_s8 + $0x6c8] sm:$0xff] %v457_v0  ;;  %v463_v26 = vld [vmem:[%s18961_s4 + $0x68] sm:$0xff]  ;;  %500 = vst [vmem:[%s18959_s8 + $0x6d0] sm:$0xff] %v458_v17  ;;  %v464_v61 = vld [vmem:[%s18961_s4 + $0x70] sm:$0xff] }
 0x545   :  { %501 = vst [vmem:[%s18959_s8 + $0x6d8] sm:$0xff] %v459_v22  ;;  %502 = vst [vmem:[%s18959_s8 + $0x6e0] sm:$0xff] %v460_v19  ;;  %v465_v49 = vld [vmem:[%s18961_s4 + $0x78] sm:$0xff]  ;;  %v466_v54 = vld [vmem:[%s18961_s4 + $0x80] sm:$0xff]  ;;  %v8407_v22 = vpop.permute.xlu0 %8406 }
 0x546   :  { %503 = vst [vmem:[%s18959_s8 + $0x6e8] sm:$0xff] %v461_v57  ;;  %504 = vst [vmem:[%s18959_s8 + $0x6f0] sm:$0xff] %v462_v58  ;;  %v467_v14 = vld [vmem:[%s18961_s4 + $0x88] sm:$0xff]  ;;  %v468_v42 = vld [vmem:[%s18961_s4 + $0x90] sm:$0xff]  ;;  %v18137_v58 = vpop.permute.xlu1 %8408 }
 0x547   :  { %505 = vst.msk [vmem:[%s18959_s8 + $0x6f8] sm:$0xff] %vm203_vm8, %v463_v26  ;;  %8538 = vst [vmem:[%s18959_s8 + $0xa88] sm:$0xff] %v8460_v6  ;;  %v469_v21 = vld [vmem:[%s18961_s4 + $0x98] sm:$0xff]  ;;  %v470_v16 = vld [vmem:[%s18961_s4 + $0xa0] sm:$0xff]  ;;  %v8472_v26 = vsel %vm8458_vm7, %v8405_v63, %v8407_v22 }
 0x548   :  { %8539 = vst [vmem:[%s18959_s8 + $0xa90] sm:$0xff] %v8461_v44  ;;  %506 = vst [vmem:[%s18959_s8 + $0x700] sm:$0xff] %v464_v61  ;;  %v471_v23 = vld [vmem:[%s18961_s4 + $0xa8] sm:$0xff]  ;;  %v472_v5 = vld [vmem:[%s18961_s4 + $0xb0] sm:$0xff] }
 0x549   :  { %507 = vst [vmem:[%s18959_s8 + $0x708] sm:$0xff] %v465_v49  ;;  %508 = vst [vmem:[%s18959_s8 + $0x710] sm:$0xff] %v466_v54  ;;  %v473_v12 = vld [vmem:[%s18961_s4 + $0xb8] sm:$0xff]  ;;  %v474_v8 = vld [vmem:[%s18961_s4 + $0xc0] sm:$0xff]  ;;  %v8473_v49 = vsel %vm8458_vm7, %v8407_v22, %v18137_v58 }
 0x54a   :  { %509 = vst [vmem:[%s18959_s8 + $0x718] sm:$0xff] %v467_v14  ;;  %510 = vst [vmem:[%s18959_s8 + $0x720] sm:$0xff] %v468_v42  ;;  %v475_v59 = vld [vmem:[%s18961_s4 + $0xc8] sm:$0xff]  ;;  %v476_v1 = vld [vmem:[%s18961_s4 + $0xd0] sm:$0xff] }
 0x54b   :  { %511 = vst [vmem:[%s18959_s8 + $0x728] sm:$0xff] %v469_v21  ;;  %512 = vst.msk [vmem:[%s18959_s8 + $0x730] sm:$0xff] %vm203_vm8, %v470_v16  ;;  %v477_v7 = vld [vmem:[%s18961_s4 + $0xd8] sm:$0xff]  ;;  %v478_v34 = vld [vmem:[%s18961_s4 + $0xe0] sm:$0xff] }
 0x54c   :  { %513 = vst [vmem:[%s18959_s8 + $0x738] sm:$0xff] %v471_v23  ;;  %514 = vst [vmem:[%s18959_s8 + $0x740] sm:$0xff] %v472_v5  ;;  %v479_v37 = vld [vmem:[%s18961_s4 + $0xe8] sm:$0xff]  ;;  %v480_v30 = vld [vmem:[%s18961_s4 + $0xf0] sm:$0xff]  ;;  %v8419_v5 = vpop.permute.xlu0 %8418 }
 0x54d   :  { %515 = vst [vmem:[%s18959_s8 + $0x748] sm:$0xff] %v473_v12  ;;  %516 = vst [vmem:[%s18959_s8 + $0x750] sm:$0xff] %v474_v8  ;;  %v481_v25 = vld [vmem:[%s18961_s4 + $0xf8] sm:$0xff]  ;;  %v482_v13 = vld [vmem:[%s18961_s4 + $0x100] sm:$0xff] }
 0x54e   :  { %517 = vst [vmem:[%s18959_s8 + $0x758] sm:$0xff] %v475_v59  ;;  %518 = vst [vmem:[%s18959_s8 + $0x760] sm:$0xff] %v476_v1  ;;  %v483_v4 = vld [vmem:[%s18961_s4 + $0x108] sm:$0xff]  ;;  %v484_v18 = vld [vmem:[%s18961_s4 + $0x110] sm:$0xff]  ;;  %v8417_v59 = vpop.permute.xlu1 %8416 }
 0x54f   :  { %519 = vst.msk [vmem:[%s18959_s8 + $0x768] sm:$0xff] %vm203_vm8, %v477_v7  ;;  %520 = vst [vmem:[%s18959_s8 + $0x770] sm:$0xff] %v478_v34  ;;  %v485_v20 = vld [vmem:[%s18961_s4 + $0x118] sm:$0xff]  ;;  %v486_v10 = vld [vmem:[%s18961_s4 + $0x120] sm:$0xff]  ;;  %v8477_v34 = vsel %vm8458_vm7, %v8417_v59, %v8419_v5 }
 0x550   :  { %8544 = vst [vmem:[%s18959_s8 + $0xab8] sm:$0xff] %v8465_v51  ;;  %521 = vst [vmem:[%s18959_s8 + $0x778] sm:$0xff] %v479_v37  ;;  %v487_v11 = vld [vmem:[%s18961_s4 + $0x128] sm:$0xff]  ;;  %v488_v43 = vld [vmem:[%s18961_s4 + $0x130] sm:$0xff] }
 0x551   :  { %522 = vst [vmem:[%s18959_s8 + $0x780] sm:$0xff] %v480_v30  ;;  %523 = vst [vmem:[%s18959_s8 + $0x788] sm:$0xff] %v481_v25  ;;  %v489_v29 = vld [vmem:[%s18961_s4 + $0x138] sm:$0xff]  ;;  %v490_v39 = vld [vmem:[%s18961_s4 + $0x140] sm:$0xff] }
 0x552   :  { %524 = vst [vmem:[%s18959_s8 + $0x790] sm:$0xff] %v482_v13  ;;  %525 = vst [vmem:[%s18959_s8 + $0x798] sm:$0xff] %v483_v4  ;;  %v491_v55 = vld [vmem:[%s18961_s4 + $0x148] sm:$0xff]  ;;  %v534_v32 = vld [vmem:[%s18962_s5] sm:$0xff]  ;;  %v8421_v36 = vpop.permute.xlu1 %8420 }
 0x553   :  { %526 = vst.msk [vmem:[%s18959_s8 + $0x7a0] sm:$0xff] %vm203_vm8, %v484_v18  ;;  %527 = vst [vmem:[%s18959_s8 + $0x7a8] sm:$0xff] %v485_v20  ;;  %v535_v31 = vld [vmem:[%s18962_s5 + $0x8] sm:$0xff]  ;;  %v536_v24 = vld [vmem:[%s18962_s5 + $0x10] sm:$0xff]  ;;  %v18281_v18 = vpop.permute.xlu0 %8422 }
 0x554   :  { %528 = vst [vmem:[%s18959_s8 + $0x7b0] sm:$0xff] %v486_v10  ;;  %529 = vst [vmem:[%s18959_s8 + $0x7b8] sm:$0xff] %v487_v11  ;;  %v537_v41 = vld [vmem:[%s18962_s5 + $0x18] sm:$0xff]  ;;  %v538_v3 = vld [vmem:[%s18962_s5 + $0x20] sm:$0xff] }
 0x555   :  { %530 = vst [vmem:[%s18959_s8 + $0x7c0] sm:$0xff] %v488_v43  ;;  %531 = vst [vmem:[%s18959_s8 + $0x7c8] sm:$0xff] %v489_v29  ;;  %v539_v28 = vld [vmem:[%s18962_s5 + $0x28] sm:$0xff]  ;;  %v540_v33 = vld [vmem:[%s18962_s5 + $0x30] sm:$0xff] }
 0x556   :  { %532 = vst [vmem:[%s18959_s8 + $0x7d0] sm:$0xff] %v490_v39  ;;  %8545 = vst [vmem:[%s18959_s8 + $0xac0] sm:$0xff] %v8466_v62  ;;  %v541_v27 = vld [vmem:[%s18962_s5 + $0x38] sm:$0xff]  ;;  %v542_v53 = vld [vmem:[%s18962_s5 + $0x40] sm:$0xff]  ;;  %v8478_v62 = vsel %vm8458_vm7, %v8419_v5, %v8421_v36  ;;  %v8433_v63 = vpop.permute.xlu1 %8432 }
 0x557   :  { %8546 = vst [vmem:[%s18959_s8 + $0xac8] sm:$0xff] %v8467_v38  ;;  %533 = vst.msk [vmem:[%s18959_s8 + $0x7d8] sm:$0xff] %vm203_vm8, %v491_v55  ;;  %v543_v50 = vld [vmem:[%s18962_s5 + $0x48] sm:$0xff]  ;;  %v544_v48 = vld [vmem:[%s18962_s5 + $0x50] sm:$0xff]  ;;  %v8479_v38 = vsel %vm8458_vm7, %v8421_v36, %v18281_v18  ;;  %v8431_v9 = vpop.permute.xlu0 %8430 }
 0x558   :  { %576 = vst [vmem:[%s18959_s8 + $0x7e0] sm:$0xff] %v534_v32  ;;  %577 = vst [vmem:[%s18959_s8 + $0x7e8] sm:$0xff] %v535_v31  ;;  %v545_v2 = vld [vmem:[%s18962_s5 + $0x58] sm:$0xff]  ;;  %v546_v15 = vld [vmem:[%s18962_s5 + $0x60] sm:$0xff] }
 0x559   :  { %578 = vst [vmem:[%s18959_s8 + $0x7f0] sm:$0xff] %v536_v24  ;;  %579 = vst [vmem:[%s18959_s8 + $0x7f8] sm:$0xff] %v537_v41  ;;  %v547_v45 = vld [vmem:[%s18962_s5 + $0x68] sm:$0xff]  ;;  %v548_v52 = vld [vmem:[%s18962_s5 + $0x70] sm:$0xff] }
 0x55a   :  { %580 = vst [vmem:[%s18959_s8 + $0x800] sm:$0xff] %v538_v3  ;;  %581 = vst [vmem:[%s18959_s8 + $0x808] sm:$0xff] %v539_v28  ;;  %v549_v0 = vld [vmem:[%s18962_s5 + $0x78] sm:$0xff]  ;;  %v550_v17 = vld [vmem:[%s18962_s5 + $0x80] sm:$0xff] }
 0x55b   :  { %582 = vst.msk [vmem:[%s18959_s8 + $0x810] sm:$0xff] %vm203_vm8, %v540_v33  ;;  %583 = vst [vmem:[%s18959_s8 + $0x818] sm:$0xff] %v541_v27  ;;  %v551_v19 = vld [vmem:[%s18962_s5 + $0x88] sm:$0xff]  ;;  %v552_v56 = vld [vmem:[%s18962_s5 + $0x90] sm:$0xff]  ;;  %v8435_v22 = vpop.permute.xlu0 %8434 }
 0x55c   :  { %584 = vst [vmem:[%s18959_s8 + $0x820] sm:$0xff] %v542_v53  ;;  %585 = vst [vmem:[%s18959_s8 + $0x828] sm:$0xff] %v543_v50  ;;  %v553_v57 = vld [vmem:[%s18962_s5 + $0x98] sm:$0xff]  ;;  %v554_v6 = vld [vmem:[%s18962_s5 + $0xa0] sm:$0xff] }
 0x55d   :  { %586 = vst [vmem:[%s18959_s8 + $0x830] sm:$0xff] %v544_v48  ;;  %8551 = vst [vmem:[%s18959_s8 + $0xaf0] sm:$0xff] %v8471_v40  ;;  %v555_v44 = vld [vmem:[%s18962_s5 + $0xa8] sm:$0xff]  ;;  %v556_v61 = vld [vmem:[%s18962_s5 + $0xb0] sm:$0xff]  ;;  %v8483_v40 = vsel %vm8458_vm7, %v8431_v9, %v8433_v63 }
 0x55e   :  { %587 = vst [vmem:[%s18959_s8 + $0x838] sm:$0xff] %v545_v2  ;;  %588 = vst [vmem:[%s18959_s8 + $0x840] sm:$0xff] %v546_v15  ;;  %v557_v54 = vld [vmem:[%s18962_s5 + $0xb8] sm:$0xff]  ;;  %v558_v14 = vld [vmem:[%s18962_s5 + $0xc0] sm:$0xff] }
 0x55f   :  { %589 = vst.msk [vmem:[%s18959_s8 + $0x848] sm:$0xff] %vm203_vm8, %v547_v45  ;;  %590 = vst [vmem:[%s18959_s8 + $0x850] sm:$0xff] %v548_v52  ;;  %v559_v42 = vld [vmem:[%s18962_s5 + $0xc8] sm:$0xff]  ;;  %v560_v21 = vld [vmem:[%s18962_s5 + $0xd0] sm:$0xff] }
 0x560   :  { %591 = vst [vmem:[%s18959_s8 + $0x858] sm:$0xff] %v549_v0  ;;  %592 = vst [vmem:[%s18959_s8 + $0x860] sm:$0xff] %v550_v17  ;;  %v561_v16 = vld [vmem:[%s18962_s5 + $0xd8] sm:$0xff]  ;;  %v562_v23 = vld [vmem:[%s18962_s5 + $0xe0] sm:$0xff] }
 0x561   :  { %593 = vst [vmem:[%s18959_s8 + $0x868] sm:$0xff] %v551_v19  ;;  %594 = vst [vmem:[%s18959_s8 + $0x870] sm:$0xff] %v552_v56  ;;  %v563_v60 = vld [vmem:[%s18962_s5 + $0xe8] sm:$0xff]  ;;  %v564_v12 = vld [vmem:[%s18962_s5 + $0xf0] sm:$0xff] }
 0x562   :  { %595 = vst [vmem:[%s18959_s8 + $0x878] sm:$0xff] %v553_v57  ;;  %8552 = vst [vmem:[%s18959_s8 + $0xaf8] sm:$0xff] %v8472_v26  ;;  %v565_v8 = vld [vmem:[%s18962_s5 + $0xf8] sm:$0xff]  ;;  %v566_v47 = vld [vmem:[%s18962_s5 + $0x100] sm:$0xff]  ;;  %v18462_v26 = vpop.permute.xlu1 %8436 }
 0x563   :  { %596 = vst.msk [vmem:[%s18959_s8 + $0x880] sm:$0xff] %vm203_vm8, %v554_v6  ;;  %597 = vst [vmem:[%s18959_s8 + $0x888] sm:$0xff] %v555_v44  ;;  %v567_v1 = vld [vmem:[%s18962_s5 + $0x108] sm:$0xff]  ;;  %v568_v7 = vld [vmem:[%s18962_s5 + $0x110] sm:$0xff]  ;;  %v8484_v6 = vsel %vm8458_vm7, %v8433_v63, %v8435_v22 }
 0x564   :  { %598 = vst [vmem:[%s18959_s8 + $0x890] sm:$0xff] %v556_v61  ;;  %8553 = vst [vmem:[%s18959_s8 + $0xb00] sm:$0xff] %v8473_v49  ;;  %v569_v51 = vld [vmem:[%s18962_s5 + $0x118] sm:$0xff]  ;;  %v570_v37 = vld [vmem:[%s18962_s5 + $0x120] sm:$0xff] }
 0x565   :  { %599 = vst [vmem:[%s18959_s8 + $0x898] sm:$0xff] %v557_v54  ;;  %600 = vst [vmem:[%s18959_s8 + $0x8a0] sm:$0xff] %v558_v14  ;;  %v571_v30 = vld [vmem:[%s18962_s5 + $0x128] sm:$0xff]  ;;  %v572_v25 = vld [vmem:[%s18962_s5 + $0x130] sm:$0xff]  ;;  %v8485_v54 = vsel %vm8458_vm7, %v8435_v22, %v18462_v26 }
 0x566   :  { %601 = vst [vmem:[%s18959_s8 + $0x8a8] sm:$0xff] %v559_v42  ;;  %602 = vst [vmem:[%s18959_s8 + $0x8b0] sm:$0xff] %v560_v21  ;;  %v573_v13 = vld [vmem:[%s18962_s5 + $0x138] sm:$0xff]  ;;  %v574_v4 = vld [vmem:[%s18962_s5 + $0x140] sm:$0xff] }
 0x567   :  { %603 = vst.msk [vmem:[%s18959_s8 + $0x8b8] sm:$0xff] %vm203_vm8, %v561_v16  ;;  %604 = vst [vmem:[%s18959_s8 + $0x8c0] sm:$0xff] %v562_v23  ;;  %v575_v20 = vld [vmem:[%s18962_s5 + $0x148] sm:$0xff]  ;;  %v618_v10 = vld [vmem:[%s18963_s6] sm:$0xff] }
 0x568   :  { %605 = vst [vmem:[%s18959_s8 + $0x8c8] sm:$0xff] %v563_v60  ;;  %606 = vst [vmem:[%s18959_s8 + $0x8d0] sm:$0xff] %v564_v12  ;;  %v619_v11 = vld [vmem:[%s18963_s6 + $0x8] sm:$0xff]  ;;  %v620_v43 = vld [vmem:[%s18963_s6 + $0x10] sm:$0xff]  ;;  %v8447_v60 = vpop.permute.xlu0 %8446 }
 0x569   :  { %607 = vst [vmem:[%s18959_s8 + $0x8d8] sm:$0xff] %v565_v8  ;;  %608 = vst [vmem:[%s18959_s8 + $0x8e0] sm:$0xff] %v566_v47  ;;  %v621_v29 = vld [vmem:[%s18963_s6 + $0x18] sm:$0xff]  ;;  %v622_v39 = vld [vmem:[%s18963_s6 + $0x20] sm:$0xff]  ;;  %v8445_v47 = vpop.permute.xlu1 %8444 }
 0x56a   :  { %609 = vst [vmem:[%s18959_s8 + $0x8e8] sm:$0xff] %v567_v1  ;;  %610 = vst.msk [vmem:[%s18959_s8 + $0x8f0] sm:$0xff] %vm203_vm8, %v568_v7  ;;  %v623_v55 = vld [vmem:[%s18963_s6 + $0x28] sm:$0xff]  ;;  %v624_v32 = vld [vmem:[%s18963_s6 + $0x30] sm:$0xff] }
 0x56b   :  { %8558 = vst [vmem:[%s18959_s8 + $0xb28] sm:$0xff] %v8477_v34  ;;  %611 = vst [vmem:[%s18959_s8 + $0x8f8] sm:$0xff] %v569_v51  ;;  %v625_v31 = vld [vmem:[%s18963_s6 + $0x38] sm:$0xff]  ;;  %v626_v24 = vld [vmem:[%s18963_s6 + $0x40] sm:$0xff]  ;;  %v8489_v51 = vsel %vm8458_vm7, %v8445_v47, %v8447_v60 }
 0x56c   :  { %612 = vst [vmem:[%s18959_s8 + $0x900] sm:$0xff] %v570_v37  ;;  %613 = vst [vmem:[%s18959_s8 + $0x908] sm:$0xff] %v571_v30  ;;  %v627_v41 = vld [vmem:[%s18963_s6 + $0x48] sm:$0xff]  ;;  %v628_v3 = vld [vmem:[%s18963_s6 + $0x50] sm:$0xff] }
 0x56d   :  { %614 = vst [vmem:[%s18959_s8 + $0x910] sm:$0xff] %v572_v25  ;;  %615 = vst [vmem:[%s18959_s8 + $0x918] sm:$0xff] %v573_v13  ;;  %v629_v28 = vld [vmem:[%s18963_s6 + $0x58] sm:$0xff]  ;;  %v630_v33 = vld [vmem:[%s18963_s6 + $0x60] sm:$0xff] }
 0x56e   :  { %616 = vst [vmem:[%s18959_s8 + $0x920] sm:$0xff] %v574_v4  ;;  %617 = vst.msk [vmem:[%s18959_s8 + $0x928] sm:$0xff] %vm203_vm8, %v575_v20  ;;  %v631_v27 = vld [vmem:[%s18963_s6 + $0x68] sm:$0xff]  ;;  %v632_v53 = vld [vmem:[%s18963_s6 + $0x70] sm:$0xff] }
 0x56f   :  { %660 = vst [vmem:[%s18959_s8 + $0x930] sm:$0xff] %v618_v10  ;;  %661 = vst [vmem:[%s18959_s8 + $0x938] sm:$0xff] %v619_v11  ;;  %v633_v50 = vld [vmem:[%s18963_s6 + $0x78] sm:$0xff]  ;;  %v634_v48 = vld [vmem:[%s18963_s6 + $0x80] sm:$0xff]  ;;  %v18606_v10 = vpop.permute.xlu0 %8450 }
 0x570   :  { %662 = vst [vmem:[%s18959_s8 + $0x940] sm:$0xff] %v620_v43  ;;  %663 = vst [vmem:[%s18959_s8 + $0x948] sm:$0xff] %v621_v29  ;;  %v635_v2 = vld [vmem:[%s18963_s6 + $0x88] sm:$0xff]  ;;  %v636_v15 = vld [vmem:[%s18963_s6 + $0x90] sm:$0xff]  ;;  %v8449_v29 = vpop.permute.xlu1 %8448 }
 0x571   :  { %664 = vst [vmem:[%s18959_s8 + $0x950] sm:$0xff] %v622_v39  ;;  %8559 = vst [vmem:[%s18959_s8 + $0xb30] sm:$0xff] %v8478_v62  ;;  %v637_v45 = vld [vmem:[%s18963_s6 + $0x98] sm:$0xff]  ;;  %v638_v52 = vld [vmem:[%s18963_s6 + $0xa0] sm:$0xff] }
 0x572   :  { %8560 = vst [vmem:[%s18959_s8 + $0xb38] sm:$0xff] %v8479_v38  ;;  %665 = vst [vmem:[%s18959_s8 + $0x958] sm:$0xff] %v623_v55  ;;  %v639_v0 = vld [vmem:[%s18963_s6 + $0xa8] sm:$0xff]  ;;  %v640_v17 = vld [vmem:[%s18963_s6 + $0xb0] sm:$0xff]  ;;  %v8490_v55 = vsel %vm8458_vm7, %v8447_v60, %v8449_v29 }
 0x573   :  { %666 = vst.msk [vmem:[%s18959_s8 + $0x960] sm:$0xff] %vm203_vm8, %v624_v32  ;;  %667 = vst [vmem:[%s18959_s8 + $0x968] sm:$0xff] %v625_v31  ;;  %v641_v19 = vld [vmem:[%s18963_s6 + $0xb8] sm:$0xff]  ;;  %v642_v56 = vld [vmem:[%s18963_s6 + $0xc0] sm:$0xff]  ;;  %v8491_v32 = vsel %vm8458_vm7, %v8449_v29, %v18606_v10 }
 0x574   :  { %668 = vst [vmem:[%s18959_s8 + $0x970] sm:$0xff] %v626_v24  ;;  %669 = vst [vmem:[%s18959_s8 + $0x978] sm:$0xff] %v627_v41  ;;  %v643_v57 = vld [vmem:[%s18963_s6 + $0xc8] sm:$0xff]  ;;  %v644_v44 = vld [vmem:[%s18963_s6 + $0xd0] sm:$0xff] }
 0x575   :  { %670 = vst [vmem:[%s18959_s8 + $0x980] sm:$0xff] %v628_v3  ;;  %671 = vst [vmem:[%s18959_s8 + $0x988] sm:$0xff] %v629_v28  ;;  %v645_v61 = vld [vmem:[%s18963_s6 + $0xd8] sm:$0xff]  ;;  %v646_v49 = vld [vmem:[%s18963_s6 + $0xe0] sm:$0xff] }
 0x576   :  { %672 = vst [vmem:[%s18959_s8 + $0x990] sm:$0xff] %v630_v33  ;;  %673 = vst.msk [vmem:[%s18959_s8 + $0x998] sm:$0xff] %vm203_vm8, %v631_v27  ;;  %v647_v14 = vld [vmem:[%s18963_s6 + $0xe8] sm:$0xff]  ;;  %v648_v42 = vld [vmem:[%s18963_s6 + $0xf0] sm:$0xff]  ;;  %v8383_v33 = vpop.permute.xlu0 %8382 }
 0x577   :  { %674 = vst [vmem:[%s18959_s8 + $0x9a0] sm:$0xff] %v632_v53  ;;  %675 = vst [vmem:[%s18959_s8 + $0x9a8] sm:$0xff] %v633_v50  ;;  %v649_v21 = vld [vmem:[%s18963_s6 + $0xf8] sm:$0xff]  ;;  %v650_v16 = vld [vmem:[%s18963_s6 + $0x100] sm:$0xff]  ;;  %v8385_v50 = vpop.permute.xlu1 %8384 }
 0x578   :  { %676 = vst [vmem:[%s18959_s8 + $0x9b0] sm:$0xff] %v634_v48  ;;  %8565 = vst [vmem:[%s18959_s8 + $0xb60] sm:$0xff] %v8483_v40  ;;  %v651_v23 = vld [vmem:[%s18963_s6 + $0x108] sm:$0xff]  ;;  %v652_v5 = vld [vmem:[%s18963_s6 + $0x110] sm:$0xff]  ;;  %v8462_v48 = vsel %vm8458_vm7, %v17794_v46, %v8383_v33  ;;  %v8463_v46 = vsel %vm8458_vm7, %v8383_v33, %v8385_v50 }
 0x579   :  { %677 = vst [vmem:[%s18959_s8 + $0x9b8] sm:$0xff] %v635_v2  ;;  %678 = vst [vmem:[%s18959_s8 + $0x9c0] sm:$0xff] %v636_v15  ;;  %v653_v12 = vld [vmem:[%s18963_s6 + $0x118] sm:$0xff]  ;;  %v654_v8 = vld [vmem:[%s18963_s6 + $0x120] sm:$0xff] }
 0x57a   :  { %679 = vst [vmem:[%s18959_s8 + $0x9c8] sm:$0xff] %v637_v45  ;;  %680 = vst.msk [vmem:[%s18959_s8 + $0x9d0] sm:$0xff] %vm203_vm8, %v638_v52  ;;  %v655_v59 = vld [vmem:[%s18963_s6 + $0x128] sm:$0xff]  ;;  %v656_v1 = vld [vmem:[%s18963_s6 + $0x130] sm:$0xff] }
 0x57b   :  { %681 = vst [vmem:[%s18959_s8 + $0x9d8] sm:$0xff] %v639_v0  ;;  %682 = vst [vmem:[%s18959_s8 + $0x9e0] sm:$0xff] %v640_v17  ;;  %v657_v7 = vld [vmem:[%s18963_s6 + $0x138] sm:$0xff]  ;;  %v658_v34 = vld [vmem:[%s18963_s6 + $0x140] sm:$0xff] }
 0x57c   :  { %683 = vst [vmem:[%s18959_s8 + $0x9e8] sm:$0xff] %v641_v19  ;;  %684 = vst [vmem:[%s18959_s8 + $0x9f0] sm:$0xff] %v642_v56  ;;  %v659_v37 = vld [vmem:[%s18963_s6 + $0x148] sm:$0xff]  ;;  %v702_v30 = vld [vmem:[%s18964_s7] sm:$0xff] }
 0x57d   :  { %685 = vst [vmem:[%s18959_s8 + $0x9f8] sm:$0xff] %v643_v57  ;;  %8566 = vst [vmem:[%s18959_s8 + $0xb68] sm:$0xff] %v8484_v6  ;;  %v703_v25 = vld [vmem:[%s18964_s7 + $0x8] sm:$0xff]  ;;  %v704_v13 = vld [vmem:[%s18964_s7 + $0x10] sm:$0xff] }
 0x57e   :  { %686 = vst [vmem:[%s18959_s8 + $0xa00] sm:$0xff] %v644_v44  ;;  %687 = vst.msk [vmem:[%s18959_s8 + $0xa08] sm:$0xff] %vm203_vm8, %v645_v61  ;;  %v705_v4 = vld [vmem:[%s18964_s7 + $0x18] sm:$0xff]  ;;  %v706_v20 = vld [vmem:[%s18964_s7 + $0x20] sm:$0xff]  ;;  %v8397_v44 = vpop.permute.xlu1 %8396 }
 0x57f   :  { %688 = vst [vmem:[%s18959_s8 + $0xa10] sm:$0xff] %v646_v49  ;;  %8567 = vst [vmem:[%s18959_s8 + $0xb70] sm:$0xff] %v8485_v54  ;;  %v707_v11 = vld [vmem:[%s18964_s7 + $0x28] sm:$0xff]  ;;  %v708_v36 = vld [vmem:[%s18964_s7 + $0x30] sm:$0xff] }
 0x580   :  { %689 = vst [vmem:[%s18959_s8 + $0xa18] sm:$0xff] %v647_v14  ;;  %690 = vst [vmem:[%s18959_s8 + $0xa20] sm:$0xff] %v648_v42  ;;  %v709_v43 = vld [vmem:[%s18964_s7 + $0x38] sm:$0xff]  ;;  %v710_v39 = vld [vmem:[%s18964_s7 + $0x40] sm:$0xff]  ;;  %v8387_v14 = vpop.permute.xlu0 %8386  ;;  %v8468_v42 = vsel %vm8458_vm7, %v17956_v35, %v8397_v44 }
 0x581   :  { %691 = vst [vmem:[%s18959_s8 + $0xa28] sm:$0xff] %v649_v21  ;;  %692 = vst [vmem:[%s18959_s8 + $0xa30] sm:$0xff] %v650_v16  ;;  %v711_v62 = vld [vmem:[%s18964_s7 + $0x48] sm:$0xff]  ;;  %v712_v38 = vld [vmem:[%s18964_s7 + $0x50] sm:$0xff]  ;;  %v8464_v35 = vsel %vm8458_vm7, %v8385_v50, %v8387_v14 }
 0x582   :  { %693 = vst [vmem:[%s18959_s8 + $0xa38] sm:$0xff] %v651_v23  ;;  %694 = vst.msk [vmem:[%s18959_s8 + $0xa40] sm:$0xff] %vm203_vm8, %v652_v5  ;;  %v713_v31 = vld [vmem:[%s18964_s7 + $0x58] sm:$0xff]  ;;  %v714_v24 = vld [vmem:[%s18964_s7 + $0x60] sm:$0xff]  ;;  %v8401_v47 = vpop.permute.xlu1 %8400 }
 0x583   :  { %695 = vst [vmem:[%s18959_s8 + $0xa48] sm:$0xff] %v653_v12  ;;  %696 = vst [vmem:[%s18959_s8 + $0xa50] sm:$0xff] %v654_v8  ;;  %v715_v41 = vld [vmem:[%s18964_s7 + $0x68] sm:$0xff]  ;;  %v716_v3 = vld [vmem:[%s18964_s7 + $0x70] sm:$0xff] }
 0x584   :  { %697 = vst [vmem:[%s18959_s8 + $0xa58] sm:$0xff] %v655_v59  ;;  %698 = vst [vmem:[%s18959_s8 + $0xa60] sm:$0xff] %v656_v1  ;;  %v717_v9 = vld [vmem:[%s18964_s7 + $0x78] sm:$0xff]  ;;  %v718_v28 = vld [vmem:[%s18964_s7 + $0x80] sm:$0xff]  ;;  %v8399_v59 = vpop.permute.xlu0 %8398 }
 0x585   :  { %699 = vst [vmem:[%s18959_s8 + $0xa68] sm:$0xff] %v657_v7  ;;  %700 = vst [vmem:[%s18959_s8 + $0xa70] sm:$0xff] %v658_v34  ;;  %v719_v27 = vld [vmem:[%s18964_s7 + $0x88] sm:$0xff]  ;;  %v720_v63 = vld [vmem:[%s18964_s7 + $0x90] sm:$0xff]  ;;  %v8469_v1 = vsel %vm8458_vm7, %v8397_v44, %v8399_v59  ;;  %v8470_v7 = vsel %vm8458_vm7, %v8399_v59, %v8401_v47 }
 0x586   :  { %8572 = vst [vmem:[%s18959_s8 + $0xb98] sm:$0xff] %v8489_v51  ;;  %701 = vst.msk [vmem:[%s18959_s8 + $0xa78] sm:$0xff] %vm203_vm8, %v659_v37  ;;  %v721_v53 = vld [vmem:[%s18964_s7 + $0x98] sm:$0xff]  ;;  %v722_v40 = vld [vmem:[%s18964_s7 + $0xa0] sm:$0xff]  ;;  %v8413_v51 = vpop.permute.xlu1 %8412 }
 0x587   :  { %744 = vst [vmem:[%s18959_s8 + $0xbd0] sm:$0xff] %v702_v30  ;;  %745 = vst [vmem:[%s18959_s8 + $0xbd8] sm:$0xff] %v703_v25  ;;  %v723_v2 = vld [vmem:[%s18964_s7 + $0xa8] sm:$0xff]  ;;  %v724_v15 = vld [vmem:[%s18964_s7 + $0xb0] sm:$0xff] }
 0x588   :  { %746 = vst [vmem:[%s18959_s8 + $0xbe0] sm:$0xff] %v704_v13  ;;  %747 = vst [vmem:[%s18959_s8 + $0xbe8] sm:$0xff] %v705_v4  ;;  %v725_v45 = vld [vmem:[%s18964_s7 + $0xb8] sm:$0xff]  ;;  %v726_v52 = vld [vmem:[%s18964_s7 + $0xc0] sm:$0xff]  ;;  %v8411_v34 = vpop.permute.xlu0 %8410 }
 0x589   :  { %748 = vst [vmem:[%s18959_s8 + $0xbf0] sm:$0xff] %v706_v20  ;;  %749 = vst [vmem:[%s18959_s8 + $0xbf8] sm:$0xff] %v707_v11  ;;  %v727_v0 = vld [vmem:[%s18964_s7 + $0xc8] sm:$0xff]  ;;  %v728_v17 = vld [vmem:[%s18964_s7 + $0xd0] sm:$0xff]  ;;  %v8474_v37 = vsel %vm8458_vm7, %v18137_v58, %v8411_v34  ;;  %v8475_v30 = vsel %vm8458_vm7, %v8411_v34, %v8413_v51 }
 0x58a   :  { %750 = vst.msk [vmem:[%s18959_s8 + $0xc00] sm:$0xff] %vm203_vm8, %v708_v36  ;;  %751 = vst [vmem:[%s18959_s8 + $0xc08] sm:$0xff] %v709_v43  ;;  %v729_v22 = vld [vmem:[%s18964_s7 + $0xd8] sm:$0xff]  ;;  %v730_v19 = vld [vmem:[%s18964_s7 + $0xe0] sm:$0xff]  ;;  %v8425_v13 = vpop.permute.xlu1 %8424 }
 0x58b   :  { %752 = vst [vmem:[%s18959_s8 + $0xc10] sm:$0xff] %v710_v39  ;;  %753 = vst [vmem:[%s18959_s8 + $0xc18] sm:$0xff] %v711_v62  ;;  %v731_v56 = vld [vmem:[%s18964_s7 + $0xe8] sm:$0xff]  ;;  %v732_v57 = vld [vmem:[%s18964_s7 + $0xf0] sm:$0xff]  ;;  %v8480_v58 = vsel %vm8458_vm7, %v18281_v18, %v8425_v13 }
 0x58c   :  { %754 = vst [vmem:[%s18959_s8 + $0xc20] sm:$0xff] %v712_v38  ;;  %8573 = vst [vmem:[%s18959_s8 + $0xba0] sm:$0xff] %v8490_v55  ;;  %v733_v6 = vld [vmem:[%s18964_s7 + $0xf8] sm:$0xff]  ;;  %v734_v61 = vld [vmem:[%s18964_s7 + $0x100] sm:$0xff]  ;;  %v8415_v25 = vpop.permute.xlu0 %8414 }
 0x58d   :  { %8574 = vst [vmem:[%s18959_s8 + $0xba8] sm:$0xff] %v8491_v32  ;;  %755 = vst [vmem:[%s18959_s8 + $0xc28] sm:$0xff] %v713_v31  ;;  %v735_v49 = vld [vmem:[%s18964_s7 + $0x108] sm:$0xff]  ;;  %v736_v54 = vld [vmem:[%s18964_s7 + $0x110] sm:$0xff]  ;;  %v8476_v4 = vsel %vm8458_vm7, %v8413_v51, %v8415_v25 }
 0x58e   :  { %756 = vst [vmem:[%s18959_s8 + $0xc30] sm:$0xff] %v714_v24  ;;  %757 = vst.msk [vmem:[%s18959_s8 + $0xc38] sm:$0xff] %vm203_vm8, %v715_v41  ;;  %v737_v21 = vld [vmem:[%s18964_s7 + $0x118] sm:$0xff]  ;;  %v738_v16 = vld [vmem:[%s18964_s7 + $0x120] sm:$0xff]  ;;  %v8429_v11 = vpop.permute.xlu1 %8428 }
 0x58f   :  { %758 = vst [vmem:[%s18959_s8 + $0xc40] sm:$0xff] %v716_v3  ;;  %759 = vst [vmem:[%s18959_s8 + $0xc48] sm:$0xff] %v717_v9  ;;  %v739_v23 = vld [vmem:[%s18964_s7 + $0x128] sm:$0xff]  ;;  %v740_v5 = vld [vmem:[%s18964_s7 + $0x130] sm:$0xff] }
 0x590   :  { %760 = vst [vmem:[%s18959_s8 + $0xc50] sm:$0xff] %v718_v28  ;;  %761 = vst [vmem:[%s18959_s8 + $0xc58] sm:$0xff] %v719_v27  ;;  %v741_v60 = vld [vmem:[%s18964_s7 + $0x138] sm:$0xff]  ;;  %v742_v12 = vld [vmem:[%s18964_s7 + $0x140] sm:$0xff]  ;;  %v8427_v20 = vpop.permute.xlu0 %8426 }
 0x591   :  { %762 = vst [vmem:[%s18959_s8 + $0xc60] sm:$0xff] %v720_v63  ;;  %763 = vst [vmem:[%s18959_s8 + $0xc68] sm:$0xff] %v721_v53  ;;  %v743_v8 = vld [vmem:[%s18964_s7 + $0x148] sm:$0xff]  ;;  %v8481_v36 = vsel %vm8458_vm7, %v8425_v13, %v8427_v20  ;;  %v8482_v43 = vsel %vm8458_vm7, %v8427_v20, %v8429_v11 }
 0x592   :  { %8540 = vst [vmem:[%s18959_s8 + $0xa98] sm:$0xff] %v8462_v48  ;;  %764 = vst.msk [vmem:[%s18959_s8 + $0xc70] sm:$0xff] %vm203_vm8, %v722_v40  ;;  %v8441_v29 = vpop.permute.xlu1 %8440 }
 0x593   :  { %765 = vst [vmem:[%s18959_s8 + $0xc78] sm:$0xff] %v723_v2  ;;  %766 = vst [vmem:[%s18959_s8 + $0xc80] sm:$0xff] %v724_v15 }
 0x594   :  { %8541 = vst [vmem:[%s18959_s8 + $0xaa0] sm:$0xff] %v8463_v46  ;;  %767 = vst [vmem:[%s18959_s8 + $0xc88] sm:$0xff] %v725_v45  ;;  %v8439_v18 = vpop.permute.xlu0 %8438 }
 0x595   :  { %768 = vst [vmem:[%s18959_s8 + $0xc90] sm:$0xff] %v726_v52  ;;  %769 = vst [vmem:[%s18959_s8 + $0xc98] sm:$0xff] %v727_v0  ;;  %v8486_v39 = vsel %vm8458_vm7, %v18462_v26, %v8439_v18  ;;  %v8487_v62 = vsel %vm8458_vm7, %v8439_v18, %v8441_v29 }
 0x596   :  { %770 = vst [vmem:[%s18959_s8 + $0xca0] sm:$0xff] %v728_v17  ;;  %771 = vst.msk [vmem:[%s18959_s8 + $0xca8] sm:$0xff] %vm203_vm8, %v729_v22  ;;  %v8453_v55 = vpop.permute.xlu1 %8452 }
 0x597   :  { %772 = vst [vmem:[%s18959_s8 + $0xcb0] sm:$0xff] %v730_v19  ;;  %773 = vst [vmem:[%s18959_s8 + $0xcb8] sm:$0xff] %v731_v56  ;;  %v8492_v26 = vsel %vm8458_vm7, %v18606_v10, %v8453_v55 }
 0x598   :  { %774 = vst [vmem:[%s18959_s8 + $0xcc0] sm:$0xff] %v732_v57  ;;  %775 = vst [vmem:[%s18959_s8 + $0xcc8] sm:$0xff] %v733_v6  ;;  %v8443_v38 = vpop.permute.xlu0 %8442 }
 0x599   :  { %776 = vst [vmem:[%s18959_s8 + $0xcd0] sm:$0xff] %v734_v61  ;;  %777 = vst [vmem:[%s18959_s8 + $0xcd8] sm:$0xff] %v735_v49  ;;  %v8488_v32 = vsel %vm8458_vm7, %v8441_v29, %v8443_v38 }
 0x59a   :  { %778 = vst.msk [vmem:[%s18959_s8 + $0xce0] sm:$0xff] %vm203_vm8, %v736_v54  ;;  %8543 = vst.msk [vmem:[%s18959_s8 + $0xab0] sm:$0xff] %vm203_vm8, %v8387_v14  ;;  %v8457_v24 = vpop.permute.xlu1 %8456 }
 0x59b   :  { %8547 = vst [vmem:[%s18959_s8 + $0xad0] sm:$0xff] %v8468_v42  ;;  %779 = vst [vmem:[%s18959_s8 + $0xce8] sm:$0xff] %v737_v21 }
 0x59c   :  { %780 = vst [vmem:[%s18959_s8 + $0xcf0] sm:$0xff] %v738_v16  ;;  %781 = vst [vmem:[%s18959_s8 + $0xcf8] sm:$0xff] %v739_v23  ;;  %v8455_v31 = vpop.permute.xlu0 %8454 }
 0x59d   :  { %8542 = vst [vmem:[%s18959_s8 + $0xaa8] sm:$0xff] %v8464_v35  ;;  %782 = vst [vmem:[%s18959_s8 + $0xd00] sm:$0xff] %v740_v5  ;;  %v8493_v41 = vsel %vm8458_vm7, %v8453_v55, %v8455_v31  ;;  %v8494_v3 = vsel %vm8458_vm7, %v8455_v31, %v8457_v24 }
 0x59e   :  { %783 = vst [vmem:[%s18959_s8 + $0xd08] sm:$0xff] %v741_v60  ;;  %784 = vst [vmem:[%s18959_s8 + $0xd10] sm:$0xff] %v742_v12 }
 0x59f   :  { %785 = vst.msk [vmem:[%s18959_s8 + $0xd18] sm:$0xff] %vm203_vm8, %v743_v8  ;;  %8550 = vst.msk [vmem:[%s18959_s8 + $0xae8] sm:$0xff] %vm203_vm8, %v8401_v47 }
 0x5a0   :  { %8548 = vst [vmem:[%s18959_s8 + $0xad8] sm:$0xff] %v8469_v1  ;;  %8549 = vst [vmem:[%s18959_s8 + $0xae0] sm:$0xff] %v8470_v7 }
 0x5a1   :  { %8554 = vst [vmem:[%s18959_s8 + $0xb08] sm:$0xff] %v8474_v37  ;;  %8555 = vst [vmem:[%s18959_s8 + $0xb10] sm:$0xff] %v8475_v30 }
 0x5a2   :  { %8557 = vst.msk [vmem:[%s18959_s8 + $0xb20] sm:$0xff] %vm203_vm8, %v8415_v25  ;;  %8556 = vst [vmem:[%s18959_s8 + $0xb18] sm:$0xff] %v8476_v4 }
 0x5a3   :  { %8561 = vst [vmem:[%s18959_s8 + $0xb40] sm:$0xff] %v8480_v58  ;;  %8564 = vst.msk [vmem:[%s18959_s8 + $0xb58] sm:$0xff] %vm203_vm8, %v8429_v11 }
 0x5a4   :  { %8562 = vst [vmem:[%s18959_s8 + $0xb48] sm:$0xff] %v8481_v36  ;;  %8563 = vst [vmem:[%s18959_s8 + $0xb50] sm:$0xff] %v8482_v43 }
 0x5a5   :  { %8568 = vst [vmem:[%s18959_s8 + $0xb78] sm:$0xff] %v8486_v39  ;;  %8569 = vst [vmem:[%s18959_s8 + $0xb80] sm:$0xff] %v8487_v62 }
 0x5a6   :  { %8571 = vst.msk [vmem:[%s18959_s8 + $0xb90] sm:$0xff] %vm203_vm8, %v8443_v38  ;;  %8570 = vst [vmem:[%s18959_s8 + $0xb88] sm:$0xff] %v8488_v32 }
 0x5a7   :  { %8575 = vst [vmem:[%s18959_s8 + $0xbb0] sm:$0xff] %v8492_v26  ;;  %8578 = vst.msk [vmem:[%s18959_s8 + $0xbc8] sm:$0xff] %vm203_vm8, %v8457_v24 }
 0x5a8   :  { %8576 = vst [vmem:[%s18959_s8 + $0xbb8] sm:$0xff] %v8493_v41  ;;  %8577 = vst [vmem:[%s18959_s8 + $0xbc0] sm:$0xff] %v8494_v3 }

</bundles_post_ra>
